<compile_context>
chip_gen: v6e
topology: v6e:2x2x1
jax: 0.10.0
libtpu: 0.0.40
codegen_flags: <defaults>
</compile_context>

<pallas_src>
import functools
import math

import jax
import jax.numpy as jnp
from jax.experimental import pallas as pl
from jax.experimental.pallas import tpu as pltpu


# ----------------------------------------------------------------------------
# helpers
# ----------------------------------------------------------------------------

_VMEM_LIMIT = 48 * 1024 * 1024  # <= v7x 64 MiB physical, well under v5e/v6e 128 MiB


def _cparams(*sems):
    return pltpu.CompilerParams(dimension_semantics=sems,
                                vmem_limit_bytes=_VMEM_LIMIT)


def _tile(dim, target):
    """Largest clean tile: `target` when it divides `dim`, else the full dim."""
    if dim >= target and dim % target == 0:
        return target
    return dim


def _layernorm_f32(x, eps):
    mu = jnp.mean(x, axis=-1, keepdims=True)
    var = jnp.mean(jnp.square(x - mu), axis=-1, keepdims=True)
    return (x - mu) * jax.lax.rsqrt(var + eps)


def _per_head_attention(q_all, kv, D, n_heads, bias=None):
    """q_all (S, D) bf16; kv (Sk, 2D) bf16 (K|V fused).  Returns (S, D) f32."""
    dh = D // n_heads
    outs = []
    for h in range(n_heads):
        q = q_all[:, h * dh:(h + 1) * dh]                # (S, dh)  scale pre-folded
        k = kv[:, h * dh:(h + 1) * dh]                   # (Sk, dh)
        v = kv[:, D + h * dh:D + (h + 1) * dh]           # (Sk, dh)
        s = jax.lax.dot_general(q, k, (((1,), (1,)), ((), ())),
                                preferred_element_type=jnp.float32)  # (S, Sk) f32
        if bias is not None:
            s = s + bias
        s = s - jnp.max(s, axis=-1, keepdims=True)
        p = jnp.exp(s)
        denom = jnp.sum(p, axis=-1, keepdims=True)
        o_h = jnp.dot(p.astype(jnp.bfloat16), v,
                      preferred_element_type=jnp.float32)            # (S, dh) f32
        outs.append(o_h * pl.reciprocal(denom, approx=True))
    return jnp.concatenate(outs, axis=-1)                # (S, D) f32, lane-dense


# ----------------------------------------------------------------------------
# Pallas kernels
# ----------------------------------------------------------------------------

# ---- generic tiled matmul (bf16 operands, f32 accumulation, dtype-out) --------

def _matmul_kernel(a_ref, b_ref, o_ref, acc_ref):
    @pl.when(pl.program_id(2) == 0)
    def _():
        acc_ref[...] = jnp.zeros_like(acc_ref)

    acc_ref[...] += jnp.dot(a_ref[...], b_ref[...],
                            preferred_element_type=jnp.float32)

    @pl.when(pl.program_id(2) == pl.num_programs(2) - 1)
    def _():
        o_ref[...] = acc_ref[...].astype(o_ref.dtype)


def matmul(a, b, *, out_dtype=jnp.bfloat16, tm=512, tn=256, tk=1024):
    M, K = a.shape
    K2, N = b.shape
    assert K == K2
    tm, tn, tk = _tile(M, tm), _tile(N, tn), _tile(K, tk)
    return pl.pallas_call(
        _matmul_kernel,
        out_shape=jax.ShapeDtypeStruct((M, N), out_dtype),
        grid=(M // tm, N // tn, K // tk),
        in_specs=[pl.BlockSpec((tm, tk), lambda i, j, k: (i, k)),
                  pl.BlockSpec((tk, tn), lambda i, j, k: (k, j))],
        out_specs=pl.BlockSpec((tm, tn), lambda i, j, k: (i, j)),
        scratch_shapes=[pltpu.VMEM((tm, tn), jnp.float32)],
        compiler_params=_cparams("parallel", "parallel", "arbitrary"),
    )(a, b)


def linear(x, w, out_dtype=jnp.bfloat16):
    orig = x.shape
    K = orig[-1]
    M = math.prod(orig[:-1])
    out = matmul(x.reshape(M, K).astype(jnp.bfloat16), w, out_dtype=out_dtype)
    return out.reshape(*orig[:-1], w.shape[1])


# ---- SiLU prologue + matmul (adaLN modulation / final-mod parameter linears) --

def _silu_matmul_kernel(x_ref, w_ref, o_ref):
    x = x_ref[...].astype(jnp.float32)
    h = x * jax.nn.sigmoid(x)
    o_ref[...] = jnp.dot(h.astype(jnp.bfloat16), w_ref[...],
                         preferred_element_type=jnp.float32)


def silu_matmul(x, w):
    M, K = x.shape
    N = w.shape[1]
    tm = _tile(M, 256)
    return pl.pallas_call(
        _silu_matmul_kernel,
        out_shape=jax.ShapeDtypeStruct((M, N), jnp.float32),
        grid=(M // tm,),
        in_specs=[pl.BlockSpec((tm, K), lambda i: (i, 0)),
                  pl.BlockSpec((K, N), lambda i: (0, 0))],
        out_specs=pl.BlockSpec((tm, N), lambda i: (i, 0)),
        compiler_params=_cparams("parallel"),
    )(x, w)


# ---- fused 2-layer MLP (time / step / pool embeddings) ------------------------

def _mlp_kernel(x_ref, w1_ref, w2_ref, o_ref, *, act):
    h = jnp.dot(x_ref[...], w1_ref[...], preferred_element_type=jnp.float32)
    if act == "silu":
        h = h * jax.nn.sigmoid(h)
    else:
        h = jax.nn.gelu(h, approximate=True)
    o_ref[...] = jnp.dot(h.astype(jnp.bfloat16), w2_ref[...],
                         preferred_element_type=jnp.float32)


def fused_mlp(x, w1, w2, act="silu"):
    orig = x.shape
    K = orig[-1]
    M = math.prod(orig[:-1])
    Hd = w1.shape[1]
    N = w2.shape[1]
    tm = _tile(M, 256)
    out = pl.pallas_call(
        functools.partial(_mlp_kernel, act=act),
        out_shape=jax.ShapeDtypeStruct((M, N), jnp.float32),
        grid=(M // tm,),
        in_specs=[pl.BlockSpec((tm, K), lambda i: (i, 0)),
                  pl.BlockSpec((K, Hd), lambda i: (0, 0)),
                  pl.BlockSpec((Hd, N), lambda i: (0, 0))],
        out_specs=pl.BlockSpec((tm, N), lambda i: (i, 0)),
        compiler_params=_cparams("parallel"),
    )(x.reshape(M, K).astype(jnp.bfloat16), w1, w2)
    return out.reshape(*orig[:-1], N)


# ---- adaLN prologue fused into a projection matmul (final mod + proj_out) -----

def _adaln_matmul_kernel(x_ref, shift_ref, scale_ref, w_ref, o_ref, *, eps):
    xn = _layernorm_f32(x_ref[0].astype(jnp.float32), eps)
    h = (xn * (1.0 + scale_ref[0]) + shift_ref[0]).astype(jnp.bfloat16)
    o_ref[0] = jnp.dot(h, w_ref[...],
                       preferred_element_type=jnp.float32).astype(o_ref.dtype)


def adaln_matmul(x, shift, scale, w, out_dtype=jnp.float32, eps=1e-6):
    B, S, D = x.shape
    N = w.shape[1]
    ts = _tile(S, 256)
    shift3 = shift.reshape(B, 1, D)
    scale3 = scale.reshape(B, 1, D)
    return pl.pallas_call(
        functools.partial(_adaln_matmul_kernel, eps=eps),
        out_shape=jax.ShapeDtypeStruct((B, S, N), out_dtype),
        grid=(B, S // ts),
        in_specs=[pl.BlockSpec((1, ts, D), lambda b, s: (b, s, 0)),
                  pl.BlockSpec((1, 1, D), lambda b, s: (b, 0, 0)),
                  pl.BlockSpec((1, 1, D), lambda b, s: (b, 0, 0)),
                  pl.BlockSpec((D, N), lambda b, s: (0, 0))],
        out_specs=pl.BlockSpec((1, ts, N), lambda b, s: (b, s, 0)),
        compiler_params=_cparams("parallel", "parallel"),
    )(x, shift3, scale3, w)


# ---- fully fused self-attention branch -----------------------------------------
#   out = x + gate * ( attn( adaLN(x) @ Wqkv ) @ Wo )
# Per-head slicing done with static lane slices (no head split/merge transposes).

def _self_attn_block_kernel(x_ref, shift_ref, scale_ref, gate_ref,
                            wqkv_ref, wo_ref, o_ref, *, n_heads, eps):
    x = x_ref[0].astype(jnp.float32)                                  # (S, D)
    xn = _layernorm_f32(x, eps)
    h = (xn * (1.0 + scale_ref[0]) + shift_ref[0]).astype(jnp.bfloat16)
    qkv = jnp.dot(h, wqkv_ref[...],
                  preferred_element_type=jnp.float32).astype(jnp.bfloat16)  # (S, 3D)
    D = qkv.shape[1] // 3
    kv = qkv[:, D:]                                                   # (S, 2D) K|V
    attn = _per_head_attention(qkv[:, :D], kv, D, n_heads)            # (S, D) f32
    proj = jnp.dot(attn.astype(jnp.bfloat16), wo_ref[...],
                   preferred_element_type=jnp.float32)
    o_ref[0] = (x + gate_ref[0] * proj).astype(o_ref.dtype)


def self_attn_block(x, shift, scale, gate, wqkv, wo, *, n_heads, eps=1e-6):
    B, S, D = x.shape
    shift3 = shift.reshape(B, 1, D)
    scale3 = scale.reshape(B, 1, D)
    gate3 = gate.reshape(B, 1, D)
    return pl.pallas_call(
        functools.partial(_self_attn_block_kernel, n_heads=n_heads, eps=eps),
        out_shape=jax.ShapeDtypeStruct((B, S, D), jnp.bfloat16),
        grid=(B,),
        in_specs=[pl.BlockSpec((1, S, D), lambda b: (b, 0, 0)),
                  pl.BlockSpec((1, 1, D), lambda b: (b, 0, 0)),
                  pl.BlockSpec((1, 1, D), lambda b: (b, 0, 0)),
                  pl.BlockSpec((1, 1, D), lambda b: (b, 0, 0)),
                  pl.BlockSpec((D, 3 * D), lambda b: (0, 0)),
                  pl.BlockSpec((D, D), lambda b: (0, 0))],
        out_specs=pl.BlockSpec((1, S, D), lambda b: (b, 0, 0)),
        compiler_params=_cparams("parallel"),
    )(x, shift3, scale3, gate3, wqkv, wo)


# ---- fully fused cross-attention branch -----------------------------------------
#   out = x + attn( LN(x) @ Wq , y @ Wkv ) @ Wo
# Padded context keys are masked to -inf before the softmax (valid_len static).

def _cross_attn_block_kernel(x_ref, y_ref, wq_ref, wkv_ref, wo_ref, o_ref,
                             *, n_heads, eps, valid_len):
    x = x_ref[0].astype(jnp.float32)                                  # (S, D)
    xn = _layernorm_f32(x, eps)
    q_all = jnp.dot(xn.astype(jnp.bfloat16), wq_ref[...],
                    preferred_element_type=jnp.float32).astype(jnp.bfloat16)
    kv = jnp.dot(y_ref[0], wkv_ref[...],
                 preferred_element_type=jnp.float32).astype(jnp.bfloat16)   # (Lp, 2D)
    S = q_all.shape[0]
    D = q_all.shape[1]
    Lp = kv.shape[0]
    bias = None
    if valid_len < Lp:
        kidx = jax.lax.broadcasted_iota(jnp.int32, (S, Lp), 1)
        bias = jnp.where(kidx < valid_len, 0.0, -1e30).astype(jnp.float32)
    attn = _per_head_attention(q_all, kv, D, n_heads, bias=bias)      # (S, D) f32
    proj = jnp.dot(attn.astype(jnp.bfloat16), wo_ref[...],
                   preferred_element_type=jnp.float32)
    o_ref[0] = (x + proj).astype(o_ref.dtype)


def cross_attn_block(x, y, wq, wkv, wo, *, n_heads, valid_len, eps=1e-6):
    B, S, D = x.shape
    Lp = y.shape[1]
    return pl.pallas_call(
        functools.partial(_cross_attn_block_kernel, n_heads=n_heads, eps=eps,
                          valid_len=valid_len),
        out_shape=jax.ShapeDtypeStruct((B, S, D), jnp.bfloat16),
        grid=(B,),
        in_specs=[pl.BlockSpec((1, S, D), lambda b: (b, 0, 0)),
                  pl.BlockSpec((1, Lp, D), lambda b: (b, 0, 0)),
                  pl.BlockSpec((D, D), lambda b: (0, 0)),
                  pl.BlockSpec((D, 2 * D), lambda b: (0, 0)),
                  pl.BlockSpec((D, D), lambda b: (0, 0))],
        out_specs=pl.BlockSpec((1, S, D), lambda b: (b, 0, 0)),
        compiler_params=_cparams("parallel"),
    )(x, y, wq, wkv, wo)


# ---- adaLN prologue + MLP + gate*out + residual (whole DiT MLP branch) ----------

def _adaln_mlp_res_kernel(x_ref, shift_ref, scale_ref, gate_ref,
                          w1_ref, w2_ref, o_ref, *, eps):
    x = x_ref[0].astype(jnp.float32)                                  # (ts, D)
    xn = _layernorm_f32(x, eps)
    h = (xn * (1.0 + scale_ref[0]) + shift_ref[0]).astype(jnp.bfloat16)
    h1 = jnp.dot(h, w1_ref[...], preferred_element_type=jnp.float32)
    h1 = jax.nn.gelu(h1, approximate=True).astype(jnp.bfloat16)
    h2 = jnp.dot(h1, w2_ref[...], preferred_element_type=jnp.float32)
    o_ref[0] = (x + gate_ref[0] * h2).astype(o_ref.dtype)


def adaln_mlp_residual(x, shift, scale, gate, w1, w2, eps=1e-6):
    B, S, D = x.shape
    Hd = w1.shape[1]
    ts = _tile(S, 256)
    shift3 = shift.reshape(B, 1, D)
    scale3 = scale.reshape(B, 1, D)
    gate3 = gate.reshape(B, 1, D)
    return pl.pallas_call(
        functools.partial(_adaln_mlp_res_kernel, eps=eps),
        out_shape=jax.ShapeDtypeStruct((B, S, D), jnp.bfloat16),
        grid=(B, S // ts),
        in_specs=[pl.BlockSpec((1, ts, D), lambda b, s: (b, s, 0)),
                  pl.BlockSpec((1, 1, D), lambda b, s: (b, 0, 0)),
                  pl.BlockSpec((1, 1, D), lambda b, s: (b, 0, 0)),
                  pl.BlockSpec((1, 1, D), lambda b, s: (b, 0, 0)),
                  pl.BlockSpec((D, Hd), lambda b, s: (0, 0)),
                  pl.BlockSpec((Hd, D), lambda b, s: (0, 0))],
        out_specs=pl.BlockSpec((1, ts, D), lambda b, s: (b, s, 0)),
        compiler_params=_cparams("parallel", "parallel"),
    )(x, shift3, scale3, gate3, w1, w2)


# ---- MSE: row-tiled, lane-dense partial accumulator, final cross-lane reduce ----

def _mse_kernel(a_ref, b_ref, o_ref, acc_ref, *, inv_count):
    @pl.when(pl.program_id(0) == 0)
    def _():
        acc_ref[...] = jnp.zeros_like(acc_ref)

    d = a_ref[...].astype(jnp.float32) - b_ref[...].astype(jnp.float32)
    acc_ref[...] += jnp.sum(d * d, axis=0, keepdims=True)     # (1, N) pure VPU FMA

    @pl.when(pl.program_id(0) == pl.num_programs(0) - 1)
    def _():
        o_ref[...] = jnp.sum(acc_ref[...], axis=-1, keepdims=True) * inv_count


def mse(a, b):
    a2 = a.reshape(a.shape[0], -1)
    b2 = b.reshape(b.shape[0], -1)
    M, N = a2.shape
    tm = _tile(M, 256)
    inv_count = 1.0 / float(M * N)
    out = pl.pallas_call(
        functools.partial(_mse_kernel, inv_count=inv_count),
        out_shape=jax.ShapeDtypeStruct((1, 1), jnp.float32),
        grid=(M // tm,),
        in_specs=[pl.BlockSpec((tm, N), lambda i: (i, 0)),
                  pl.BlockSpec((tm, N), lambda i: (i, 0))],
        out_specs=pl.BlockSpec((1, 1), lambda i: (0, 0)),
        scratch_shapes=[pltpu.VMEM((1, N), jnp.float32)],
        compiler_params=_cparams("arbitrary"),
    )(a2, b2)
    return out[0, 0]


# ----------------------------------------------------------------------------
# Model glue (plain JAX: tiny reshapes, residual wiring, sinusoidal embeds)
# ----------------------------------------------------------------------------

def sinusoidal_embed(t, dim):
    half = dim // 2
    freqs = jnp.exp(-math.log(10000.0) * jnp.arange(half, dtype=jnp.float32) / half)
    args = t.astype(jnp.float32)[:, None] * freqs[None, :]
    return jnp.concatenate([jnp.cos(args), jnp.sin(args)], axis=-1)


def dit_block(x, y_proj, cond, p, cfg):
    nh = cfg["n_heads"]

    # adaLN parameters (SiLU prologue fused into the matmul kernel)
    mod = silu_matmul(cond, p["mod_w"])                              # (B, 6D) f32
    (shift_msa, scale_msa, gate_msa,
     shift_mlp, scale_mlp, gate_mlp) = jnp.split(mod, 6, axis=-1)

    # ---- self-attention branch: one fused kernel ----
    x = self_attn_block(x, shift_msa, scale_msa, gate_msa,
                        p["wqkv"], p["wo"], n_heads=nh)

    # ---- cross-attention branch: one fused kernel ----
    x = cross_attn_block(x, y_proj, p["cwq"], p["cwkv"], p["cwo"],
                         n_heads=nh, valid_len=cfg["text_seq"])

    # ---- MLP branch: one fused kernel ----
    x = adaln_mlp_residual(x, shift_mlp, scale_mlp, gate_mlp,
                           p["mlp_w1"], p["mlp_w2"])
    return x


def rft_core_forward(params, x, y, ts, d, cfg):
    """RFTCore.forward — x NCHW f32, y (B, L, text_d), ts (B,), d (B,)."""
    B, C, H, W = x.shape
    S = H * W
    D = cfg["d_model"]
    L = y.shape[1]
    Lp = ((L + 127) // 128) * 128      # lane-dense padded context length

    # y_pool = y.mean(1) over valid tokens ; then pad + project context
    y_pool = jnp.mean(y, axis=1)                                     # (B, text_d)
    if Lp > L:
        y = jnp.pad(y, ((0, 0), (0, Lp - L), (0, 0)))
    y_proj = linear(y, params["text_proj"], out_dtype=jnp.bfloat16)  # (B, Lp, D)

    # patch_proj: 1x1 conv (no bias) == per-pixel linear; then flatten(2).T
    x_tok = x.reshape(B, C, S).transpose(0, 2, 1)                    # (B, S, C)
    x_tok = linear(x_tok, params["patch_proj"], out_dtype=jnp.bfloat16)  # (B,S,D)

    # cond = t_embed(ts) + pool_embed(y_pool) + d_embed(d)   (tiny, f32)
    t_emb = fused_mlp(sinusoidal_embed(ts, D), params["t_w1"], params["t_w2"])
    d_emb = fused_mlp(sinusoidal_embed(d, D), params["d_w1"], params["d_w2"])
    pool_emb = fused_mlp(y_pool, params["pool_w1"], params["pool_w2"])
    cond = t_emb + pool_emb + d_emb                                  # (B, D) f32

    # StackedDiT
    for blk in params["blocks"]:
        x_tok = dit_block(x_tok, y_proj, cond, blk, cfg)

    # FinalMod + proj_out fused: adaLN prologue + proj_out matmul (f32 for the loss)
    fmod = silu_matmul(cond, params["final_mod_w"])                  # (B, 2D)
    shift, scale = jnp.split(fmod, 2, axis=-1)
    x_out = adaln_matmul(x_tok, shift, scale, params["proj_out"],
                         out_dtype=jnp.float32)                      # (B, S, C)

    return x_out.transpose(0, 2, 1).reshape(B, C, H, W)              # NCHW out


def rft_forward(params, x, ctx, key, cfg):
    """RFT.forward (sc_weight == 0 path): diffusion MSE training loss."""
    B, C, H, W = x.shape
    ctx_tok = jnp.repeat(ctx[:, None, :], cfg["text_seq"], axis=1).astype(x.dtype)

    kz, kt = jax.random.split(key)
    z = jax.random.normal(kz, x.shape, x.dtype)
    t = jax.nn.sigmoid(jax.random.normal(kt, (B,), x.dtype))
    d = jnp.full((B,), float(cfg["base_steps"]), x.dtype)

    t_exp = t[:, None, None, None]
    lerpd = x * (1.0 - t_exp) + z * t_exp
    target = z - x

    pred = rft_core_forward(params, lerpd, ctx_tok, t, d, cfg)
    diff_loss = mse(target, pred)
    total_loss = diff_loss
    extra = {"diff_loss": diff_loss, "sc_loss": jnp.float32(0.0)}
    return total_loss, extra


# ----------------------------------------------------------------------------
# Deterministic parameter init: fused QKV / cross-KV weights, attention scale
# folded into the Q columns, everything cast to bf16 once for HBM residency.
# ----------------------------------------------------------------------------

def init_params(key, cfg):
    D = cfg["d_model"]
    Td = cfg["text_d_model"]
    C = cfg["channels"]
    dh = D // cfg["n_heads"]
    qscale = 1.0 / math.sqrt(dh)
    keys = iter(jax.random.split(key, 512))

    def w(shape, scale=0.02):
        return scale * jax.random.normal(next(keys), shape, jnp.float32)

    params = {
        "text_proj": w((Td, D)),
        "patch_proj": w((C, D)),        # 1x1 conv weight, stored (C_in, D_out)
        "proj_out": w((D, C)),
        "t_w1": w((D, D)), "t_w2": w((D, D)),
        "d_w1": w((D, D)), "d_w2": w((D, D)),
        "pool_w1": w((Td, D)), "pool_w2": w((D, D)),
        "final_mod_w": w((D, 2 * D)),
        "blocks": [],
    }
    for _ in range(cfg["n_layers"]):
        wqkv = w((D, 3 * D))
        wqkv = wqkv.at[:, :D].multiply(qscale)     # fold 1/sqrt(dh) into Q columns
        params["blocks"].append({
            "mod_w": w((D, 6 * D)),
            "wqkv": wqkv,                          # fused Q|K|V
            "wo": w((D, D)),
            "cwq": w((D, D)) * qscale,             # fold 1/sqrt(dh) into cross Q
            "cwkv": w((D, 2 * D)),                 # fused cross K|V
            "cwo": w((D, D)),
            "mlp_w1": w((D, 4 * D)), "mlp_w2": w((4 * D, D)),
        })
    # weights live in HBM as bf16 (f32 accumulation happens inside the kernels)
    return jax.tree_util.tree_map(lambda a: a.astype(jnp.bfloat16), params)


# ----------------------------------------------------------------------------
# Main
# ----------------------------------------------------------------------------

if __name__ == "__main__":
    cfg = dict(
        channels=4,
        d_model=128,       # lane-dense feature dim
        text_d_model=64,
        sample_size=8,     # latent spatial size -> S = 64 tokens
        n_layers=2,
        n_heads=4,         # head dim 32
        base_steps=128,
        text_seq=77,       # ctx repeated to 77 tokens (padded to 128 for the kernel)
    )

    key = jax.random.PRNGKey(0)
    kp, kx, kc, kn = jax.random.split(key, 4)

    params = init_params(kp, cfg)

    B = 2
    x = jax.random.normal(
        kx, (B, cfg["channels"], cfg["sample_size"], cfg["sample_size"]),
        jnp.float32)
    ctx = jax.random.normal(kc, (B, cfg["text_d_model"]), jnp.float32)

    fwd = jax.jit(lambda p, x_, c_, k_: rft_forward(p, x_, c_, k_, cfg))
    total_loss, extra = fwd(params, x, ctx, kn)
    jax.block_until_ready(total_loss)

    print("KERNEL_OK")
</pallas_src>

<mosaic_0001>
module attributes {stable_mosaic.version = 11 : i64} {
  func.func @_matmul_kernel(%arg0: i32, %arg1: i32, %arg2: i32, %arg3: memref<128x4xbf16, #tpu.memory_space<vmem>>, %arg4: memref<4x128xbf16, #tpu.memory_space<vmem>>, %arg5: memref<128x128xbf16, #tpu.memory_space<vmem>>, %arg6: memref<128x128xf32, #tpu.memory_space<vmem>>) attributes {dimension_semantics = [#tpu.dimension_semantics<parallel>, #tpu.dimension_semantics<parallel>, #tpu.dimension_semantics<arbitrary>], iteration_bounds = array<i64: 1, 1, 1>, scalar_prefetch = 0 : i64, scratch_operands = 1 : i64, tpu.core_type = #tpu.core_type<tc>, window_params = [{transform_indices = @transform_0, window_bounds = array<i64: 128, 4>}, {transform_indices = @transform_1, window_bounds = array<i64: 4, 128>}, {transform_indices = @transform_2, window_bounds = array<i64: 128, 128>}]} {
    %c0_i32 = arith.constant 0 : i32
    %0 = arith.cmpi eq, %arg2, %c0_i32 : i32
    %1 = arith.extui %0 : i1 to i32
    %c0_i32_0 = arith.constant 0 : i32
    %2 = arith.cmpi ne, %1, %c0_i32_0 : i32
    scf.if %2 {
      %cst_10 = arith.constant 0.000000e+00 : f32
      %12 = vector.broadcast %cst_10 : f32 to vector<128x128xf32>
      %c0_11 = arith.constant 0 : index
      %c0_12 = arith.constant 0 : index
      %13 = vector.load %arg6[%c0_11, %c0_12] : memref<128x128xf32, #tpu.memory_space<vmem>>, vector<128x128xf32>
      tpu.vector_store %arg6[%c0_11, %c0_12], %12 {strides = array<i32>} : memref<128x128xf32, #tpu.memory_space<vmem>>, vector<128x128xf32>,
    } else {
    }
    %c0 = arith.constant 0 : index
    %c0_1 = arith.constant 0 : index
    %3 = vector.load %arg6[%c0, %c0_1] : memref<128x128xf32, #tpu.memory_space<vmem>>, vector<128x128xf32>
    %c0_2 = arith.constant 0 : index
    %c0_3 = arith.constant 0 : index
    %4 = vector.load %arg3[%c0_2, %c0_3] : memref<128x4xbf16, #tpu.memory_space<vmem>>, vector<128x4xbf16>
    %c0_4 = arith.constant 0 : index
    %c0_5 = arith.constant 0 : index
    %5 = vector.load %arg4[%c0_4, %c0_5] : memref<4x128xbf16, #tpu.memory_space<vmem>>, vector<4x128xbf16>
    %cst = arith.constant dense<0.000000e+00> : vector<128x128xf32>
    %6 = tpu.matmul %4, %5, %cst {dimension_numbers = #tpu.dot_dimension_numbers<[1], [0], [0], [1], [0, 0, 1, 1], [], []>} : vector<128x4xbf16>, vector<4x128xbf16>, vector<128x128xf32> -> vector<128x128xf32>
    %7 = arith.addf %3, %6 : vector<128x128xf32>
    %c0_6 = arith.constant 0 : index
    %c0_7 = arith.constant 0 : index
    %8 = vector.load %arg6[%c0_6, %c0_7] : memref<128x128xf32, #tpu.memory_space<vmem>>, vector<128x128xf32>
    tpu.vector_store %arg6[%c0_6, %c0_7], %7 {strides = array<i32>} : memref<128x128xf32, #tpu.memory_space<vmem>>, vector<128x128xf32>,
    %c0_i32_8 = arith.constant 0 : i32
    %9 = arith.cmpi eq, %arg2, %c0_i32_8 : i32
    %10 = arith.extui %9 : i1 to i32
    %c0_i32_9 = arith.constant 0 : i32
    %11 = arith.cmpi ne, %10, %c0_i32_9 : i32
    scf.if %11 {
      %c0_10 = arith.constant 0 : index
      %c0_11 = arith.constant 0 : index
      %12 = vector.load %arg6[%c0_10, %c0_11] : memref<128x128xf32, #tpu.memory_space<vmem>>, vector<128x128xf32>
      %13 = arith.truncf %12 : vector<128x128xf32> to vector<128x128xbf16>
      %c0_12 = arith.constant 0 : index
      %c0_13 = arith.constant 0 : index
      %14 = vector.load %arg5[%c0_12, %c0_13] : memref<128x128xbf16, #tpu.memory_space<vmem>>, vector<128x128xbf16>
      tpu.vector_store %arg5[%c0_12, %c0_13], %13 {strides = array<i32>} : memref<128x128xbf16, #tpu.memory_space<vmem>>, vector<128x128xbf16>,
    } else {
    }
    return
  }
  func.func @transform_0(%arg0: i32, %arg1: i32, %arg2: i32) -> (i32, i32) {
    %c0_i32 = arith.constant 0 : i32
    return %arg0, %arg2 : i32, i32
  }
  func.func @transform_1(%arg0: i32, %arg1: i32, %arg2: i32) -> (i32, i32) {
    %c0_i32 = arith.constant 0 : i32
    return %arg2, %arg1 : i32, i32
  }
  func.func @transform_2(%arg0: i32, %arg1: i32, %arg2: i32) -> (i32, i32) {
    %c0_i32 = arith.constant 0 : i32
    return %arg0, %arg1 : i32, i32
  }
}

module attributes {stable_mosaic.version = 11 : i64} {
  func.func @_mlp_kernel(%arg0: i32, %arg1: memref<2x128xbf16, #tpu.memory_space<vmem>>, %arg2: memref<128x128xbf16, #tpu.memory_space<vmem>>, %arg3: memref<128x128xbf16, #tpu.memory_space<vmem>>, %arg4: memref<2x128xf32, #tpu.memory_space<vmem>>) attributes {dimension_semantics = [#tpu.dimension_semantics<parallel>], iteration_bounds = array<i64: 1>, scalar_prefetch = 0 : i64, scratch_operands = 0 : i64, tpu.core_type = #tpu.core_type<tc>, window_params = [{transform_indices = @transform_0, window_bounds = array<i64: 2, 128>}, {pipeline_mode = #tpu.pipeline_mode<synchronous>, transform_indices = @transform_1, window_bounds = array<i64: 128, 128>}, {pipeline_mode = #tpu.pipeline_mode<synchronous>, transform_indices = @transform_2, window_bounds = array<i64: 128, 128>}, {transform_indices = @transform_3, window_bounds = array<i64: 2, 128>}]} {
    %c0 = arith.constant 0 : index
    %c0_0 = arith.constant 0 : index
    %0 = vector.load %arg1[%c0, %c0_0] : memref<2x128xbf16, #tpu.memory_space<vmem>>, vector<2x128xbf16>
    %c0_1 = arith.constant 0 : index
    %c0_2 = arith.constant 0 : index
    %1 = vector.load %arg2[%c0_1, %c0_2] : memref<128x128xbf16, #tpu.memory_space<vmem>>, vector<128x128xbf16>
    %cst = arith.constant dense<0.000000e+00> : vector<2x128xf32>
    %2 = tpu.matmul %0, %1, %cst {dimension_numbers = #tpu.dot_dimension_numbers<[1], [0], [0], [1], [0, 0, 1, 1], [], []>} : vector<2x128xbf16>, vector<128x128xbf16>, vector<2x128xf32> -> vector<2x128xf32>
    %3 = arith.negf %2 : vector<2x128xf32>
    %4 = math.exp %3 : vector<2x128xf32>
    %cst_3 = arith.constant 1.000000e+00 : f32
    %5 = vector.broadcast %cst_3 : f32 to vector<2x128xf32>
    %6 = arith.addf %5, %4 : vector<2x128xf32>
    %7 = arith.divf %5, %6 : vector<2x128xf32>
    %8 = arith.mulf %2, %7 : vector<2x128xf32>
    %9 = arith.truncf %8 : vector<2x128xf32> to vector<2x128xbf16>
    %c0_4 = arith.constant 0 : index
    %c0_5 = arith.constant 0 : index
    %10 = vector.load %arg3[%c0_4, %c0_5] : memref<128x128xbf16, #tpu.memory_space<vmem>>, vector<128x128xbf16>
    %cst_6 = arith.constant dense<0.000000e+00> : vector<2x128xf32>
    %11 = tpu.matmul %9, %10, %cst_6 {dimension_numbers = #tpu.dot_dimension_numbers<[1], [0], [0], [1], [0, 0, 1, 1], [], []>} : vector<2x128xbf16>, vector<128x128xbf16>, vector<2x128xf32> -> vector<2x128xf32>
    %c0_7 = arith.constant 0 : index
    %c0_8 = arith.constant 0 : index
    %12 = vector.load %arg4[%c0_7, %c0_8] : memref<2x128xf32, #tpu.memory_space<vmem>>, vector<2x128xf32>
    tpu.vector_store %arg4[%c0_7, %c0_8], %11 {strides = array<i32>} : memref<2x128xf32, #tpu.memory_space<vmem>>, vector<2x128xf32>,
    return
  }
  func.func @transform_0(%arg0: i32) -> (i32, i32) {
    %c0_i32 = arith.constant 0 : i32
    %c0_i32_0 = arith.constant 0 : i32
    return %arg0, %c0_i32 : i32, i32
  }
  func.func @transform_1(%arg0: i32) -> (i32, i32) {
    %c0_i32 = arith.constant 0 : i32
    %c0_i32_0 = arith.constant 0 : i32
    %c0_i32_1 = arith.constant 0 : i32
    return %c0_i32, %c0_i32_0 : i32, i32
  }
  func.func @transform_2(%arg0: i32) -> (i32, i32) {
    %c0_i32 = arith.constant 0 : i32
    %c0_i32_0 = arith.constant 0 : i32
    %c0_i32_1 = arith.constant 0 : i32
    return %c0_i32, %c0_i32_0 : i32, i32
  }
  func.func @transform_3(%arg0: i32) -> (i32, i32) {
    %c0_i32 = arith.constant 0 : i32
    %c0_i32_0 = arith.constant 0 : i32
    return %arg0, %c0_i32 : i32, i32
  }
}

module attributes {stable_mosaic.version = 11 : i64} {
  func.func @_mlp_kernel(%arg0: i32, %arg1: memref<2x64xbf16, #tpu.memory_space<vmem>>, %arg2: memref<64x128xbf16, #tpu.memory_space<vmem>>, %arg3: memref<128x128xbf16, #tpu.memory_space<vmem>>, %arg4: memref<2x128xf32, #tpu.memory_space<vmem>>) attributes {dimension_semantics = [#tpu.dimension_semantics<parallel>], iteration_bounds = array<i64: 1>, scalar_prefetch = 0 : i64, scratch_operands = 0 : i64, tpu.core_type = #tpu.core_type<tc>, window_params = [{transform_indices = @transform_0, window_bounds = array<i64: 2, 64>}, {pipeline_mode = #tpu.pipeline_mode<synchronous>, transform_indices = @transform_1, window_bounds = array<i64: 64, 128>}, {pipeline_mode = #tpu.pipeline_mode<synchronous>, transform_indices = @transform_2, window_bounds = array<i64: 128, 128>}, {transform_indices = @transform_3, window_bounds = array<i64: 2, 128>}]} {
    %c0 = arith.constant 0 : index
    %c0_0 = arith.constant 0 : index
    %0 = vector.load %arg1[%c0, %c0_0] : memref<2x64xbf16, #tpu.memory_space<vmem>>, vector<2x64xbf16>
    %c0_1 = arith.constant 0 : index
    %c0_2 = arith.constant 0 : index
    %1 = vector.load %arg2[%c0_1, %c0_2] : memref<64x128xbf16, #tpu.memory_space<vmem>>, vector<64x128xbf16>
    %cst = arith.constant dense<0.000000e+00> : vector<2x128xf32>
    %2 = tpu.matmul %0, %1, %cst {dimension_numbers = #tpu.dot_dimension_numbers<[1], [0], [0], [1], [0, 0, 1, 1], [], []>} : vector<2x64xbf16>, vector<64x128xbf16>, vector<2x128xf32> -> vector<2x128xf32>
    %3 = arith.negf %2 : vector<2x128xf32>
    %4 = math.exp %3 : vector<2x128xf32>
    %cst_3 = arith.constant 1.000000e+00 : f32
    %5 = vector.broadcast %cst_3 : f32 to vector<2x128xf32>
    %6 = arith.addf %5, %4 : vector<2x128xf32>
    %7 = arith.divf %5, %6 : vector<2x128xf32>
    %8 = arith.mulf %2, %7 : vector<2x128xf32>
    %9 = arith.truncf %8 : vector<2x128xf32> to vector<2x128xbf16>
    %c0_4 = arith.constant 0 : index
    %c0_5 = arith.constant 0 : index
    %10 = vector.load %arg3[%c0_4, %c0_5] : memref<128x128xbf16, #tpu.memory_space<vmem>>, vector<128x128xbf16>
    %cst_6 = arith.constant dense<0.000000e+00> : vector<2x128xf32>
    %11 = tpu.matmul %9, %10, %cst_6 {dimension_numbers = #tpu.dot_dimension_numbers<[1], [0], [0], [1], [0, 0, 1, 1], [], []>} : vector<2x128xbf16>, vector<128x128xbf16>, vector<2x128xf32> -> vector<2x128xf32>
    %c0_7 = arith.constant 0 : index
    %c0_8 = arith.constant 0 : index
    %12 = vector.load %arg4[%c0_7, %c0_8] : memref<2x128xf32, #tpu.memory_space<vmem>>, vector<2x128xf32>
    tpu.vector_store %arg4[%c0_7, %c0_8], %11 {strides = array<i32>} : memref<2x128xf32, #tpu.memory_space<vmem>>, vector<2x128xf32>,
    return
  }
  func.func @transform_0(%arg0: i32) -> (i32, i32) {
    %c0_i32 = arith.constant 0 : i32
    %c0_i32_0 = arith.constant 0 : i32
    return %arg0, %c0_i32 : i32, i32
  }
  func.func @transform_1(%arg0: i32) -> (i32, i32) {
    %c0_i32 = arith.constant 0 : i32
    %c0_i32_0 = arith.constant 0 : i32
    %c0_i32_1 = arith.constant 0 : i32
    return %c0_i32, %c0_i32_0 : i32, i32
  }
  func.func @transform_2(%arg0: i32) -> (i32, i32) {
    %c0_i32 = arith.constant 0 : i32
    %c0_i32_0 = arith.constant 0 : i32
    %c0_i32_1 = arith.constant 0 : i32
    return %c0_i32, %c0_i32_0 : i32, i32
  }
  func.func @transform_3(%arg0: i32) -> (i32, i32) {
    %c0_i32 = arith.constant 0 : i32
    %c0_i32_0 = arith.constant 0 : i32
    return %arg0, %c0_i32 : i32, i32
  }
}

module attributes {stable_mosaic.version = 11 : i64} {
  func.func @_silu_matmul_kernel(%arg0: i32, %arg1: memref<2x128xf32, #tpu.memory_space<vmem>>, %arg2: memref<128x768xbf16, #tpu.memory_space<vmem>>, %arg3: memref<2x768xf32, #tpu.memory_space<vmem>>) attributes {dimension_semantics = [#tpu.dimension_semantics<parallel>], iteration_bounds = array<i64: 1>, scalar_prefetch = 0 : i64, scratch_operands = 0 : i64, tpu.core_type = #tpu.core_type<tc>, window_params = [{transform_indices = @transform_0, window_bounds = array<i64: 2, 128>}, {pipeline_mode = #tpu.pipeline_mode<synchronous>, transform_indices = @transform_1, window_bounds = array<i64: 128, 768>}, {transform_indices = @transform_2, window_bounds = array<i64: 2, 768>}]} {
    %c0 = arith.constant 0 : index
    %c0_0 = arith.constant 0 : index
    %0 = vector.load %arg1[%c0, %c0_0] : memref<2x128xf32, #tpu.memory_space<vmem>>, vector<2x128xf32>
    %1 = arith.negf %0 : vector<2x128xf32>
    %2 = math.exp %1 : vector<2x128xf32>
    %cst = arith.constant 1.000000e+00 : f32
    %3 = vector.broadcast %cst : f32 to vector<2x128xf32>
    %4 = arith.addf %3, %2 : vector<2x128xf32>
    %5 = arith.divf %3, %4 : vector<2x128xf32>
    %6 = arith.mulf %0, %5 : vector<2x128xf32>
    %7 = arith.truncf %6 : vector<2x128xf32> to vector<2x128xbf16>
    %c0_1 = arith.constant 0 : index
    %c0_2 = arith.constant 0 : index
    %8 = vector.load %arg2[%c0_1, %c0_2] : memref<128x768xbf16, #tpu.memory_space<vmem>>, vector<128x768xbf16>
    %cst_3 = arith.constant dense<0.000000e+00> : vector<2x768xf32>
    %9 = tpu.matmul %7, %8, %cst_3 {dimension_numbers = #tpu.dot_dimension_numbers<[1], [0], [0], [1], [0, 0, 1, 1], [], []>} : vector<2x128xbf16>, vector<128x768xbf16>, vector<2x768xf32> -> vector<2x768xf32>
    %c0_4 = arith.constant 0 : index
    %c0_5 = arith.constant 0 : index
    %10 = vector.load %arg3[%c0_4, %c0_5] : memref<2x768xf32, #tpu.memory_space<vmem>>, vector<2x768xf32>
    tpu.vector_store %arg3[%c0_4, %c0_5], %9 {strides = array<i32>} : memref<2x768xf32, #tpu.memory_space<vmem>>, vector<2x768xf32>,
    return
  }
  func.func @transform_0(%arg0: i32) -> (i32, i32) {
    %c0_i32 = arith.constant 0 : i32
    %c0_i32_0 = arith.constant 0 : i32
    return %arg0, %c0_i32 : i32, i32
  }
  func.func @transform_1(%arg0: i32) -> (i32, i32) {
    %c0_i32 = arith.constant 0 : i32
    %c0_i32_0 = arith.constant 0 : i32
    %c0_i32_1 = arith.constant 0 : i32
    return %c0_i32, %c0_i32_0 : i32, i32
  }
  func.func @transform_2(%arg0: i32) -> (i32, i32) {
    %c0_i32 = arith.constant 0 : i32
    %c0_i32_0 = arith.constant 0 : i32
    return %arg0, %c0_i32 : i32, i32
  }
}

module attributes {stable_mosaic.version = 11 : i64} {
  func.func @_matmul_kernel(%arg0: i32, %arg1: i32, %arg2: i32, %arg3: memref<256x64xbf16, #tpu.memory_space<vmem>>, %arg4: memref<64x128xbf16, #tpu.memory_space<vmem>>, %arg5: memref<256x128xbf16, #tpu.memory_space<vmem>>, %arg6: memref<256x128xf32, #tpu.memory_space<vmem>>) attributes {dimension_semantics = [#tpu.dimension_semantics<parallel>, #tpu.dimension_semantics<parallel>, #tpu.dimension_semantics<arbitrary>], iteration_bounds = array<i64: 1, 1, 1>, scalar_prefetch = 0 : i64, scratch_operands = 1 : i64, tpu.core_type = #tpu.core_type<tc>, window_params = [{transform_indices = @transform_0, window_bounds = array<i64: 256, 64>}, {transform_indices = @transform_1, window_bounds = array<i64: 64, 128>}, {transform_indices = @transform_2, window_bounds = array<i64: 256, 128>}]} {
    %c0_i32 = arith.constant 0 : i32
    %0 = arith.cmpi eq, %arg2, %c0_i32 : i32
    %1 = arith.extui %0 : i1 to i32
    %c0_i32_0 = arith.constant 0 : i32
    %2 = arith.cmpi ne, %1, %c0_i32_0 : i32
    scf.if %2 {
      %cst_10 = arith.constant 0.000000e+00 : f32
      %12 = vector.broadcast %cst_10 : f32 to vector<256x128xf32>
      %c0_11 = arith.constant 0 : index
      %c0_12 = arith.constant 0 : index
      %13 = vector.load %arg6[%c0_11, %c0_12] : memref<256x128xf32, #tpu.memory_space<vmem>>, vector<256x128xf32>
      tpu.vector_store %arg6[%c0_11, %c0_12], %12 {strides = array<i32>} : memref<256x128xf32, #tpu.memory_space<vmem>>, vector<256x128xf32>,
    } else {
    }
    %c0 = arith.constant 0 : index
    %c0_1 = arith.constant 0 : index
    %3 = vector.load %arg6[%c0, %c0_1] : memref<256x128xf32, #tpu.memory_space<vmem>>, vector<256x128xf32>
    %c0_2 = arith.constant 0 : index
    %c0_3 = arith.constant 0 : index
    %4 = vector.load %arg3[%c0_2, %c0_3] : memref<256x64xbf16, #tpu.memory_space<vmem>>, vector<256x64xbf16>
    %c0_4 = arith.constant 0 : index
    %c0_5 = arith.constant 0 : index
    %5 = vector.load %arg4[%c0_4, %c0_5] : memref<64x128xbf16, #tpu.memory_space<vmem>>, vector<64x128xbf16>
    %cst = arith.constant dense<0.000000e+00> : vector<256x128xf32>
    %6 = tpu.matmul %4, %5, %cst {dimension_numbers = #tpu.dot_dimension_numbers<[1], [0], [0], [1], [0, 0, 1, 1], [], []>} : vector<256x64xbf16>, vector<64x128xbf16>, vector<256x128xf32> -> vector<256x128xf32>
    %7 = arith.addf %3, %6 : vector<256x128xf32>
    %c0_6 = arith.constant 0 : index
    %c0_7 = arith.constant 0 : index
    %8 = vector.load %arg6[%c0_6, %c0_7] : memref<256x128xf32, #tpu.memory_space<vmem>>, vector<256x128xf32>
    tpu.vector_store %arg6[%c0_6, %c0_7], %7 {strides = array<i32>} : memref<256x128xf32, #tpu.memory_space<vmem>>, vector<256x128xf32>,
    %c0_i32_8 = arith.constant 0 : i32
    %9 = arith.cmpi eq, %arg2, %c0_i32_8 : i32
    %10 = arith.extui %9 : i1 to i32
    %c0_i32_9 = arith.constant 0 : i32
    %11 = arith.cmpi ne, %10, %c0_i32_9 : i32
    scf.if %11 {
      %c0_10 = arith.constant 0 : index
      %c0_11 = arith.constant 0 : index
      %12 = vector.load %arg6[%c0_10, %c0_11] : memref<256x128xf32, #tpu.memory_space<vmem>>, vector<256x128xf32>
      %13 = arith.truncf %12 : vector<256x128xf32> to vector<256x128xbf16>
      %c0_12 = arith.constant 0 : index
      %c0_13 = arith.constant 0 : index
      %14 = vector.load %arg5[%c0_12, %c0_13] : memref<256x128xbf16, #tpu.memory_space<vmem>>, vector<256x128xbf16>
      tpu.vector_store %arg5[%c0_12, %c0_13], %13 {strides = array<i32>} : memref<256x128xbf16, #tpu.memory_space<vmem>>, vector<256x128xbf16>,
    } else {
    }
    return
  }
  func.func @transform_0(%arg0: i32, %arg1: i32, %arg2: i32) -> (i32, i32) {
    %c0_i32 = arith.constant 0 : i32
    return %arg0, %arg2 : i32, i32
  }
  func.func @transform_1(%arg0: i32, %arg1: i32, %arg2: i32) -> (i32, i32) {
    %c0_i32 = arith.constant 0 : i32
    return %arg2, %arg1 : i32, i32
  }
  func.func @transform_2(%arg0: i32, %arg1: i32, %arg2: i32) -> (i32, i32) {
    %c0_i32 = arith.constant 0 : i32
    return %arg0, %arg1 : i32, i32
  }
}

module attributes {stable_mosaic.version = 11 : i64} {
  func.func @_self_attn_block_kernel(%arg0: i32, %arg1: memref<1x64x128xbf16, #tpu.memory_space<vmem>>, %arg2: memref<1x1x128xf32, #tpu.memory_space<vmem>>, %arg3: memref<1x1x128xf32, #tpu.memory_space<vmem>>, %arg4: memref<1x1x128xf32, #tpu.memory_space<vmem>>, %arg5: memref<128x384xbf16, #tpu.memory_space<vmem>>, %arg6: memref<128x128xbf16, #tpu.memory_space<vmem>>, %arg7: memref<1x64x128xbf16, #tpu.memory_space<vmem>>) attributes {dimension_semantics = [#tpu.dimension_semantics<parallel>], iteration_bounds = array<i64: 2>, scalar_prefetch = 0 : i64, scratch_operands = 0 : i64, tpu.core_type = #tpu.core_type<tc>, window_params = [{transform_indices = @transform_0, window_bounds = array<i64: 1, 64, 128>}, {transform_indices = @transform_1, window_bounds = array<i64: 1, 1, 128>}, {transform_indices = @transform_2, window_bounds = array<i64: 1, 1, 128>}, {transform_indices = @transform_3, window_bounds = array<i64: 1, 1, 128>}, {pipeline_mode = #tpu.pipeline_mode<synchronous>, transform_indices = @transform_4, window_bounds = array<i64: 128, 384>}, {pipeline_mode = #tpu.pipeline_mode<synchronous>, transform_indices = @transform_5, window_bounds = array<i64: 128, 128>}, {transform_indices = @transform_6, window_bounds = array<i64: 1, 64, 128>}]} {
    %c0 = arith.constant 0 : index
    %c0_0 = arith.constant 0 : index
    %c0_1 = arith.constant 0 : index
    %0 = vector.load %arg1[%c0, %c0_0, %c0_1] : memref<1x64x128xbf16, #tpu.memory_space<vmem>>, vector<1x64x128xbf16>
    %1 = vector.shape_cast %0 : vector<1x64x128xbf16> to vector<64x128xbf16>
    %2 = arith.extf %1 : vector<64x128xbf16> to vector<64x128xf32>
    %cst = arith.constant dense<0.000000e+00> : vector<64xf32>
    %3 = vector.multi_reduction <add>, %2, %cst [1] : vector<64x128xf32> to vector<64xf32>
    %4 = vector.shape_cast %3 : vector<64xf32> to vector<64x1xf32>
    %cst_2 = arith.constant 1.280000e+02 : f32
    %5 = vector.broadcast %cst_2 : f32 to vector<64x1xf32>
    %6 = arith.divf %4, %5 : vector<64x1xf32>
    %7 = vector.broadcast %6 : vector<64x1xf32> to vector<64x128xf32>
    %8 = arith.subf %2, %7 : vector<64x128xf32>
    %9 = arith.mulf %8, %8 : vector<64x128xf32>
    %cst_3 = arith.constant dense<0.000000e+00> : vector<64xf32>
    %10 = vector.multi_reduction <add>, %9, %cst_3 [1] : vector<64x128xf32> to vector<64xf32>
    %11 = vector.shape_cast %10 : vector<64xf32> to vector<64x1xf32>
    %cst_4 = arith.constant 1.280000e+02 : f32
    %12 = vector.broadcast %cst_4 : f32 to vector<64x1xf32>
    %13 = arith.divf %11, %12 : vector<64x1xf32>
    %14 = vector.broadcast %6 : vector<64x1xf32> to vector<64x128xf32>
    %15 = arith.subf %2, %14 : vector<64x128xf32>
    %cst_5 = arith.constant 9.99999997E-7 : f32
    %16 = vector.broadcast %cst_5 : f32 to vector<64x1xf32>
    %17 = arith.addf %13, %16 : vector<64x1xf32>
    %18 = math.rsqrt %17 : vector<64x1xf32>
    %19 = vector.broadcast %18 : vector<64x1xf32> to vector<64x128xf32>
    %20 = arith.mulf %15, %19 : vector<64x128xf32>
    %c0_6 = arith.constant 0 : index
    %c0_7 = arith.constant 0 : index
    %c0_8 = arith.constant 0 : index
    %21 = vector.load %arg3[%c0_6, %c0_7, %c0_8] : memref<1x1x128xf32, #tpu.memory_space<vmem>>, vector<1x1x128xf32>
    %22 = vector.shape_cast %21 : vector<1x1x128xf32> to vector<1x128xf32>
    %cst_9 = arith.constant 1.000000e+00 : f32
    %23 = vector.broadcast %cst_9 : f32 to vector<1x128xf32>
    %24 = arith.addf %23, %22 : vector<1x128xf32>
    %25 = vector.broadcast %24 : vector<1x128xf32> to vector<64x128xf32>
    %26 = arith.mulf %20, %25 : vector<64x128xf32>
    %c0_10 = arith.constant 0 : index
    %c0_11 = arith.constant 0 : index
    %c0_12 = arith.constant 0 : index
    %27 = vector.load %arg2[%c0_10, %c0_11, %c0_12] : memref<1x1x128xf32, #tpu.memory_space<vmem>>, vector<1x1x128xf32>
    %28 = vector.shape_cast %27 : vector<1x1x128xf32> to vector<1x128xf32>
    %29 = vector.broadcast %28 : vector<1x128xf32> to vector<64x128xf32>
    %30 = arith.addf %26, %29 : vector<64x128xf32>
    %31 = arith.truncf %30 : vector<64x128xf32> to vector<64x128xbf16>
    %c0_13 = arith.constant 0 : index
    %c0_14 = arith.constant 0 : index
    %32 = vector.load %arg5[%c0_13, %c0_14] : memref<128x384xbf16, #tpu.memory_space<vmem>>, vector<128x384xbf16>
    %cst_15 = arith.constant dense<0.000000e+00> : vector<64x384xf32>
    %33 = tpu.matmul %31, %32, %cst_15 {dimension_numbers = #tpu.dot_dimension_numbers<[1], [0], [0], [1], [0, 0, 1, 1], [], []>} : vector<64x128xbf16>, vector<128x384xbf16>, vector<64x384xf32> -> vector<64x384xf32>
    %34 = arith.truncf %33 : vector<64x384xf32> to vector<64x384xbf16>
    %35 = vector.extract_strided_slice %34 {offsets = [0, 128], sizes = [64, 256], strides = [1, 1]} : vector<64x384xbf16> to vector<64x256xbf16>
    %36 = vector.extract_strided_slice %34 {offsets = [0, 0], sizes = [64, 128], strides = [1, 1]} : vector<64x384xbf16> to vector<64x128xbf16>
    %37 = vector.extract_strided_slice %36 {offsets = [0, 0], sizes = [64, 32], strides = [1, 1]} : vector<64x128xbf16> to vector<64x32xbf16>
    %38 = vector.extract_strided_slice %35 {offsets = [0, 0], sizes = [64, 32], strides = [1, 1]} : vector<64x256xbf16> to vector<64x32xbf16>
    %39 = vector.extract_strided_slice %35 {offsets = [0, 128], sizes = [64, 32], strides = [1, 1]} : vector<64x256xbf16> to vector<64x32xbf16>
    %cst_16 = arith.constant dense<0.000000e+00> : vector<64x64xf32>
    %40 = tpu.matmul %37, %38, %cst_16 {dimension_numbers = #tpu.dot_dimension_numbers<[1], [1], [0], [0], [0, 0, 1, 0], [], []>} : vector<64x32xbf16>, vector<64x32xbf16>, vector<64x64xf32> -> vector<64x64xf32>
    %cst_17 = arith.constant dense<0xFF800000> : vector<64xf32>
    %41 = vector.multi_reduction <maximumf>, %40, %cst_17 [1] : vector<64x64xf32> to vector<64xf32>
    %42 = vector.shape_cast %41 : vector<64xf32> to vector<64x1xf32>
    %43 = vector.broadcast %42 : vector<64x1xf32> to vector<64x64xf32>
    %44 = arith.subf %40, %43 : vector<64x64xf32>
    %45 = math.exp %44 : vector<64x64xf32>
    %cst_18 = arith.constant dense<0.000000e+00> : vector<64xf32>
    %46 = vector.multi_reduction <add>, %45, %cst_18 [1] : vector<64x64xf32> to vector<64xf32>
    %47 = vector.shape_cast %46 : vector<64xf32> to vector<64x1xf32>
    %48 = arith.truncf %45 : vector<64x64xf32> to vector<64x64xbf16>
    %cst_19 = arith.constant dense<0.000000e+00> : vector<64x32xf32>
    %49 = tpu.matmul %48, %39, %cst_19 {dimension_numbers = #tpu.dot_dimension_numbers<[1], [0], [0], [1], [0, 0, 1, 1], [], []>} : vector<64x64xbf16>, vector<64x32xbf16>, vector<64x32xf32> -> vector<64x32xf32>
    %50 = tpu.reciprocal %47 {approx = true} : vector<64x1xf32> -> vector<64x1xf32>
    %51 = vector.broadcast %50 : vector<64x1xf32> to vector<64x32xf32>
    %52 = arith.mulf %49, %51 : vector<64x32xf32>
    %53 = vector.extract_strided_slice %36 {offsets = [0, 32], sizes = [64, 32], strides = [1, 1]} : vector<64x128xbf16> to vector<64x32xbf16>
    %54 = vector.extract_strided_slice %35 {offsets = [0, 32], sizes = [64, 32], strides = [1, 1]} : vector<64x256xbf16> to vector<64x32xbf16>
    %55 = vector.extract_strided_slice %35 {offsets = [0, 160], sizes = [64, 32], strides = [1, 1]} : vector<64x256xbf16> to vector<64x32xbf16>
    %cst_20 = arith.constant dense<0.000000e+00> : vector<64x64xf32>
    %56 = tpu.matmul %53, %54, %cst_20 {dimension_numbers = #tpu.dot_dimension_numbers<[1], [1], [0], [0], [0, 0, 1, 0], [], []>} : vector<64x32xbf16>, vector<64x32xbf16>, vector<64x64xf32> -> vector<64x64xf32>
    %cst_21 = arith.constant dense<0xFF800000> : vector<64xf32>
    %57 = vector.multi_reduction <maximumf>, %56, %cst_21 [1] : vector<64x64xf32> to vector<64xf32>
    %58 = vector.shape_cast %57 : vector<64xf32> to vector<64x1xf32>
    %59 = vector.broadcast %58 : vector<64x1xf32> to vector<64x64xf32>
    %60 = arith.subf %56, %59 : vector<64x64xf32>
    %61 = math.exp %60 : vector<64x64xf32>
    %cst_22 = arith.constant dense<0.000000e+00> : vector<64xf32>
    %62 = vector.multi_reduction <add>, %61, %cst_22 [1] : vector<64x64xf32> to vector<64xf32>
    %63 = vector.shape_cast %62 : vector<64xf32> to vector<64x1xf32>
    %64 = arith.truncf %61 : vector<64x64xf32> to vector<64x64xbf16>
    %cst_23 = arith.constant dense<0.000000e+00> : vector<64x32xf32>
    %65 = tpu.matmul %64, %55, %cst_23 {dimension_numbers = #tpu.dot_dimension_numbers<[1], [0], [0], [1], [0, 0, 1, 1], [], []>} : vector<64x64xbf16>, vector<64x32xbf16>, vector<64x32xf32> -> vector<64x32xf32>
    %66 = tpu.reciprocal %63 {approx = true} : vector<64x1xf32> -> vector<64x1xf32>
    %67 = vector.broadcast %66 : vector<64x1xf32> to vector<64x32xf32>
    %68 = arith.mulf %65, %67 : vector<64x32xf32>
    %69 = vector.extract_strided_slice %36 {offsets = [0, 64], sizes = [64, 32], strides = [1, 1]} : vector<64x128xbf16> to vector<64x32xbf16>
    %70 = vector.extract_strided_slice %35 {offsets = [0, 64], sizes = [64, 32], strides = [1, 1]} : vector<64x256xbf16> to vector<64x32xbf16>
    %71 = vector.extract_strided_slice %35 {offsets = [0, 192], sizes = [64, 32], strides = [1, 1]} : vector<64x256xbf16> to vector<64x32xbf16>
    %cst_24 = arith.constant dense<0.000000e+00> : vector<64x64xf32>
    %72 = tpu.matmul %69, %70, %cst_24 {dimension_numbers = #tpu.dot_dimension_numbers<[1], [1], [0], [0], [0, 0, 1, 0], [], []>} : vector<64x32xbf16>, vector<64x32xbf16>, vector<64x64xf32> -> vector<64x64xf32>
    %cst_25 = arith.constant dense<0xFF800000> : vector<64xf32>
    %73 = vector.multi_reduction <maximumf>, %72, %cst_25 [1] : vector<64x64xf32> to vector<64xf32>
    %74 = vector.shape_cast %73 : vector<64xf32> to vector<64x1xf32>
    %75 = vector.broadcast %74 : vector<64x1xf32> to vector<64x64xf32>
    %76 = arith.subf %72, %75 : vector<64x64xf32>
    %77 = math.exp %76 : vector<64x64xf32>
    %cst_26 = arith.constant dense<0.000000e+00> : vector<64xf32>
    %78 = vector.multi_reduction <add>, %77, %cst_26 [1] : vector<64x64xf32> to vector<64xf32>
    %79 = vector.shape_cast %78 : vector<64xf32> to vector<64x1xf32>
    %80 = arith.truncf %77 : vector<64x64xf32> to vector<64x64xbf16>
    %cst_27 = arith.constant dense<0.000000e+00> : vector<64x32xf32>
    %81 = tpu.matmul %80, %71, %cst_27 {dimension_numbers = #tpu.dot_dimension_numbers<[1], [0], [0], [1], [0, 0, 1, 1], [], []>} : vector<64x64xbf16>, vector<64x32xbf16>, vector<64x32xf32> -> vector<64x32xf32>
    %82 = tpu.reciprocal %79 {approx = true} : vector<64x1xf32> -> vector<64x1xf32>
    %83 = vector.broadcast %82 : vector<64x1xf32> to vector<64x32xf32>
    %84 = arith.mulf %81, %83 : vector<64x32xf32>
    %85 = vector.extract_strided_slice %36 {offsets = [0, 96], sizes = [64, 32], strides = [1, 1]} : vector<64x128xbf16> to vector<64x32xbf16>
    %86 = vector.extract_strided_slice %35 {offsets = [0, 96], sizes = [64, 32], strides = [1, 1]} : vector<64x256xbf16> to vector<64x32xbf16>
    %87 = vector.extract_strided_slice %35 {offsets = [0, 224], sizes = [64, 32], strides = [1, 1]} : vector<64x256xbf16> to vector<64x32xbf16>
    %cst_28 = arith.constant dense<0.000000e+00> : vector<64x64xf32>
    %88 = tpu.matmul %85, %86, %cst_28 {dimension_numbers = #tpu.dot_dimension_numbers<[1], [1], [0], [0], [0, 0, 1, 0], [], []>} : vector<64x32xbf16>, vector<64x32xbf16>, vector<64x64xf32> -> vector<64x64xf32>
    %cst_29 = arith.constant dense<0xFF800000> : vector<64xf32>
    %89 = vector.multi_reduction <maximumf>, %88, %cst_29 [1] : vector<64x64xf32> to vector<64xf32>
    %90 = vector.shape_cast %89 : vector<64xf32> to vector<64x1xf32>
    %91 = vector.broadcast %90 : vector<64x1xf32> to vector<64x64xf32>
    %92 = arith.subf %88, %91 : vector<64x64xf32>
    %93 = math.exp %92 : vector<64x64xf32>
    %cst_30 = arith.constant dense<0.000000e+00> : vector<64xf32>
    %94 = vector.multi_reduction <add>, %93, %cst_30 [1] : vector<64x64xf32> to vector<64xf32>
    %95 = vector.shape_cast %94 : vector<64xf32> to vector<64x1xf32>
    %96 = arith.truncf %93 : vector<64x64xf32> to vector<64x64xbf16>
    %cst_31 = arith.constant dense<0.000000e+00> : vector<64x32xf32>
    %97 = tpu.matmul %96, %87, %cst_31 {dimension_numbers = #tpu.dot_dimension_numbers<[1], [0], [0], [1], [0, 0, 1, 1], [], []>} : vector<64x64xbf16>, vector<64x32xbf16>, vector<64x32xf32> -> vector<64x32xf32>
    %98 = tpu.reciprocal %95 {approx = true} : vector<64x1xf32> -> vector<64x1xf32>
    %99 = vector.broadcast %98 : vector<64x1xf32> to vector<64x32xf32>
    %100 = arith.mulf %97, %99 : vector<64x32xf32>
    %101 = tpu.concatenate %52, %68, %84, %100 in 1 : vector<64x32xf32>, vector<64x32xf32>, vector<64x32xf32>, vector<64x32xf32> -> vector<64x128xf32>
    %102 = arith.truncf %101 : vector<64x128xf32> to vector<64x128xbf16>
    %c0_32 = arith.constant 0 : index
    %c0_33 = arith.constant 0 : index
    %103 = vector.load %arg6[%c0_32, %c0_33] : memref<128x128xbf16, #tpu.memory_space<vmem>>, vector<128x128xbf16>
    %cst_34 = arith.constant dense<0.000000e+00> : vector<64x128xf32>
    %104 = tpu.matmul %102, %103, %cst_34 {dimension_numbers = #tpu.dot_dimension_numbers<[1], [0], [0], [1], [0, 0, 1, 1], [], []>} : vector<64x128xbf16>, vector<128x128xbf16>, vector<64x128xf32> -> vector<64x128xf32>
    %c0_35 = arith.constant 0 : index
    %c0_36 = arith.constant 0 : index
    %c0_37 = arith.constant 0 : index
    %105 = vector.load %arg4[%c0_35, %c0_36, %c0_37] : memref<1x1x128xf32, #tpu.memory_space<vmem>>, vector<1x1x128xf32>
    %106 = vector.shape_cast %105 : vector<1x1x128xf32> to vector<1x128xf32>
    %107 = vector.broadcast %106 : vector<1x128xf32> to vector<64x128xf32>
    %108 = arith.mulf %107, %104 : vector<64x128xf32>
    %109 = arith.addf %2, %108 : vector<64x128xf32>
    %110 = arith.truncf %109 : vector<64x128xf32> to vector<64x128xbf16>
    %c0_38 = arith.constant 0 : index
    %c0_39 = arith.constant 0 : index
    %c0_40 = arith.constant 0 : index
    %111 = vector.load %arg7[%c0_38, %c0_39, %c0_40] : memref<1x64x128xbf16, #tpu.memory_space<vmem>>, vector<1x64x128xbf16>
    %112 = vector.shape_cast %111 : vector<1x64x128xbf16> to vector<64x128xbf16>
    %113 = vector.shape_cast %110 : vector<64x128xbf16> to vector<1x64x128xbf16>
    tpu.vector_store %arg7[%c0_38, %c0_39, %c0_40], %113 {strides = array<i32>} : memref<1x64x128xbf16, #tpu.memory_space<vmem>>, vector<1x64x128xbf16>,
    return
  }
  func.func @transform_0(%arg0: i32) -> (i32, i32, i32) {
    %c0_i32 = arith.constant 0 : i32
    %c0_i32_0 = arith.constant 0 : i32
    %c0_i32_1 = arith.constant 0 : i32
    return %arg0, %c0_i32, %c0_i32_0 : i32, i32, i32
  }
  func.func @transform_1(%arg0: i32) -> (i32, i32, i32) {
    %c0_i32 = arith.constant 0 : i32
    %c0_i32_0 = arith.constant 0 : i32
    %c0_i32_1 = arith.constant 0 : i32
    return %arg0, %c0_i32, %c0_i32_0 : i32, i32, i32
  }
  func.func @transform_2(%arg0: i32) -> (i32, i32, i32) {
    %c0_i32 = arith.constant 0 : i32
    %c0_i32_0 = arith.constant 0 : i32
    %c0_i32_1 = arith.constant 0 : i32
    return %arg0, %c0_i32, %c0_i32_0 : i32, i32, i32
  }
  func.func @transform_3(%arg0: i32) -> (i32, i32, i32) {
    %c0_i32 = arith.constant 0 : i32
    %c0_i32_0 = arith.constant 0 : i32
    %c0_i32_1 = arith.constant 0 : i32
    return %arg0, %c0_i32, %c0_i32_0 : i32, i32, i32
  }
  func.func @transform_4(%arg0: i32) -> (i32, i32) {
    %c0_i32 = arith.constant 0 : i32
    %c0_i32_0 = arith.constant 0 : i32
    %c0_i32_1 = arith.constant 0 : i32
    return %c0_i32, %c0_i32_0 : i32, i32
  }
  func.func @transform_5(%arg0: i32) -> (i32, i32) {
    %c0_i32 = arith.constant 0 : i32
    %c0_i32_0 = arith.constant 0 : i32
    %c0_i32_1 = arith.constant 0 : i32
    return %c0_i32, %c0_i32_0 : i32, i32
  }
  func.func @transform_6(%arg0: i32) -> (i32, i32, i32) {
    %c0_i32 = arith.constant 0 : i32
    %c0_i32_0 = arith.constant 0 : i32
    %c0_i32_1 = arith.constant 0 : i32
    return %arg0, %c0_i32, %c0_i32_0 : i32, i32, i32
  }
}

module attributes {stable_mosaic.version = 11 : i64} {
  func.func @_cross_attn_block_kernel(%arg0: i32, %arg1: memref<1x64x128xbf16, #tpu.memory_space<vmem>>, %arg2: memref<1x128x128xbf16, #tpu.memory_space<vmem>>, %arg3: memref<128x128xbf16, #tpu.memory_space<vmem>>, %arg4: memref<128x256xbf16, #tpu.memory_space<vmem>>, %arg5: memref<128x128xbf16, #tpu.memory_space<vmem>>, %arg6: memref<1x64x128xbf16, #tpu.memory_space<vmem>>) attributes {dimension_semantics = [#tpu.dimension_semantics<parallel>], iteration_bounds = array<i64: 2>, scalar_prefetch = 0 : i64, scratch_operands = 0 : i64, tpu.core_type = #tpu.core_type<tc>, window_params = [{transform_indices = @transform_0, window_bounds = array<i64: 1, 64, 128>}, {transform_indices = @transform_1, window_bounds = array<i64: 1, 128, 128>}, {pipeline_mode = #tpu.pipeline_mode<synchronous>, transform_indices = @transform_2, window_bounds = array<i64: 128, 128>}, {pipeline_mode = #tpu.pipeline_mode<synchronous>, transform_indices = @transform_3, window_bounds = array<i64: 128, 256>}, {pipeline_mode = #tpu.pipeline_mode<synchronous>, transform_indices = @transform_4, window_bounds = array<i64: 128, 128>}, {transform_indices = @transform_5, window_bounds = array<i64: 1, 64, 128>}]} {
    %c0 = arith.constant 0 : index
    %c0_0 = arith.constant 0 : index
    %c0_1 = arith.constant 0 : index
    %0 = vector.load %arg1[%c0, %c0_0, %c0_1] : memref<1x64x128xbf16, #tpu.memory_space<vmem>>, vector<1x64x128xbf16>
    %1 = vector.shape_cast %0 : vector<1x64x128xbf16> to vector<64x128xbf16>
    %2 = arith.extf %1 : vector<64x128xbf16> to vector<64x128xf32>
    %cst = arith.constant dense<0.000000e+00> : vector<64xf32>
    %3 = vector.multi_reduction <add>, %2, %cst [1] : vector<64x128xf32> to vector<64xf32>
    %4 = vector.shape_cast %3 : vector<64xf32> to vector<64x1xf32>
    %cst_2 = arith.constant 1.280000e+02 : f32
    %5 = vector.broadcast %cst_2 : f32 to vector<64x1xf32>
    %6 = arith.divf %4, %5 : vector<64x1xf32>
    %7 = vector.broadcast %6 : vector<64x1xf32> to vector<64x128xf32>
    %8 = arith.subf %2, %7 : vector<64x128xf32>
    %9 = arith.mulf %8, %8 : vector<64x128xf32>
    %cst_3 = arith.constant dense<0.000000e+00> : vector<64xf32>
    %10 = vector.multi_reduction <add>, %9, %cst_3 [1] : vector<64x128xf32> to vector<64xf32>
    %11 = vector.shape_cast %10 : vector<64xf32> to vector<64x1xf32>
    %cst_4 = arith.constant 1.280000e+02 : f32
    %12 = vector.broadcast %cst_4 : f32 to vector<64x1xf32>
    %13 = arith.divf %11, %12 : vector<64x1xf32>
    %14 = vector.broadcast %6 : vector<64x1xf32> to vector<64x128xf32>
    %15 = arith.subf %2, %14 : vector<64x128xf32>
    %cst_5 = arith.constant 9.99999997E-7 : f32
    %16 = vector.broadcast %cst_5 : f32 to vector<64x1xf32>
    %17 = arith.addf %13, %16 : vector<64x1xf32>
    %18 = math.rsqrt %17 : vector<64x1xf32>
    %19 = vector.broadcast %18 : vector<64x1xf32> to vector<64x128xf32>
    %20 = arith.mulf %15, %19 : vector<64x128xf32>
    %21 = arith.truncf %20 : vector<64x128xf32> to vector<64x128xbf16>
    %c0_6 = arith.constant 0 : index
    %c0_7 = arith.constant 0 : index
    %22 = vector.load %arg3[%c0_6, %c0_7] : memref<128x128xbf16, #tpu.memory_space<vmem>>, vector<128x128xbf16>
    %cst_8 = arith.constant dense<0.000000e+00> : vector<64x128xf32>
    %23 = tpu.matmul %21, %22, %cst_8 {dimension_numbers = #tpu.dot_dimension_numbers<[1], [0], [0], [1], [0, 0, 1, 1], [], []>} : vector<64x128xbf16>, vector<128x128xbf16>, vector<64x128xf32> -> vector<64x128xf32>
    %24 = arith.truncf %23 : vector<64x128xf32> to vector<64x128xbf16>
    %c0_9 = arith.constant 0 : index
    %c0_10 = arith.constant 0 : index
    %c0_11 = arith.constant 0 : index
    %25 = vector.load %arg2[%c0_9, %c0_10, %c0_11] : memref<1x128x128xbf16, #tpu.memory_space<vmem>>, vector<1x128x128xbf16>
    %26 = vector.shape_cast %25 : vector<1x128x128xbf16> to vector<128x128xbf16>
    %c0_12 = arith.constant 0 : index
    %c0_13 = arith.constant 0 : index
    %27 = vector.load %arg4[%c0_12, %c0_13] : memref<128x256xbf16, #tpu.memory_space<vmem>>, vector<128x256xbf16>
    %cst_14 = arith.constant dense<0.000000e+00> : vector<128x256xf32>
    %28 = tpu.matmul %26, %27, %cst_14 {dimension_numbers = #tpu.dot_dimension_numbers<[1], [0], [0], [1], [0, 0, 1, 1], [], []>} : vector<128x128xbf16>, vector<128x256xbf16>, vector<128x256xf32> -> vector<128x256xf32>
    %29 = arith.truncf %28 : vector<128x256xf32> to vector<128x256xbf16>
    %30 = tpu.iota {dimensions = array<i32: 1>} : vector<64x128xi32>
    %c77_i32 = arith.constant 77 : i32
    %31 = vector.broadcast %c77_i32 : i32 to vector<64x128xi32>
    %32 = arith.cmpi slt, %30, %31 : vector<64x128xi32>
    %cst_15 = arith.constant 0.000000e+00 : f32
    %cst_16 = arith.constant -1.000000e+30 : f32
    %33 = vector.broadcast %cst_15 : f32 to vector<64x128xf32>
    %34 = vector.broadcast %cst_16 : f32 to vector<64x128xf32>
    %35 = arith.select %32, %33, %34 : vector<64x128xi1>, vector<64x128xf32>
    %36 = vector.extract_strided_slice %24 {offsets = [0, 0], sizes = [64, 32], strides = [1, 1]} : vector<64x128xbf16> to vector<64x32xbf16>
    %37 = vector.extract_strided_slice %29 {offsets = [0, 0], sizes = [128, 32], strides = [1, 1]} : vector<128x256xbf16> to vector<128x32xbf16>
    %38 = vector.extract_strided_slice %29 {offsets = [0, 128], sizes = [128, 32], strides = [1, 1]} : vector<128x256xbf16> to vector<128x32xbf16>
    %cst_17 = arith.constant dense<0.000000e+00> : vector<64x128xf32>
    %39 = tpu.matmul %36, %37, %cst_17 {dimension_numbers = #tpu.dot_dimension_numbers<[1], [1], [0], [0], [0, 0, 1, 0], [], []>} : vector<64x32xbf16>, vector<128x32xbf16>, vector<64x128xf32> -> vector<64x128xf32>
    %40 = arith.addf %39, %35 : vector<64x128xf32>
    %cst_18 = arith.constant dense<0xFF800000> : vector<64xf32>
    %41 = vector.multi_reduction <maximumf>, %40, %cst_18 [1] : vector<64x128xf32> to vector<64xf32>
    %42 = vector.shape_cast %41 : vector<64xf32> to vector<64x1xf32>
    %43 = vector.broadcast %42 : vector<64x1xf32> to vector<64x128xf32>
    %44 = arith.subf %40, %43 : vector<64x128xf32>
    %45 = math.exp %44 : vector<64x128xf32>
    %cst_19 = arith.constant dense<0.000000e+00> : vector<64xf32>
    %46 = vector.multi_reduction <add>, %45, %cst_19 [1] : vector<64x128xf32> to vector<64xf32>
    %47 = vector.shape_cast %46 : vector<64xf32> to vector<64x1xf32>
    %48 = arith.truncf %45 : vector<64x128xf32> to vector<64x128xbf16>
    %cst_20 = arith.constant dense<0.000000e+00> : vector<64x32xf32>
    %49 = tpu.matmul %48, %38, %cst_20 {dimension_numbers = #tpu.dot_dimension_numbers<[1], [0], [0], [1], [0, 0, 1, 1], [], []>} : vector<64x128xbf16>, vector<128x32xbf16>, vector<64x32xf32> -> vector<64x32xf32>
    %50 = tpu.reciprocal %47 {approx = true} : vector<64x1xf32> -> vector<64x1xf32>
    %51 = vector.broadcast %50 : vector<64x1xf32> to vector<64x32xf32>
    %52 = arith.mulf %49, %51 : vector<64x32xf32>
    %53 = vector.extract_strided_slice %24 {offsets = [0, 32], sizes = [64, 32], strides = [1, 1]} : vector<64x128xbf16> to vector<64x32xbf16>
    %54 = vector.extract_strided_slice %29 {offsets = [0, 32], sizes = [128, 32], strides = [1, 1]} : vector<128x256xbf16> to vector<128x32xbf16>
    %55 = vector.extract_strided_slice %29 {offsets = [0, 160], sizes = [128, 32], strides = [1, 1]} : vector<128x256xbf16> to vector<128x32xbf16>
    %cst_21 = arith.constant dense<0.000000e+00> : vector<64x128xf32>
    %56 = tpu.matmul %53, %54, %cst_21 {dimension_numbers = #tpu.dot_dimension_numbers<[1], [1], [0], [0], [0, 0, 1, 0], [], []>} : vector<64x32xbf16>, vector<128x32xbf16>, vector<64x128xf32> -> vector<64x128xf32>
    %57 = arith.addf %56, %35 : vector<64x128xf32>
    %cst_22 = arith.constant dense<0xFF800000> : vector<64xf32>
    %58 = vector.multi_reduction <maximumf>, %57, %cst_22 [1] : vector<64x128xf32> to vector<64xf32>
    %59 = vector.shape_cast %58 : vector<64xf32> to vector<64x1xf32>
    %60 = vector.broadcast %59 : vector<64x1xf32> to vector<64x128xf32>
    %61 = arith.subf %57, %60 : vector<64x128xf32>
    %62 = math.exp %61 : vector<64x128xf32>
    %cst_23 = arith.constant dense<0.000000e+00> : vector<64xf32>
    %63 = vector.multi_reduction <add>, %62, %cst_23 [1] : vector<64x128xf32> to vector<64xf32>
    %64 = vector.shape_cast %63 : vector<64xf32> to vector<64x1xf32>
    %65 = arith.truncf %62 : vector<64x128xf32> to vector<64x128xbf16>
    %cst_24 = arith.constant dense<0.000000e+00> : vector<64x32xf32>
    %66 = tpu.matmul %65, %55, %cst_24 {dimension_numbers = #tpu.dot_dimension_numbers<[1], [0], [0], [1], [0, 0, 1, 1], [], []>} : vector<64x128xbf16>, vector<128x32xbf16>, vector<64x32xf32> -> vector<64x32xf32>
    %67 = tpu.reciprocal %64 {approx = true} : vector<64x1xf32> -> vector<64x1xf32>
    %68 = vector.broadcast %67 : vector<64x1xf32> to vector<64x32xf32>
    %69 = arith.mulf %66, %68 : vector<64x32xf32>
    %70 = vector.extract_strided_slice %24 {offsets = [0, 64], sizes = [64, 32], strides = [1, 1]} : vector<64x128xbf16> to vector<64x32xbf16>
    %71 = vector.extract_strided_slice %29 {offsets = [0, 64], sizes = [128, 32], strides = [1, 1]} : vector<128x256xbf16> to vector<128x32xbf16>
    %72 = vector.extract_strided_slice %29 {offsets = [0, 192], sizes = [128, 32], strides = [1, 1]} : vector<128x256xbf16> to vector<128x32xbf16>
    %cst_25 = arith.constant dense<0.000000e+00> : vector<64x128xf32>
    %73 = tpu.matmul %70, %71, %cst_25 {dimension_numbers = #tpu.dot_dimension_numbers<[1], [1], [0], [0], [0, 0, 1, 0], [], []>} : vector<64x32xbf16>, vector<128x32xbf16>, vector<64x128xf32> -> vector<64x128xf32>
    %74 = arith.addf %73, %35 : vector<64x128xf32>
    %cst_26 = arith.constant dense<0xFF800000> : vector<64xf32>
    %75 = vector.multi_reduction <maximumf>, %74, %cst_26 [1] : vector<64x128xf32> to vector<64xf32>
    %76 = vector.shape_cast %75 : vector<64xf32> to vector<64x1xf32>
    %77 = vector.broadcast %76 : vector<64x1xf32> to vector<64x128xf32>
    %78 = arith.subf %74, %77 : vector<64x128xf32>
    %79 = math.exp %78 : vector<64x128xf32>
    %cst_27 = arith.constant dense<0.000000e+00> : vector<64xf32>
    %80 = vector.multi_reduction <add>, %79, %cst_27 [1] : vector<64x128xf32> to vector<64xf32>
    %81 = vector.shape_cast %80 : vector<64xf32> to vector<64x1xf32>
    %82 = arith.truncf %79 : vector<64x128xf32> to vector<64x128xbf16>
    %cst_28 = arith.constant dense<0.000000e+00> : vector<64x32xf32>
    %83 = tpu.matmul %82, %72, %cst_28 {dimension_numbers = #tpu.dot_dimension_numbers<[1], [0], [0], [1], [0, 0, 1, 1], [], []>} : vector<64x128xbf16>, vector<128x32xbf16>, vector<64x32xf32> -> vector<64x32xf32>
    %84 = tpu.reciprocal %81 {approx = true} : vector<64x1xf32> -> vector<64x1xf32>
    %85 = vector.broadcast %84 : vector<64x1xf32> to vector<64x32xf32>
    %86 = arith.mulf %83, %85 : vector<64x32xf32>
    %87 = vector.extract_strided_slice %24 {offsets = [0, 96], sizes = [64, 32], strides = [1, 1]} : vector<64x128xbf16> to vector<64x32xbf16>
    %88 = vector.extract_strided_slice %29 {offsets = [0, 96], sizes = [128, 32], strides = [1, 1]} : vector<128x256xbf16> to vector<128x32xbf16>
    %89 = vector.extract_strided_slice %29 {offsets = [0, 224], sizes = [128, 32], strides = [1, 1]} : vector<128x256xbf16> to vector<128x32xbf16>
    %cst_29 = arith.constant dense<0.000000e+00> : vector<64x128xf32>
    %90 = tpu.matmul %87, %88, %cst_29 {dimension_numbers = #tpu.dot_dimension_numbers<[1], [1], [0], [0], [0, 0, 1, 0], [], []>} : vector<64x32xbf16>, vector<128x32xbf16>, vector<64x128xf32> -> vector<64x128xf32>
    %91 = arith.addf %90, %35 : vector<64x128xf32>
    %cst_30 = arith.constant dense<0xFF800000> : vector<64xf32>
    %92 = vector.multi_reduction <maximumf>, %91, %cst_30 [1] : vector<64x128xf32> to vector<64xf32>
    %93 = vector.shape_cast %92 : vector<64xf32> to vector<64x1xf32>
    %94 = vector.broadcast %93 : vector<64x1xf32> to vector<64x128xf32>
    %95 = arith.subf %91, %94 : vector<64x128xf32>
    %96 = math.exp %95 : vector<64x128xf32>
    %cst_31 = arith.constant dense<0.000000e+00> : vector<64xf32>
    %97 = vector.multi_reduction <add>, %96, %cst_31 [1] : vector<64x128xf32> to vector<64xf32>
    %98 = vector.shape_cast %97 : vector<64xf32> to vector<64x1xf32>
    %99 = arith.truncf %96 : vector<64x128xf32> to vector<64x128xbf16>
    %cst_32 = arith.constant dense<0.000000e+00> : vector<64x32xf32>
    %100 = tpu.matmul %99, %89, %cst_32 {dimension_numbers = #tpu.dot_dimension_numbers<[1], [0], [0], [1], [0, 0, 1, 1], [], []>} : vector<64x128xbf16>, vector<128x32xbf16>, vector<64x32xf32> -> vector<64x32xf32>
    %101 = tpu.reciprocal %98 {approx = true} : vector<64x1xf32> -> vector<64x1xf32>
    %102 = vector.broadcast %101 : vector<64x1xf32> to vector<64x32xf32>
    %103 = arith.mulf %100, %102 : vector<64x32xf32>
    %104 = tpu.concatenate %52, %69, %86, %103 in 1 : vector<64x32xf32>, vector<64x32xf32>, vector<64x32xf32>, vector<64x32xf32> -> vector<64x128xf32>
    %105 = arith.truncf %104 : vector<64x128xf32> to vector<64x128xbf16>
    %c0_33 = arith.constant 0 : index
    %c0_34 = arith.constant 0 : index
    %106 = vector.load %arg5[%c0_33, %c0_34] : memref<128x128xbf16, #tpu.memory_space<vmem>>, vector<128x128xbf16>
    %cst_35 = arith.constant dense<0.000000e+00> : vector<64x128xf32>
    %107 = tpu.matmul %105, %106, %cst_35 {dimension_numbers = #tpu.dot_dimension_numbers<[1], [0], [0], [1], [0, 0, 1, 1], [], []>} : vector<64x128xbf16>, vector<128x128xbf16>, vector<64x128xf32> -> vector<64x128xf32>
    %108 = arith.addf %2, %107 : vector<64x128xf32>
    %109 = arith.truncf %108 : vector<64x128xf32> to vector<64x128xbf16>
    %c0_36 = arith.constant 0 : index
    %c0_37 = arith.constant 0 : index
    %c0_38 = arith.constant 0 : index
    %110 = vector.load %arg6[%c0_36, %c0_37, %c0_38] : memref<1x64x128xbf16, #tpu.memory_space<vmem>>, vector<1x64x128xbf16>
    %111 = vector.shape_cast %110 : vector<1x64x128xbf16> to vector<64x128xbf16>
    %112 = vector.shape_cast %109 : vector<64x128xbf16> to vector<1x64x128xbf16>
    tpu.vector_store %arg6[%c0_36, %c0_37, %c0_38], %112 {strides = array<i32>} : memref<1x64x128xbf16, #tpu.memory_space<vmem>>, vector<1x64x128xbf16>,
    return
  }
  func.func @transform_0(%arg0: i32) -> (i32, i32, i32) {
    %c0_i32 = arith.constant 0 : i32
    %c0_i32_0 = arith.constant 0 : i32
    %c0_i32_1 = arith.constant 0 : i32
    return %arg0, %c0_i32, %c0_i32_0 : i32, i32, i32
  }
  func.func @transform_1(%arg0: i32) -> (i32, i32, i32) {
    %c0_i32 = arith.constant 0 : i32
    %c0_i32_0 = arith.constant 0 : i32
    %c0_i32_1 = arith.constant 0 : i32
    return %arg0, %c0_i32, %c0_i32_0 : i32, i32, i32
  }
  func.func @transform_2(%arg0: i32) -> (i32, i32) {
    %c0_i32 = arith.constant 0 : i32
    %c0_i32_0 = arith.constant 0 : i32
    %c0_i32_1 = arith.constant 0 : i32
    return %c0_i32, %c0_i32_0 : i32, i32
  }
  func.func @transform_3(%arg0: i32) -> (i32, i32) {
    %c0_i32 = arith.constant 0 : i32
    %c0_i32_0 = arith.constant 0 : i32
    %c0_i32_1 = arith.constant 0 : i32
    return %c0_i32, %c0_i32_0 : i32, i32
  }
  func.func @transform_4(%arg0: i32) -> (i32, i32) {
    %c0_i32 = arith.constant 0 : i32
    %c0_i32_0 = arith.constant 0 : i32
    %c0_i32_1 = arith.constant 0 : i32
    return %c0_i32, %c0_i32_0 : i32, i32
  }
  func.func @transform_5(%arg0: i32) -> (i32, i32, i32) {
    %c0_i32 = arith.constant 0 : i32
    %c0_i32_0 = arith.constant 0 : i32
    %c0_i32_1 = arith.constant 0 : i32
    return %arg0, %c0_i32, %c0_i32_0 : i32, i32, i32
  }
}

module attributes {stable_mosaic.version = 11 : i64} {
  func.func @_adaln_mlp_res_kernel(%arg0: i32, %arg1: i32, %arg2: memref<1x64x128xbf16, #tpu.memory_space<vmem>>, %arg3: memref<1x1x128xf32, #tpu.memory_space<vmem>>, %arg4: memref<1x1x128xf32, #tpu.memory_space<vmem>>, %arg5: memref<1x1x128xf32, #tpu.memory_space<vmem>>, %arg6: memref<128x512xbf16, #tpu.memory_space<vmem>>, %arg7: memref<512x128xbf16, #tpu.memory_space<vmem>>, %arg8: memref<1x64x128xbf16, #tpu.memory_space<vmem>>) attributes {dimension_semantics = [#tpu.dimension_semantics<parallel>, #tpu.dimension_semantics<parallel>], iteration_bounds = array<i64: 2, 1>, scalar_prefetch = 0 : i64, scratch_operands = 0 : i64, tpu.core_type = #tpu.core_type<tc>, window_params = [{transform_indices = @transform_0, window_bounds = array<i64: 1, 64, 128>}, {transform_indices = @transform_1, window_bounds = array<i64: 1, 1, 128>}, {transform_indices = @transform_2, window_bounds = array<i64: 1, 1, 128>}, {transform_indices = @transform_3, window_bounds = array<i64: 1, 1, 128>}, {pipeline_mode = #tpu.pipeline_mode<synchronous>, transform_indices = @transform_4, window_bounds = array<i64: 128, 512>}, {pipeline_mode = #tpu.pipeline_mode<synchronous>, transform_indices = @transform_5, window_bounds = array<i64: 512, 128>}, {transform_indices = @transform_6, window_bounds = array<i64: 1, 64, 128>}]} {
    %c0 = arith.constant 0 : index
    %c0_0 = arith.constant 0 : index
    %c0_1 = arith.constant 0 : index
    %0 = vector.load %arg2[%c0, %c0_0, %c0_1] : memref<1x64x128xbf16, #tpu.memory_space<vmem>>, vector<1x64x128xbf16>
    %1 = vector.shape_cast %0 : vector<1x64x128xbf16> to vector<64x128xbf16>
    %2 = arith.extf %1 : vector<64x128xbf16> to vector<64x128xf32>
    %cst = arith.constant dense<0.000000e+00> : vector<64xf32>
    %3 = vector.multi_reduction <add>, %2, %cst [1] : vector<64x128xf32> to vector<64xf32>
    %4 = vector.shape_cast %3 : vector<64xf32> to vector<64x1xf32>
    %cst_2 = arith.constant 1.280000e+02 : f32
    %5 = vector.broadcast %cst_2 : f32 to vector<64x1xf32>
    %6 = arith.divf %4, %5 : vector<64x1xf32>
    %7 = vector.broadcast %6 : vector<64x1xf32> to vector<64x128xf32>
    %8 = arith.subf %2, %7 : vector<64x128xf32>
    %9 = arith.mulf %8, %8 : vector<64x128xf32>
    %cst_3 = arith.constant dense<0.000000e+00> : vector<64xf32>
    %10 = vector.multi_reduction <add>, %9, %cst_3 [1] : vector<64x128xf32> to vector<64xf32>
    %11 = vector.shape_cast %10 : vector<64xf32> to vector<64x1xf32>
    %cst_4 = arith.constant 1.280000e+02 : f32
    %12 = vector.broadcast %cst_4 : f32 to vector<64x1xf32>
    %13 = arith.divf %11, %12 : vector<64x1xf32>
    %14 = vector.broadcast %6 : vector<64x1xf32> to vector<64x128xf32>
    %15 = arith.subf %2, %14 : vector<64x128xf32>
    %cst_5 = arith.constant 9.99999997E-7 : f32
    %16 = vector.broadcast %cst_5 : f32 to vector<64x1xf32>
    %17 = arith.addf %13, %16 : vector<64x1xf32>
    %18 = math.rsqrt %17 : vector<64x1xf32>
    %19 = vector.broadcast %18 : vector<64x1xf32> to vector<64x128xf32>
    %20 = arith.mulf %15, %19 : vector<64x128xf32>
    %c0_6 = arith.constant 0 : index
    %c0_7 = arith.constant 0 : index
    %c0_8 = arith.constant 0 : index
    %21 = vector.load %arg4[%c0_6, %c0_7, %c0_8] : memref<1x1x128xf32, #tpu.memory_space<vmem>>, vector<1x1x128xf32>
    %22 = vector.shape_cast %21 : vector<1x1x128xf32> to vector<1x128xf32>
    %cst_9 = arith.constant 1.000000e+00 : f32
    %23 = vector.broadcast %cst_9 : f32 to vector<1x128xf32>
    %24 = arith.addf %23, %22 : vector<1x128xf32>
    %25 = vector.broadcast %24 : vector<1x128xf32> to vector<64x128xf32>
    %26 = arith.mulf %20, %25 : vector<64x128xf32>
    %c0_10 = arith.constant 0 : index
    %c0_11 = arith.constant 0 : index
    %c0_12 = arith.constant 0 : index
    %27 = vector.load %arg3[%c0_10, %c0_11, %c0_12] : memref<1x1x128xf32, #tpu.memory_space<vmem>>, vector<1x1x128xf32>
    %28 = vector.shape_cast %27 : vector<1x1x128xf32> to vector<1x128xf32>
    %29 = vector.broadcast %28 : vector<1x128xf32> to vector<64x128xf32>
    %30 = arith.addf %26, %29 : vector<64x128xf32>
    %31 = arith.truncf %30 : vector<64x128xf32> to vector<64x128xbf16>
    %c0_13 = arith.constant 0 : index
    %c0_14 = arith.constant 0 : index
    %32 = vector.load %arg6[%c0_13, %c0_14] : memref<128x512xbf16, #tpu.memory_space<vmem>>, vector<128x512xbf16>
    %cst_15 = arith.constant dense<0.000000e+00> : vector<64x512xf32>
    %33 = tpu.matmul %31, %32, %cst_15 {dimension_numbers = #tpu.dot_dimension_numbers<[1], [0], [0], [1], [0, 0, 1, 1], [], []>} : vector<64x128xbf16>, vector<128x512xbf16>, vector<64x512xf32> -> vector<64x512xf32>
    %34 = arith.mulf %33, %33 : vector<64x512xf32>
    %35 = arith.mulf %33, %34 : vector<64x512xf32>
    %cst_16 = arith.constant 4.471500e-02 : f32
    %36 = vector.broadcast %cst_16 : f32 to vector<64x512xf32>
    %37 = arith.mulf %36, %35 : vector<64x512xf32>
    %38 = arith.addf %33, %37 : vector<64x512xf32>
    %cst_17 = arith.constant 0.797884583 : f32
    %39 = vector.broadcast %cst_17 : f32 to vector<64x512xf32>
    %40 = arith.mulf %39, %38 : vector<64x512xf32>
    %41 = math.tanh %40 : vector<64x512xf32>
    %cst_18 = arith.constant 1.000000e+00 : f32
    %42 = vector.broadcast %cst_18 : f32 to vector<64x512xf32>
    %43 = arith.addf %42, %41 : vector<64x512xf32>
    %cst_19 = arith.constant 5.000000e-01 : f32
    %44 = vector.broadcast %cst_19 : f32 to vector<64x512xf32>
    %45 = arith.mulf %44, %43 : vector<64x512xf32>
    %46 = arith.mulf %33, %45 : vector<64x512xf32>
    %47 = arith.truncf %46 : vector<64x512xf32> to vector<64x512xbf16>
    %c0_20 = arith.constant 0 : index
    %c0_21 = arith.constant 0 : index
    %48 = vector.load %arg7[%c0_20, %c0_21] : memref<512x128xbf16, #tpu.memory_space<vmem>>, vector<512x128xbf16>
    %cst_22 = arith.constant dense<0.000000e+00> : vector<64x128xf32>
    %49 = tpu.matmul %47, %48, %cst_22 {dimension_numbers = #tpu.dot_dimension_numbers<[1], [0], [0], [1], [0, 0, 1, 1], [], []>} : vector<64x512xbf16>, vector<512x128xbf16>, vector<64x128xf32> -> vector<64x128xf32>
    %c0_23 = arith.constant 0 : index
    %c0_24 = arith.constant 0 : index
    %c0_25 = arith.constant 0 : index
    %50 = vector.load %arg5[%c0_23, %c0_24, %c0_25] : memref<1x1x128xf32, #tpu.memory_space<vmem>>, vector<1x1x128xf32>
    %51 = vector.shape_cast %50 : vector<1x1x128xf32> to vector<1x128xf32>
    %52 = vector.broadcast %51 : vector<1x128xf32> to vector<64x128xf32>
    %53 = arith.mulf %52, %49 : vector<64x128xf32>
    %54 = arith.addf %2, %53 : vector<64x128xf32>
    %55 = arith.truncf %54 : vector<64x128xf32> to vector<64x128xbf16>
    %c0_26 = arith.constant 0 : index
    %c0_27 = arith.constant 0 : index
    %c0_28 = arith.constant 0 : index
    %56 = vector.load %arg8[%c0_26, %c0_27, %c0_28] : memref<1x64x128xbf16, #tpu.memory_space<vmem>>, vector<1x64x128xbf16>
    %57 = vector.shape_cast %56 : vector<1x64x128xbf16> to vector<64x128xbf16>
    %58 = vector.shape_cast %55 : vector<64x128xbf16> to vector<1x64x128xbf16>
    tpu.vector_store %arg8[%c0_26, %c0_27, %c0_28], %58 {strides = array<i32>} : memref<1x64x128xbf16, #tpu.memory_space<vmem>>, vector<1x64x128xbf16>,
    return
  }
  func.func @transform_0(%arg0: i32, %arg1: i32) -> (i32, i32, i32) {
    %c0_i32 = arith.constant 0 : i32
    %c0_i32_0 = arith.constant 0 : i32
    return %arg0, %arg1, %c0_i32 : i32, i32, i32
  }
  func.func @transform_1(%arg0: i32, %arg1: i32) -> (i32, i32, i32) {
    %c0_i32 = arith.constant 0 : i32
    %c0_i32_0 = arith.constant 0 : i32
    %c0_i32_1 = arith.constant 0 : i32
    return %arg0, %c0_i32, %c0_i32_0 : i32, i32, i32
  }
  func.func @transform_2(%arg0: i32, %arg1: i32) -> (i32, i32, i32) {
    %c0_i32 = arith.constant 0 : i32
    %c0_i32_0 = arith.constant 0 : i32
    %c0_i32_1 = arith.constant 0 : i32
    return %arg0, %c0_i32, %c0_i32_0 : i32, i32, i32
  }
  func.func @transform_3(%arg0: i32, %arg1: i32) -> (i32, i32, i32) {
    %c0_i32 = arith.constant 0 : i32
    %c0_i32_0 = arith.constant 0 : i32
    %c0_i32_1 = arith.constant 0 : i32
    return %arg0, %c0_i32, %c0_i32_0 : i32, i32, i32
  }
  func.func @transform_4(%arg0: i32, %arg1: i32) -> (i32, i32) {
    %c0_i32 = arith.constant 0 : i32
    %c0_i32_0 = arith.constant 0 : i32
    %c0_i32_1 = arith.constant 0 : i32
    return %c0_i32, %c0_i32_0 : i32, i32
  }
  func.func @transform_5(%arg0: i32, %arg1: i32) -> (i32, i32) {
    %c0_i32 = arith.constant 0 : i32
    %c0_i32_0 = arith.constant 0 : i32
    %c0_i32_1 = arith.constant 0 : i32
    return %c0_i32, %c0_i32_0 : i32, i32
  }
  func.func @transform_6(%arg0: i32, %arg1: i32) -> (i32, i32, i32) {
    %c0_i32 = arith.constant 0 : i32
    %c0_i32_0 = arith.constant 0 : i32
    return %arg0, %arg1, %c0_i32 : i32, i32, i32
  }
}

module attributes {stable_mosaic.version = 11 : i64} {
  func.func @_silu_matmul_kernel(%arg0: i32, %arg1: memref<2x128xf32, #tpu.memory_space<vmem>>, %arg2: memref<128x256xbf16, #tpu.memory_space<vmem>>, %arg3: memref<2x256xf32, #tpu.memory_space<vmem>>) attributes {dimension_semantics = [#tpu.dimension_semantics<parallel>], iteration_bounds = array<i64: 1>, scalar_prefetch = 0 : i64, scratch_operands = 0 : i64, tpu.core_type = #tpu.core_type<tc>, window_params = [{transform_indices = @transform_0, window_bounds = array<i64: 2, 128>}, {pipeline_mode = #tpu.pipeline_mode<synchronous>, transform_indices = @transform_1, window_bounds = array<i64: 128, 256>}, {transform_indices = @transform_2, window_bounds = array<i64: 2, 256>}]} {
    %c0 = arith.constant 0 : index
    %c0_0 = arith.constant 0 : index
    %0 = vector.load %arg1[%c0, %c0_0] : memref<2x128xf32, #tpu.memory_space<vmem>>, vector<2x128xf32>
    %1 = arith.negf %0 : vector<2x128xf32>
    %2 = math.exp %1 : vector<2x128xf32>
    %cst = arith.constant 1.000000e+00 : f32
    %3 = vector.broadcast %cst : f32 to vector<2x128xf32>
    %4 = arith.addf %3, %2 : vector<2x128xf32>
    %5 = arith.divf %3, %4 : vector<2x128xf32>
    %6 = arith.mulf %0, %5 : vector<2x128xf32>
    %7 = arith.truncf %6 : vector<2x128xf32> to vector<2x128xbf16>
    %c0_1 = arith.constant 0 : index
    %c0_2 = arith.constant 0 : index
    %8 = vector.load %arg2[%c0_1, %c0_2] : memref<128x256xbf16, #tpu.memory_space<vmem>>, vector<128x256xbf16>
    %cst_3 = arith.constant dense<0.000000e+00> : vector<2x256xf32>
    %9 = tpu.matmul %7, %8, %cst_3 {dimension_numbers = #tpu.dot_dimension_numbers<[1], [0], [0], [1], [0, 0, 1, 1], [], []>} : vector<2x128xbf16>, vector<128x256xbf16>, vector<2x256xf32> -> vector<2x256xf32>
    %c0_4 = arith.constant 0 : index
    %c0_5 = arith.constant 0 : index
    %10 = vector.load %arg3[%c0_4, %c0_5] : memref<2x256xf32, #tpu.memory_space<vmem>>, vector<2x256xf32>
    tpu.vector_store %arg3[%c0_4, %c0_5], %9 {strides = array<i32>} : memref<2x256xf32, #tpu.memory_space<vmem>>, vector<2x256xf32>,
    return
  }
  func.func @transform_0(%arg0: i32) -> (i32, i32) {
    %c0_i32 = arith.constant 0 : i32
    %c0_i32_0 = arith.constant 0 : i32
    return %arg0, %c0_i32 : i32, i32
  }
  func.func @transform_1(%arg0: i32) -> (i32, i32) {
    %c0_i32 = arith.constant 0 : i32
    %c0_i32_0 = arith.constant 0 : i32
    %c0_i32_1 = arith.constant 0 : i32
    return %c0_i32, %c0_i32_0 : i32, i32
  }
  func.func @transform_2(%arg0: i32) -> (i32, i32) {
    %c0_i32 = arith.constant 0 : i32
    %c0_i32_0 = arith.constant 0 : i32
    return %arg0, %c0_i32 : i32, i32
  }
}

module attributes {stable_mosaic.version = 11 : i64} {
  func.func @_adaln_matmul_kernel(%arg0: i32, %arg1: i32, %arg2: memref<1x64x128xbf16, #tpu.memory_space<vmem>>, %arg3: memref<1x1x128xf32, #tpu.memory_space<vmem>>, %arg4: memref<1x1x128xf32, #tpu.memory_space<vmem>>, %arg5: memref<128x4xbf16, #tpu.memory_space<vmem>>, %arg6: memref<1x64x4xf32, #tpu.memory_space<vmem>>) attributes {dimension_semantics = [#tpu.dimension_semantics<parallel>, #tpu.dimension_semantics<parallel>], iteration_bounds = array<i64: 2, 1>, scalar_prefetch = 0 : i64, scratch_operands = 0 : i64, tpu.core_type = #tpu.core_type<tc>, window_params = [{transform_indices = @transform_0, window_bounds = array<i64: 1, 64, 128>}, {transform_indices = @transform_1, window_bounds = array<i64: 1, 1, 128>}, {transform_indices = @transform_2, window_bounds = array<i64: 1, 1, 128>}, {pipeline_mode = #tpu.pipeline_mode<synchronous>, transform_indices = @transform_3, window_bounds = array<i64: 128, 4>}, {transform_indices = @transform_4, window_bounds = array<i64: 1, 64, 4>}]} {
    %c0 = arith.constant 0 : index
    %c0_0 = arith.constant 0 : index
    %c0_1 = arith.constant 0 : index
    %0 = vector.load %arg2[%c0, %c0_0, %c0_1] : memref<1x64x128xbf16, #tpu.memory_space<vmem>>, vector<1x64x128xbf16>
    %1 = vector.shape_cast %0 : vector<1x64x128xbf16> to vector<64x128xbf16>
    %2 = arith.extf %1 : vector<64x128xbf16> to vector<64x128xf32>
    %cst = arith.constant dense<0.000000e+00> : vector<64xf32>
    %3 = vector.multi_reduction <add>, %2, %cst [1] : vector<64x128xf32> to vector<64xf32>
    %4 = vector.shape_cast %3 : vector<64xf32> to vector<64x1xf32>
    %cst_2 = arith.constant 1.280000e+02 : f32
    %5 = vector.broadcast %cst_2 : f32 to vector<64x1xf32>
    %6 = arith.divf %4, %5 : vector<64x1xf32>
    %7 = vector.broadcast %6 : vector<64x1xf32> to vector<64x128xf32>
    %8 = arith.subf %2, %7 : vector<64x128xf32>
    %9 = arith.mulf %8, %8 : vector<64x128xf32>
    %cst_3 = arith.constant dense<0.000000e+00> : vector<64xf32>
    %10 = vector.multi_reduction <add>, %9, %cst_3 [1] : vector<64x128xf32> to vector<64xf32>
    %11 = vector.shape_cast %10 : vector<64xf32> to vector<64x1xf32>
    %cst_4 = arith.constant 1.280000e+02 : f32
    %12 = vector.broadcast %cst_4 : f32 to vector<64x1xf32>
    %13 = arith.divf %11, %12 : vector<64x1xf32>
    %14 = vector.broadcast %6 : vector<64x1xf32> to vector<64x128xf32>
    %15 = arith.subf %2, %14 : vector<64x128xf32>
    %cst_5 = arith.constant 9.99999997E-7 : f32
    %16 = vector.broadcast %cst_5 : f32 to vector<64x1xf32>
    %17 = arith.addf %13, %16 : vector<64x1xf32>
    %18 = math.rsqrt %17 : vector<64x1xf32>
    %19 = vector.broadcast %18 : vector<64x1xf32> to vector<64x128xf32>
    %20 = arith.mulf %15, %19 : vector<64x128xf32>
    %c0_6 = arith.constant 0 : index
    %c0_7 = arith.constant 0 : index
    %c0_8 = arith.constant 0 : index
    %21 = vector.load %arg4[%c0_6, %c0_7, %c0_8] : memref<1x1x128xf32, #tpu.memory_space<vmem>>, vector<1x1x128xf32>
    %22 = vector.shape_cast %21 : vector<1x1x128xf32> to vector<1x128xf32>
    %cst_9 = arith.constant 1.000000e+00 : f32
    %23 = vector.broadcast %cst_9 : f32 to vector<1x128xf32>
    %24 = arith.addf %23, %22 : vector<1x128xf32>
    %25 = vector.broadcast %24 : vector<1x128xf32> to vector<64x128xf32>
    %26 = arith.mulf %20, %25 : vector<64x128xf32>
    %c0_10 = arith.constant 0 : index
    %c0_11 = arith.constant 0 : index
    %c0_12 = arith.constant 0 : index
    %27 = vector.load %arg3[%c0_10, %c0_11, %c0_12] : memref<1x1x128xf32, #tpu.memory_space<vmem>>, vector<1x1x128xf32>
    %28 = vector.shape_cast %27 : vector<1x1x128xf32> to vector<1x128xf32>
    %29 = vector.broadcast %28 : vector<1x128xf32> to vector<64x128xf32>
    %30 = arith.addf %26, %29 : vector<64x128xf32>
    %31 = arith.truncf %30 : vector<64x128xf32> to vector<64x128xbf16>
    %c0_13 = arith.constant 0 : index
    %c0_14 = arith.constant 0 : index
    %32 = vector.load %arg5[%c0_13, %c0_14] : memref<128x4xbf16, #tpu.memory_space<vmem>>, vector<128x4xbf16>
    %cst_15 = arith.constant dense<0.000000e+00> : vector<64x4xf32>
    %33 = tpu.matmul %31, %32, %cst_15 {dimension_numbers = #tpu.dot_dimension_numbers<[1], [0], [0], [1], [0, 0, 1, 1], [], []>} : vector<64x128xbf16>, vector<128x4xbf16>, vector<64x4xf32> -> vector<64x4xf32>
    %c0_16 = arith.constant 0 : index
    %c0_17 = arith.constant 0 : index
    %c0_18 = arith.constant 0 : index
    %34 = vector.load %arg6[%c0_16, %c0_17, %c0_18] : memref<1x64x4xf32, #tpu.memory_space<vmem>>, vector<1x64x4xf32>
    %35 = vector.shape_cast %34 : vector<1x64x4xf32> to vector<64x4xf32>
    %36 = vector.shape_cast %33 : vector<64x4xf32> to vector<1x64x4xf32>
    tpu.vector_store %arg6[%c0_16, %c0_17, %c0_18], %36 {strides = array<i32>} : memref<1x64x4xf32, #tpu.memory_space<vmem>>, vector<1x64x4xf32>,
    return
  }
  func.func @transform_0(%arg0: i32, %arg1: i32) -> (i32, i32, i32) {
    %c0_i32 = arith.constant 0 : i32
    %c0_i32_0 = arith.constant 0 : i32
    return %arg0, %arg1, %c0_i32 : i32, i32, i32
  }
  func.func @transform_1(%arg0: i32, %arg1: i32) -> (i32, i32, i32) {
    %c0_i32 = arith.constant 0 : i32
    %c0_i32_0 = arith.constant 0 : i32
    %c0_i32_1 = arith.constant 0 : i32
    return %arg0, %c0_i32, %c0_i32_0 : i32, i32, i32
  }
  func.func @transform_2(%arg0: i32, %arg1: i32) -> (i32, i32, i32) {
    %c0_i32 = arith.constant 0 : i32
    %c0_i32_0 = arith.constant 0 : i32
    %c0_i32_1 = arith.constant 0 : i32
    return %arg0, %c0_i32, %c0_i32_0 : i32, i32, i32
  }
  func.func @transform_3(%arg0: i32, %arg1: i32) -> (i32, i32) {
    %c0_i32 = arith.constant 0 : i32
    %c0_i32_0 = arith.constant 0 : i32
    %c0_i32_1 = arith.constant 0 : i32
    return %c0_i32, %c0_i32_0 : i32, i32
  }
  func.func @transform_4(%arg0: i32, %arg1: i32) -> (i32, i32, i32) {
    %c0_i32 = arith.constant 0 : i32
    %c0_i32_0 = arith.constant 0 : i32
    return %arg0, %arg1, %c0_i32 : i32, i32, i32
  }
}

module attributes {stable_mosaic.version = 11 : i64} {
  func.func @_mse_kernel(%arg0: i32, %arg1: memref<2x256xf32, #tpu.memory_space<vmem>>, %arg2: memref<2x256xf32, #tpu.memory_space<vmem>>, %arg3: memref<1x1xf32, #tpu.memory_space<vmem>>, %arg4: memref<1x256xf32, #tpu.memory_space<vmem>>) attributes {dimension_semantics = [#tpu.dimension_semantics<arbitrary>], iteration_bounds = array<i64: 1>, scalar_prefetch = 0 : i64, scratch_operands = 1 : i64, tpu.core_type = #tpu.core_type<tc>, window_params = [{transform_indices = @transform_0, window_bounds = array<i64: 2, 256>}, {transform_indices = @transform_1, window_bounds = array<i64: 2, 256>}, {pipeline_mode = #tpu.pipeline_mode<synchronous>, transform_indices = @transform_2, window_bounds = array<i64: 1, 1>}]} {
    %c0_i32 = arith.constant 0 : i32
    %0 = arith.cmpi eq, %arg0, %c0_i32 : i32
    %1 = arith.extui %0 : i1 to i32
    %c0_i32_0 = arith.constant 0 : i32
    %2 = arith.cmpi ne, %1, %c0_i32_0 : i32
    scf.if %2 {
      %cst_10 = arith.constant 0.000000e+00 : f32
      %15 = vector.broadcast %cst_10 : f32 to vector<1x256xf32>
      %c0_11 = arith.constant 0 : index
      %c0_12 = arith.constant 0 : index
      %16 = vector.load %arg4[%c0_11, %c0_12] : memref<1x256xf32, #tpu.memory_space<vmem>>, vector<1x256xf32>
      tpu.vector_store %arg4[%c0_11, %c0_12], %15 {strides = array<i32>} : memref<1x256xf32, #tpu.memory_space<vmem>>, vector<1x256xf32>,
    } else {
    }
    %c0 = arith.constant 0 : index
    %c0_1 = arith.constant 0 : index
    %3 = vector.load %arg1[%c0, %c0_1] : memref<2x256xf32, #tpu.memory_space<vmem>>, vector<2x256xf32>
    %c0_2 = arith.constant 0 : index
    %c0_3 = arith.constant 0 : index
    %4 = vector.load %arg2[%c0_2, %c0_3] : memref<2x256xf32, #tpu.memory_space<vmem>>, vector<2x256xf32>
    %5 = arith.subf %3, %4 : vector<2x256xf32>
    %c0_4 = arith.constant 0 : index
    %c0_5 = arith.constant 0 : index
    %6 = vector.load %arg4[%c0_4, %c0_5] : memref<1x256xf32, #tpu.memory_space<vmem>>, vector<1x256xf32>
    %7 = arith.mulf %5, %5 : vector<2x256xf32>
    %cst = arith.constant dense<0.000000e+00> : vector<256xf32>
    %8 = vector.multi_reduction <add>, %7, %cst [0] : vector<2x256xf32> to vector<256xf32>
    %9 = vector.shape_cast %8 : vector<256xf32> to vector<1x256xf32>
    %10 = arith.addf %6, %9 : vector<1x256xf32>
    %c0_6 = arith.constant 0 : index
    %c0_7 = arith.constant 0 : index
    %11 = vector.load %arg4[%c0_6, %c0_7] : memref<1x256xf32, #tpu.memory_space<vmem>>, vector<1x256xf32>
    tpu.vector_store %arg4[%c0_6, %c0_7], %10 {strides = array<i32>} : memref<1x256xf32, #tpu.memory_space<vmem>>, vector<1x256xf32>,
    %c0_i32_8 = arith.constant 0 : i32
    %12 = arith.cmpi eq, %arg0, %c0_i32_8 : i32
    %13 = arith.extui %12 : i1 to i32
    %c0_i32_9 = arith.constant 0 : i32
    %14 = arith.cmpi ne, %13, %c0_i32_9 : i32
    scf.if %14 {
      %c0_10 = arith.constant 0 : index
      %c0_11 = arith.constant 0 : index
      %15 = vector.load %arg4[%c0_10, %c0_11] : memref<1x256xf32, #tpu.memory_space<vmem>>, vector<1x256xf32>
      %cst_12 = arith.constant dense<0.000000e+00> : vector<1xf32>
      %16 = vector.multi_reduction <add>, %15, %cst_12 [1] : vector<1x256xf32> to vector<1xf32>
      %17 = vector.shape_cast %16 : vector<1xf32> to vector<1x1xf32>
      %cst_13 = arith.constant 0.001953125 : f32
      %18 = vector.broadcast %cst_13 : f32 to vector<1x1xf32>
      %19 = arith.mulf %17, %18 : vector<1x1xf32>
      %c0_14 = arith.constant 0 : index
      %c0_15 = arith.constant 0 : index
      %20 = vector.load %arg3[%c0_14, %c0_15] : memref<1x1xf32, #tpu.memory_space<vmem>>, vector<1x1xf32>
      tpu.vector_store %arg3[%c0_14, %c0_15], %19 {strides = array<i32>} : memref<1x1xf32, #tpu.memory_space<vmem>>, vector<1x1xf32>,
    } else {
    }
    return
  }
  func.func @transform_0(%arg0: i32) -> (i32, i32) {
    %c0_i32 = arith.constant 0 : i32
    %c0_i32_0 = arith.constant 0 : i32
    return %arg0, %c0_i32 : i32, i32
  }
  func.func @transform_1(%arg0: i32) -> (i32, i32) {
    %c0_i32 = arith.constant 0 : i32
    %c0_i32_0 = arith.constant 0 : i32
    return %arg0, %c0_i32 : i32, i32
  }
  func.func @transform_2(%arg0: i32) -> (i32, i32) {
    %c0_i32 = arith.constant 0 : i32
    %c0_i32_0 = arith.constant 0 : i32
    %c0_i32_1 = arith.constant 0 : i32
    return %c0_i32, %c0_i32_0 : i32, i32
  }
}

</mosaic_0001>

<bundles_post_ra>
// kernel: _lambda_.18
= control target key start
LH: loop header
LB: loop body
LE: loop exit
PB: predicated region body
PF: predicated region fallthrough
CT: control target
= control target key end

     0   :  { %v287_v0 = vmov 0.0   ;;  %vm288_vm0 = vmmov 0   ;;  %vm48_vm1 = vcmask 523264   ;;  %s351_s1 = inlined_call_operand.vmem [shape: bf16[64,128], index: 1, kind: input, shape index: {}]   ;;  %s352_s0 = inlined_call_operand.vmem [shape: bf16[2,64], index: 0, kind: input, shape index: {}]   ;;  %s353_s2 = inlined_call_operand.vmem [shape: bf16[128,128], index: 2, kind: input, shape index: {}]   ;;  %s354_s3 = inlined_call_operand.vmem [shape: f32[2,128], index: 3, kind: output, shape index: {}]  }
   0x1   :  { %237 = vmatprep.subr.bf16.mxu0 %v287_v0  ;;  %v271_v1 = vld [vmem:[%s351_s1 + $0x18] sm:$0xff]   ;;  %245 = vmatprep.mubr.msk.bf16.mxu0 %vm288_vm0, %v287_v0  ;;  %v272_v2 = vld [vmem:[%s351_s1 + $0x10] sm:$0xff]   ;;  %v273_v3 = vld [vmem:[%s351_s1 + $0x8] sm:$0xff]  }
   0x2   :  { %249 = vmatprep.subr.bf16.mxu1 %v287_v0  ;;  %265 = vmatprep.mubr.msk.bf16.mxu1 %vm288_vm0, %v287_v0  ;;  %v274_v4 = vld [vmem:[%s351_s1] sm:$0xff]   ;;  %v275_v6 = vld [vmem:[%s353_s2 + $0x38] sm:$0xff]   ;;  %v276_v7 = vld [vmem:[%s353_s2 + $0x30] sm:$0xff]  }
   0x3   :  { %238 = vmatpush3.bf16.msra.mxu0 %v271_v1  ;;  %v15_v5 = vld [vmem:[%s352_s0] sm:$0x1]  ;;  %250 = vmatpush3.bf16.msra.mxu1 %v275_v6  ;;  %v277_v8 = vld [vmem:[%s353_s2 + $0x28] sm:$0xff]   ;;  %v279_v10 = vld [vmem:[%s353_s2 + $0x18] sm:$0xff]  }
   0x4   :  { %239 = vmatprep.subr.bf16.mxu0 %v287_v0  ;;  %251 = vmatprep.subr.bf16.mxu1 %v287_v0  ;;  %v278_v9 = vld [vmem:[%s353_s2 + $0x20] sm:$0xff]   ;;  %v280_v11 = vld [vmem:[%s353_s2 + $0x10] sm:$0xff]   ;;  %v281_v12 = vld [vmem:[%s353_s2 + $0x8] sm:$0xff]  }
   0x5   :  { %v282_v13 = vld [vmem:[%s353_s2] sm:$0xff]  }
   0x7   :  { %240 = vmatpush3.bf16.msra.mxu0 %v272_v2  ;;  %252 = vmatpush3.bf16.msra.mxu1 %v276_v7 }
   0x8   :  { %241 = vmatprep.subr.bf16.mxu0 %v287_v0  ;;  %253 = vmatprep.subr.bf16.mxu1 %v287_v0 }
   0xb   :  { %242 = vmatpush3.bf16.msra.mxu0 %v273_v3  ;;  %254 = vmatpush3.bf16.msra.mxu1 %v277_v8 }
   0xc   :  { %243 = vmatprep.subr.bf16.mxu0 %v287_v0  ;;  %255 = vmatprep.subr.bf16.mxu1 %v287_v0 }
   0xf   :  { %244 = vmatpush3.bf16.msra.mxu0 %v274_v4  ;;  %256 = vmatpush3.bf16.msra.mxu1 %v278_v9 }
  0x10   :  { %257 = vmatprep.subr.bf16.mxu1 %v287_v0 }
  0x12   :  { %246 = vmatmul.mubr.msk.bf16.vlgmr.msra.gmra.mxu0 %vm48_vm1, %v15_v5 }
  0x13   :  { %258 = vmatpush3.bf16.msra.mxu1 %v279_v10 }
  0x14   :  { %259 = vmatprep.subr.bf16.mxu1 %v287_v0 }
  0x17   :  { %260 = vmatpush3.bf16.msra.mxu1 %v280_v11 }
  0x18   :  { %261 = vmatprep.subr.bf16.mxu1 %v287_v0 }
  0x1b   :  { %262 = vmatpush3.bf16.msra.mxu1 %v281_v12 }
  0x1c   :  { %263 = vmatprep.subr.bf16.mxu1 %v287_v0 }
  0x1f   :  { %264 = vmatpush3.bf16.msra.mxu1 %v282_v13 }
  0xd2   :  { %v86_v14 = vpop.f32.mrf.mxu0 }
  0xd3   :  { %v214_v15 = vmul.f32 -1.442695, %v86_v14 }
  0xd4   :  { %v247_v16 = vpop.f32.mrf.mxu0 }
  0xd5   :  { %283 = vpow2.f32 %v214_v15 }
  0xd6   :  { %v89_v17 = vpop.f32.mrf.mxu0 }
  0xd8   :  { %v248_v18 = vpop.f32.mrf.mxu0 }
  0xe2   :  { %v284_v19 = vpop.eup %283 }
  0xe3   :  { %v95_v20 = vadd.f32 1.0, %v284_v19 }
  0xe5   :  { %285 = vrcp.f32 %v95_v20 }
  0xf2   :  { %v286_v21 = vpop.eup %285 }
  0xf3   :  { %v98_v22 = vmul.f32 %v286_v21, %v86_v14 }
  0xf5   :  { %v99_v23 = vpack.c.bf16 %v98_v22, %v98_v22 }
  0xf7   :  { %266 = vmatmul.mubr.bf16.vlgmr.msra.gmra.mxu1 %v99_v23 }
 0x1b7   :  { %v198_v24 = vpop.f32.mrf.mxu1 }
 0x1b8   :  { %204 = vst [vmem:[%s354_s3] sm:$0x3] %v198_v24 }
 0x1b9   :  { %v267_v25 = vpop.f32.mrf.mxu1 }
 0x1bb   :  { %v201_v26 = vpop.f32.mrf.mxu1 }
 0x1bd   :  { %v268_v27 = vpop.f32.mrf.mxu1 }

// kernel: _lambda_.19
= control target key start
LH: loop header
LB: loop body
LE: loop exit
PB: predicated region body
PF: predicated region fallthrough
CT: control target
= control target key end

     0   :  { %v334_v0 = vmov 0.0   ;;  %vm335_vm0 = vmmov 0   ;;  %s410_s1 = inlined_call_operand.vmem [shape: bf16[128,128], index: 1, kind: input, shape index: {}]   ;;  %s411_s0 = inlined_call_operand.vmem [shape: bf16[2,128], index: 0, kind: input, shape index: {}]   ;;  %s412_s2 = inlined_call_operand.vmem [shape: bf16[128,128], index: 2, kind: input, shape index: {}]   ;;  %s413_s3 = inlined_call_operand.vmem [shape: f32[2,128], index: 3, kind: output, shape index: {}]  }
   0x1   :  { %272 = vmatprep.subr.bf16.mxu0 %v334_v0  ;;  %v314_v1 = vld [vmem:[%s410_s1 + $0x38] sm:$0xff]   ;;  %288 = vmatprep.mubr.msk.bf16.mxu0 %vm335_vm0, %v334_v0  ;;  %v315_v2 = vld [vmem:[%s410_s1 + $0x30] sm:$0xff]   ;;  %v316_v3 = vld [vmem:[%s410_s1 + $0x28] sm:$0xff]  }
   0x2   :  { %292 = vmatprep.subr.bf16.mxu1 %v334_v0  ;;  %308 = vmatprep.mubr.msk.bf16.mxu1 %vm335_vm0, %v334_v0  ;;  %v317_v4 = vld [vmem:[%s410_s1 + $0x20] sm:$0xff]   ;;  %v318_v5 = vld [vmem:[%s410_s1 + $0x18] sm:$0xff]   ;;  %v319_v6 = vld [vmem:[%s410_s1 + $0x10] sm:$0xff]  }
   0x3   :  { %273 = vmatpush3.bf16.msra.mxu0 %v314_v1  ;;  %v320_v7 = vld [vmem:[%s410_s1 + $0x8] sm:$0xff]   ;;  %v321_v8 = vld [vmem:[%s410_s1] sm:$0xff]   ;;  %v322_v10 = vld [vmem:[%s412_s2 + $0x38] sm:$0xff]  }
   0x4   :  { %274 = vmatprep.subr.bf16.mxu0 %v334_v0  ;;  %v15_v9 = vld [vmem:[%s411_s0] sm:$0x1]  ;;  %293 = vmatpush3.bf16.msra.mxu1 %v322_v10  ;;  %v323_v11 = vld [vmem:[%s412_s2 + $0x30] sm:$0xff]   ;;  %v324_v12 = vld [vmem:[%s412_s2 + $0x28] sm:$0xff]  }
   0x5   :  { %294 = vmatprep.subr.bf16.mxu1 %v334_v0  ;;  %v325_v13 = vld [vmem:[%s412_s2 + $0x20] sm:$0xff]   ;;  %v326_v14 = vld [vmem:[%s412_s2 + $0x18] sm:$0xff]   ;;  %v327_v15 = vld [vmem:[%s412_s2 + $0x10] sm:$0xff]  }
   0x6   :  { %v328_v16 = vld [vmem:[%s412_s2 + $0x8] sm:$0xff]   ;;  %v329_v17 = vld [vmem:[%s412_s2] sm:$0xff]  }
   0x7   :  { %275 = vmatpush3.bf16.msra.mxu0 %v315_v2 }
   0x8   :  { %276 = vmatprep.subr.bf16.mxu0 %v334_v0  ;;  %295 = vmatpush3.bf16.msra.mxu1 %v323_v11 }
   0x9   :  { %296 = vmatprep.subr.bf16.mxu1 %v334_v0 }
   0xb   :  { %277 = vmatpush3.bf16.msra.mxu0 %v316_v3 }
   0xc   :  { %278 = vmatprep.subr.bf16.mxu0 %v334_v0  ;;  %297 = vmatpush3.bf16.msra.mxu1 %v324_v12 }
   0xd   :  { %298 = vmatprep.subr.bf16.mxu1 %v334_v0 }
   0xf   :  { %279 = vmatpush3.bf16.msra.mxu0 %v317_v4 }
  0x10   :  { %280 = vmatprep.subr.bf16.mxu0 %v334_v0  ;;  %299 = vmatpush3.bf16.msra.mxu1 %v325_v13 }
  0x11   :  { %300 = vmatprep.subr.bf16.mxu1 %v334_v0 }
  0x13   :  { %281 = vmatpush3.bf16.msra.mxu0 %v318_v5 }
  0x14   :  { %282 = vmatprep.subr.bf16.mxu0 %v334_v0  ;;  %301 = vmatpush3.bf16.msra.mxu1 %v326_v14 }
  0x15   :  { %302 = vmatprep.subr.bf16.mxu1 %v334_v0 }
  0x17   :  { %283 = vmatpush3.bf16.msra.mxu0 %v319_v6 }
  0x18   :  { %284 = vmatprep.subr.bf16.mxu0 %v334_v0  ;;  %303 = vmatpush3.bf16.msra.mxu1 %v327_v15 }
  0x19   :  { %304 = vmatprep.subr.bf16.mxu1 %v334_v0 }
  0x1b   :  { %285 = vmatpush3.bf16.msra.mxu0 %v320_v7 }
  0x1c   :  { %286 = vmatprep.subr.bf16.mxu0 %v334_v0  ;;  %305 = vmatpush3.bf16.msra.mxu1 %v328_v16 }
  0x1d   :  { %306 = vmatprep.subr.bf16.mxu1 %v334_v0 }
  0x1f   :  { %287 = vmatpush3.bf16.msra.mxu0 %v321_v8 }
  0x20   :  { %307 = vmatpush3.bf16.msra.mxu1 %v329_v17 }
  0x22   :  { %289 = vmatmul.mubr.bf16.vlgmr.msra.gmra.mxu0 %v15_v9 }
  0xe2   :  { %v114_v18 = vpop.f32.mrf.mxu0 }
  0xe3   :  { %v245_v19 = vmul.f32 -1.442695, %v114_v18 }
  0xe4   :  { %v290_v20 = vpop.f32.mrf.mxu0 }
  0xe5   :  { %330 = vpow2.f32 %v245_v19 }
  0xe6   :  { %v117_v21 = vpop.f32.mrf.mxu0 }
  0xe8   :  { %v291_v22 = vpop.f32.mrf.mxu0 }
  0xf2   :  { %v331_v23 = vpop.eup %330 }
  0xf3   :  { %v123_v24 = vadd.f32 1.0, %v331_v23 }
  0xf5   :  { %332 = vrcp.f32 %v123_v24 }
 0x102   :  { %v333_v25 = vpop.eup %332 }
 0x103   :  { %v126_v26 = vmul.f32 %v333_v25, %v114_v18 }
 0x105   :  { %v127_v27 = vpack.c.bf16 %v126_v26, %v126_v26 }
 0x107   :  { %309 = vmatmul.mubr.bf16.vlgmr.msra.gmra.mxu1 %v127_v27 }
 0x1c7   :  { %v226_v28 = vpop.f32.mrf.mxu1 }
 0x1c8   :  { %232 = vst [vmem:[%s413_s3] sm:$0x3] %v226_v28 }
 0x1c9   :  { %v310_v29 = vpop.f32.mrf.mxu1 }
 0x1cb   :  { %v229_v30 = vpop.f32.mrf.mxu1 }
 0x1cd   :  { %v311_v31 = vpop.f32.mrf.mxu1 }

// kernel: _lambda_.16
= control target key start
LH: loop header
LB: loop body
LE: loop exit
PB: predicated region body
PF: predicated region fallthrough
CT: control target
= control target key end

     0   :  { %vm130_vm0 = vcmask 1041408   ;;  %vm105_vm1 = vcmask 31744   ;;  %s574_s1 = inlined_call_operand.vmem [shape: bf16[4,128], index: 1, kind: input, shape index: {}]   ;;  %s575_s0 = inlined_call_operand.vmem [shape: bf16[128,4], index: 0, kind: input, shape index: {}]   ;;  %s576_s2 = inlined_call_operand.vmem [shape: bf16[128,128], index: 2, kind: output, shape index: {}]  }
   0x1   :  { %v64_v0 = vld [vmem:[%s574_s1] sm:$0x3]  ;;  %v494_v4 = vld [vmem:[%s575_s0 + $0x8] sm:$0xff]   ;;  %v496_v6 = vld [vmem:[%s575_s0 + $0x10] sm:$0xff]  }
   0x2   :  { %490 = vmatprep.subr.msk.bf16.mxu0 %vm130_vm0, %v64_v0  ;;  %491 = vmatprep.subr.msk.bf16.mxu1 %vm130_vm0, %v64_v0  ;;  %v132_v1 = vsel %vm130_vm0, %v64_v0, 0  ;;  %v492_v2 = vld [vmem:[%s575_s0] sm:$0xff]   ;;  %v495_v5 = vld [vmem:[%s575_s0 + $0x28] sm:$0xff]   ;;  %v497_v7 = vld [vmem:[%s575_s0 + $0x30] sm:$0xff]  }
   0x3   :  { %471 = vmatpush3.bf16.msra.mxu0 %v132_v1  ;;  %489 = vmatpush3.bf16.msra.mxu1 %v132_v1  ;;  %v493_v3 = vld [vmem:[%s575_s0 + $0x20] sm:$0xff]   ;;  %v498_v8 = vld [vmem:[%s575_s0 + $0x18] sm:$0xff]  }
   0x4   :  { %472 = vmatprep.mubr.msk.bf16.mxu0 %vm105_vm1, %v492_v2  ;;  %480 = vmatprep.mubr.msk.bf16.mxu1 %vm105_vm1, %v493_v3  ;;  %v499_v9 = vld [vmem:[%s575_s0 + $0x38] sm:$0xff]  }
   0x6   :  { %473 = vmatmul.mubr.msk.bf16.vlgmr.msra.gmra.mxu0 %vm105_vm1, %v494_v4  ;;  %481 = vmatmul.mubr.msk.bf16.vlgmr.msra.gmra.mxu1 %vm105_vm1, %v495_v5 }
   0x7   :  { %476 = vmatprep.mubr.msk.bf16.mxu0 %vm105_vm1, %v496_v6  ;;  %484 = vmatprep.mubr.msk.bf16.mxu1 %vm105_vm1, %v497_v7 }
   0xe   :  { %477 = vmatmul.mubr.msk.bf16.gmra.mxu0 %vm105_vm1, %v498_v8  ;;  %485 = vmatmul.mubr.msk.bf16.gmra.mxu1 %vm105_vm1, %v499_v9 }
  0xc6   :  { %v474_v10 = vpop.f32.mrf.mxu0  ;;  %v482_v11 = vpop.f32.mrf.mxu1 }
  0xc8   :  { %v168_v12 = vpop.f32.mrf.mxu0  ;;  %v200_v13 = vpop.f32.mrf.mxu1 }
  0xca   :  { %v475_v14 = vpop.f32.mrf.mxu0  ;;  %v483_v16 = vpop.f32.mrf.mxu1 }
  0xcb   :  { %v422_v15 = vpack.c.bf16 %v475_v14, %v474_v10  ;;  %v442_v17 = vpack.c.bf16 %v483_v16, %v482_v11 }
  0xcc   :  { %v171_v18 = vpop.f32.mrf.mxu0  ;;  %v203_v20 = vpop.f32.mrf.mxu1 }
  0xcd   :  { %454 = vst [vmem:[%s576_s2 + $0x8] sm:$0xff] %v422_v15   ;;  %v417_v19 = vpack.c.bf16 %v171_v18, %v168_v12  ;;  %458 = vst [vmem:[%s576_s2 + $0x28] sm:$0xff] %v442_v17   ;;  %v437_v21 = vpack.c.bf16 %v203_v20, %v200_v13 }
  0xce   :  { %v478_v22 = vpop.f32.mrf.mxu0  ;;  %v486_v23 = vpop.f32.mrf.mxu1 }
  0xcf   :  { %418 = vst [vmem:[%s576_s2] sm:$0xff] %v417_v19   ;;  %457 = vst [vmem:[%s576_s2 + $0x20] sm:$0xff] %v437_v21  }
  0xd0   :  { %v184_v24 = vpop.f32.mrf.mxu0  ;;  %v216_v25 = vpop.f32.mrf.mxu1 }
  0xd2   :  { %v479_v26 = vpop.f32.mrf.mxu0  ;;  %v487_v28 = vpop.f32.mrf.mxu1 }
  0xd3   :  { %v432_v27 = vpack.c.bf16 %v479_v26, %v478_v22  ;;  %v452_v29 = vpack.c.bf16 %v487_v28, %v486_v23 }
  0xd4   :  { %v187_v30 = vpop.f32.mrf.mxu0  ;;  %v219_v32 = vpop.f32.mrf.mxu1 }
  0xd5   :  { %456 = vst [vmem:[%s576_s2 + $0x18] sm:$0xff] %v432_v27   ;;  %v427_v31 = vpack.c.bf16 %v187_v30, %v184_v24  ;;  %460 = vst [vmem:[%s576_s2 + $0x38] sm:$0xff] %v452_v29   ;;  %v447_v33 = vpack.c.bf16 %v219_v32, %v216_v25 }
  0xd7   :  { %455 = vst [vmem:[%s576_s2 + $0x10] sm:$0xff] %v427_v31   ;;  %459 = vst [vmem:[%s576_s2 + $0x30] sm:$0xff] %v447_v33  }

// kernel: _lambda_.20
= control target key start
LH: loop header
LB: loop body
LE: loop exit
PB: predicated region body
PF: predicated region fallthrough
CT: control target
= control target key end

     0   :  { %v599_v1 = vmov 0   ;;  %v600_v56 = vmov 1983009808   ;;  %v443_v58 = vlaneseq  ;;  %s772_s1 = inlined_call_operand.vmem [shape: bf16[128,768], index: 1, kind: input, shape index: {}]   ;;  %s773_s0 = inlined_call_operand.vmem [shape: f32[2,128], index: 0, kind: input, shape index: {}]   ;;  %s774_s2 = inlined_call_operand.vmem [shape: f32[2,768], index: 2, kind: output, shape index: {}]  }
   0x1   :  { %v523_v0 = vld [vmem:[%s772_s1 + $0x154] ss:$24 sps:$4 sm:$0xff]   ;;  %341 = vmatprep.mubr.bf16.mxu0 %v599_v1  ;;  %382 = vmatprep.mubr.bf16.mxu1 %v599_v1  ;;  %v525_v2 = vld [vmem:[%s772_s1 + $0x150] ss:$24 sps:$4 sm:$0xff]   ;;  %v529_v5 = vld [vmem:[%s772_s1 + $0x124] ss:$24 sps:$4 sm:$0xff]   ;;  %v441_v57 = vunpack.c.l.s4 %v600_v56 }
   0x2   :  { %309 = vmatprep.subr.bf16.mxu0 %v523_v0  ;;  %v526_v3 = vld [vmem:[%s772_s1 + $0x15c] ss:$24 sps:$4 sm:$0xff]   ;;  %v528_v4 = vld [vmem:[%s772_s1 + $0x158] ss:$24 sps:$4 sm:$0xff]   ;;  %v532_v7 = vld [vmem:[%s772_s1 + $0x12c] ss:$24 sps:$4 sm:$0xff]  }
   0x3   :  { %310 = vmatpush1.bf16.msra.mxu0 %v525_v2  ;;  %v531_v6 = vld [vmem:[%s772_s1 + $0x120] ss:$24 sps:$4 sm:$0xff]   ;;  %350 = vmatprep.subr.bf16.mxu1 %v526_v3  ;;  %v535_v9 = vld [vmem:[%s772_s1 + $0xf4] ss:$24 sps:$4 sm:$0xff]   ;;  %v537_v10 = vld [vmem:[%s772_s1 + $0xf0] ss:$24 sps:$4 sm:$0xff]   ;;  %v442_v59 = vunpack.c.0.s8 %v441_v57 }
   0x4   :  { %351 = vmatpush1.bf16.msra.mxu1 %v528_v4  ;;  %311 = vmatprep.subr.bf16.mxu0 %v529_v5  ;;  %v534_v8 = vld [vmem:[%s772_s1 + $0x128] ss:$24 sps:$4 sm:$0xff]   ;;  %v538_v11 = vld [vmem:[%s772_s1 + $0xfc] ss:$24 sps:$4 sm:$0xff]   ;;  %v540_v13 = vld [vmem:[%s772_s1 + $0xf8] ss:$24 sps:$4 sm:$0xff]  }
   0x5   :  { %352 = vmatprep.subr.bf16.mxu1 %v532_v7  ;;  %v541_v12 = vld [vmem:[%s772_s1 + $0xc4] ss:$24 sps:$4 sm:$0xff]   ;;  %v543_v15 = vld [vmem:[%s772_s1 + $0xc0] ss:$24 sps:$4 sm:$0xff]   ;;  %v547_v16 = vld [vmem:[%s772_s1 + $0x94] ss:$24 sps:$4 sm:$0xff]  }
   0x6   :  { %v544_v14 = vld [vmem:[%s772_s1 + $0xcc] ss:$24 sps:$4 sm:$0xff]   ;;  %v546_v17 = vld [vmem:[%s772_s1 + $0xc8] ss:$24 sps:$4 sm:$0xff]   ;;  %v550_v18 = vld [vmem:[%s772_s1 + $0x9c] ss:$24 sps:$4 sm:$0xff]  }
   0x7   :  { %312 = vmatpush1.bf16.msra.mxu0 %v531_v6  ;;  %v549_v19 = vld [vmem:[%s772_s1 + $0x90] ss:$24 sps:$4 sm:$0xff]   ;;  %v553_v20 = vld [vmem:[%s772_s1 + $0x64] ss:$24 sps:$4 sm:$0xff]   ;;  %v555_v23 = vld [vmem:[%s772_s1 + $0x60] ss:$24 sps:$4 sm:$0xff]  }
   0x8   :  { %313 = vmatprep.subr.bf16.mxu0 %v535_v9  ;;  %353 = vmatpush1.bf16.msra.mxu1 %v534_v8  ;;  %v552_v21 = vld [vmem:[%s772_s1 + $0x98] ss:$24 sps:$4 sm:$0xff]   ;;  %v556_v22 = vld [vmem:[%s772_s1 + $0x6c] ss:$24 sps:$4 sm:$0xff]   ;;  %v558_v25 = vld [vmem:[%s772_s1 + $0x68] ss:$24 sps:$4 sm:$0xff]  }
   0x9   :  { %354 = vmatprep.subr.bf16.mxu1 %v538_v11  ;;  %v559_v24 = vld [vmem:[%s772_s1 + $0x34] ss:$24 sps:$4 sm:$0xff]   ;;  %v12_v27 = vld [vmem:[%s773_s0] sm:$0x3]  ;;  %v561_v28 = vld [vmem:[%s772_s1 + $0x30] ss:$24 sps:$4 sm:$0xff]  }
   0xa   :  { %v562_v26 = vld [vmem:[%s772_s1 + $0x3c] ss:$24 sps:$4 sm:$0xff]   ;;  %v471_v29 = vmul.f32 -1.442695, %v12_v27  ;;  %v564_v31 = vld [vmem:[%s772_s1 + $0x38] ss:$24 sps:$4 sm:$0xff]  }
   0xb   :  { %314 = vmatpush1.bf16.msra.mxu0 %v537_v10  ;;  %v565_v30 = vld [vmem:[%s772_s1 + $0x4] ss:$24 sps:$4 sm:$0xff]   ;;  %v567_v33 = vld [vmem:[%s772_s1] ss:$24 sps:$4 sm:$0xff]   ;;  %v576_v42 = vld [vmem:[%s772_s1 + $0x134] ss:$24 sps:$4 sm:$0xff]  }
   0xc   :  { %315 = vmatprep.subr.bf16.mxu0 %v541_v12  ;;  %355 = vmatpush1.bf16.msra.mxu1 %v540_v13  ;;  %595 = vpow2.f32 %v471_v29  ;;  %v568_v32 = vld [vmem:[%s772_s1 + $0xc] ss:$24 sps:$4 sm:$0xff]   ;;  %v570_v35 = vld [vmem:[%s772_s1 + $0x8] ss:$24 sps:$4 sm:$0xff]   ;;  %v444_v60 = vshrl.u32 %v443_v58, 7 }
   0xd   :  { %356 = vmatprep.subr.bf16.mxu1 %v544_v14  ;;  %v573_v34 = vld [vmem:[%s772_s1 + $0x164] ss:$24 sps:$4 sm:$0xff]   ;;  %v571_v40 = vld [vmem:[%s772_s1 + $0x160] ss:$24 sps:$4 sm:$0xff]   ;;  %v574_v43 = vld [vmem:[%s772_s1 + $0x130] ss:$24 sps:$4 sm:$0xff]  }
   0xe   :  { %v579_v44 = vld [vmem:[%s772_s1 + $0x104] ss:$24 sps:$4 sm:$0xff]   ;;  %v577_v45 = vld [vmem:[%s772_s1 + $0x100] ss:$24 sps:$4 sm:$0xff]   ;;  %v582_v46 = vld [vmem:[%s772_s1 + $0xd4] ss:$24 sps:$4 sm:$0xff]   ;;  %v445_v63 = vsub.s32 %v442_v59, %v444_v60 }
   0xf   :  { %316 = vmatpush1.bf16.msra.mxu0 %v543_v15  ;;  %v580_v47 = vld [vmem:[%s772_s1 + $0xd0] ss:$24 sps:$4 sm:$0xff]   ;;  %v585_v48 = vld [vmem:[%s772_s1 + $0xa4] ss:$24 sps:$4 sm:$0xff]   ;;  %v583_v49 = vld [vmem:[%s772_s1 + $0xa0] ss:$24 sps:$4 sm:$0xff]  }
  0x10   :  { %317 = vmatprep.subr.bf16.mxu0 %v547_v16  ;;  %357 = vmatpush1.bf16.msra.mxu1 %v546_v17  ;;  %v588_v50 = vld [vmem:[%s772_s1 + $0x74] ss:$24 sps:$4 sm:$0xff]   ;;  %v586_v51 = vld [vmem:[%s772_s1 + $0x70] ss:$24 sps:$4 sm:$0xff]   ;;  %v591_v52 = vld [vmem:[%s772_s1 + $0x44] ss:$24 sps:$4 sm:$0xff]  }
  0x11   :  { %358 = vmatprep.subr.bf16.mxu1 %v550_v18  ;;  %v589_v53 = vld [vmem:[%s772_s1 + $0x40] ss:$24 sps:$4 sm:$0xff]   ;;  %v594_v54 = vld [vmem:[%s772_s1 + $0x14] ss:$24 sps:$4 sm:$0xff]   ;;  %v592_v55 = vld [vmem:[%s772_s1 + $0x10] ss:$24 sps:$4 sm:$0xff]  }
  0x13   :  { %318 = vmatpush1.bf16.msra.mxu0 %v549_v19 }
  0x14   :  { %319 = vmatprep.subr.bf16.mxu0 %v553_v20  ;;  %359 = vmatpush1.bf16.msra.mxu1 %v552_v21 }
  0x15   :  { %360 = vmatprep.subr.bf16.mxu1 %v556_v22 }
  0x17   :  { %320 = vmatpush1.bf16.msra.mxu0 %v555_v23 }
  0x18   :  { %321 = vmatprep.subr.bf16.mxu0 %v559_v24  ;;  %361 = vmatpush1.bf16.msra.mxu1 %v558_v25 }
  0x19   :  { %362 = vmatprep.subr.bf16.mxu1 %v562_v26  ;;  %v596_v36 = vpop.eup %595 }
  0x1a   :  { %v16_v37 = vadd.f32 1.0, %v596_v36 }
  0x1b   :  { %322 = vmatpush1.bf16.msra.mxu0 %v561_v28 }
  0x1c   :  { %323 = vmatprep.subr.bf16.mxu0 %v565_v30  ;;  %363 = vmatpush1.bf16.msra.mxu1 %v564_v31  ;;  %597 = vrcp.f32 %v16_v37 }
  0x1d   :  { %364 = vmatprep.subr.bf16.mxu1 %v568_v32 }
  0x1f   :  { %324 = vmatpush1.bf16.msra.mxu0 %v567_v33 }
  0x20   :  { %391 = vmatprep.subr.bf16.mxu0 %v573_v34  ;;  %365 = vmatpush1.bf16.msra.mxu1 %v570_v35 }
  0x29   :  { %v598_v38 = vpop.eup %597 }
  0x2a   :  { %v19_v39 = vmul.f32 %v598_v38, %v12_v27 }
  0x2c   :  { %v20_v41 = vpack.c.bf16 %v19_v39, %v19_v39 }
  0x2e   :  { %342 = vmatmul.mubr.bf16.vlgmr.msra.gmra.mxu0 %v20_v41  ;;  %383 = vmatmul.mubr.bf16.vlgmr.msra.gmra.mxu1 %v20_v41 }
  0x2f   :  { %392 = vmatpush1.bf16.msra.mxu0 %v571_v40  ;;  %423 = vmatprep.mubr.bf16.mxu0 %v599_v1 }
  0x30   :  { %393 = vmatprep.subr.bf16.mxu0 %v576_v42 }
  0x33   :  { %394 = vmatpush1.bf16.msra.mxu0 %v574_v43 }
  0x34   :  { %395 = vmatprep.subr.bf16.mxu0 %v579_v44 }
  0x37   :  { %396 = vmatpush1.bf16.msra.mxu0 %v577_v45 }
  0x38   :  { %397 = vmatprep.subr.bf16.mxu0 %v582_v46 }
  0x3b   :  { %398 = vmatpush1.bf16.msra.mxu0 %v580_v47 }
  0x3c   :  { %399 = vmatprep.subr.bf16.mxu0 %v585_v48 }
  0x3f   :  { %400 = vmatpush1.bf16.msra.mxu0 %v583_v49 }
  0x40   :  { %401 = vmatprep.subr.bf16.mxu0 %v588_v50 }
  0x43   :  { %402 = vmatpush1.bf16.msra.mxu0 %v586_v51 }
  0x44   :  { %403 = vmatprep.subr.bf16.mxu0 %v591_v52 }
  0x47   :  { %404 = vmatpush1.bf16.msra.mxu0 %v589_v53 }
  0x48   :  { %405 = vmatprep.subr.bf16.mxu0 %v594_v54 }
  0x4b   :  { %406 = vmatpush1.bf16.msra.mxu0 %v592_v55 }
  0x4e   :  { %424 = vmatmul.mubr.bf16.vlgmr.msra.gmra.mxu0 %v20_v41 }
  0xee   :  { %v343_v61 = vpop.f32.mrf.mxu0  ;;  %v384_v62 = vpop.f32.mrf.mxu1 }
  0xf0   :  { %v345_v0 = vpop.f32.mrf.mxu0  ;;  %v386_v1 = vpop.f32.mrf.mxu1 }
  0xf1   :  { %v438_v2 = vcombine.low %v343_v61, %v345_v0  ;;  %v439_v3 = vcombine.low %v384_v62, %v386_v1 }
  0xf2   :  { %v347_v4 = vpop.f32.mrf.mxu0  ;;  %v388_v5 = vpop.f32.mrf.mxu1 }
  0xf3   :  { %v446_v6 = vrot.slane %v438_v2, %v445_v63  ;;  %v453_v7 = vrot.slane %v439_v3, %v445_v63 }
  0xf4   :  { %v348_v8 = vpop.f32.mrf.mxu0  ;;  %v389_v9 = vpop.f32.mrf.mxu1 }
  0xf5   :  { %v454_v10 = vcombine.low %v446_v6, %v453_v7 }
  0xf7   :  { %465 = vst [vmem:[%s774_s2] sm:$0xff] %v454_v10 }
 0x10e   :  { %v425_v11 = vpop.f32.mrf.mxu0 }
 0x110   :  { %v427_v12 = vpop.f32.mrf.mxu0 }
 0x111   :  { %v455_v13 = vcombine.low %v425_v11, %v427_v12 }
 0x112   :  { %v429_v14 = vpop.f32.mrf.mxu0 }
 0x113   :  { %520 = vst.sshfl [vmem:[%s774_s2 + $0x8] sm:$0x33 pattern:$0x76325410] %v455_v13 }
 0x114   :  { %v430_v15 = vpop.f32.mrf.mxu0 }

// kernel: _lambda_.22
= control target key start
LH: loop header
LB: loop body
LE: loop exit
PB: predicated region body
PF: predicated region fallthrough
CT: control target
= control target key end

     0   :  { %vm224_vm0 = vcmask 523264   ;;  %s1119_s1 = inlined_call_operand.vmem [shape: bf16[64,128], index: 1, kind: input, shape index: {}]   ;;  %s1120_s0 = inlined_call_operand.vmem [shape: bf16[256,64], index: 0, kind: input, shape index: {}]   ;;  %s1121_s2 = inlined_call_operand.vmem [shape: bf16[256,128], index: 2, kind: output, shape index: {}]  }
   0x1   :  { %v960_v0 = vld [vmem:[%s1119_s1 + $0x18] sm:$0xff]   ;;  %v961_v1 = vld [vmem:[%s1119_s1 + $0x10] sm:$0xff]   ;;  %v962_v2 = vld [vmem:[%s1119_s1 + $0x8] sm:$0xff]  }
   0x2   :  { %912 = vmatprep.subr.bf16.mxu0 %v960_v0  ;;  %952 = vmatprep.subr.bf16.mxu1 %v960_v0  ;;  %v964_v3 = vld [vmem:[%s1120_s0] sm:$0xff]   ;;  %v966_v6 = vld [vmem:[%s1120_s0 + $0x8] sm:$0xff]   ;;  %v968_v8 = vld [vmem:[%s1120_s0 + $0x10] sm:$0xff]  }
   0x3   :  { %913 = vmatpush3.bf16.msra.mxu0 %v960_v0  ;;  %956 = vmatpush3.bf16.msra.mxu1 %v960_v0  ;;  %v965_v4 = vld [vmem:[%s1120_s0 + $0x40] sm:$0xff]   ;;  %v967_v7 = vld [vmem:[%s1120_s0 + $0x48] sm:$0xff]   ;;  %v969_v9 = vld [vmem:[%s1120_s0 + $0x50] sm:$0xff]  }
   0x4   :  { %914 = vmatprep.subr.bf16.mxu0 %v961_v1  ;;  %953 = vmatprep.subr.bf16.mxu1 %v961_v1  ;;  %v963_v5 = vld [vmem:[%s1119_s1] sm:$0xff]   ;;  %v970_v10 = vld [vmem:[%s1120_s0 + $0x18] sm:$0xff]   ;;  %v974_v14 = vld [vmem:[%s1120_s0 + $0x28] sm:$0xff]  }
   0x5   :  { %920 = vmatprep.mubr.msk.bf16.mxu0 %vm224_vm0, %v964_v3  ;;  %936 = vmatprep.mubr.msk.bf16.mxu1 %vm224_vm0, %v965_v4  ;;  %v971_v11 = vld [vmem:[%s1120_s0 + $0x58] sm:$0xff]   ;;  %v972_v12 = vld [vmem:[%s1120_s0 + $0x20] sm:$0xff]   ;;  %v975_v15 = vld [vmem:[%s1120_s0 + $0x68] sm:$0xff]  }
   0x6   :  { %v973_v13 = vld [vmem:[%s1120_s0 + $0x60] sm:$0xff]   ;;  %v976_v16 = vld [vmem:[%s1120_s0 + $0x30] sm:$0xff]   ;;  %v978_v18 = vld [vmem:[%s1120_s0 + $0x38] sm:$0xff]  }
   0x7   :  { %915 = vmatpush3.bf16.msra.mxu0 %v961_v1  ;;  %957 = vmatpush3.bf16.msra.mxu1 %v961_v1  ;;  %v977_v17 = vld [vmem:[%s1120_s0 + $0x70] sm:$0xff]   ;;  %v979_v19 = vld [vmem:[%s1120_s0 + $0x78] sm:$0xff]  }
   0x8   :  { %916 = vmatprep.subr.bf16.mxu0 %v962_v2  ;;  %954 = vmatprep.subr.bf16.mxu1 %v962_v2 }
   0xb   :  { %917 = vmatpush3.bf16.msra.mxu0 %v962_v2  ;;  %958 = vmatpush3.bf16.msra.mxu1 %v962_v2 }
   0xc   :  { %918 = vmatprep.subr.bf16.mxu0 %v963_v5  ;;  %955 = vmatprep.subr.bf16.mxu1 %v963_v5 }
   0xf   :  { %919 = vmatpush3.bf16.msra.mxu0 %v963_v5  ;;  %959 = vmatpush3.bf16.msra.mxu1 %v963_v5 }
  0x12   :  { %921 = vmatmul.mubr.msk.bf16.vlgmr.msra.gmra.mxu0 %vm224_vm0, %v966_v6  ;;  %937 = vmatmul.mubr.msk.bf16.vlgmr.msra.gmra.mxu1 %vm224_vm0, %v967_v7 }
  0x13   :  { %924 = vmatprep.mubr.msk.bf16.mxu0 %vm224_vm0, %v968_v8  ;;  %940 = vmatprep.mubr.msk.bf16.mxu1 %vm224_vm0, %v969_v9 }
  0x1a   :  { %925 = vmatmul.mubr.msk.bf16.gmra.mxu0 %vm224_vm0, %v970_v10  ;;  %941 = vmatmul.mubr.msk.bf16.gmra.mxu1 %vm224_vm0, %v971_v11 }
  0x1b   :  { %928 = vmatprep.mubr.msk.bf16.mxu0 %vm224_vm0, %v972_v12  ;;  %944 = vmatprep.mubr.msk.bf16.mxu1 %vm224_vm0, %v973_v13 }
  0x22   :  { %929 = vmatmul.mubr.msk.bf16.gmra.mxu0 %vm224_vm0, %v974_v14  ;;  %945 = vmatmul.mubr.msk.bf16.gmra.mxu1 %vm224_vm0, %v975_v15 }
  0x23   :  { %932 = vmatprep.mubr.msk.bf16.mxu0 %vm224_vm0, %v976_v16  ;;  %948 = vmatprep.mubr.msk.bf16.mxu1 %vm224_vm0, %v977_v17 }
  0x2a   :  { %933 = vmatmul.mubr.msk.bf16.gmra.mxu0 %vm224_vm0, %v978_v18  ;;  %949 = vmatmul.mubr.msk.bf16.gmra.mxu1 %vm224_vm0, %v979_v19 }
  0xd2   :  { %v922_v20 = vpop.f32.mrf.mxu0  ;;  %v938_v21 = vpop.f32.mrf.mxu1 }
  0xd4   :  { %v307_v22 = vpop.f32.mrf.mxu0  ;;  %v371_v23 = vpop.f32.mrf.mxu1 }
  0xd6   :  { %v923_v24 = vpop.f32.mrf.mxu0  ;;  %v939_v25 = vpop.f32.mrf.mxu1 }
  0xd7   :  { %v805_v26 = vpack.c.bf16 %v923_v24, %v922_v20  ;;  %v845_v27 = vpack.c.bf16 %v939_v25, %v938_v21 }
  0xd8   :  { %v310_v28 = vpop.f32.mrf.mxu0  ;;  %v374_v29 = vpop.f32.mrf.mxu1 }
  0xd9   :  { %877 = vst [vmem:[%s1121_s2 + $0x8] sm:$0xff] %v805_v26   ;;  %885 = vst [vmem:[%s1121_s2 + $0x48] sm:$0xff] %v845_v27   ;;  %v800_v30 = vpack.c.bf16 %v310_v28, %v307_v22  ;;  %v840_v31 = vpack.c.bf16 %v374_v29, %v371_v23 }
  0xda   :  { %v926_v32 = vpop.f32.mrf.mxu0  ;;  %v942_v33 = vpop.f32.mrf.mxu1 }
  0xdb   :  { %801 = vst [vmem:[%s1121_s2] sm:$0xff] %v800_v30   ;;  %884 = vst [vmem:[%s1121_s2 + $0x40] sm:$0xff] %v840_v31  }
  0xdc   :  { %v323_v34 = vpop.f32.mrf.mxu0  ;;  %v387_v35 = vpop.f32.mrf.mxu1 }
  0xde   :  { %v927_v36 = vpop.f32.mrf.mxu0  ;;  %v943_v37 = vpop.f32.mrf.mxu1 }
  0xdf   :  { %v815_v38 = vpack.c.bf16 %v927_v36, %v926_v32  ;;  %v855_v39 = vpack.c.bf16 %v943_v37, %v942_v33 }
  0xe0   :  { %v326_v40 = vpop.f32.mrf.mxu0  ;;  %v390_v41 = vpop.f32.mrf.mxu1 }
  0xe1   :  { %879 = vst [vmem:[%s1121_s2 + $0x18] sm:$0xff] %v815_v38   ;;  %887 = vst [vmem:[%s1121_s2 + $0x58] sm:$0xff] %v855_v39   ;;  %v810_v42 = vpack.c.bf16 %v326_v40, %v323_v34  ;;  %v850_v43 = vpack.c.bf16 %v390_v41, %v387_v35 }
  0xe2   :  { %v930_v44 = vpop.f32.mrf.mxu0  ;;  %v946_v45 = vpop.f32.mrf.mxu1 }
  0xe3   :  { %878 = vst [vmem:[%s1121_s2 + $0x10] sm:$0xff] %v810_v42   ;;  %886 = vst [vmem:[%s1121_s2 + $0x50] sm:$0xff] %v850_v43  }
  0xe4   :  { %v339_v46 = vpop.f32.mrf.mxu0  ;;  %v403_v47 = vpop.f32.mrf.mxu1 }
  0xe6   :  { %v931_v48 = vpop.f32.mrf.mxu0  ;;  %v947_v49 = vpop.f32.mrf.mxu1 }
  0xe7   :  { %v825_v50 = vpack.c.bf16 %v931_v48, %v930_v44  ;;  %v865_v51 = vpack.c.bf16 %v947_v49, %v946_v45 }
  0xe8   :  { %v342_v52 = vpop.f32.mrf.mxu0  ;;  %v406_v53 = vpop.f32.mrf.mxu1 }
  0xe9   :  { %881 = vst [vmem:[%s1121_s2 + $0x28] sm:$0xff] %v825_v50   ;;  %889 = vst [vmem:[%s1121_s2 + $0x68] sm:$0xff] %v865_v51   ;;  %v820_v54 = vpack.c.bf16 %v342_v52, %v339_v46  ;;  %v860_v55 = vpack.c.bf16 %v406_v53, %v403_v47 }
  0xea   :  { %v934_v56 = vpop.f32.mrf.mxu0  ;;  %v950_v57 = vpop.f32.mrf.mxu1 }
  0xeb   :  { %880 = vst [vmem:[%s1121_s2 + $0x20] sm:$0xff] %v820_v54   ;;  %888 = vst [vmem:[%s1121_s2 + $0x60] sm:$0xff] %v860_v55  }
  0xec   :  { %v355_v58 = vpop.f32.mrf.mxu0  ;;  %v419_v59 = vpop.f32.mrf.mxu1 }
  0xee   :  { %v935_v60 = vpop.f32.mrf.mxu0  ;;  %v951_v61 = vpop.f32.mrf.mxu1 }
  0xef   :  { %v835_v62 = vpack.c.bf16 %v935_v60, %v934_v56  ;;  %v875_v63 = vpack.c.bf16 %v951_v61, %v950_v57 }
  0xf0   :  { %v358_v0 = vpop.f32.mrf.mxu0  ;;  %v422_v1 = vpop.f32.mrf.mxu1 }
  0xf1   :  { %883 = vst [vmem:[%s1121_s2 + $0x38] sm:$0xff] %v835_v62   ;;  %891 = vst [vmem:[%s1121_s2 + $0x78] sm:$0xff] %v875_v63   ;;  %v830_v2 = vpack.c.bf16 %v358_v0, %v355_v58  ;;  %v870_v3 = vpack.c.bf16 %v422_v1, %v419_v59 }
  0xf3   :  { %882 = vst [vmem:[%s1121_s2 + $0x30] sm:$0xff] %v830_v2   ;;  %890 = vst [vmem:[%s1121_s2 + $0x70] sm:$0xff] %v870_v3  }

// kernel: _lambda_.24
= control target key start
LH: loop header
LB: loop body
LE: loop exit
PB: predicated region body
PF: predicated region fallthrough
CT: control target
= control target key end

     0   :  { %s2141_s21 = smov 0   ;;  %s2143_s22 = smov 0   ;;  %s2749_s0 = inlined_call_operand.vmem [shape: bf16[2,64,128], index: 0, kind: input, shape index: {}]   ;;  %s2750_s1 = inlined_call_operand.vmem [shape: f32[2,1,128], index: 1, kind: input, shape index: {}]   ;;  %s2751_s2 = inlined_call_operand.vmem [shape: f32[2,1,128], index: 2, kind: input, shape index: {}]   ;;  %s2752_s3 = inlined_call_operand.vmem [shape: f32[2,1,128], index: 3, kind: input, shape index: {}]   ;;  %s2753_s4 = inlined_call_operand.vmem [shape: bf16[128,512], index: 4, kind: input, shape index: {}]   ;;  %s2754_s5 = inlined_call_operand.vmem [shape: bf16[512,128], index: 5, kind: input, shape index: {}]   ;;  %s2755_s6 = inlined_call_operand.vmem [shape: bf16[2,64,128], index: 6, kind: output, shape index: {}]  }
   0x1   :  { %s2145_s23 = smov 0  }
   0x2 LB: > { %s28_s24 = sadd.s32 1, %s2099_s22  ;;  %p1683_p0 = scmp.ge.s32.totalorder %s2103_s23, 1  ;;  %s2103_s23 = sphi %s2145_s23, %s16_s23   ;;  %s2099_s22 = sphi %s2143_s22, %s2774_s22   ;;  %s2095_s21 = sphi %s2141_s21, %s2773_s21  }
   0x3   : > { %p30_p1 = scmp.ge.s32.totalorder %s28_s24, 2  ;;  %p257_p2 = scmp.lt.s32.totalorder %s2103_s23, 3 }
   0x5   : > { %s2776_s24 = smov (%p30_p1, %s28_s24), 0  ;;  %p258_p3 = pnand %p1683_p0, %p257_p2 }
   0x7   : > { %261 = sbr.rel (%p258_p3) target bundleno = 825 (0x339), region = 44 }
   0xc   : > { %p305_p4 = scmp.lt.s32.totalorder %s2095_s21, 1  ;;  %v1921_v12 = vld [vmem:[%s2753_s4 + $0xe4] ss:$16 sps:$4 sm:$0xff]   ;;  %v1923_v13 = vld [vmem:[%s2753_s4 + $0xec] ss:$16 sps:$4 sm:$0xff]  }
   0xd   : > { %v1925_v14 = vld [vmem:[%s2753_s4 + $0xe0] ss:$16 sps:$4 sm:$0xff]   ;;  %v1926_v15 = vld [vmem:[%s2753_s4 + $0xe8] ss:$16 sps:$4 sm:$0xff]   ;;  %666 = vmatprep.subr.bf16.mxu0 %v1921_v12  ;;  %739 = vmatprep.subr.bf16.mxu1 %v1923_v13  ;;  %v1927_v47 = vld [vmem:[%s2753_s4 + $0xc4] ss:$16 sps:$4 sm:$0xff]  }
   0xe   : > { %s2778_s21 = smov (!%p305_p4, %s2095_s21), 1  ;;  %667 = vmatpush1.bf16.msra.mxu0 %v1925_v14  ;;  %740 = vmatpush1.bf16.msra.mxu1 %v1926_v15  ;;  %v1929_v48 = vld [vmem:[%s2753_s4 + $0xcc] ss:$16 sps:$4 sm:$0xff]   ;;  %v1931_v49 = vld [vmem:[%s2753_s4 + $0xc0] ss:$16 sps:$4 sm:$0xff]  }
   0xf   : > { %s1764_s25 = sshll.u32 %s2778_s21, 5  ;;  %v1932_v50 = vld [vmem:[%s2753_s4 + $0xc8] ss:$16 sps:$4 sm:$0xff]   ;;  %668 = vmatprep.subr.bf16.mxu0 %v1927_v47  ;;  %741 = vmatprep.subr.bf16.mxu1 %v1929_v48  ;;  %v1933_v52 = vld [vmem:[%s2753_s4 + $0xa4] ss:$16 sps:$4 sm:$0xff]   ;;  %s319_s14 = scalar_lea.vmem %s2751_s2, %s2778_s21 }
  0x10   : > { %s312_s28 = scalar_lea.vmem %s2749_s0, %s1764_s25  ;;  %v1935_v53 = vld [vmem:[%s2753_s4 + $0xac] ss:$16 sps:$4 sm:$0xff]   ;;  %v1937_v54 = vld [vmem:[%s2753_s4 + $0xa0] ss:$16 sps:$4 sm:$0xff]   ;;  %v1938_v55 = vld [vmem:[%s2753_s4 + $0xa8] ss:$16 sps:$4 sm:$0xff]   ;;  %s316_s17 = scalar_lea.vmem %s2750_s1, %s2778_s21 }
  0x11   : > { %v1775_v0 = vld [vmem:[%s312_s28] sm:$0xff]   ;;  %v1810_v1 = vld [vmem:[%s312_s28 + $0x8] sm:$0xff]   ;;  %v1811_v4 = vld [vmem:[%s312_s28 + $0x10] sm:$0xff]   ;;  %s322_s8 = scalar_lea.vmem %s2752_s3, %s2778_s21  ;;  %s2722_s11 = scalar_lea.vmem %s2755_s6, %s1764_s25 }
  0x12   : > { %v2167_v2 = vunpack.c.l.bf16 %v1775_v0  ;;  %v2169_v3 = vunpack.c.l.bf16 %v1810_v1  ;;  %v2173_v5 = vunpack.c.h.bf16 %v1775_v0  ;;  %v2175_v6 = vunpack.c.h.bf16 %v1810_v1  ;;  %v1812_v7 = vld [vmem:[%s312_s28 + $0x18] sm:$0xff]   ;;  %669 = vmatpush1.bf16.msra.mxu0 %v1931_v49  ;;  %742 = vmatpush1.bf16.msra.mxu1 %v1932_v50  ;;  %v1939_v56 = vld [vmem:[%s2753_s4 + $0x84] ss:$16 sps:$4 sm:$0xff]   ;;  %v1943_v58 = vld [vmem:[%s2753_s4 + $0x80] ss:$16 sps:$4 sm:$0xff]  }
  0x13   : > { %v2179_v8 = vunpack.c.l.bf16 %v1811_v4  ;;  %v2181_v9 = vunpack.c.h.bf16 %v1811_v4  ;;  %v2185_v10 = vunpack.c.l.bf16 %v1812_v7  ;;  %v2187_v11 = vunpack.c.h.bf16 %v1812_v7  ;;  %670 = vmatprep.subr.bf16.mxu0 %v1933_v52  ;;  %743 = vmatprep.subr.bf16.mxu1 %v1935_v53  ;;  %v1941_v57 = vld [vmem:[%s2753_s4 + $0x8c] ss:$16 sps:$4 sm:$0xff]   ;;  %v1944_v59 = vld [vmem:[%s2753_s4 + $0x88] ss:$16 sps:$4 sm:$0xff]   ;;  %v1945_v60 = vld [vmem:[%s2753_s4 + $0x64] ss:$16 sps:$4 sm:$0xff]  }
  0x14   : > { %350 = vadd.xlane.f32.xlu0 %v2167_v2  ;;  %354 = vadd.xlane.f32.xlu1 %v2169_v3  ;;  %2761 = vst [vmem:[#allocation2_spill] sm:$0xff] %v2175_v6  ;;  %v1947_v61 = vld [vmem:[%s2753_s4 + $0x6c] ss:$16 sps:$4 sm:$0xff]   ;;  %v1949_v62 = vld [vmem:[%s2753_s4 + $0x60] ss:$16 sps:$4 sm:$0xff]  }
  0x15   : > { %2762 = vst [vmem:[#allocation3_spill] sm:$0xff] %v2179_v8  ;;  %2763 = vst [vmem:[#allocation4_spill] sm:$0xff] %v2181_v9  ;;  %v1950_v63 = vld [vmem:[%s2753_s4 + $0x68] ss:$16 sps:$4 sm:$0xff]   ;;  %v1951_v0 = vld [vmem:[%s2753_s4 + $0x44] ss:$16 sps:$4 sm:$0xff]  }
  0x16   : > { %2764 = vst [vmem:[#allocation5_spill] sm:$0xff] %v2185_v10  ;;  %2765 = vst [vmem:[#allocation6_spill] sm:$0xff] %v2187_v11  ;;  %671 = vmatpush1.bf16.msra.mxu0 %v1937_v54  ;;  %744 = vmatpush1.bf16.msra.mxu1 %v1938_v55  ;;  %v1953_v1 = vld [vmem:[%s2753_s4 + $0x4c] ss:$16 sps:$4 sm:$0xff]   ;;  %v1955_v4 = vld [vmem:[%s2753_s4 + $0x40] ss:$16 sps:$4 sm:$0xff]  }
  0x17   : > { %672 = vmatprep.subr.bf16.mxu0 %v1939_v56  ;;  %745 = vmatprep.subr.bf16.mxu1 %v1941_v57  ;;  %v1956_v7 = vld [vmem:[%s2753_s4 + $0x48] ss:$16 sps:$4 sm:$0xff]   ;;  %v1957_v12 = vld [vmem:[%s2753_s4 + $0x24] ss:$16 sps:$4 sm:$0xff]   ;;  %v1959_v13 = vld [vmem:[%s2753_s4 + $0x2c] ss:$16 sps:$4 sm:$0xff]  }
  0x18   : > { %352 = vadd.xlane.f32.xlu0 %v2173_v5  ;;  %356 = vadd.xlane.f32.xlu1 %v2175_v6  ;;  %v1961_v14 = vld [vmem:[%s2753_s4 + $0x20] ss:$16 sps:$4 sm:$0xff]   ;;  %v1962_v15 = vld [vmem:[%s2753_s4 + $0x28] ss:$16 sps:$4 sm:$0xff]  }
  0x1a   : > { %673 = vmatpush1.bf16.msra.mxu0 %v1943_v58  ;;  %746 = vmatpush1.bf16.msra.mxu1 %v1944_v59 }
  0x1b   : > { %674 = vmatprep.subr.bf16.mxu0 %v1945_v60  ;;  %747 = vmatprep.subr.bf16.mxu1 %v1947_v61 }
  0x1c   : > { %358 = vadd.xlane.f32.xlu0 %v2179_v8  ;;  %360 = vadd.xlane.f32.xlu1 %v2181_v9 }
  0x1e   : > { %675 = vmatpush1.bf16.msra.mxu0 %v1949_v62  ;;  %748 = vmatpush1.bf16.msra.mxu1 %v1950_v63 }
  0x1f   : > { %676 = vmatprep.subr.bf16.mxu0 %v1951_v0  ;;  %749 = vmatprep.subr.bf16.mxu1 %v1953_v1  ;;  %v1688_v1 = vld [vmem:[%s316_s17] ss:$0 sm:$0xff] }
  0x20   : > { %362 = vadd.xlane.f32.xlu0 %v2185_v10  ;;  %364 = vadd.xlane.f32.xlu1 %v2187_v11 }
  0x22   : > { %677 = vmatpush1.bf16.msra.mxu0 %v1955_v4  ;;  %750 = vmatpush1.bf16.msra.mxu1 %v1956_v7 }
  0x23   : > { %678 = vmatprep.subr.bf16.mxu0 %v1957_v12  ;;  %751 = vmatprep.subr.bf16.mxu1 %v1959_v13 }
  0x26   : > { %679 = vmatpush1.bf16.msra.mxu0 %v1961_v14  ;;  %752 = vmatpush1.bf16.msra.mxu1 %v1962_v15 }
  0x9d   : > { %v351_v16 = vpop.xlane.xlu0 %350  ;;  %v355_v17 = vpop.xlane.xlu1 %354 }
  0x9e   : > { %v367_v18 = vmul.f32 0.0078125, %v351_v16  ;;  %v369_v19 = vmul.f32 0.0078125, %v355_v17  ;;  %v1963_v16 = vld [vmem:[%s2753_s4 + $0x4] ss:$16 sps:$4 sm:$0xff]   ;;  %v1965_v17 = vld [vmem:[%s2753_s4 + $0xc] ss:$16 sps:$4 sm:$0xff]  }
  0x9f   : > { %680 = vmatprep.subr.bf16.mxu0 %v1963_v16  ;;  %753 = vmatprep.subr.bf16.mxu1 %v1965_v17 }
  0xa0   : > { %v2204_v20 = vsub.f32 %v2167_v2, %v367_v18  ;;  %v2207_v21 = vsub.f32 %v2169_v3, %v369_v19  ;;  %v2105_v18 = vmov 0   ;;  %v1967_v19 = vld [vmem:[%s2753_s4] ss:$16 sps:$4 sm:$0xff]  }
  0xa1   : > { %v353_v22 = vpop.xlane.xlu0 %352  ;;  %v357_v23 = vpop.xlane.xlu1 %356  ;;  %698 = vmatprep.mubr.bf16.mxu0 %v2105_v18  ;;  %771 = vmatprep.mubr.bf16.mxu1 %v2105_v18 }
  0xa2   : > { %v368_v24 = vmul.f32 0.0078125, %v353_v22  ;;  %v383_v25 = vmul.f32 %v2204_v20, %v2204_v20  ;;  %v370_v26 = vmul.f32 0.0078125, %v357_v23  ;;  %v385_v29 = vmul.f32 %v2207_v21, %v2207_v21  ;;  %v1968_v22 = vld [vmem:[%s2753_s4 + $0x8] ss:$16 sps:$4 sm:$0xff]   ;;  %681 = vmatpush1.bf16.msra.mxu0 %v1967_v19 }
  0xa3   : > { %754 = vmatpush1.bf16.msra.mxu1 %v1968_v22 }
  0xa4   : > { %v2212_v27 = vsub.f32 %v2173_v5, %v368_v24  ;;  %391 = vadd.xlane.f32.xlu0 %v383_v25  ;;  %v2215_v28 = vsub.f32 %v2175_v6, %v370_v26 }
  0xa5   : > { %v359_v30 = vpop.xlane.xlu0 %358  ;;  %v361_v31 = vpop.xlane.xlu1 %360 }
  0xa6   : > { %v371_v32 = vmul.f32 0.0078125, %v359_v30  ;;  %v384_v33 = vmul.f32 %v2212_v27, %v2212_v27  ;;  %v372_v34 = vmul.f32 0.0078125, %v361_v31  ;;  %v386_v37 = vmul.f32 %v2215_v28, %v2215_v28 }
  0xa8   : > { %v2222_v35 = vsub.f32 %v2179_v8, %v371_v32  ;;  %395 = vadd.xlane.f32.xlu0 %v385_v29  ;;  %393 = vadd.xlane.f32.xlu1 %v384_v33  ;;  %v2225_v36 = vsub.f32 %v2181_v9, %v372_v34  ;;  %v442_v32 = vlaneseq }
  0xa9   : > { %v363_v38 = vpop.xlane.xlu0 %362  ;;  %v365_v39 = vpop.xlane.xlu1 %364 }
  0xaa   : > { %v373_v40 = vmul.f32 0.0078125, %v363_v38  ;;  %v387_v41 = vmul.f32 %v2222_v35, %v2222_v35  ;;  %v374_v42 = vmul.f32 0.0078125, %v365_v39  ;;  %v388_v45 = vmul.f32 %v2225_v36, %v2225_v36 }
  0xac   : > { %v2232_v43 = vsub.f32 %v2185_v10, %v373_v40  ;;  %397 = vadd.xlane.f32.xlu1 %v386_v37  ;;  %399 = vadd.xlane.f32.xlu0 %v387_v41  ;;  %v2235_v44 = vsub.f32 %v2187_v11, %v374_v42  ;;  %v443_v40 = vshrl.u32 %v442_v32, 7 }
  0xae   : > { %v389_v46 = vmul.f32 %v2232_v43, %v2232_v43  ;;  %v390_v51 = vmul.f32 %v2235_v44, %v2235_v44  ;;  %v444_v49 = vsub.s32 0, %v443_v40 }
  0xb0   : > { %401 = vadd.xlane.f32.xlu1 %v388_v45  ;;  %403 = vadd.xlane.f32.xlu0 %v389_v46  ;;  %v439_v45 = vld [vmem:[%s319_s14] sm:$0x1] }
  0xb1   : > { %v440_v48 = vadd.f32 1.0, %v439_v45  ;;  %v1974_v45 = vld [vmem:[%s2754_s5 + $0xf0] sm:$0xff]  }
  0xb3   : > { %v445_v57 = vrot.slane %v440_v48, %v444_v49  ;;  %v1977_v48 = vld [vmem:[%s2754_s5 + $0x68] sm:$0xff]  }
  0xb4   : > { %405 = vadd.xlane.f32.xlu1 %v390_v51  ;;  %v1978_v49 = vld [vmem:[%s2754_s5 + $0xe8] sm:$0xff]  }
 0x12d   : > { %v392_v23 = vpop.xlane.xlu0 %391 }
 0x12e   : > { %v407_v24 = vmul.f32 0.0078125, %v392_v23 }
 0x130   : > { %v415_v25 = vadd.f32 1e-06, %v407_v24 }
 0x131   : > { %v394_v26 = vpop.xlane.xlu1 %393  ;;  %v396_v29 = vpop.xlane.xlu0 %395 }
 0x132   : > { %2001 = vrsqrt.f32 %v415_v25  ;;  %v408_v30 = vmul.f32 0.0078125, %v394_v26  ;;  %v409_v31 = vmul.f32 0.0078125, %v396_v29 }
 0x134   : > { %v416_v33 = vadd.f32 1e-06, %v408_v30  ;;  %v417_v34 = vadd.f32 1e-06, %v409_v31 }
 0x135   : > { %v398_v37 = vpop.xlane.xlu1 %397  ;;  %v400_v38 = vpop.xlane.xlu0 %399 }
 0x136   : > { %2003 = vrsqrt.f32 %v416_v33  ;;  %v410_v39 = vmul.f32 0.0078125, %v398_v37  ;;  %v411_v42 = vmul.f32 0.0078125, %v400_v38 }
 0x137   : > { %2005 = vrsqrt.f32 %v417_v34 }
 0x138   : > { %v418_v41 = vadd.f32 1e-06, %v410_v39  ;;  %v419_v50 = vadd.f32 1e-06, %v411_v42  ;;  %v1973_v42 = vld [vmem:[%s2754_s5 + $0x70] sm:$0xff]  }
 0x139   : > { %v402_v46 = vpop.xlane.xlu1 %401  ;;  %v404_v52 = vpop.xlane.xlu0 %403 }
 0x13a   : > { %2007 = vrsqrt.f32 %v418_v41  ;;  %v412_v47 = vmul.f32 0.0078125, %v402_v46  ;;  %v413_v56 = vmul.f32 0.0078125, %v404_v52  ;;  %v1971_v41 = vld [vmem:[%s2754_s5 + $0x38] sm:$0xff]   ;;  %v1975_v46 = vld [vmem:[%s2754_s5 + $0x30] sm:$0xff]   ;;  %v1981_v52 = vld [vmem:[%s2754_s5 + $0x60] sm:$0xff]  }
 0x13c   : > { %v420_v51 = vadd.f32 1e-06, %v412_v47  ;;  %v421_v61 = vadd.f32 1e-06, %v413_v56  ;;  %v1976_v47 = vld [vmem:[%s2754_s5 + $0xb0] sm:$0xff]   ;;  %v1985_v56 = vld [vmem:[%s2754_s5 + $0x58] sm:$0xff]  }
 0x13d   : > { %v406_v53 = vpop.xlane.xlu1 %405 }
 0x13e   : > { %2009 = vrsqrt.f32 %v420_v51  ;;  %v414_v54 = vmul.f32 0.0078125, %v406_v53  ;;  %v1980_v51 = vld [vmem:[%s2754_s5 + $0xa8] sm:$0xff]   ;;  %v1982_v53 = vld [vmem:[%s2754_s5 + $0xe0] sm:$0xff]  }
 0x13f   : > { %v2002_v55 = vpop.eup %2001  ;;  %2011 = vrsqrt.f32 %v419_v50  ;;  %v1979_v50 = vld [vmem:[%s2754_s5 + $0x28] sm:$0xff]  }
 0x140   : > { %v431_v58 = vmul.f32 %v2002_v55, %v2204_v20  ;;  %v422_v59 = vadd.f32 1e-06, %v414_v54  ;;  %v1983_v54 = vld [vmem:[%s2754_s5 + $0x20] sm:$0xff]  }
 0x141   : > { %v1984_v55 = vld [vmem:[%s2754_s5 + $0xa0] sm:$0xff]  }
 0x142   : > { %v447_v63 = vmul.f32 %v445_v57, %v431_v58  ;;  %2013 = vrsqrt.f32 %v422_v59  ;;  %v1987_v58 = vld [vmem:[%s2754_s5 + $0x18] sm:$0xff]  }
 0x143   : > { %v2004_v60 = vpop.eup %2003  ;;  %2015 = vrsqrt.f32 %v421_v61  ;;  %v1988_v59 = vld [vmem:[%s2754_s5 + $0x98] sm:$0xff]   ;;  %v1990_v61 = vld [vmem:[%s2754_s5 + $0xd0] sm:$0xff]  }
 0x144   : > { %v432_v62 = vmul.f32 %v2004_v60, %v2212_v27  ;;  %v2006_v0 = vpop.eup %2005  ;;  %v462_v12 = vadd.f32 %v1688_v1, %v447_v63  ;;  %v1989_v60 = vld [vmem:[%s2754_s5 + $0x50] sm:$0xff]  }
 0x145   : > { %v433_v20 = vmul.f32 %v2006_v0, %v2207_v21  ;;  %v1992_v63 = vld [vmem:[%s2754_s5 + $0x90] sm:$0xff]   ;;  %v1993_v0 = vld [vmem:[%s2754_s5 + $0x48] sm:$0xff]  }
 0x146   : > { %v448_v4 = vmul.f32 %v445_v57, %v432_v62  ;;  %v1991_v62 = vld [vmem:[%s2754_s5 + $0x10] sm:$0xff]  }
 0x147   : > { %v2008_v7 = vpop.eup %2007  ;;  %v449_v19 = vmul.f32 %v445_v57, %v433_v20  ;;  %v1999_v20 = vld [vmem:[%s2754_s5] sm:$0xff]  }
 0x148   : > { %v463_v13 = vadd.f32 %v1688_v1, %v448_v4  ;;  %v434_v14 = vmul.f32 %v2008_v7, %v2215_v28  ;;  %v1995_v4 = vld [vmem:[%s2754_s5 + $0x8] sm:$0xff]  }
 0x149   : > { %v464_v24 = vadd.f32 %v1688_v1, %v449_v19  ;;  %v1996_v7 = vld [vmem:[%s2754_s5 + $0x88] sm:$0xff]  }
 0x14a   : > { %v470_v15 = vpack.c.bf16 %v463_v13, %v462_v12  ;;  %v450_v16 = vmul.f32 %v445_v57, %v434_v14  ;;  %v1997_v12 = vld [vmem:[%s2754_s5 + $0x40] sm:$0xff]  }
 0x14b   : > { %v2010_v17 = vpop.eup %2009  ;;  %v1998_v13 = vld [vmem:[%s2754_s5 + $0xc0] sm:$0xff]  }
 0x14c   : > { %699 = vmatmul.mubr.bf16.vlgmr.msra.gmra.mxu0 %v470_v15  ;;  %772 = vmatmul.mubr.bf16.vlgmr.msra.gmra.mxu1 %v470_v15  ;;  %v2012_v27 = vpop.eup %2011  ;;  %v465_v22 = vadd.f32 %v1688_v1, %v450_v16  ;;  %v436_v23 = vmul.f32 %v2010_v17, %v2225_v36  ;;  %v2000_v14 = vld [vmem:[%s2754_s5 + $0x80] sm:$0xff]  }
 0x14d   : > { %708 = vmatprep.mubr.bf16.mxu0 %v2105_v18  ;;  %781 = vmatprep.mubr.bf16.mxu1 %v2105_v18  ;;  %v435_v25 = vmul.f32 %v2012_v27, %v2222_v35 }
 0x14e   : > { %v471_v21 = vpack.c.bf16 %v465_v22, %v464_v24  ;;  %v452_v26 = vmul.f32 %v445_v57, %v436_v23 }
 0x14f   : > { %v2014_v28 = vpop.eup %2013  ;;  %v451_v30 = vmul.f32 %v445_v57, %v435_v25 }
 0x150   : > { %v2016_v29 = vpop.eup %2015  ;;  %v467_v31 = vadd.f32 %v1688_v1, %v452_v26  ;;  %v438_v32 = vmul.f32 %v2014_v28, %v2235_v44  ;;  %v1969_v44 = vld [vmem:[%s2754_s5 + $0x78] sm:$0xff]  }
 0x151   : > { %v466_v33 = vadd.f32 %v1688_v1, %v451_v30  ;;  %v437_v36 = vmul.f32 %v2016_v29, %v2232_v43  ;;  %v1970_v43 = vld [vmem:[%s2754_s5 + $0xf8] sm:$0xff]   ;;  %1816 = vmatprep.subr.bf16.mxu0 %v1969_v44 }
 0x152   : > { %v454_v37 = vmul.f32 %v445_v57, %v438_v32  ;;  %1856 = vmatprep.subr.bf16.mxu1 %v1970_v43  ;;  %1817 = vmatpush3.bf16.msra.mxu0 %v1971_v41 }
 0x153   : > { %v472_v34 = vpack.c.bf16 %v467_v31, %v466_v33  ;;  %v453_v35 = vmul.f32 %v445_v57, %v437_v36  ;;  %1818 = vmatprep.subr.bf16.mxu0 %v1973_v42  ;;  %v1986_v57 = vld [vmem:[%s2754_s5 + $0xd8] sm:$0xff]  }
 0x154   : > { %709 = vmatmul.mubr.bf16.gmra.mxu0 %v471_v21  ;;  %782 = vmatmul.mubr.bf16.gmra.mxu1 %v471_v21  ;;  %v469_v38 = vadd.f32 %v1688_v1, %v454_v37 }
 0x155   : > { %718 = vmatprep.mubr.bf16.mxu0 %v2105_v18  ;;  %791 = vmatprep.mubr.bf16.mxu1 %v2105_v18  ;;  %v468_v39 = vadd.f32 %v1688_v1, %v453_v35  ;;  %v1994_v1 = vld [vmem:[%s2754_s5 + $0xc8] sm:$0xff]  }
 0x156   : > { %1819 = vmatpush3.bf16.msra.mxu0 %v1975_v46 }
 0x157   : > { %v473_v40 = vpack.c.bf16 %v469_v38, %v468_v39  ;;  %1820 = vmatprep.subr.bf16.mxu0 %v1977_v48 }
 0x15a   : > { %1821 = vmatpush3.bf16.msra.mxu0 %v1979_v50 }
 0x15b   : > { %1822 = vmatprep.subr.bf16.mxu0 %v1981_v52 }
 0x15c   : > { %719 = vmatmul.mubr.bf16.gmra.mxu0 %v472_v34  ;;  %792 = vmatmul.mubr.bf16.gmra.mxu1 %v472_v34 }
 0x15d   : > { %728 = vmatprep.mubr.bf16.mxu0 %v2105_v18  ;;  %801 = vmatprep.mubr.bf16.mxu1 %v2105_v18  ;;  %v1972_v18 = vld [vmem:[%s2754_s5 + $0xb8] sm:$0xff]  }
 0x15e   : > { %1857 = vmatpush3.bf16.msra.mxu1 %v1972_v18  ;;  %1823 = vmatpush3.bf16.msra.mxu0 %v1983_v54 }
 0x15f   : > { %1858 = vmatprep.subr.bf16.mxu1 %v1974_v45  ;;  %1824 = vmatprep.subr.bf16.mxu0 %v1985_v56 }
 0x162   : > { %1859 = vmatpush3.bf16.msra.mxu1 %v1976_v47  ;;  %1825 = vmatpush3.bf16.msra.mxu0 %v1987_v58 }
 0x163   : > { %1860 = vmatprep.subr.bf16.mxu1 %v1978_v49  ;;  %1826 = vmatprep.subr.bf16.mxu0 %v1989_v60 }
 0x164   : > { %729 = vmatmul.mubr.bf16.gmra.mxu0 %v473_v40  ;;  %802 = vmatmul.mubr.bf16.gmra.mxu1 %v473_v40 }
 0x166   : > { %1861 = vmatpush3.bf16.msra.mxu1 %v1980_v51  ;;  %1827 = vmatpush3.bf16.msra.mxu0 %v1991_v62 }
 0x167   : > { %1862 = vmatprep.subr.bf16.mxu1 %v1982_v53  ;;  %1828 = vmatprep.subr.bf16.mxu0 %v1993_v0 }
 0x16a   : > { %1863 = vmatpush3.bf16.msra.mxu1 %v1984_v55  ;;  %1829 = vmatpush3.bf16.msra.mxu0 %v1995_v4 }
 0x16b   : > { %1864 = vmatprep.subr.bf16.mxu1 %v1986_v57  ;;  %1830 = vmatprep.subr.bf16.mxu0 %v1997_v12 }
 0x16e   : > { %1865 = vmatpush3.bf16.msra.mxu1 %v1988_v59  ;;  %1831 = vmatpush3.bf16.msra.mxu0 %v1999_v20 }
 0x16f   : > { %1866 = vmatprep.subr.bf16.mxu1 %v1990_v61 }
 0x172   : > { %1867 = vmatpush3.bf16.msra.mxu1 %v1992_v63 }
 0x173   : > { %1868 = vmatprep.subr.bf16.mxu1 %v1994_v1 }
 0x176   : > { %1869 = vmatpush3.bf16.msra.mxu1 %v1996_v7 }
 0x177   : > { %1870 = vmatprep.subr.bf16.mxu1 %v1998_v13 }
 0x17a   : > { %1871 = vmatpush3.bf16.msra.mxu1 %v2000_v14 }
 0x20c   : > { %v2447_v15 = vpop.f32.mrf.mxu0  ;;  %v2449_v16 = vpop.f32.mrf.mxu1 }
 0x20d   : > { %v812_v17 = vmul.f32 %v2447_v15, %v2447_v15  ;;  %v814_v19 = vmul.f32 %v2449_v16, %v2449_v16 }
 0x20e   : > { %v2455_v27 = vpop.f32.mrf.mxu0  ;;  %v2457_v22 = vpop.f32.mrf.mxu1 }
 0x20f   : > { %v844_v23 = vmul.f32 %v812_v17, %v2447_v15  ;;  %v846_v24 = vmul.f32 %v814_v19, %v2449_v16  ;;  %v813_v25 = vmul.f32 %v2455_v27, %v2455_v27  ;;  %v815_v21 = vmul.f32 %v2457_v22, %v2457_v22 }
 0x210   : > { %v2465_v26 = vpop.f32.mrf.mxu0  ;;  %v2467_v28 = vpop.f32.mrf.mxu1 }
 0x211   : > { %v876_v29 = vmul.f32 0.044715, %v844_v23  ;;  %v878_v30 = vmul.f32 0.044715, %v846_v24  ;;  %v845_v31 = vmul.f32 %v813_v25, %v2455_v27  ;;  %v847_v32 = vmul.f32 %v815_v21, %v2457_v22 }
 0x212   : > { %v816_v33 = vmul.f32 %v2465_v26, %v2465_v26  ;;  %v818_v36 = vmul.f32 %v2467_v28, %v2467_v28  ;;  %v2475_v34 = vpop.f32.mrf.mxu0  ;;  %v2477_v37 = vpop.f32.mrf.mxu1 }
 0x213   : > { %v908_v35 = vadd.f32 %v876_v29, %v2447_v15  ;;  %v910_v38 = vadd.f32 %v878_v30, %v2449_v16  ;;  %v877_v39 = vmul.f32 0.044715, %v845_v31  ;;  %v879_v40 = vmul.f32 0.044715, %v847_v32 }
 0x214   : > { %v848_v44 = vmul.f32 %v816_v33, %v2465_v26  ;;  %v850_v43 = vmul.f32 %v818_v36, %v2467_v28  ;;  %v817_v41 = vmul.f32 %v2475_v34, %v2475_v34  ;;  %v819_v18 = vmul.f32 %v2477_v37, %v2477_v37  ;;  %v2487_v42 = vpop.f32.mrf.mxu0  ;;  %v2489_v45 = vpop.f32.mrf.mxu1 }
 0x215   : > { %v940_v46 = vmul.f32 0.7978846, %v908_v35  ;;  %v942_v47 = vmul.f32 0.7978846, %v910_v38  ;;  %v909_v48 = vadd.f32 %v877_v39, %v2455_v27  ;;  %v911_v55 = vadd.f32 %v879_v40, %v2457_v22 }
 0x216   : > { %v880_v49 = vmul.f32 0.044715, %v848_v44  ;;  %v882_v50 = vmul.f32 0.044715, %v850_v43  ;;  %v849_v51 = vmul.f32 %v817_v41, %v2475_v34  ;;  %v851_v52 = vmul.f32 %v819_v18, %v2477_v37  ;;  %v2494_v53 = vpop.f32.mrf.mxu0  ;;  %v2496_v54 = vpop.f32.mrf.mxu1 }
 0x217   : > { %v820_v56 = vmul.f32 %v2487_v42, %v2487_v42  ;;  %2017 = vtanh.f32 %v940_v46  ;;  %v941_v60 = vmul.f32 0.7978846, %v909_v48  ;;  %v822_v63 = vmul.f32 %v2489_v45, %v2489_v45 }
 0x218   : > { %v912_v57 = vadd.f32 %v880_v49, %v2465_v26  ;;  %v914_v58 = vadd.f32 %v882_v50, %v2467_v28  ;;  %v881_v59 = vmul.f32 0.044715, %v849_v51  ;;  %v883_v61 = vmul.f32 0.044715, %v851_v52  ;;  %v2506_v0 = vpop.f32.mrf.mxu0  ;;  %v2509_v12 = vpop.f32.mrf.mxu1 }
 0x219   : > { %v852_v62 = vmul.f32 %v820_v56, %v2487_v42  ;;  %2019 = vtanh.f32 %v942_v47  ;;  %v854_v14 = vmul.f32 %v822_v63, %v2489_v45  ;;  %v821_v17 = vmul.f32 %v2494_v53, %v2494_v53 }
 0x21a   : > { %v944_v1 = vmul.f32 0.7978846, %v912_v57  ;;  %v946_v4 = vmul.f32 0.7978846, %v914_v58  ;;  %v913_v7 = vadd.f32 %v881_v59, %v2475_v34  ;;  %v915_v13 = vadd.f32 %v883_v61, %v2477_v37  ;;  %v2519_v21 = vpop.f32.mrf.mxu0  ;;  %v2524_v33 = vpop.f32.mrf.mxu1 }
 0x21b   : > { %v884_v20 = vmul.f32 0.044715, %v852_v62  ;;  %v943_v19 = vmul.f32 0.7978846, %v911_v55  ;;  %v823_v23 = vmul.f32 %v2496_v54, %v2496_v54  ;;  %v824_v25 = vmul.f32 %v2506_v0, %v2506_v0 }
 0x21c   : > { %2021 = vtanh.f32 %v944_v1  ;;  %v945_v24 = vmul.f32 0.7978846, %v913_v7  ;;  %v947_v29 = vmul.f32 0.7978846, %v915_v13  ;;  %v853_v31 = vmul.f32 %v821_v17, %v2494_v53  ;;  %v2537_v49 = vpop.f32.mrf.mxu0  ;;  %v2540_v51 = vpop.f32.mrf.mxu1 }
 0x21d   : > { %2023 = vtanh.f32 %v946_v4  ;;  %v916_v30 = vadd.f32 %v884_v20, %v2487_v42  ;;  %v855_v32 = vmul.f32 %v823_v23, %v2496_v54  ;;  %v886_v36 = vmul.f32 0.044715, %v854_v14 }
 0x21e   : > { %2025 = vtanh.f32 %v941_v60  ;;  %v826_v35 = vmul.f32 %v2509_v12, %v2509_v12  ;;  %v885_v38 = vmul.f32 0.044715, %v853_v31  ;;  %v825_v39 = vmul.f32 %v2519_v21, %v2519_v21  ;;  %v2553_v31 = vpop.f32.mrf.mxu0 }
 0x21f   : > { %2027 = vtanh.f32 %v943_v19  ;;  %v887_v40 = vmul.f32 0.044715, %v855_v32  ;;  %v856_v44 = vmul.f32 %v824_v25, %v2506_v0  ;;  %v827_v43 = vmul.f32 %v2524_v33, %v2524_v33 }
 0x220   : > { %2029 = vtanh.f32 %v945_v24  ;;  %v948_v41 = vmul.f32 0.7978846, %v916_v30  ;;  %v857_v18 = vmul.f32 %v825_v39, %v2519_v21  ;;  %v918_v46 = vadd.f32 %v886_v36, %v2489_v45 }
 0x221   : > { %2031 = vtanh.f32 %v947_v29  ;;  %v858_v47 = vmul.f32 %v826_v35, %v2509_v12  ;;  %v859_v48 = vmul.f32 %v827_v43, %v2524_v33  ;;  %v917_v50 = vadd.f32 %v885_v38, %v2494_v53  ;;  %v2555_v38 = vpop.f32.mrf.mxu1 }
 0x222   : > { %v919_v55 = vadd.f32 %v887_v40, %v2496_v54  ;;  %v888_v56 = vmul.f32 0.044715, %v856_v44  ;;  %v889_v57 = vmul.f32 0.044715, %v857_v18  ;;  %2033 = vtanh.f32 %v948_v41 }
 0x223   : > { %v891_v58 = vmul.f32 0.044715, %v859_v48  ;;  %v828_v59 = vmul.f32 %v2537_v49, %v2537_v49  ;;  %v950_v61 = vmul.f32 0.7978846, %v918_v46  ;;  %v890_v62 = vmul.f32 0.044715, %v858_v47 }
 0x224   : > { %v2018_v52 = vpop.eup %2017  ;;  %v830_v63 = vmul.f32 %v2540_v51, %v2540_v51  ;;  %v949_v1 = vmul.f32 0.7978846, %v917_v50  ;;  %v921_v4 = vadd.f32 %v889_v57, %v2519_v21  ;;  %v951_v20 = vmul.f32 0.7978846, %v919_v55 }
 0x225   : > { %v1004_v13 = vadd.f32 1.0, %v2018_v52  ;;  %v920_v14 = vadd.f32 %v888_v56, %v2506_v0  ;;  %v923_v17 = vadd.f32 %v891_v58, %v2524_v33  ;;  %v860_v24 = vmul.f32 %v828_v59, %v2537_v49  ;;  %v2559_v56 = vpop.f32.mrf.mxu0 }
 0x226   : > { %v2020_v60 = vpop.eup %2019  ;;  %v953_v23 = vmul.f32 0.7978846, %v921_v4  ;;  %2035 = vtanh.f32 %v950_v61  ;;  %v922_v29 = vadd.f32 %v890_v62, %v2509_v12  ;;  %v862_v30 = vmul.f32 %v830_v63, %v2540_v51 }
 0x227   : > { %v1006_v25 = vadd.f32 1.0, %v2020_v60  ;;  %2037 = vtanh.f32 %v949_v1  ;;  %v955_v35 = vmul.f32 0.7978846, %v923_v17  ;;  %v1036_v40 = vmul.f32 0.5, %v1004_v13  ;;  %v2562_v60 = vpop.f32.mrf.mxu1 }
 0x228   : > { %2039 = vtanh.f32 %v951_v20  ;;  %v952_v43 = vmul.f32 0.7978846, %v920_v14  ;;  %v892_v18 = vmul.f32 0.044715, %v860_v24  ;;  %v829_v46 = vmul.f32 %v2553_v31, %v2553_v31 }
 0x229   : > { %v2022_v7 = vpop.eup %2021  ;;  %2041 = vtanh.f32 %v953_v23  ;;  %v1038_v48 = vmul.f32 0.5, %v1006_v25  ;;  %v954_v52 = vmul.f32 0.7978846, %v922_v29  ;;  %v894_v55 = vmul.f32 0.044715, %v862_v30  ;;  %v2575_v23 = vpop.f32.mrf.mxu0 }
 0x22a   : > { %v2024_v19 = vpop.eup %2023  ;;  %v1008_v36 = vadd.f32 1.0, %v2022_v7  ;;  %2043 = vtanh.f32 %v955_v35  ;;  %v861_v59 = vmul.f32 %v829_v46, %v2553_v31  ;;  %v2565_v61 = vmul.f32 %v1036_v40, %v2447_v15  ;;  %v2587_v40 = vpop.f32.mrf.mxu1 }
 0x22b   : > { %v2026_v32 = vpop.eup %2025  ;;  %v1010_v44 = vadd.f32 1.0, %v2024_v19  ;;  %2045 = vtanh.f32 %v952_v43  ;;  %v924_v4 = vadd.f32 %v892_v18, %v2537_v49  ;;  %v831_v13 = vmul.f32 %v2555_v38, %v2555_v38 }
 0x22c   : > { %v2028_v39 = vpop.eup %2027  ;;  %v1005_v50 = vadd.f32 1.0, %v2026_v32  ;;  %v1040_v58 = vmul.f32 0.5, %v1008_v36  ;;  %v893_v7 = vmul.f32 0.044715, %v861_v59  ;;  %v926_v17 = vadd.f32 %v894_v55, %v2540_v51 }
 0x22d   : > { %v2030_v41 = vpop.eup %2029  ;;  %v1007_v57 = vadd.f32 1.0, %v2028_v39  ;;  %v1042_v62 = vmul.f32 0.5, %v1010_v44  ;;  %v832_v19 = vmul.f32 %v2559_v56, %v2559_v56  ;;  %v834_v15 = vmul.f32 %v2562_v60, %v2562_v60 }
 0x22e   : > { %v2032_v47 = vpop.eup %2031  ;;  %v1009_v63 = vadd.f32 1.0, %v2030_v41  ;;  %v1037_v14 = vmul.f32 0.5, %v1005_v50  ;;  %v2578_v25 = vmul.f32 %v1040_v58, %v2465_v26  ;;  %v925_v29 = vadd.f32 %v893_v7, %v2553_v31  ;;  %v2589_v50 = vpop.f32.mrf.mxu0 }
 0x22f   : > { %v1011_v1 = vadd.f32 1.0, %v2032_v47  ;;  %v2034_v20 = vpop.eup %2033  ;;  %v1039_v24 = vmul.f32 0.5, %v1007_v57  ;;  %v863_v30 = vmul.f32 %v831_v13, %v2555_v38  ;;  %v2583_v32 = vmul.f32 %v1042_v62, %v2467_v28 }
 0x230   : > { %v1041_v36 = vmul.f32 0.5, %v1009_v63  ;;  %v864_v35 = vmul.f32 %v832_v19, %v2559_v56  ;;  %v866_v39 = vmul.f32 %v834_v15, %v2562_v60  ;;  %v1012_v43 = vadd.f32 1.0, %v2034_v20 }
 0x231   : > { %v1043_v44 = vmul.f32 0.5, %v1011_v1  ;;  %v956_v41 = vmul.f32 0.7978846, %v924_v4  ;;  %v895_v18 = vmul.f32 0.044715, %v863_v30  ;;  %2047 = vtanh.f32 %v954_v52 }
 0x232   : > { %v958_v26 = vmul.f32 0.7978846, %v926_v17  ;;  %v896_v46 = vmul.f32 0.044715, %v864_v35  ;;  %v898_v47 = vmul.f32 0.044715, %v866_v39  ;;  %v2592_v28 = vmul.f32 %v1038_v48, %v2449_v16  ;;  %v2607_v16 = vpop.f32.mrf.mxu1  ;;  %v2619_v17 = vpop.f32.mrf.mxu0 }
 0x233   : > { %v2036_v55 = vpop.eup %2035  ;;  %v2595_v57 = vmul.f32 %v1037_v14, %v2455_v27  ;;  %v957_v58 = vmul.f32 0.7978846, %v925_v29  ;;  %v927_v59 = vadd.f32 %v895_v18, %v2555_v38  ;;  %v2599_v63 = vmul.f32 %v1039_v24, %v2457_v22 }
 0x234   : > { %v2038_v62 = vpop.eup %2037  ;;  %v2604_v1 = vmul.f32 %v1041_v36, %v2475_v34  ;;  %v928_v4 = vadd.f32 %v896_v46, %v2559_v56  ;;  %2049 = vtanh.f32 %v956_v41  ;;  %v930_v7 = vadd.f32 %v898_v47, %v2562_v60  ;;  %v2628_v39 = vpop.f32.mrf.mxu1 }
 0x235   : > { %v2040_v48 = vpop.eup %2039  ;;  %v833_v22 = vmul.f32 %v2575_v23, %v2575_v23  ;;  %v2615_v20 = vmul.f32 %v1043_v44, %v2477_v37  ;;  %v2617_v34 = vmul.f32 0.5, %v1012_v43  ;;  %2051 = vtanh.f32 %v958_v26 }
 0x236   : > { %v2042_v13 = vpop.eup %2041  ;;  %v959_v14 = vmul.f32 0.7978846, %v927_v59  ;;  %v1013_v19 = vadd.f32 1.0, %v2038_v62  ;;  %2053 = vtanh.f32 %v957_v58  ;;  %v835_v24 = vmul.f32 %v2587_v40, %v2587_v40  ;;  %v2635_v59 = vpop.f32.mrf.mxu0 }
 0x237   : > { %v865_v15 = vmul.f32 %v833_v22, %v2575_v23  ;;  %v2044_v29 = vpop.eup %2043  ;;  %v1015_v30 = vadd.f32 1.0, %v2040_v48  ;;  %v960_v36 = vmul.f32 0.7978846, %v928_v4  ;;  %v836_v37 = vmul.f32 %v2589_v50, %v2589_v50 }
 0x238   : > { %v838_v35 = vmul.f32 %v2607_v16, %v2607_v16  ;;  %v2046_v44 = vpop.eup %2045  ;;  %v1017_v43 = vadd.f32 1.0, %v2042_v13  ;;  %v962_v41 = vmul.f32 0.7978846, %v930_v7  ;;  %v867_v26 = vmul.f32 %v835_v24, %v2587_v40  ;;  %v2650_v11 = vpop.f32.mrf.mxu0 }
 0x239   : > { %v897_v18 = vmul.f32 0.044715, %v865_v15  ;;  %2055 = vtanh.f32 %v959_v14  ;;  %v868_v46 = vmul.f32 %v836_v37, %v2589_v50  ;;  %v837_v58 = vmul.f32 %v2619_v17, %v2619_v17 }
 0x23a   : > { %v870_v47 = vmul.f32 %v838_v35, %v2607_v16  ;;  %v1019_v62 = vadd.f32 1.0, %v2044_v29  ;;  %v899_v48 = vmul.f32 0.044715, %v867_v26  ;;  %v839_v7 = vmul.f32 %v2628_v39, %v2628_v39  ;;  %v2644_v35 = vpop.f32.mrf.mxu1 }
 0x23b   : > { %v929_v4 = vadd.f32 %v897_v18, %v2575_v23  ;;  %2057 = vtanh.f32 %v960_v36  ;;  %v900_v22 = vmul.f32 0.044715, %v868_v46  ;;  %v869_v14 = vmul.f32 %v837_v58, %v2619_v17 }
 0x23c   : > { %v902_v13 = vmul.f32 0.044715, %v870_v47  ;;  %2059 = vtanh.f32 %v962_v41  ;;  %v931_v24 = vadd.f32 %v899_v48, %v2587_v40  ;;  %v840_v37 = vmul.f32 %v2635_v59, %v2635_v59 }
 0x23d   : > { %v961_v15 = vmul.f32 0.7978846, %v929_v4  ;;  %v932_v29 = vadd.f32 %v900_v22, %v2589_v50  ;;  %v901_v26 = vmul.f32 0.044715, %v869_v14  ;;  %v871_v36 = vmul.f32 %v839_v7, %v2628_v39  ;;  %v2653_v14 = vpop.f32.mrf.mxu1 }
 0x23e   : > { %v934_v18 = vadd.f32 %v902_v13, %v2607_v16  ;;  %v2048_v46 = vpop.eup %2047  ;;  %v1014_v47 = vadd.f32 1.0, %v2036_v55  ;;  %v1045_v27 = vmul.f32 0.5, %v1013_v19  ;;  %v963_v41 = vmul.f32 0.7978846, %v931_v24 }
 0x23f   : > { %2061 = vtanh.f32 %v961_v15  ;;  %v1047_v58 = vmul.f32 0.5, %v1015_v30  ;;  %v1016_v4 = vadd.f32 1.0, %v2046_v44  ;;  %v933_v48 = vadd.f32 %v901_v26, %v2619_v17 }
 0x240   : > { %v903_v52 = vmul.f32 0.044715, %v871_v36  ;;  %v1049_v10 = vmul.f32 0.5, %v1017_v43  ;;  %2063 = vtanh.f32 %v963_v41  ;;  %v964_v22 = vmul.f32 0.7978846, %v932_v29 }
 0x241   : > { %v872_v13 = vmul.f32 %v840_v37, %v2635_v59  ;;  %v2050_v7 = vpop.eup %2049  ;;  %v1051_v9 = vmul.f32 0.5, %v1019_v62  ;;  %v966_v55 = vmul.f32 0.7978846, %v934_v18  ;;  %v842_v30 = vmul.f32 %v2644_v35, %v2644_v35 }
 0x242   : > { %v935_v19 = vadd.f32 %v903_v52, %v2628_v39  ;;  %v2658_v44 = vpop.eup %2051  ;;  %v1018_v15 = vadd.f32 1.0, %v2048_v46  ;;  %v965_v24 = vmul.f32 0.7978846, %v933_v48  ;;  %v841_v43 = vmul.f32 %v2650_v11, %v2650_v11 }
 0x243   : > { %v904_v26 = vmul.f32 0.044715, %v872_v13  ;;  %v2054_v29 = vpop.eup %2053  ;;  %v1077_v37 = vmul.f32 %v1045_v27, %v2494_v53  ;;  %v874_v62 = vmul.f32 %v842_v30, %v2644_v35  ;;  %v843_v52 = vmul.f32 %v2653_v14, %v2653_v14 }
 0x244   : > { %v967_v36 = vmul.f32 0.7978846, %v935_v19  ;;  %v1081_v18 = vmul.f32 %v1049_v10, %v2519_v21  ;;  %2065 = vtanh.f32 %v964_v22  ;;  %v873_v46 = vmul.f32 %v841_v43, %v2650_v11 }
 0x245   : > { %v936_v41 = vadd.f32 %v904_v26, %v2635_v59  ;;  %v1083_v48 = vmul.f32 %v1051_v9, %v2524_v33  ;;  %2067 = vtanh.f32 %v966_v55  ;;  %v906_v13 = vmul.f32 0.044715, %v874_v62 }
 0x246   : > { %v875_v8 = vmul.f32 %v843_v52, %v2653_v14  ;;  %v2056_v53 = vpop.eup %2055  ;;  %v1021_v27 = vadd.f32 1.0, %v2054_v29  ;;  %2069 = vtanh.f32 %v965_v24  ;;  %v905_v30 = vmul.f32 0.044715, %v873_v46 }
 0x247   : > { %v968_v19 = vmul.f32 0.7978846, %v936_v41  ;;  %2071 = vtanh.f32 %v967_v36  ;;  %v938_v6 = vadd.f32 %v906_v13, %v2644_v35  ;;  %v1101_v21 = vpack.c.bf16 %v2604_v1, %v2595_v57 }
 0x248   : > { %v907_v10 = vmul.f32 0.044715, %v875_v8  ;;  %v2058_v22 = vpop.eup %2057  ;;  %v1079_v26 = vmul.f32 %v1047_v58, %v2496_v54  ;;  %v1048_v9 = vmul.f32 0.5, %v1016_v4  ;;  %v937_v33 = vadd.f32 %v905_v30, %v2650_v11 }
 0x249   : > { %2073 = vtanh.f32 %v968_v19  ;;  %v2060_v55 = vpop.eup %2059  ;;  %v1023_v43 = vadd.f32 1.0, %v2056_v53  ;;  %v970_v29 = vmul.f32 0.7978846, %v938_v6  ;;  %1404 = vmatprep.mubr.bf16.mxu0 %v1101_v21  ;;  %v1103_v36 = vpack.c.bf16 %v2615_v20, %v2599_v63 }
 0x24a   : > { %v939_v24 = vadd.f32 %v907_v10, %v2653_v14  ;;  %v1050_v8 = vmul.f32 0.5, %v1018_v15  ;;  %v969_v62 = vmul.f32 0.7978846, %v937_v33  ;;  %v2766_v57 = vpack.c.bf16 %v2578_v25, %v2565_v61 }
 0x24b   : > { %v1105_v54 = vpack.c.bf16 %v1081_v18, %v1077_v37  ;;  %v1107_v1 = vpack.c.bf16 %v1083_v48, %v1079_v26  ;;  %v1046_v4 = vmul.f32 0.5, %v1014_v47  ;;  %v1053_v52 = vmul.f32 0.5, %v1021_v27  ;;  %1469 = vmatprep.mubr.bf16.mxu1 %v1103_v36 }
 0x24c   : > { %1405 = vmatmul.mubr.bf16.vlgmr.msra.gmra.mxu0 %v2766_v57  ;;  %v2062_v58 = vpop.eup %2061  ;;  %2075 = vtanh.f32 %v970_v29  ;;  %v971_v41 = vmul.f32 0.7978846, %v939_v24  ;;  %v1080_v6 = vmul.f32 %v1048_v9, %v2506_v0  ;;  %v1024_v46 = vadd.f32 1.0, %v2058_v22 }
 0x24d   : > { %v1025_v13 = vadd.f32 1.0, %v2062_v58  ;;  %2077 = vtanh.f32 %v969_v62  ;;  %v2767_v63 = vpack.c.bf16 %v2583_v32, %v2592_v28  ;;  %1412 = vmatprep.mubr.bf16.mxu0 %v1105_v54  ;;  %v2064_v61 = vpop.eup %2063  ;;  %v1076_v25 = vmul.f32 %v2617_v34, %v2487_v42 }
 0x24e   : > { %v1020_v20 = vadd.f32 1.0, %v2050_v7  ;;  %v1055_v47 = vmul.f32 0.5, %v1023_v43  ;;  %2079 = vtanh.f32 %v971_v41  ;;  %v1082_v15 = vmul.f32 %v1050_v8, %v2509_v12 }
 0x24f   : > { %1470 = vmatmul.mubr.bf16.vlgmr.msra.gmra.mxu1 %v2767_v63  ;;  %v1026_v37 = vadd.f32 1.0, %v2060_v55  ;;  %v1057_v0 = vmul.f32 0.5, %v1025_v13  ;;  %v1027_v18 = vadd.f32 1.0, %v2064_v61  ;;  %v1078_v48 = vmul.f32 %v1046_v4, %v2489_v45 }
 0x250   : > { %1477 = vmatprep.mubr.bf16.mxu1 %v1107_v1  ;;  %v1022_v53 = vadd.f32 1.0, %v2658_v44  ;;  %v1085_v32 = vmul.f32 %v1053_v52, %v2553_v31  ;;  %v1056_v28 = vmul.f32 0.5, %v1024_v46  ;;  %v1104_v42 = vpack.c.bf16 %v1080_v6, %v1076_v25 }
 0x251   : > { %v1089_v27 = vmul.f32 %v1057_v0, %v2575_v23  ;;  %v1059_v19 = vmul.f32 0.5, %v1027_v18  ;;  %v2066_v34 = vpop.eup %2065  ;;  %v1052_v7 = vmul.f32 0.5, %v1020_v20  ;;  %v1087_v30 = vmul.f32 %v1055_v47, %v2555_v38 }
 0x252   : > { %v2068_v10 = vpop.eup %2067  ;;  %v1058_v12 = vmul.f32 0.5, %v1026_v37  ;;  %v1106_v22 = vpack.c.bf16 %v1082_v15, %v1078_v48  ;;  %v1054_v9 = vmul.f32 0.5, %v1022_v53  ;;  %v1088_v31 = vmul.f32 %v1056_v28, %v2559_v56 }
 0x253   : > { %v1091_v21 = vmul.f32 %v1059_v19, %v2587_v40  ;;  %v1109_v45 = vpack.c.bf16 %v1089_v27, %v1085_v32  ;;  %v2070_v26 = vpop.eup %2069  ;;  %v1084_v55 = vmul.f32 %v1052_v7, %v2537_v49  ;;  %v1028_v40 = vadd.f32 1.0, %v2066_v34  ;;  %v2711_v34 = vld [vmem:[%s322_s8] ss:$0 sm:$0xff] }
 0x254   : > { %1413 = vmatmul.mubr.bf16.gmra.mxu0 %v1104_v42  ;;  %v2072_v44 = vpop.eup %2071  ;;  %v1090_v38 = vmul.f32 %v1058_v12, %v2562_v60  ;;  %v1029_v43 = vadd.f32 1.0, %v2070_v26  ;;  %v1086_v8 = vmul.f32 %v1054_v9, %v2540_v51  ;;  %v1030_v62 = vadd.f32 1.0, %v2068_v10 }
 0x255   : > { %1420 = vmatprep.mubr.bf16.mxu0 %v1109_v45  ;;  %v1111_v23 = vpack.c.bf16 %v1091_v21, %v1087_v30  ;;  %v1031_v24 = vadd.f32 1.0, %v2072_v44  ;;  %v1108_v57 = vpack.c.bf16 %v1088_v31, %v1084_v55  ;;  %v1060_v41 = vmul.f32 0.5, %v1028_v40 }
 0x256   : > { %v2074_v33 = vpop.eup %2073  ;;  %v1061_v4 = vmul.f32 0.5, %v1029_v43  ;;  %v1110_v49 = vpack.c.bf16 %v1090_v38, %v1086_v8  ;;  %v1062_v13 = vmul.f32 0.5, %v1030_v62 }
 0x257   : > { %1478 = vmatmul.mubr.bf16.gmra.mxu1 %v1106_v22  ;;  %v1032_v29 = vadd.f32 1.0, %v2074_v33  ;;  %v1063_v60 = vmul.f32 0.5, %v1031_v24  ;;  %v1092_v15 = vmul.f32 %v1060_v41, %v2589_v50 }
 0x258   : > { %1485 = vmatprep.mubr.bf16.mxu1 %v1111_v23  ;;  %v1093_v25 = vmul.f32 %v1061_v4, %v2619_v17  ;;  %v1094_v18 = vmul.f32 %v1062_v13, %v2607_v16 }
 0x259   : > { %v2076_v36 = vpop.eup %2075  ;;  %v1064_v56 = vmul.f32 0.5, %v1032_v29  ;;  %v1095_v37 = vmul.f32 %v1063_v60, %v2628_v39 }
 0x25a   : > { %v2078_v54 = vpop.eup %2077  ;;  %v1034_v1 = vadd.f32 1.0, %v2076_v36 }
 0x25b   : > { %v2080_v58 = vpop.eup %2079  ;;  %v1033_v52 = vadd.f32 1.0, %v2078_v54  ;;  %v1096_v61 = vmul.f32 %v1064_v56, %v2635_v59 }
 0x25c   : > { %1421 = vmatmul.mubr.bf16.gmra.mxu0 %v1108_v57  ;;  %v1066_v6 = vmul.f32 0.5, %v1034_v1  ;;  %v1035_v46 = vadd.f32 1.0, %v2080_v58 }
 0x25d   : > { %v1065_v63 = vmul.f32 0.5, %v1033_v52  ;;  %v1112_v32 = vpack.c.bf16 %v1096_v61, %v1092_v15 }
 0x25e   : > { %v1067_v51 = vmul.f32 0.5, %v1035_v46  ;;  %v1098_v20 = vmul.f32 %v1066_v6, %v2644_v35  ;;  %v2768_v6 = vld [vmem:[#allocation2_spill] sm:$0xff] }
 0x25f   : > { %1486 = vmatmul.mubr.bf16.gmra.mxu1 %v1110_v49  ;;  %v1097_v47 = vmul.f32 %v1065_v63, %v2650_v11 }
 0x260   : > { %v1099_v0 = vmul.f32 %v1067_v51, %v2653_v14  ;;  %v1114_v59 = vpack.c.bf16 %v1098_v20, %v1094_v18 }
 0x261   : > { %v1113_v48 = vpack.c.bf16 %v1097_v47, %v1093_v25 }
 0x262   : > { %v1115_v53 = vpack.c.bf16 %v1099_v0, %v1095_v37 }
 0x263   : > { %1428 = vmatprep.mubr.bf16.mxu0 %v1113_v48 }
 0x264   : > { %1493 = vmatprep.mubr.bf16.mxu1 %v1115_v53  ;;  %1429 = vmatmul.mubr.bf16.gmra.mxu0 %v1112_v32 }
 0x267   : > { %1494 = vmatmul.mubr.bf16.gmra.mxu1 %v1114_v59 }
 0x30c   : > { %v1832_v17 = vpop.f32.mrf.mxu0 }
 0x30e   : > { %v1833_v11 = vpop.f32.mrf.mxu0 }
 0x30f   : > { %v1872_v35 = vpop.f32.mrf.mxu1  ;;  %v1834_v28 = vadd.f32 %v1833_v11, %v1832_v17  ;;  %v2769_v17 = vld [vmem:[#allocation3_spill] sm:$0xff]  ;;  %v2770_v11 = vld [vmem:[#allocation4_spill] sm:$0xff] }
 0x310   : > { %v1835_v27 = vpop.f32.mrf.mxu0 }
 0x311   : > { %v1873_v50 = vpop.f32.mrf.mxu1 }
 0x312   : > { %v1874_v39 = vadd.f32 %v1873_v50, %v1872_v35  ;;  %v1836_v14 = vpop.f32.mrf.mxu0 }
 0x313   : > { %v1875_v16 = vpop.f32.mrf.mxu1  ;;  %v1837_v42 = vadd.f32 %v1836_v14, %v1835_v27 }
 0x314   : > { %v1472_v19 = vadd.f32 %v1874_v39, %v1834_v28  ;;  %v1838_v30 = vpop.f32.mrf.mxu0 }
 0x315   : > { %v1876_v7 = vpop.f32.mrf.mxu1 }
 0x316   : > { %v1877_v10 = vadd.f32 %v1876_v7, %v1875_v16  ;;  %v1839_v21 = vpop.f32.mrf.mxu0  ;;  %v1509_v22 = vmul.f32 %v2711_v34, %v1472_v19 }
 0x317   : > { %v1878_v12 = vpop.f32.mrf.mxu1  ;;  %v1840_v26 = vadd.f32 %v1839_v21, %v1838_v30  ;;  %v2772_v21 = vld [vmem:[#allocation6_spill] sm:$0xff] }
 0x318   : > { %v1475_v45 = vadd.f32 %v1877_v10, %v1837_v42  ;;  %v1841_v9 = vpop.f32.mrf.mxu0  ;;  %v1517_v38 = vadd.f32 %v2167_v2, %v1509_v22  ;;  %v2771_v10 = vld [vmem:[#allocation5_spill] sm:$0xff] }
 0x319   : > { %v1879_v44 = vpop.f32.mrf.mxu1 }
 0x31a   : > { %v1510_v31 = vmul.f32 %v2711_v34, %v1475_v45  ;;  %v1880_v23 = vadd.f32 %v1879_v44, %v1878_v12  ;;  %v1842_v55 = vpop.f32.mrf.mxu0 }
 0x31b   : > { %v1881_v33 = vpop.f32.mrf.mxu1  ;;  %v1843_v40 = vadd.f32 %v1842_v55, %v1841_v9 }
 0x31c   : > { %v1518_v43 = vadd.f32 %v2173_v5, %v1510_v31  ;;  %v1480_v29 = vadd.f32 %v1880_v23, %v1840_v26  ;;  %v1844_v36 = vpop.f32.mrf.mxu0 }
 0x31d   : > { %v1882_v24 = vpop.f32.mrf.mxu1 }
 0x31e   : > { %v1793_v8 = vpack.c.bf16 %v1518_v43, %v1517_v38  ;;  %v1883_v62 = vadd.f32 %v1882_v24, %v1881_v33  ;;  %v1845_v54 = vpop.f32.mrf.mxu0  ;;  %v1511_v2 = vmul.f32 %v2711_v34, %v1480_v29 }
 0x31f   : > { %v1884_v57 = vpop.f32.mrf.mxu1  ;;  %v1846_v5 = vadd.f32 %v1845_v54, %v1844_v36 }
 0x320   : > { %1794 = vst [vmem:[%s2722_s11] sm:$0xff] %v1793_v8   ;;  %v1483_v56 = vadd.f32 %v1883_v62, %v1843_v40  ;;  %v1847_v58 = vpop.f32.mrf.mxu0  ;;  %v1519_v60 = vadd.f32 %v2169_v3, %v1511_v2 }
 0x321   : > { %v1885_v1 = vpop.f32.mrf.mxu1 }
 0x322   : > { %v1512_v4 = vmul.f32 %v2711_v34, %v1483_v56  ;;  %v1886_v52 = vadd.f32 %v1885_v1, %v1884_v57  ;;  %v1848_v41 = vpop.f32.mrf.mxu0 }
 0x323   : > { %v1887_v49 = vpop.f32.mrf.mxu1  ;;  %v1849_v63 = vadd.f32 %v1848_v41, %v1847_v58 }
 0x324   : > { %v1520_v46 = vadd.f32 %v2768_v6, %v1512_v4  ;;  %v1488_v13 = vadd.f32 %v1886_v52, %v1846_v5  ;;  %v1850_v20 = vpop.f32.mrf.mxu0 }
 0x325   : > { %v1888_v61 = vpop.f32.mrf.mxu1 }
 0x326   : > { %v1798_v51 = vpack.c.bf16 %v1520_v46, %v1519_v60  ;;  %v1889_v25 = vadd.f32 %v1888_v61, %v1887_v49  ;;  %v1513_v15 = vmul.f32 %v2711_v34, %v1488_v13  ;;  %v1851_v0 = vpop.f32.mrf.mxu0 }
 0x327   : > { %v1890_v47 = vpop.f32.mrf.mxu1  ;;  %v1852_v18 = vadd.f32 %v1851_v0, %v1850_v20 }
 0x328   : > { %1813 = vst [vmem:[%s2722_s11 + $0x8] sm:$0xff] %v1798_v51   ;;  %v1491_v37 = vadd.f32 %v1889_v25, %v1849_v63  ;;  %v1853_v32 = vpop.f32.mrf.mxu0  ;;  %v1521_v35 = vadd.f32 %v2769_v17, %v1513_v15 }
 0x329   : > { %v1891_v48 = vpop.f32.mrf.mxu1 }
 0x32a   : > { %v1514_v53 = vmul.f32 %v2711_v34, %v1491_v37  ;;  %v1892_v3 = vadd.f32 %v1891_v48, %v1890_v47  ;;  %v1854_v27 = vpop.f32.mrf.mxu0 }
 0x32b   : > { %v1893_v59 = vpop.f32.mrf.mxu1  ;;  %v1855_v39 = vadd.f32 %v1854_v27, %v1853_v32 }
 0x32c   : > { %v1522_v28 = vadd.f32 %v2770_v11, %v1514_v53  ;;  %v1496_v50 = vadd.f32 %v1892_v3, %v1852_v18 }
 0x32d   : > { %v1894_v16 = vpop.f32.mrf.mxu1 }
 0x32e   : > { %v1803_v14 = vpack.c.bf16 %v1522_v28, %v1521_v35  ;;  %v1895_v19 = vadd.f32 %v1894_v16, %v1893_v59  ;;  %v1515_v42 = vmul.f32 %v2711_v34, %v1496_v50 }
 0x330   : > { %1814 = vst [vmem:[%s2722_s11 + $0x10] sm:$0xff] %v1803_v14   ;;  %v1499_v7 = vadd.f32 %v1895_v19, %v1855_v39  ;;  %v1523_v12 = vadd.f32 %v2771_v10, %v1515_v42 }
 0x332   : > { %v1516_v30 = vmul.f32 %v2711_v34, %v1499_v7 }
 0x334   : > { %v1524_v22 = vadd.f32 %v2772_v21, %v1516_v30 }
 0x336   : > { %v1808_v45 = vpack.c.bf16 %v1524_v22, %v1523_v12 }
 0x338   : > { %1815 = vst [vmem:[%s2722_s11 + $0x18] sm:$0xff] %v1808_v45  }
 0x339 PF: > { %s16_s23 = sadd.s32 1, %s2103_s23   ;;  %s2773_s21 = smov %s2099_s22 }
 0x33a   : > { %p13_p5 = scmp.ge.s32.totalorder %s16_s23, 4   ;;  %s2774_s22 = smov %s2776_s24 }
 0x33c   :  { %15 = sbr.rel (!%p13_p5) target bundleno = 2 (0x2), region = 83 }

// kernel: _lambda_.23
= control target key start
LH: loop header
LB: loop body
LE: loop exit
PB: predicated region body
PF: predicated region fallthrough
CT: control target
= control target key end

     0   :  { %s3114_s18 = smov 0   ;;  %s3958_s0 = inlined_call_operand.vmem [shape: bf16[2,64,128], index: 0, kind: input, shape index: {}]   ;;  %s3959_s1 = inlined_call_operand.vmem [shape: bf16[2,128,128], index: 1, kind: input, shape index: {}]   ;;  %s3960_s2 = inlined_call_operand.vmem [shape: bf16[128,128], index: 2, kind: input, shape index: {}]   ;;  %s3961_s3 = inlined_call_operand.vmem [shape: bf16[128,256], index: 3, kind: input, shape index: {}]   ;;  %s3962_s4 = inlined_call_operand.vmem [shape: bf16[128,128], index: 4, kind: input, shape index: {}]   ;;  %s3963_s5 = inlined_call_operand.vmem [shape: bf16[2,64,128], index: 5, kind: output, shape index: {}]  }
   0x1 LB: > { %s2284_s19 = sadd.s32 4294967295, %s3077_s18   ;;  %p2288_p0 = scmp.ge.s32.totalorder %s3077_s18, 1  ;;  %s3077_s18 = sphi %s3114_s18, %s15_s18  }
   0x2   : > { %p197_p1 = scmp.lt.s32.totalorder %s3077_s18, 3 }
   0x4   : > { %p198_p2 = pnand %p2288_p0, %p197_p1 }
   0x6   : > { %201 = sbr.rel (%p198_p2) target bundleno = 2412 (0x96c), region = 40 }
   0xb   : > { %p230_p3 = scmp.lt.s32.totalorder %s2284_s19, 1  ;;  %v2879_v0 = vld [vmem:[%s3961_s3 + $0x74] ss:$8 sps:$4 sm:$0xff]   ;;  %v2881_v1 = vld [vmem:[%s3961_s3 + $0x70] ss:$8 sps:$4 sm:$0xff]   ;;  %v3079_v2 = vmov 0  }
   0xc   : > { %680 = vmatprep.mubr.bf16.mxu1 %v3079_v2  ;;  %648 = vmatprep.subr.bf16.mxu1 %v2879_v0  ;;  %v2882_v3 = vld [vmem:[%s3961_s3 + $0x64] ss:$8 sps:$4 sm:$0xff]   ;;  %v2884_v4 = vld [vmem:[%s3961_s3 + $0x60] ss:$8 sps:$4 sm:$0xff]   ;;  %v2885_v5 = vld [vmem:[%s3961_s3 + $0x54] ss:$8 sps:$4 sm:$0xff]  }
   0xd   : > { %s3991_s19 = smov (!%p230_p3, %s2284_s19), 1  ;;  %649 = vmatpush1.bf16.msra.mxu1 %v2881_v1  ;;  %v2887_v10 = vld [vmem:[%s3961_s3 + $0x50] ss:$8 sps:$4 sm:$0xff]   ;;  %v2888_v11 = vld [vmem:[%s3961_s3 + $0x44] ss:$8 sps:$4 sm:$0xff]   ;;  %s3080_s7 = smov 96  }
   0xe   : > { %s2361_s28 = sshll.u32 %s3991_s19, 5  ;;  %650 = vmatprep.subr.bf16.mxu1 %v2882_v3  ;;  %s2362_s11 = sshll.u32 %s3991_s19, 6  ;;  %v2890_v15 = vld [vmem:[%s3961_s3 + $0x40] ss:$8 sps:$4 sm:$0xff]   ;;  %v2891_v16 = vld [vmem:[%s3961_s3 + $0x34] ss:$8 sps:$4 sm:$0xff]  }
   0xf   : > { %s234_s8 = scalar_lea.vmem %s3958_s0, %s2361_s28  ;;  %s3166_s16 = scalar_lea.vmem %s3959_s1, %s2362_s11  ;;  %v2893_v20 = vld [vmem:[%s3961_s3 + $0x30] ss:$8 sps:$4 sm:$0xff]   ;;  %v2894_v21 = vld [vmem:[%s3961_s3 + $0x24] ss:$8 sps:$4 sm:$0xff]   ;;  %v2896_v24 = vld [vmem:[%s3961_s3 + $0x20] ss:$8 sps:$4 sm:$0xff]  }
  0x10   : > { %v2373_v6 = vld [vmem:[%s234_s8] sm:$0xff]   ;;  %v2408_v7 = vld [vmem:[%s234_s8 + $0x8] sm:$0xff]   ;;  %v2409_v14 = vld [vmem:[%s234_s8 + $0x10] sm:$0xff]   ;;  %vm781_vm0 = vcmask 261120   ;;  %s3083_s9 = smov 32   ;;  %vm2018_vm2 = vcmask 523264   ;;  %s244_s6 = scalar_lea.vmem %s3963_s5, %s2361_s28 }
  0x11   : > { %v3146_v8 = vunpack.c.l.bf16 %v2373_v6  ;;  %v3148_v9 = vunpack.c.l.bf16 %v2408_v7  ;;  %651 = vmatpush1.bf16.msra.mxu1 %v2884_v4  ;;  %v3159_v12 = vunpack.c.h.bf16 %v2373_v6  ;;  %v3161_v13 = vunpack.c.h.bf16 %v2408_v7  ;;  %v2410_v19 = vld [vmem:[%s234_s8 + $0x18] sm:$0xff]   ;;  %v2900_v27 = vld [vmem:[%s3961_s3 + $0x4] ss:$8 sps:$4 sm:$0xff]   ;;  %v2902_v28 = vld [vmem:[%s3961_s3] ss:$8 sps:$4 sm:$0xff]   ;;  %s3081_s8 = smov 64  }
  0x12   : > { %652 = vmatprep.subr.bf16.mxu1 %v2885_v5  ;;  %v3176_v17 = vunpack.c.l.bf16 %v2409_v14  ;;  %v3178_v18 = vunpack.c.h.bf16 %v2409_v14  ;;  %v3188_v22 = vunpack.c.l.bf16 %v2410_v19  ;;  %v3190_v23 = vunpack.c.h.bf16 %v2410_v19  ;;  %v2897_v25 = vld [vmem:[%s3961_s3 + $0x14] ss:$8 sps:$4 sm:$0xff]   ;;  %v2899_v26 = vld [vmem:[%s3961_s3 + $0x10] ss:$8 sps:$4 sm:$0xff]   ;;  %v2903_v29 = vld [vmem:[%s3166_s16] sm:$0xff]  }
  0x13   : > { %3972 = vst [vmem:[#allocation2_spill] sm:$0xff] %v3146_v8  ;;  %3973 = vst [vmem:[#allocation3_spill] sm:$0xff] %v3148_v9  ;;  %262 = vadd.xlane.f32.xlu0 %v3146_v8  ;;  %266 = vadd.xlane.f32.xlu1 %v3148_v9  ;;  %v2904_v30 = vld [vmem:[%s3166_s16 + $0x8] sm:$0xff]   ;;  %v2905_v31 = vld [vmem:[%s3166_s16 + $0x10] sm:$0xff]   ;;  %vm2027_vm3 = vcmask 785408  }
  0x14   : > { %3974 = vst [vmem:[#allocation4_spill] sm:$0xff] %v3159_v12  ;;  %3975 = vst [vmem:[#allocation5_spill] sm:$0xff] %v3161_v13  ;;  %v2906_v32 = vld [vmem:[%s3166_s16 + $0x18] sm:$0xff]   ;;  %v2907_v33 = vld [vmem:[%s3166_s16 + $0x20] sm:$0xff]  }
  0x15   : > { %653 = vmatpush1.bf16.msra.mxu1 %v2887_v10  ;;  %3976 = vst [vmem:[#allocation6_spill] sm:$0xff] %v3176_v17  ;;  %3977 = vst [vmem:[#allocation7_spill] sm:$0xff] %v3178_v18  ;;  %v2908_v34 = vld [vmem:[%s3166_s16 + $0x28] sm:$0xff]   ;;  %v2909_v35 = vld [vmem:[%s3166_s16 + $0x30] sm:$0xff]  }
  0x16   : > { %654 = vmatprep.subr.bf16.mxu1 %v2888_v11  ;;  %3978 = vst [vmem:[#allocation8_spill] sm:$0xff] %v3188_v22  ;;  %3979 = vst [vmem:[#allocation9_spill] sm:$0xff] %v3190_v23  ;;  %v2910_v36 = vld [vmem:[%s3166_s16 + $0x38] sm:$0xff]   ;;  %v2912_v5 = vld [vmem:[%s3960_s2 + $0x30] sm:$0xff]  }
  0x17   : > { %264 = vadd.xlane.f32.xlu0 %v3159_v12  ;;  %268 = vadd.xlane.f32.xlu1 %v3161_v13  ;;  %v2911_v37 = vld [vmem:[%s3960_s2 + $0x38] sm:$0xff]   ;;  %v2913_v7 = vld [vmem:[%s3960_s2 + $0x28] sm:$0xff]   ;;  %v2914_v10 = vld [vmem:[%s3960_s2 + $0x20] sm:$0xff]  }
  0x18   : > { %2534 = vmatprep.subr.bf16.mxu0 %v2911_v37  ;;  %v2915_v11 = vld [vmem:[%s3960_s2 + $0x18] sm:$0xff]   ;;  %v2916_v14 = vld [vmem:[%s3960_s2 + $0x10] sm:$0xff]  }
  0x19   : > { %655 = vmatpush1.bf16.msra.mxu1 %v2890_v15  ;;  %2535 = vmatpush3.bf16.msra.mxu0 %v2911_v37  ;;  %v2917_v15 = vld [vmem:[%s3960_s2 + $0x8] sm:$0xff]  }
  0x1a   : > { %656 = vmatprep.subr.bf16.mxu1 %v2891_v16  ;;  %2536 = vmatprep.subr.bf16.mxu0 %v2912_v5  ;;  %v2918_v16 = vld [vmem:[%s3960_s2] sm:$0xff]  }
  0x1b   : > { %270 = vadd.xlane.f32.xlu0 %v3176_v17  ;;  %272 = vadd.xlane.f32.xlu1 %v3178_v18 }
  0x1d   : > { %657 = vmatpush1.bf16.msra.mxu1 %v2893_v20  ;;  %2537 = vmatpush3.bf16.msra.mxu0 %v2912_v5 }
  0x1e   : > { %658 = vmatprep.subr.bf16.mxu1 %v2894_v21  ;;  %2538 = vmatprep.subr.bf16.mxu0 %v2913_v7 }
  0x1f   : > { %274 = vadd.xlane.f32.xlu0 %v3188_v22  ;;  %276 = vadd.xlane.f32.xlu1 %v3190_v23 }
  0x21   : > { %659 = vmatpush1.bf16.msra.mxu1 %v2896_v24  ;;  %2539 = vmatpush3.bf16.msra.mxu0 %v2913_v7 }
  0x22   : > { %660 = vmatprep.subr.bf16.mxu1 %v2897_v25  ;;  %2540 = vmatprep.subr.bf16.mxu0 %v2914_v10 }
  0x25   : > { %661 = vmatpush1.bf16.msra.mxu1 %v2899_v26  ;;  %2541 = vmatpush3.bf16.msra.mxu0 %v2914_v10 }
  0x26   : > { %662 = vmatprep.subr.bf16.mxu1 %v2900_v27  ;;  %2542 = vmatprep.subr.bf16.mxu0 %v2915_v11 }
  0x29   : > { %663 = vmatpush1.bf16.msra.mxu1 %v2902_v28  ;;  %2543 = vmatpush3.bf16.msra.mxu0 %v2915_v11 }
  0x2a   : > { %2544 = vmatprep.subr.bf16.mxu0 %v2916_v14 }
  0x2c   : > { %681 = vmatmul.mubr.bf16.vlgmr.msra.gmra.mxu1 %v2903_v29 }
  0x2d   : > { %690 = vmatprep.mubr.bf16.mxu1 %v3079_v2  ;;  %2545 = vmatpush3.bf16.msra.mxu0 %v2916_v14 }
  0x2e   : > { %2546 = vmatprep.subr.bf16.mxu0 %v2917_v15 }
  0x31   : > { %2547 = vmatpush3.bf16.msra.mxu0 %v2917_v15 }
  0x32   : > { %2548 = vmatprep.subr.bf16.mxu0 %v2918_v16 }
  0x34   : > { %691 = vmatmul.mubr.bf16.gmra.mxu1 %v2904_v30 }
  0x35   : > { %700 = vmatprep.mubr.bf16.mxu1 %v3079_v2  ;;  %2549 = vmatpush3.bf16.msra.mxu0 %v2918_v16 }
  0x3c   : > { %701 = vmatmul.mubr.bf16.gmra.mxu1 %v2905_v31 }
  0x3d   : > { %710 = vmatprep.mubr.bf16.mxu1 %v3079_v2 }
  0x44   : > { %711 = vmatmul.mubr.bf16.gmra.mxu1 %v2906_v32 }
  0x45   : > { %720 = vmatprep.mubr.bf16.mxu1 %v3079_v2 }
  0x4c   : > { %721 = vmatmul.mubr.bf16.gmra.mxu1 %v2907_v33 }
  0x4d   : > { %730 = vmatprep.mubr.bf16.mxu1 %v3079_v2 }
  0x54   : > { %731 = vmatmul.mubr.bf16.gmra.mxu1 %v2908_v34 }
  0x55   : > { %740 = vmatprep.mubr.bf16.mxu1 %v3079_v2 }
  0x5c   : > { %741 = vmatmul.mubr.bf16.gmra.mxu1 %v2909_v35 }
  0x5d   : > { %750 = vmatprep.mubr.bf16.mxu1 %v3079_v2 }
  0x64   : > { %751 = vmatmul.mubr.bf16.gmra.mxu1 %v2910_v36 }
  0x9c   : > { %v263_v38 = vpop.xlane.xlu0 %262  ;;  %v267_v39 = vpop.xlane.xlu1 %266 }
  0x9d   : > { %v279_v40 = vmul.f32 0.0078125, %v263_v38  ;;  %v281_v41 = vmul.f32 0.0078125, %v267_v39 }
  0x9f   : > { %v3228_v42 = vsub.f32 %v3146_v8, %v279_v40  ;;  %v3231_v43 = vsub.f32 %v3148_v9, %v281_v41 }
  0xa0   : > { %v265_v44 = vpop.xlane.xlu0 %264  ;;  %v269_v45 = vpop.xlane.xlu1 %268 }
  0xa1   : > { %v280_v46 = vmul.f32 0.0078125, %v265_v44  ;;  %v295_v47 = vmul.f32 %v3228_v42, %v3228_v42  ;;  %v282_v48 = vmul.f32 0.0078125, %v269_v45  ;;  %v297_v49 = vmul.f32 %v3231_v43, %v3231_v43 }
  0xa3   : > { %303 = vadd.xlane.f32.xlu0 %v295_v47  ;;  %v3238_v50 = vsub.f32 %v3159_v12, %v280_v46  ;;  %v3241_v51 = vsub.f32 %v3161_v13, %v282_v48 }
  0xa4   : > { %v271_v52 = vpop.xlane.xlu0 %270  ;;  %v273_v53 = vpop.xlane.xlu1 %272 }
  0xa5   : > { %v283_v54 = vmul.f32 0.0078125, %v271_v52  ;;  %v296_v55 = vmul.f32 %v3238_v50, %v3238_v50  ;;  %v284_v56 = vmul.f32 0.0078125, %v273_v53  ;;  %v298_v57 = vmul.f32 %v3241_v51, %v3241_v51 }
  0xa7   : > { %307 = vadd.xlane.f32.xlu0 %v297_v49  ;;  %305 = vadd.xlane.f32.xlu1 %v296_v55  ;;  %v3248_v58 = vsub.f32 %v3176_v17, %v283_v54  ;;  %v3251_v59 = vsub.f32 %v3178_v18, %v284_v56 }
  0xa8   : > { %v275_v60 = vpop.xlane.xlu0 %274  ;;  %v277_v61 = vpop.xlane.xlu1 %276 }
  0xa9   : > { %v285_v62 = vmul.f32 0.0078125, %v275_v60  ;;  %v299_v63 = vmul.f32 %v3248_v58, %v3248_v58  ;;  %v286_v0 = vmul.f32 0.0078125, %v277_v61  ;;  %v300_v1 = vmul.f32 %v3251_v59, %v3251_v59 }
  0xab   : > { %309 = vadd.xlane.f32.xlu1 %v298_v57  ;;  %311 = vadd.xlane.f32.xlu0 %v299_v63  ;;  %v3258_v2 = vsub.f32 %v3188_v22, %v285_v62  ;;  %v3261_v3 = vsub.f32 %v3190_v23, %v286_v0 }
  0xad   : > { %v301_v4 = vmul.f32 %v3258_v2, %v3258_v2  ;;  %v302_v6 = vmul.f32 %v3261_v3, %v3261_v3 }
  0xaf   : > { %313 = vadd.xlane.f32.xlu1 %v300_v1  ;;  %315 = vadd.xlane.f32.xlu0 %v301_v4 }
  0xb3   : > { %317 = vadd.xlane.f32.xlu1 %v302_v6 }
  0xec   : > { %v682_v19 = vpop.f32.mrf.mxu1 }
  0xee   : > { %v684_v20 = vpop.f32.mrf.mxu1 }
  0xf0   : > { %v686_v21 = vpop.f32.mrf.mxu1 }
  0xf1   : > { %v3288_v24 = vpack.c.bf16 %v686_v21, %v682_v19 }
  0xf2   : > { %v688_v25 = vpop.f32.mrf.mxu1 }
  0xf3   : > { %v3290_v26 = vpack.c.bf16 %v688_v25, %v684_v20 }
  0xf4   : > { %v692_v27 = vpop.f32.mrf.mxu1 }
  0xf6   : > { %v694_v28 = vpop.f32.mrf.mxu1 }
  0xf8   : > { %v696_v29 = vpop.f32.mrf.mxu1 }
  0xf9   : > { %v3337_v25 = vpack.c.bf16 %v696_v29, %v692_v27 }
  0xfa   : > { %v698_v30 = vpop.f32.mrf.mxu1 }
  0xfb   : > { %v3292_v31 = vpack.c.bf16 %v698_v30, %v694_v28 }
  0xfc   : > { %v702_v32 = vpop.f32.mrf.mxu1 }
  0xfe   : > { %v3294_v33 = vpop.f32.mrf.mxu1 }
 0x100   : > { %v706_v34 = vpop.f32.mrf.mxu1 }
 0x101   : > { %v3324_v10 = vpack.c.bf16 %v706_v34, %v702_v32 }
 0x102   : > { %v3296_v35 = vpop.f32.mrf.mxu1 }
 0x104   : > { %v712_v36 = vpop.f32.mrf.mxu1 }
 0x106   : > { %v3298_v37 = vpop.f32.mrf.mxu1 }
 0x108   : > { %v716_v38 = vpop.f32.mrf.mxu1 }
 0x109   : > { %v3327_v11 = vpack.c.bf16 %v716_v38, %v712_v36 }
 0x10a   : > { %v3300_v39 = vpop.f32.mrf.mxu1 }
 0x10c   : > { %v722_v40 = vpop.f32.mrf.mxu1 }
 0x10e   : > { %v724_v41 = vpop.f32.mrf.mxu1 }
 0x110   : > { %v726_v44 = vpop.f32.mrf.mxu1 }
 0x111   : > { %v3310_v63 = vpack.c.bf16 %v726_v44, %v722_v40 }
 0x112   : > { %v728_v45 = vpop.f32.mrf.mxu1 }
 0x113   : > { %v3340_v32 = vpack.c.bf16 %v728_v45, %v724_v41  ;;  %v3350_v41 = vpack.c.bf16 %v3300_v39, %v3298_v37 }
 0x114   : > { %v732_v46 = vpop.f32.mrf.mxu1 }
 0x116   : > { %v734_v47 = vpop.f32.mrf.mxu1 }
 0x118   : > { %v736_v48 = vpop.f32.mrf.mxu1 }
 0x119   : > { %v3306_v60 = vpack.c.bf16 %v736_v48, %v732_v46  ;;  %v3356_v48 = vpack.c.bf16 %v3296_v35, %v3294_v33 }
 0x11a   : > { %v738_v49 = vpop.f32.mrf.mxu1 }
 0x11b   : > { %v3330_v15 = vpack.c.bf16 %v738_v49, %v734_v47 }
 0x11c   : > { %v742_v52 = vpop.f32.mrf.mxu1 }
 0x11e   : > { %v744_v53 = vpop.f32.mrf.mxu1 }
 0x120   : > { %v746_v54 = vpop.f32.mrf.mxu1 }
 0x121   : > { %v3302_v55 = vpack.c.bf16 %v746_v54, %v742_v52 }
 0x122   : > { %v748_v56 = vpop.f32.mrf.mxu1 }
 0x123   : > { %1056 = vrot.lane.b32.xlu1 %v3302_v55, %s3080_s7  ;;  %v3314_v4 = vpack.c.bf16 %v748_v56, %v744_v53 }
 0x124   : > { %v752_v57 = vpop.f32.mrf.mxu1 }
 0x126   : > { %v754_v61 = vpop.f32.mrf.mxu1 }
 0x127   : > { %1054 = vrot.lane.b32.xlu1 %v3306_v60, %s3080_s7 }
 0x128   : > { %v756_v62 = vpop.f32.mrf.mxu1 }
 0x129   : > { %v3312_v0 = vpack.c.bf16 %v756_v62, %v752_v57 }
 0x12a   : > { %v758_v1 = vpop.f32.mrf.mxu1 }
 0x12b   : > { %2774 = vmatprep.subr.msk.bf16.mxu0 %vm781_vm0, %v3312_v0  ;;  %v3318_v5 = vpack.c.bf16 %v758_v1, %v754_v61  ;;  %1052 = vrot.lane.b32.xlu1 %v3310_v63, %s3080_s7 }
 0x12c   : > { %v304_v6 = vpop.xlane.xlu0 %303  ;;  %1058 = vrot.lane.b32.xlu0 %v3312_v0, %s3080_s7 }
 0x12d   : > { %v319_v7 = vmul.f32 0.0078125, %v304_v6  ;;  %2582 = vmatprep.subr.bf16.mxu1 %v3318_v5 }
 0x12e   : > { %2583 = vmatpush3.bf16.msra.mxu1 %v3318_v5 }
 0x12f   : > { %v327_v14 = vadd.f32 1e-06, %v319_v7  ;;  %2584 = vmatprep.subr.bf16.mxu1 %v3314_v4  ;;  %1048 = vrot.lane.b32.xlu1 %v3324_v10, %s3080_s7 }
 0x130   : > { %v306_v16 = vpop.xlane.xlu1 %305  ;;  %v308_v19 = vpop.xlane.xlu0 %307  ;;  %1050 = vrot.lane.b32.xlu0 %v3327_v11, %s3080_s7 }
 0x131   : > { %v320_v20 = vmul.f32 0.0078125, %v306_v16  ;;  %v321_v21 = vmul.f32 0.0078125, %v308_v19  ;;  %2927 = vrsqrt.f32 %v327_v14 }
 0x132   : > { %2585 = vmatpush3.bf16.msra.mxu1 %v3314_v4 }
 0x133   : > { %v328_v28 = vadd.f32 1e-06, %v320_v20  ;;  %v329_v30 = vadd.f32 1e-06, %v321_v21  ;;  %2586 = vmatprep.subr.bf16.mxu1 %v3330_v15  ;;  %1044 = vrot.lane.b32.xlu1 %v3288_v24, %s3080_s7 }
 0x134   : > { %v310_v34 = vpop.xlane.xlu1 %309  ;;  %v312_v36 = vpop.xlane.xlu0 %311  ;;  %1046 = vrot.lane.b32.xlu0 %v3337_v25, %s3080_s7 }
 0x135   : > { %2929 = vrsqrt.f32 %v328_v28  ;;  %v322_v27 = vmul.f32 0.0078125, %v310_v34  ;;  %v323_v29 = vmul.f32 0.0078125, %v312_v36  ;;  %v813_v34 = vsel %vm781_vm0, %v3302_v55, 0 }
 0x136   : > { %2587 = vmatpush3.bf16.msra.mxu1 %v3330_v15  ;;  %2931 = vrsqrt.f32 %v329_v30  ;;  %v798_v36 = vsel %vm781_vm0, %v3337_v25, 0 }
 0x137   : > { %v330_v38 = vadd.f32 1e-06, %v322_v27  ;;  %v331_v40 = vadd.f32 1e-06, %v323_v29  ;;  %2588 = vmatprep.subr.bf16.mxu1 %v3340_v32  ;;  %v795_v27 = vsel %vm781_vm0, %v3288_v24, 0 }
 0x138   : > { %v314_v44 = vpop.xlane.xlu1 %313  ;;  %v316_v45 = vpop.xlane.xlu0 %315 }
 0x139   : > { %2933 = vrsqrt.f32 %v330_v38  ;;  %v324_v46 = vmul.f32 0.0078125, %v314_v44  ;;  %v325_v47 = vmul.f32 0.0078125, %v316_v45 }
 0x13a   : > { %2589 = vmatpush3.bf16.msra.mxu1 %v3340_v32  ;;  %2935 = vrsqrt.f32 %v331_v40 }
 0x13b   : > { %v332_v49 = vadd.f32 1e-06, %v324_v46  ;;  %v333_v52 = vadd.f32 1e-06, %v325_v47  ;;  %2590 = vmatprep.subr.bf16.mxu1 %v3350_v41 }
 0x13c   : > { %v318_v37 = vpop.xlane.xlu1 %317 }
 0x13d   : > { %2937 = vrsqrt.f32 %v332_v49  ;;  %v326_v39 = vmul.f32 0.0078125, %v318_v37 }
 0x13e   : > { %2591 = vmatpush3.bf16.msra.mxu1 %v3350_v41  ;;  %2939 = vrsqrt.f32 %v333_v52  ;;  %v2928_v54 = vpop.eup %2927 }
 0x13f   : > { %v334_v53 = vadd.f32 1e-06, %v326_v39  ;;  %2592 = vmatprep.subr.bf16.mxu1 %v3356_v48  ;;  %v343_v33 = vmul.f32 %v2928_v54, %v3228_v42  ;;  %v816_v42 = vsel %vm781_vm0, %v3312_v0, 0 }
 0x141   : > { %2941 = vrsqrt.f32 %v334_v53 }
 0x142   : > { %v2930_v56 = vpop.eup %2929  ;;  %2593 = vmatpush3.bf16.msra.mxu1 %v3356_v48 }
 0x143   : > { %v344_v35 = vmul.f32 %v2930_v56, %v3238_v50  ;;  %2594 = vmatprep.subr.bf16.mxu1 %v3292_v31  ;;  %v2932_v57 = vpop.eup %2931 }
 0x144   : > { %v345_v1 = vmul.f32 %v2932_v57, %v3231_v43 }
 0x145   : > { %v351_v61 = vpack.c.bf16 %v344_v35, %v343_v33 }
 0x146   : > { %v2934_v62 = vpop.eup %2933  ;;  %2595 = vmatpush3.bf16.msra.mxu1 %v3292_v31 }
 0x147   : > { %2550 = vmatprep.mubr.bf16.mxu0 %v351_v61  ;;  %v346_v6 = vmul.f32 %v2934_v62, %v3241_v51  ;;  %2596 = vmatprep.subr.bf16.mxu1 %v3290_v26  ;;  %v2936_v7 = vpop.eup %2935 }
 0x148   : > { %v347_v16 = vmul.f32 %v2936_v7, %v3248_v58  ;;  %v810_v58 = vsel %vm781_vm0, %v3306_v60, 0 }
 0x149   : > { %v352_v14 = vpack.c.bf16 %v346_v6, %v345_v1 }
 0x14a   : > { %v2938_v50 = vpop.eup %2937  ;;  %2597 = vmatpush3.bf16.msra.mxu1 %v3290_v26 }
 0x14b   : > { %2551 = vmatmul.mubr.bf16.vlgmr.msra.gmra.mxu0 %v352_v14  ;;  %v348_v19 = vmul.f32 %v2938_v50, %v3251_v59  ;;  %v2940_v20 = vpop.eup %2939  ;;  %v807_v59 = vsel %vm781_vm0, %v3310_v63, 0 }
 0x14c   : > { %2559 = vmatpush3.bf16.xpose.msra.mxu0 %v816_v42  ;;  %v349_v21 = vmul.f32 %v2940_v20, %v3258_v2  ;;  %v804_v2 = vsel %vm781_vm0, %v3327_v11, 0 }
 0x14d   : > { %v353_v43 = vpack.c.bf16 %v348_v19, %v347_v16  ;;  %2775 = vmatprep.subr.msk.bf16.mxu0 %vm781_vm0, %v3302_v55 }
 0x14e   : > { %v2942_v51 = vpop.eup %2941 }
 0x14f   : > { %2554 = vmatprep.mubr.bf16.mxu0 %v353_v43  ;;  %v350_v28 = vmul.f32 %v2942_v51, %v3261_v3  ;;  %v801_v3 = vsel %vm781_vm0, %v3324_v10, 0 }
 0x151   : > { %v354_v30 = vpack.c.bf16 %v350_v28, %v349_v21 }
 0x153   : > { %2555 = vmatmul.mubr.bf16.gmra.mxu0 %v354_v30 }
 0x154   : > { %2561 = vmatpush3.bf16.xpose.msra.mxu0 %v813_v34  ;;  %v777_v34 = vlaneseq }
 0x155   : > { %2776 = vmatprep.subr.msk.bf16.mxu0 %vm781_vm0, %v3306_v60 }
 0x15c   : > { %2563 = vmatpush3.bf16.xpose.msra.mxu0 %v810_v58  ;;  %v778_v58 = vand.u32 127, %v777_v34 }
 0x15d   : > { %2777 = vmatprep.subr.msk.bf16.mxu0 %vm781_vm0, %v3310_v63 }
 0x15e   : > { %vm779_vm1 = vcmp.lt.s32.totalorder %v778_v58, 77 }
 0x164   : > { %2565 = vmatpush3.bf16.xpose.msra.mxu0 %v807_v59  ;;  %v3082_v59 = vmov -1e+30  }
 0x165   : > { %2778 = vmatprep.subr.msk.bf16.mxu0 %vm781_vm0, %v3327_v11 }
 0x16c   : > { %2567 = vmatpush3.bf16.xpose.msra.mxu0 %v804_v2  ;;  %v3471_v2 = vsel %vm779_vm1, 0.0, %v3082_v59 }
 0x16d   : > { %2779 = vmatprep.subr.msk.bf16.mxu0 %vm781_vm0, %v3324_v10 }
 0x174   : > { %2569 = vmatpush3.bf16.xpose.msra.mxu0 %v801_v3 }
 0x175   : > { %2780 = vmatprep.subr.msk.bf16.mxu0 %vm781_vm0, %v3337_v25 }
 0x17c   : > { %2571 = vmatpush3.bf16.xpose.msra.mxu0 %v798_v36 }
 0x17d   : > { %2781 = vmatprep.subr.msk.bf16.mxu0 %vm781_vm0, %v3288_v24 }
 0x184   : > { %2573 = vmatpush3.bf16.xpose.msra.mxu0 %v795_v27 }
 0x195   : > { %v1057_v39 = vpop.permute.xlu1 %1056 }
 0x196   : > { %v1091_v35 = vsel %vm781_vm0, %v1057_v39, 0 }
 0x199   : > { %v1055_v57 = vpop.permute.xlu1 %1054 }
 0x19a   : > { %v1088_v61 = vsel %vm781_vm0, %v1055_v57, 0 }
 0x19d   : > { %v1053_v62 = vpop.permute.xlu1 %1052 }
 0x19e   : > { %v1059_v29 = vpop.permute.xlu0 %1058  ;;  %v1085_v1 = vsel %vm781_vm0, %v1053_v62, 0 }
 0x19f   : > { %2782 = vmatprep.subr.msk.bf16.mxu0 %vm781_vm0, %v1059_v29  ;;  %v1094_v52 = vsel %vm781_vm0, %v1059_v29, 0 }
 0x1a1   : > { %v1049_v14 = vpop.permute.xlu1 %1048 }
 0x1a2   : > { %v1051_v6 = vpop.permute.xlu0 %1050  ;;  %v1079_v42 = vsel %vm781_vm0, %v1049_v14, 0 }
 0x1a3   : > { %v1082_v7 = vsel %vm781_vm0, %v1051_v6, 0 }
 0x1a5   : > { %v1045_v19 = vpop.permute.xlu1 %1044 }
 0x1a6   : > { %v1047_v50 = vpop.permute.xlu0 %1046  ;;  %v1073_v20 = vsel %vm781_vm0, %v1045_v19, 0 }
 0x1a7   : > { %v1076_v16 = vsel %vm781_vm0, %v1047_v50, 0 }
 0x20b   : > { %v2552_v38 = vpop.f32.mrf.mxu0 }
 0x20d   : > { %v453_v40 = vpop.f32.mrf.mxu0 }
 0x20f   : > { %v2553_v44 = vpop.f32.mrf.mxu0 }
 0x210   : > { %v3405_v45 = vpack.c.bf16 %v2553_v44, %v2552_v38 }
 0x211   : > { %v456_v46 = vpop.f32.mrf.mxu0 }
 0x212   : > { %v3407_v47 = vpack.c.bf16 %v456_v46, %v453_v40  ;;  %1030 = vrot.lane.b32.xlu1 %v3405_v45, %s3080_s7 }
 0x213   : > { %v2556_v49 = vpop.f32.mrf.mxu0 }
 0x214   : > { %1028 = vrot.lane.b32.xlu0 %v3407_v47, %s3080_s7  ;;  %2574 = vmatprep.mubr.msk.bf16.mxu0 %vm781_vm0, %v3407_v47 }
 0x215   : > { %v469_v37 = vpop.f32.mrf.mxu0  ;;  %2575 = vmatmul.mubr.msk.bf16.vlgmr.msra.gmra.mxu0 %vm781_vm0, %v3405_v45 }
 0x216   : > { %2607 = vmatpush3.bf16.xpose.msra.mxu0 %v1094_v52 }
 0x217   : > { %v2557_v53 = vpop.f32.mrf.mxu0  ;;  %2783 = vmatprep.subr.msk.bf16.mxu0 %vm781_vm0, %v1057_v39 }
 0x218   : > { %v3419_v54 = vpack.c.bf16 %v2557_v53, %v2556_v49 }
 0x219   : > { %v472_v56 = vpop.f32.mrf.mxu0 }
 0x21a   : > { %v3421_v33 = vpack.c.bf16 %v472_v56, %v469_v37  ;;  %1034 = vrot.lane.b32.xlu1 %v3419_v54, %s3080_s7 }
 0x21c   : > { %1032 = vrot.lane.b32.xlu0 %v3421_v33, %s3080_s7  ;;  %2578 = vmatprep.mubr.msk.bf16.mxu0 %vm781_vm0, %v3421_v33 }
 0x21d   : > { %2579 = vmatmul.mubr.msk.bf16.gmra.mxu0 %vm781_vm0, %v3419_v54 }
 0x21e   : > { %2609 = vmatpush3.bf16.xpose.msra.mxu0 %v1091_v35  ;;  %1241 = vrot.lane.b32.xlu1 %v3314_v4, %s3080_s7 }
 0x21f   : > { %2784 = vmatprep.subr.msk.bf16.mxu0 %vm781_vm0, %v1055_v57 }
 0x220   : > { %1243 = vrot.lane.b32.xlu0 %v3318_v5, %s3080_s7 }
 0x222   : > { %1237 = vrot.lane.b32.xlu1 %v3340_v32, %s3080_s7 }
 0x224   : > { %1239 = vrot.lane.b32.xlu0 %v3330_v15, %s3080_s7 }
 0x226   : > { %2611 = vmatpush3.bf16.xpose.msra.mxu0 %v1088_v61  ;;  %1233 = vrot.lane.b32.xlu1 %v3356_v48, %s3080_s7 }
 0x227   : > { %2785 = vmatprep.subr.msk.bf16.mxu0 %vm781_vm0, %v1053_v62 }
 0x228   : > { %1235 = vrot.lane.b32.xlu0 %v3350_v41, %s3080_s7 }
 0x22a   : > { %1229 = vrot.lane.b32.xlu1 %v3290_v26, %s3080_s7 }
 0x22c   : > { %1231 = vrot.lane.b32.xlu0 %v3292_v31, %s3080_s7 }
 0x22e   : > { %2613 = vmatpush3.bf16.xpose.msra.mxu0 %v1085_v1  ;;  %1354 = vrot.lane.b32.xlu1 %v3302_v55, %s3081_s8 }
 0x22f   : > { %2786 = vmatprep.subr.msk.bf16.mxu0 %vm781_vm0, %v1051_v6 }
 0x230   : > { %1356 = vrot.lane.b32.xlu0 %v3312_v0, %s3081_s8 }
 0x236   : > { %2615 = vmatpush3.bf16.xpose.msra.mxu0 %v1082_v7 }
 0x237   : > { %2787 = vmatprep.subr.msk.bf16.mxu0 %vm781_vm0, %v1049_v14 }
 0x23e   : > { %2617 = vmatpush3.bf16.xpose.msra.mxu0 %v1079_v42 }
 0x23f   : > { %2788 = vmatprep.subr.msk.bf16.mxu0 %vm781_vm0, %v1047_v50 }
 0x246   : > { %2619 = vmatpush3.bf16.xpose.msra.mxu0 %v1076_v16 }
 0x247   : > { %2789 = vmatprep.subr.msk.bf16.mxu0 %vm781_vm0, %v1045_v19 }
 0x24e   : > { %2621 = vmatpush3.bf16.xpose.msra.mxu0 %v1073_v20 }
 0x284   : > { %v1031_v51 = vpop.permute.xlu1 %1030 }
 0x286   : > { %v1029_v43 = vpop.permute.xlu0 %1028 }
 0x287   : > { %2622 = vmatprep.mubr.msk.bf16.mxu0 %vm781_vm0, %v1029_v43 }
 0x288   : > { %2623 = vmatmul.mubr.msk.bf16.vlgmr.msra.gmra.mxu0 %vm781_vm0, %v1031_v51 }
 0x28c   : > { %v1035_v28 = vpop.permute.xlu1 %1034 }
 0x28e   : > { %v1033_v21 = vpop.permute.xlu0 %1032 }
 0x28f   : > { %2626 = vmatprep.mubr.msk.bf16.mxu0 %vm781_vm0, %v1033_v21 }
 0x290   : > { %2627 = vmatmul.mubr.msk.bf16.gmra.mxu0 %vm781_vm0, %v1035_v28  ;;  %v3484_v6 = vpop.permute.xlu1 %1241 }
 0x292   : > { %v3468_v30 = vpop.permute.xlu0 %1243 }
 0x293   : > { %2630 = vmatprep.subr.bf16.mxu1 %v3468_v30 }
 0x294   : > { %v3497_v19 = vpop.permute.xlu1 %1237 }
 0x296   : > { %v3486_v7 = vpop.permute.xlu0 %1239 }
 0x298   : > { %v3505_v51 = vpop.permute.xlu1 %1233 }
 0x29a   : > { %v3499_v20 = vpop.permute.xlu0 %1235 }
 0x29c   : > { %v3509_v28 = vpop.permute.xlu1 %1229 }
 0x29e   : > { %v3507_v21 = vpop.permute.xlu0 %1231 }
 0x2a0   : > { %v3513_v59 = vpop.permute.xlu1 %1354 }
 0x2a2   : > { %v3511_v34 = vpop.permute.xlu0 %1356 }
 0x2d5   : > { %v2576_v3 = vpop.f32.mrf.mxu0 }
 0x2d6   : > { %v861_v36 = vadd.f32 %v2576_v3, %v3471_v2 }
 0x2d7   : > { %v852_v27 = vpop.f32.mrf.mxu0 }
 0x2d8   : > { %887 = vmax.xlane.f32.xlu0 %v861_v36  ;;  %v853_v38 = vadd.f32 %v852_v27, %v3471_v2 }
 0x2d9   : > { %v2577_v29 = vpop.f32.mrf.mxu0 }
 0x2da   : > { %v864_v49 = vadd.f32 %v2577_v29, %v3471_v2 }
 0x2db   : > { %v855_v40 = vpop.f32.mrf.mxu0 }
 0x2dc   : > { %v856_v44 = vadd.f32 %v855_v40, %v3471_v2  ;;  %883 = vmax.xlane.f32.xlu0 %v853_v38 }
 0x2dd   : > { %v2580_v46 = vpop.f32.mrf.mxu0 }
 0x2de   : > { %885 = vmax.xlane.f32.xlu1 %v856_v44  ;;  %v877_v39 = vadd.f32 %v2580_v46, %v3471_v2 }
 0x2df   : > { %v868_v52 = vpop.f32.mrf.mxu0 }
 0x2e0   : > { %889 = vmax.xlane.f32.xlu0 %v864_v49  ;;  %v869_v35 = vadd.f32 %v868_v52, %v3471_v2 }
 0x2e1   : > { %v2581_v37 = vpop.f32.mrf.mxu0 }
 0x2e2   : > { %v880_v53 = vadd.f32 %v2581_v37, %v3471_v2 }
 0x2e3   : > { %v871_v56 = vpop.f32.mrf.mxu0 }
 0x2e4   : > { %895 = vmax.xlane.f32.xlu0 %v877_v39  ;;  %897 = vmax.xlane.f32.xlu1 %v880_v53  ;;  %v872_v57 = vadd.f32 %v871_v56, %v3471_v2 }
 0x2e8   : > { %893 = vmax.xlane.f32.xlu1 %v872_v57  ;;  %891 = vmax.xlane.f32.xlu0 %v869_v35 }
 0x348   : > { %v2624_v61 = vpop.f32.mrf.mxu0 }
 0x349   : > { %v3482_v62 = vadd.f32 %v2624_v61, %v3471_v2 }
 0x34a   : > { %v1130_v1 = vpop.f32.mrf.mxu0 }
 0x34b   : > { %v3489_v14 = vadd.f32 %v1130_v1, %v3471_v2  ;;  %1165 = vmax.xlane.f32.xlu1 %v3482_v62 }
 0x34c   : > { %v2625_v42 = vpop.f32.mrf.mxu0 }
 0x34d   : > { %v3493_v50 = vadd.f32 %v2625_v42, %v3471_v2  ;;  %1161 = vmax.xlane.f32.xlu0 %v3489_v14 }
 0x34e   : > { %v1133_v16 = vpop.f32.mrf.mxu0 }
 0x34f   : > { %1167 = vmax.xlane.f32.xlu1 %v3493_v50  ;;  %v3502_v43 = vadd.f32 %v1133_v16, %v3471_v2 }
 0x353   : > { %1163 = vmax.xlane.f32.xlu1 %v3502_v43 }
 0x361   : > { %v888_v58 = vpop.xlane.xlu0 %887 }
 0x362   : > { %v901_v3 = vsub.f32 %v861_v36, %v888_v58 }
 0x363   : > { %1352 = vrot.lane.b32.xlu0 %v3306_v60, %s3081_s8 }
 0x364   : > { %1350 = vrot.lane.b32.xlu1 %v3310_v63, %s3081_s8  ;;  %v911_v37 = vmul.f32 1.442695, %v901_v3 }
 0x365   : > { %v884_v27 = vpop.xlane.xlu0 %883 }
 0x366   : > { %v899_v29 = vsub.f32 %v853_v38, %v884_v27 }
 0x367   : > { %v886_v40 = vpop.xlane.xlu1 %885 }
 0x368   : > { %v907_v46 = vmul.f32 1.442695, %v899_v29  ;;  %v900_v52 = vsub.f32 %v856_v44, %v886_v40 }
 0x369   : > { %v890_v56 = vpop.xlane.xlu0 %889 }
 0x36a   : > { %v909_v61 = vmul.f32 1.442695, %v900_v52  ;;  %v902_v1 = vsub.f32 %v864_v49, %v890_v56  ;;  %2943 = vpow2.f32 %v907_v46  ;;  %v2628_v46 = vpop.f32.mrf.mxu0 }
 0x36c   : > { %2945 = vpow2.f32 %v909_v61  ;;  %v913_v42 = vmul.f32 1.442695, %v902_v1 }
 0x36d   : > { %2947 = vpow2.f32 %v911_v37  ;;  %v898_v16 = vpop.xlane.xlu1 %897  ;;  %v896_v18 = vpop.xlane.xlu0 %895 }
 0x36e   : > { %2949 = vpow2.f32 %v913_v42  ;;  %v906_v17 = vsub.f32 %v880_v53, %v898_v16  ;;  %v905_v23 = vsub.f32 %v877_v39, %v896_v18  ;;  %v3533_v39 = vadd.f32 %v2628_v46, %v3471_v2 }
 0x36f   : > { %v1389_v46 = vsel %vm781_vm0, %v3513_v59, 0 }
 0x370   : > { %v921_v22 = vmul.f32 1.442695, %v906_v17  ;;  %v919_v36 = vmul.f32 1.442695, %v905_v23  ;;  %v1146_v23 = vpop.f32.mrf.mxu0 }
 0x371   : > { %v894_v58 = vpop.xlane.xlu1 %893  ;;  %v892_v38 = vpop.xlane.xlu0 %891  ;;  %v3556_v16 = vadd.f32 %v1146_v23, %v3471_v2 }
 0x372   : > { %v904_v27 = vsub.f32 %v872_v57, %v894_v58  ;;  %v903_v29 = vsub.f32 %v869_v35, %v892_v38  ;;  %2951 = vpow2.f32 %v921_v22  ;;  %v2629_v35 = vpop.f32.mrf.mxu0 }
 0x373   : > { %2953 = vpow2.f32 %v919_v36 }
 0x374   : > { %v917_v44 = vmul.f32 1.442695, %v904_v27  ;;  %v915_v3 = vmul.f32 1.442695, %v903_v29  ;;  %v1149_v61 = vpop.f32.mrf.mxu0 }
 0x376   : > { %2955 = vpow2.f32 %v917_v44 }
 0x377   : > { %2957 = vpow2.f32 %v915_v3  ;;  %v3519_v49 = vpop.eup %2943  ;;  %v1392_v3 = vsel %vm781_vm0, %v3511_v34, 0 }
 0x379   : > { %v3521_v40 = vpop.eup %2945 }
 0x37a   : > { %v3523_v52 = vpop.eup %2947  ;;  %v939_v17 = vpack.c.bf16 %v3521_v40, %v3519_v49 }
 0x37b   : > { %v3527_v18 = vpop.eup %2949 }
 0x37c   : > { %2598 = vmatprep.mubr.bf16.mxu1 %v939_v17  ;;  %v940_v22 = vpack.c.bf16 %v3527_v18, %v3523_v52 }
 0x37e   : > { %2599 = vmatmul.mubr.bf16.vlgmr.msra.gmra.mxu1 %v940_v22 }
 0x37f   : > { %2631 = vmatpush3.bf16.msra.mxu1 %v3468_v30  ;;  %v3536_v53 = vpop.eup %2951  ;;  %v3547_v30 = vadd.f32 %v2629_v35, %v3471_v2 }
 0x380   : > { %2632 = vmatprep.subr.bf16.mxu1 %v3484_v6  ;;  %v3538_v57 = vpop.eup %2953 }
 0x381   : > { %v942_v42 = vpack.c.bf16 %v3536_v53, %v3538_v57 }
 0x382   : > { %1173 = vmax.xlane.f32.xlu0 %v3533_v39 }
 0x383   : > { %v3541_v37 = vpop.eup %2955  ;;  %2633 = vmatpush3.bf16.msra.mxu1 %v3484_v6  ;;  %v3560_v6 = vadd.f32 %v1149_v61, %v3471_v2 }
 0x384   : > { %v3544_v56 = vpop.eup %2957  ;;  %2634 = vmatprep.subr.bf16.mxu1 %v3486_v7 }
 0x385   : > { %v941_v1 = vpack.c.bf16 %v3541_v37, %v3544_v56 }
 0x386   : > { %1175 = vmax.xlane.f32.xlu0 %v3547_v30 }
 0x387   : > { %2602 = vmatprep.mubr.bf16.mxu1 %v941_v1  ;;  %2635 = vmatpush3.bf16.msra.mxu1 %v3486_v7 }
 0x388   : > { %2603 = vmatmul.mubr.bf16.gmra.mxu1 %v942_v42  ;;  %2636 = vmatprep.subr.bf16.mxu1 %v3497_v19 }
 0x389   : > { %1169 = vmax.xlane.f32.xlu1 %v3556_v16 }
 0x38a   : > { %1171 = vmax.xlane.f32.xlu0 %v3560_v6 }
 0x38b   : > { %2637 = vmatpush3.bf16.msra.mxu1 %v3497_v19 }
 0x38c   : > { %2638 = vmatprep.subr.bf16.mxu1 %v3499_v20 }
 0x38f   : > { %2639 = vmatpush3.bf16.msra.mxu1 %v3499_v20 }
 0x390   : > { %2640 = vmatprep.subr.bf16.mxu1 %v3505_v51 }
 0x393   : > { %2641 = vmatpush3.bf16.msra.mxu1 %v3505_v51 }
 0x394   : > { %2642 = vmatprep.subr.bf16.mxu1 %v3507_v21 }
 0x397   : > { %2643 = vmatpush3.bf16.msra.mxu1 %v3507_v21 }
 0x398   : > { %2644 = vmatprep.subr.bf16.mxu1 %v3509_v28 }
 0x39a   : > { %1346 = vrot.lane.b32.xlu1 %v3324_v10, %s3081_s8 }
 0x39b   : > { %2645 = vmatpush3.bf16.msra.mxu1 %v3509_v28 }
 0x39c   : > { %2790 = vmatprep.subr.msk.bf16.mxu1 %vm781_vm0, %v3511_v34 }
 0x39e   : > { %1344 = vrot.lane.b32.xlu1 %v3337_v25, %s3081_s8 }
 0x3a0   : > { %1348 = vrot.lane.b32.xlu0 %v3327_v11, %s3081_s8 }
 0x3a2   : > { %1342 = vrot.lane.b32.xlu1 %v3288_v24, %s3081_s8 }
 0x3a4   : > { %1334 = vrot.lane.b32.xlu0 %v3407_v47, %s3081_s8 }
 0x3a6   : > { %1336 = vrot.lane.b32.xlu1 %v3405_v45, %s3081_s8 }
 0x3a8   : > { %1338 = vrot.lane.b32.xlu0 %v3421_v33, %s3081_s8 }
 0x3aa   : > { %1340 = vrot.lane.b32.xlu1 %v3419_v54, %s3081_s8 }
 0x3ac   : > { %1533 = vrot.lane.b32.xlu0 %v3318_v5, %s3081_s8 }
 0x3ae   : > { %1531 = vrot.lane.b32.xlu1 %v3314_v4, %s3081_s8 }
 0x3b0   : > { %1529 = vrot.lane.b32.xlu0 %v3330_v15, %s3081_s8 }
 0x3b2   : > { %1523 = vrot.lane.b32.xlu1 %v3356_v48, %s3081_s8 }
 0x3b4   : > { %1527 = vrot.lane.b32.xlu0 %v3340_v32, %s3081_s8 }
 0x3b6   : > { %1519 = vrot.lane.b32.xlu1 %v3290_v26, %s3081_s8 }
 0x3b8   : > { %1525 = vrot.lane.b32.xlu0 %v3350_v41, %s3081_s8 }
 0x3ba   : > { %1644 = vrot.lane.b32.xlu1 %v3302_v55, %s3083_s9 }
 0x3bc   : > { %1521 = vrot.lane.b32.xlu0 %v3292_v31, %s3081_s8 }
 0x3c0   : > { %1646 = vrot.lane.b32.xlu0 %v3312_v0, %s3083_s9 }
 0x3d4   : > { %v1166_v7 = vpop.xlane.xlu1 %1165 }
 0x3d5   : > { %v1179_v28 = vsub.f32 %v3482_v62, %v1166_v7 }
 0x3d6   : > { %v1162_v19 = vpop.xlane.xlu0 %1161 }
 0x3d7   : > { %v1177_v20 = vsub.f32 %v3489_v14, %v1162_v19  ;;  %v1189_v27 = vmul.f32 1.442695, %v1179_v28 }
 0x3d8   : > { %v1168_v51 = vpop.xlane.xlu1 %1167 }
 0x3d9   : > { %v1180_v21 = vsub.f32 %v3493_v50, %v1168_v51  ;;  %v1185_v36 = vmul.f32 1.442695, %v1177_v20 }
 0x3da   : > { %v1353_v17 = vpop.permute.xlu0 %1352 }
 0x3db   : > { %v1191_v58 = vmul.f32 1.442695, %v1180_v21  ;;  %2959 = vpow2.f32 %v1185_v36  ;;  %v1386_v22 = vsel %vm781_vm0, %v1353_v17, 0 }
 0x3dc   : > { %v1164_v38 = vpop.xlane.xlu1 %1163 }
 0x3dd   : > { %v1178_v55 = vsub.f32 %v3502_v43, %v1164_v38  ;;  %2961 = vpow2.f32 %v1191_v58 }
 0x3df   : > { %v1187_v29 = vmul.f32 1.442695, %v1178_v55 }
 0x3e0   : > { %v1351_v23 = vpop.permute.xlu1 %1350 }
 0x3e1   : > { %2963 = vpow2.f32 %v1187_v29  ;;  %v1383_v35 = vsel %vm781_vm0, %v1351_v23, 0 }
 0x3e2   : > { %2965 = vpow2.f32 %v1189_v27 }
 0x3e8   : > { %v3616_v0 = vpop.eup %2959 }
 0x3ea   : > { %v3618_v44 = vpop.eup %2961 }
 0x3ee   : > { %v3620_v14 = vpop.eup %2963 }
 0x3ef   : > { %v3622_v50 = vpop.eup %2965  ;;  %v1217_v62 = vpack.c.bf16 %v3620_v14, %v3616_v0 }
 0x3f0   : > { %v1218_v43 = vpack.c.bf16 %v3618_v44, %v3622_v50 }
 0x3f1   : > { %2646 = vmatprep.mubr.bf16.mxu1 %v1217_v62 }
 0x3f2   : > { %2647 = vmatmul.mubr.bf16.vlgmr.msra.gmra.mxu1 %v1218_v43 }
 0x3f3   : > { %2655 = vmatpush3.bf16.xpose.msra.mxu1 %v1392_v3 }
 0x3f4   : > { %2791 = vmatprep.subr.msk.bf16.mxu1 %vm781_vm0, %v3513_v59 }
 0x3fb   : > { %2657 = vmatpush3.bf16.xpose.msra.mxu1 %v1389_v46 }
 0x3fc   : > { %2792 = vmatprep.subr.msk.bf16.mxu1 %vm781_vm0, %v1353_v17 }
 0x403   : > { %2659 = vmatpush3.bf16.xpose.msra.mxu1 %v1386_v22 }
 0x404   : > { %2793 = vmatprep.subr.msk.bf16.mxu1 %vm781_vm0, %v1351_v23 }
 0x40b   : > { %2661 = vmatpush3.bf16.xpose.msra.mxu1 %v1383_v35  ;;  %v1174_v34 = vpop.xlane.xlu0 %1173 }
 0x40c   : > { %v1183_v42 = vsub.f32 %v3533_v39, %v1174_v34 }
 0x40e   : > { %v1197_v21 = vmul.f32 1.442695, %v1183_v42 }
 0x40f   : > { %v1176_v61 = vpop.xlane.xlu0 %1175 }
 0x410   : > { %v1184_v1 = vsub.f32 %v3547_v30, %v1176_v61 }
 0x412   : > { %v1199_v59 = vmul.f32 1.442695, %v1184_v1  ;;  %v1170_v7 = vpop.xlane.xlu1 %1169 }
 0x413   : > { %v1181_v19 = vsub.f32 %v3556_v16, %v1170_v7  ;;  %v1172_v20 = vpop.xlane.xlu0 %1171 }
 0x414   : > { %v1182_v51 = vsub.f32 %v3560_v6, %v1172_v20  ;;  %2967 = vpow2.f32 %v1199_v59 }
 0x415   : > { %v1193_v28 = vmul.f32 1.442695, %v1181_v19 }
 0x416   : > { %v1195_v36 = vmul.f32 1.442695, %v1182_v51  ;;  %v1347_v58 = vpop.permute.xlu1 %1346 }
 0x417   : > { %2969 = vpow2.f32 %v1193_v28  ;;  %v1349_v38 = vpop.permute.xlu0 %1348  ;;  %v1377_v27 = vsel %vm781_vm0, %v1347_v58, 0 }
 0x418   : > { %2971 = vpow2.f32 %v1195_v36  ;;  %v1380_v55 = vsel %vm781_vm0, %v1349_v38, 0  ;;  %2794 = vmatprep.subr.msk.bf16.mxu1 %vm781_vm0, %v1349_v38 }
 0x419   : > { %2973 = vpow2.f32 %v1197_v21  ;;  %2663 = vmatpush3.bf16.xpose.msra.mxu1 %v1380_v55 }
 0x41a   : > { %v1345_v39 = vpop.permute.xlu1 %1344  ;;  %2795 = vmatprep.subr.msk.bf16.mxu1 %vm781_vm0, %v1347_v58 }
 0x41b   : > { %v1335_v30 = vpop.permute.xlu0 %1334  ;;  %v1374_v61 = vsel %vm781_vm0, %v1345_v39, 0 }
 0x41e   : > { %v1343_v16 = vpop.permute.xlu1 %1342 }
 0x41f   : > { %v1339_v6 = vpop.permute.xlu0 %1338  ;;  %v1371_v59 = vsel %vm781_vm0, %v1343_v16, 0 }
 0x421   : > { %2665 = vmatpush3.bf16.xpose.msra.mxu1 %v1377_v27  ;;  %v3647_v62 = vpop.eup %2967 }
 0x422   : > { %v1337_v29 = vpop.permute.xlu1 %1336  ;;  %2796 = vmatprep.subr.msk.bf16.mxu1 %vm781_vm0, %v1345_v39 }
 0x423   : > { %v1534_v43 = vpop.permute.xlu0 %1533 }
 0x424   : > { %v3649_v3 = vpop.eup %2969  ;;  %2678 = vmatprep.subr.bf16.mxu0 %v1534_v43 }
 0x425   : > { %v3651_v46 = vpop.eup %2971  ;;  %2679 = vmatpush3.bf16.msra.mxu0 %v1534_v43 }
 0x426   : > { %v3653_v17 = vpop.eup %2973  ;;  %v1341_v22 = vpop.permute.xlu1 %1340  ;;  %v1219_v23 = vpack.c.bf16 %v3651_v46, %v3649_v3 }
 0x427   : > { %v1220_v35 = vpack.c.bf16 %v3647_v62, %v3653_v17  ;;  %v1530_v34 = vpop.permute.xlu0 %1529 }
 0x428   : > { %2650 = vmatprep.mubr.bf16.mxu1 %v1219_v23 }
 0x429   : > { %2651 = vmatmul.mubr.bf16.gmra.mxu1 %v1220_v35 }
 0x42a   : > { %v1532_v1 = vpop.permute.xlu1 %1531  ;;  %2667 = vmatpush3.bf16.xpose.msra.mxu1 %v1374_v61  ;;  %2670 = vmatprep.mubr.msk.bf16.mxu1 %vm781_vm0, %v1335_v30 }
 0x42b   : > { %2797 = vmatprep.subr.msk.bf16.mxu1 %vm781_vm0, %v1343_v16  ;;  %2680 = vmatprep.subr.bf16.mxu0 %v1532_v1  ;;  %v1528_v42 = vpop.permute.xlu0 %1527 }
 0x42c   : > { %2681 = vmatpush3.bf16.msra.mxu0 %v1532_v1 }
 0x42d   : > { %2682 = vmatprep.subr.bf16.mxu0 %v1530_v34 }
 0x42e   : > { %v1524_v19 = vpop.permute.xlu1 %1523 }
 0x42f   : > { %v1526_v7 = vpop.permute.xlu0 %1525 }
 0x430   : > { %2683 = vmatpush3.bf16.msra.mxu0 %v1530_v34 }
 0x431   : > { %2684 = vmatprep.subr.bf16.mxu0 %v1528_v42 }
 0x432   : > { %2669 = vmatpush3.bf16.xpose.msra.mxu1 %v1371_v59  ;;  %v1520_v51 = vpop.permute.xlu1 %1519 }
 0x433   : > { %v1522_v20 = vpop.permute.xlu0 %1521 }
 0x434   : > { %2685 = vmatpush3.bf16.msra.mxu0 %v1528_v42 }
 0x435   : > { %2686 = vmatprep.subr.bf16.mxu0 %v1526_v7 }
 0x437   : > { %v3666_v21 = vpop.permute.xlu0 %1646 }
 0x438   : > { %2687 = vmatpush3.bf16.msra.mxu0 %v1526_v7 }
 0x439   : > { %2671 = vmatmul.mubr.msk.bf16.vlgmr.msra.gmra.mxu1 %vm781_vm0, %v1337_v29  ;;  %2688 = vmatprep.subr.bf16.mxu0 %v1524_v19 }
 0x43a   : > { %2674 = vmatprep.mubr.msk.bf16.mxu1 %vm781_vm0, %v1339_v6 }
 0x43c   : > { %2689 = vmatpush3.bf16.msra.mxu0 %v1524_v19 }
 0x43d   : > { %2690 = vmatprep.subr.bf16.mxu0 %v1522_v20 }
 0x43e   : > { %v3670_v28 = vpop.f32.mrf.mxu1 }
 0x440   : > { %2691 = vmatpush3.bf16.msra.mxu0 %v1522_v20  ;;  %v3672_v36 = vpop.f32.mrf.mxu1 }
 0x441   : > { %2675 = vmatmul.mubr.msk.bf16.gmra.mxu1 %vm781_vm0, %v1341_v22  ;;  %2692 = vmatprep.subr.bf16.mxu0 %v1520_v51 }
 0x442   : > { %v3674_v58 = vpop.f32.mrf.mxu1 }
 0x444   : > { %2693 = vmatpush3.bf16.msra.mxu0 %v1520_v51  ;;  %v3676_v38 = vpop.f32.mrf.mxu1 }
 0x445   : > { %2798 = vmatprep.subr.msk.bf16.mxu0 %vm781_vm0, %v3666_v21 }
 0x448   : > { %v3678_v55 = vpop.f32.mrf.mxu1 }
 0x44a   : > { %v3680_v39 = vpop.f32.mrf.mxu1 }
 0x44c   : > { %v3682_v30 = vpop.f32.mrf.mxu1 }
 0x44d   : > { %3980 = vst [vmem:[#allocation10_spill] sm:$0xff] %v3682_v30 }
 0x44e   : > { %v3684_v16 = vpop.f32.mrf.mxu1 }
 0x4b2   : > { %v3686_v6 = vpop.f32.mrf.mxu1 }
 0x4b4   : > { %v3688_v27 = vpop.f32.mrf.mxu1 }
 0x4b6   : > { %v3690_v29 = vpop.f32.mrf.mxu1 }
 0x4b8   : > { %v3692_v43 = vpop.f32.mrf.mxu1 }
 0x4e9   : > { %v3694_v22 = vpop.f32.mrf.mxu1 }
 0x4eb   : > { %v3696_v23 = vpop.f32.mrf.mxu1 }
 0x4ed   : > { %v3698_v35 = vpop.f32.mrf.mxu1 }
 0x4ef   : > { %v3700_v34 = vpop.f32.mrf.mxu1 }
 0x4f9   : > { %v2672_v61 = vpop.f32.mrf.mxu1 }
 0x4fa   : > { %v1437_v1 = vadd.f32 %v2672_v61, %v3471_v2 }
 0x4fb   : > { %v1428_v42 = vpop.f32.mrf.mxu1 }
 0x4fc   : > { %v1429_v59 = vadd.f32 %v1428_v42, %v3471_v2  ;;  %1463 = vmax.xlane.f32.xlu1 %v1437_v1 }
 0x4fd   : > { %v2673_v7 = vpop.f32.mrf.mxu1 }
 0x4fe   : > { %v1440_v19 = vadd.f32 %v2673_v7, %v3471_v2  ;;  %1459 = vmax.xlane.f32.xlu0 %v1429_v59 }
 0x4ff   : > { %v1431_v20 = vpop.f32.mrf.mxu1 }
 0x500   : > { %1465 = vmax.xlane.f32.xlu1 %v1440_v19  ;;  %v1432_v51 = vadd.f32 %v1431_v20, %v3471_v2 }
 0x501   : > { %v2676_v61 = vpop.f32.mrf.mxu1 }
 0x502   : > { %v3711_v42 = vadd.f32 %v2676_v61, %v3471_v2 }
 0x503   : > { %v1444_v12 = vpop.f32.mrf.mxu1 }
 0x504   : > { %1461 = vmax.xlane.f32.xlu1 %v1432_v51  ;;  %v3718_v20 = vadd.f32 %v1444_v12, %v3471_v2 }
 0x505   : > { %v2677_v8 = vpop.f32.mrf.mxu1 }
 0x506   : > { %v3715_v7 = vadd.f32 %v2677_v8, %v3471_v2  ;;  %v1645_v8 = vpop.permute.xlu1 %1644 }
 0x507   : > { %v1447_v13 = vpop.f32.mrf.mxu1 }
 0x514   : > { %1642 = vrot.lane.b32.xlu0 %v3306_v60, %s3083_s9  ;;  %v3722_v60 = vadd.f32 %v1447_v13, %v3471_v2 }
 0x515   : > { %1640 = vrot.lane.b32.xlu1 %v3310_v63, %s3083_s9 }
 0x533   : > { %1471 = vmax.xlane.f32.xlu0 %v3711_v42 }
 0x537   : > { %1473 = vmax.xlane.f32.xlu0 %v3715_v7 }
 0x539   : > { %1467 = vmax.xlane.f32.xlu1 %v3718_v20 }
 0x53b   : > { %1469 = vmax.xlane.f32.xlu0 %v3722_v60 }
 0x54a   : > { %1636 = vrot.lane.b32.xlu1 %v3324_v10, %s3083_s9 }
 0x54e   : > { %1634 = vrot.lane.b32.xlu1 %v3337_v25, %s3083_s9 }
 0x551   : > { %1638 = vrot.lane.b32.xlu0 %v3327_v11, %s3083_s9 }
 0x552   : > { %1632 = vrot.lane.b32.xlu1 %v3288_v24, %s3083_s9 }
 0x555   : > { %1624 = vrot.lane.b32.xlu0 %v3407_v47, %s3083_s9 }
 0x556   : > { %1626 = vrot.lane.b32.xlu1 %v3405_v45, %s3083_s9 }
 0x559   : > { %1628 = vrot.lane.b32.xlu0 %v3421_v33, %s3083_s9 }
 0x55a   : > { %1630 = vrot.lane.b32.xlu1 %v3419_v54, %s3083_s9 }
 0x55d   : > { %1823 = vrot.lane.b32.xlu0 %v3318_v5, %s3083_s9 }
 0x55e   : > { %1821 = vrot.lane.b32.xlu1 %v3314_v4, %s3083_s9 }
 0x561   : > { %1819 = vrot.lane.b32.xlu0 %v3330_v15, %s3083_s9 }
 0x562   : > { %1817 = vrot.lane.b32.xlu1 %v3340_v32, %s3083_s9 }
 0x566   : > { %1815 = vrot.lane.b32.xlu1 %v3350_v41, %s3083_s9 }
 0x56a   : > { %1813 = vrot.lane.b32.xlu1 %v3356_v48, %s3083_s9 }
 0x585   : > { %v1464_v12 = vpop.xlane.xlu1 %1463 }
 0x586   : > { %v1477_v10 = vsub.f32 %v1437_v1, %v1464_v12 }
 0x587   : > { %v1460_v13 = vpop.xlane.xlu0 %1459 }
 0x588   : > { %v1475_v24 = vsub.f32 %v1429_v59, %v1460_v13  ;;  %v1487_v45 = vmul.f32 1.442695, %v1477_v10  ;;  %v1682_v59 = vsel %vm781_vm0, %v3666_v21, 0 }
 0x589   : > { %v1466_v63 = vpop.xlane.xlu1 %1465 }
 0x58a   : > { %v1478_v5 = vsub.f32 %v1440_v19, %v1466_v63  ;;  %v1483_v4 = vmul.f32 1.442695, %v1475_v24  ;;  %v1679_v19 = vsel %vm781_vm0, %v1645_v8, 0 }
 0x58c   : > { %v1489_v11 = vmul.f32 1.442695, %v1478_v5  ;;  %2975 = vpow2.f32 %v1483_v4 }
 0x58d   : > { %v1462_v25 = vpop.xlane.xlu1 %1461 }
 0x58e   : > { %v1476_v15 = vsub.f32 %v1432_v51, %v1462_v25  ;;  %2977 = vpow2.f32 %v1489_v11  ;;  %v1643_v51 = vpop.permute.xlu0 %1642 }
 0x58f   : > { %v1676_v61 = vsel %vm781_vm0, %v1643_v51, 0 }
 0x590   : > { %v1485_v32 = vmul.f32 1.442695, %v1476_v15 }
 0x591   : > { %v1641_v12 = vpop.permute.xlu1 %1640 }
 0x592   : > { %2979 = vpow2.f32 %v1485_v32  ;;  %v1673_v13 = vsel %vm781_vm0, %v1641_v12, 0 }
 0x593   : > { %2981 = vpow2.f32 %v1487_v45 }
 0x599   : > { %v3754_v41 = vpop.eup %2975 }
 0x59b   : > { %v3756_v48 = vpop.eup %2977 }
 0x59f   : > { %v3758_v47 = vpop.eup %2979 }
 0x5a0   : > { %v3760_v54 = vpop.eup %2981  ;;  %v1515_v33 = vpack.c.bf16 %v3758_v47, %v3754_v41 }
 0x5a1   : > { %v1516_v1 = vpack.c.bf16 %v3756_v48, %v3760_v54 }
 0x5a2   : > { %2694 = vmatprep.mubr.bf16.mxu0 %v1515_v33 }
 0x5a3   : > { %2695 = vmatmul.mubr.bf16.vlgmr.msra.gmra.mxu0 %v1516_v1 }
 0x5a4   : > { %2703 = vmatpush3.bf16.xpose.msra.mxu0 %v1682_v59 }
 0x5a5   : > { %2799 = vmatprep.subr.msk.bf16.mxu0 %vm781_vm0, %v1645_v8 }
 0x5ac   : > { %2705 = vmatpush3.bf16.xpose.msra.mxu0 %v1679_v19 }
 0x5ad   : > { %2800 = vmatprep.subr.msk.bf16.mxu0 %vm781_vm0, %v1643_v51 }
 0x5b4   : > { %2707 = vmatpush3.bf16.xpose.msra.mxu0 %v1676_v61 }
 0x5b5   : > { %2801 = vmatprep.subr.msk.bf16.mxu0 %vm781_vm0, %v1641_v12 }
 0x5bc   : > { %2709 = vmatpush3.bf16.xpose.msra.mxu0 %v1673_v13  ;;  %v1472_v21 = vpop.xlane.xlu0 %1471 }
 0x5bd   : > { %v1481_v5 = vsub.f32 %v3711_v42, %v1472_v21 }
 0x5bf   : > { %v1495_v45 = vmul.f32 1.442695, %v1481_v5 }
 0x5c0   : > { %v1474_v24 = vpop.xlane.xlu0 %1473 }
 0x5c1   : > { %v1482_v63 = vsub.f32 %v3715_v7, %v1474_v24 }
 0x5c2   : > { %v1468_v8 = vpop.xlane.xlu1 %1467 }
 0x5c3   : > { %v1497_v10 = vmul.f32 1.442695, %v1482_v63  ;;  %v1479_v4 = vsub.f32 %v3718_v20, %v1468_v8 }
 0x5c4   : > { %v1470_v11 = vpop.xlane.xlu0 %1469 }
 0x5c5   : > { %v1491_v25 = vmul.f32 1.442695, %v1479_v4  ;;  %v1480_v15 = vsub.f32 %v3722_v60, %v1470_v11  ;;  %2983 = vpow2.f32 %v1497_v10 }
 0x5c6   : > { %v1637_v32 = vpop.permute.xlu1 %1636 }
 0x5c7   : > { %v1493_v33 = vmul.f32 1.442695, %v1480_v15  ;;  %2985 = vpow2.f32 %v1491_v25  ;;  %v1667_v60 = vsel %vm781_vm0, %v1637_v32, 0 }
 0x5c8   : > { %v1639_v1 = vpop.permute.xlu0 %1638 }
 0x5c9   : > { %2987 = vpow2.f32 %v1493_v33  ;;  %v1670_v59 = vsel %vm781_vm0, %v1639_v1, 0  ;;  %2802 = vmatprep.subr.msk.bf16.mxu0 %vm781_vm0, %v1639_v1 }
 0x5ca   : > { %2989 = vpow2.f32 %v1495_v45  ;;  %v1635_v42 = vpop.permute.xlu1 %1634  ;;  %2711 = vmatpush3.bf16.xpose.msra.mxu0 %v1670_v59 }
 0x5cb   : > { %2803 = vmatprep.subr.msk.bf16.mxu0 %vm781_vm0, %v1637_v32  ;;  %v1664_v10 = vsel %vm781_vm0, %v1635_v42, 0 }
 0x5cc   : > { %v1625_v7 = vpop.permute.xlu0 %1624 }
 0x5ce   : > { %v1633_v20 = vpop.permute.xlu1 %1632 }
 0x5cf   : > { %v1661_v15 = vsel %vm781_vm0, %v1633_v20, 0 }
 0x5d0   : > { %v1629_v19 = vpop.permute.xlu0 %1628 }
 0x5d2   : > { %v1627_v51 = vpop.permute.xlu1 %1626  ;;  %2713 = vmatpush3.bf16.xpose.msra.mxu0 %v1667_v60  ;;  %v3783_v61 = vpop.eup %2983 }
 0x5d3   : > { %2804 = vmatprep.subr.msk.bf16.mxu0 %vm781_vm0, %v1635_v42 }
 0x5d4   : > { %v1824_v12 = vpop.permute.xlu0 %1823  ;;  %v3785_v13 = vpop.eup %2985 }
 0x5d5   : > { %2726 = vmatprep.subr.bf16.mxu1 %v1824_v12 }
 0x5d6   : > { %v3787_v21 = vpop.eup %2987  ;;  %v1631_v24 = vpop.permute.xlu1 %1630  ;;  %2727 = vmatpush3.bf16.msra.mxu1 %v1824_v12 }
 0x5d7   : > { %v3789_v63 = vpop.eup %2989  ;;  %v1517_v5 = vpack.c.bf16 %v3787_v21, %v3785_v13 }
 0x5d8   : > { %v1518_v8 = vpack.c.bf16 %v3783_v61, %v3789_v63  ;;  %v1820_v11 = vpop.permute.xlu0 %1819 }
 0x5d9   : > { %2698 = vmatprep.mubr.bf16.mxu0 %v1517_v5 }
 0x5da   : > { %v1822_v4 = vpop.permute.xlu1 %1821  ;;  %2699 = vmatmul.mubr.bf16.gmra.mxu0 %v1518_v8 }
 0x5db   : > { %2715 = vmatpush3.bf16.xpose.msra.mxu0 %v1664_v10  ;;  %2718 = vmatprep.mubr.msk.bf16.mxu0 %vm781_vm0, %v1625_v7 }
 0x5dc   : > { %2805 = vmatprep.subr.msk.bf16.mxu0 %vm781_vm0, %v1633_v20  ;;  %2728 = vmatprep.subr.bf16.mxu1 %v1822_v4 }
 0x5dd   : > { %2729 = vmatpush3.bf16.msra.mxu1 %v1822_v4 }
 0x5de   : > { %2730 = vmatprep.subr.bf16.mxu1 %v1820_v11  ;;  %v1818_v25 = vpop.permute.xlu1 %1817 }
 0x5e1   : > { %2731 = vmatpush3.bf16.msra.mxu1 %v1820_v11 }
 0x5e2   : > { %2732 = vmatprep.subr.bf16.mxu1 %v1818_v25  ;;  %v1816_v45 = vpop.permute.xlu1 %1815 }
 0x5e3   : > { %2717 = vmatpush3.bf16.xpose.msra.mxu0 %v1661_v15 }
 0x5e5   : > { %2733 = vmatpush3.bf16.msra.mxu1 %v1818_v25 }
 0x5e6   : > { %2734 = vmatprep.subr.bf16.mxu1 %v1816_v45  ;;  %v1814_v32 = vpop.permute.xlu1 %1813 }
 0x5e9   : > { %2735 = vmatpush3.bf16.msra.mxu1 %v1816_v45 }
 0x5ea   : > { %2719 = vmatmul.mubr.msk.bf16.vlgmr.msra.gmra.mxu0 %vm781_vm0, %v1627_v51  ;;  %2736 = vmatprep.subr.bf16.mxu1 %v1814_v32 }
 0x5eb   : > { %2722 = vmatprep.mubr.msk.bf16.mxu0 %vm781_vm0, %v1629_v19 }
 0x5ed   : > { %2737 = vmatpush3.bf16.msra.mxu1 %v1814_v32 }
 0x5f2   : > { %2723 = vmatmul.mubr.msk.bf16.gmra.mxu0 %vm781_vm0, %v1631_v24 }
 0x663   : > { %v3802_v33 = vpop.f32.mrf.mxu0 }
 0x665   : > { %v3804_v1 = vpop.f32.mrf.mxu0 }
 0x667   : > { %v3806_v59 = vpop.f32.mrf.mxu0 }
 0x669   : > { %v3808_v42 = vpop.f32.mrf.mxu0 }
 0x69a   : > { %v3810_v7 = vpop.f32.mrf.mxu0 }
 0x69c   : > { %v3812_v20 = vpop.f32.mrf.mxu0 }
 0x69e   : > { %v3814_v60 = vpop.f32.mrf.mxu0 }
 0x6a0   : > { %v3816_v51 = vpop.f32.mrf.mxu0 }
 0x6aa   : > { %v2720_v19 = vpop.f32.mrf.mxu0 }
 0x6ab   : > { %v1727_v12 = vadd.f32 %v2720_v19, %v3471_v2 }
 0x6ac   : > { %v1718_v24 = vpop.f32.mrf.mxu0 }
 0x6ad   : > { %1753 = vmax.xlane.f32.xlu0 %v1727_v12  ;;  %v1719_v8 = vadd.f32 %v1718_v24, %v3471_v2 }
 0x6ae   : > { %v2721_v5 = vpop.f32.mrf.mxu0 }
 0x6af   : > { %v1730_v25 = vadd.f32 %v2721_v5, %v3471_v2 }
 0x6b0   : > { %v1721_v10 = vpop.f32.mrf.mxu0 }
 0x6b1   : > { %v1722_v4 = vadd.f32 %v1721_v10, %v3471_v2  ;;  %1749 = vmax.xlane.f32.xlu0 %v1719_v8 }
 0x6b2   : > { %v2724_v11 = vpop.f32.mrf.mxu0 }
 0x6b3   : > { %1751 = vmax.xlane.f32.xlu1 %v1722_v4  ;;  %v1743_v19 = vadd.f32 %v2724_v11, %v3471_v2 }
 0x6b4   : > { %v1734_v15 = vpop.f32.mrf.mxu0 }
 0x6b5   : > { %v1735_v45 = vadd.f32 %v1734_v15, %v3471_v2  ;;  %1755 = vmax.xlane.f32.xlu0 %v1730_v25 }
 0x6b6   : > { %v2725_v32 = vpop.f32.mrf.mxu0 }
 0x6b7   : > { %1757 = vmax.xlane.f32.xlu1 %v1735_v45  ;;  %v1746_v30 = vadd.f32 %v2725_v32, %v3471_v2 }
 0x6b8   : > { %v1737_v9 = vpop.f32.mrf.mxu0 }
 0x6b9   : > { %1761 = vmax.xlane.f32.xlu0 %v1743_v19  ;;  %v1738_v24 = vadd.f32 %v1737_v9, %v3471_v2 }
 0x6bb   : > { %1763 = vmax.xlane.f32.xlu1 %v1746_v30 }
 0x6bd   : > { %1759 = vmax.xlane.f32.xlu0 %v1738_v24 }
 0x6cc   : > { %1809 = vrot.lane.b32.xlu1 %v3290_v26, %s3083_s9 }
 0x6d3   : > { %1811 = vrot.lane.b32.xlu0 %v3292_v31, %s3083_s9 }
 0x6f0   : > { %1203 = vadd.xlane.f32.xlu1 %v3620_v14 }
 0x6f2   : > { %1201 = vadd.xlane.f32.xlu0 %v3616_v0 }
 0x6f4   : > { %1501 = vadd.xlane.f32.xlu1 %v3758_v47 }
 0x6f6   : > { %1205 = vadd.xlane.f32.xlu0 %v3622_v50 }
 0x6f8   : > { %1505 = vadd.xlane.f32.xlu1 %v3756_v48 }
 0x6fa   : > { %1207 = vadd.xlane.f32.xlu0 %v3618_v44 }
 0x6fc   : > { %1211 = vadd.xlane.f32.xlu1 %v3651_v46 }
 0x6fe   : > { %1499 = vadd.xlane.f32.xlu0 %v3754_v41 }
 0x700   : > { %1215 = vadd.xlane.f32.xlu1 %v3647_v62 }
 0x702   : > { %1503 = vadd.xlane.f32.xlu0 %v3760_v54 }
 0x704   : > { %1509 = vadd.xlane.f32.xlu1 %v3787_v21 }
 0x706   : > { %1209 = vadd.xlane.f32.xlu0 %v3649_v3 }
 0x70a   : > { %1213 = vadd.xlane.f32.xlu0 %v3653_v17 }
 0x70e   : > { %1507 = vadd.xlane.f32.xlu0 %v3785_v13 }
 0x736   : > { %v1754_v9 = vpop.xlane.xlu0 %1753 }
 0x737   : > { %v1767_v26 = vsub.f32 %v1727_v12, %v1754_v9 }
 0x739   : > { %v1777_v31 = vmul.f32 1.442695, %v1767_v26 }
 0x73a   : > { %v1750_v2 = vpop.xlane.xlu0 %1749 }
 0x73b   : > { %2991 = vpow2.f32 %v1777_v31  ;;  %v1765_v0 = vsub.f32 %v1719_v8, %v1750_v2 }
 0x73c   : > { %v1752_v44 = vpop.xlane.xlu1 %1751 }
 0x73d   : > { %v1773_v14 = vmul.f32 1.442695, %v1765_v0  ;;  %v1766_v50 = vsub.f32 %v1722_v4, %v1752_v44 }
 0x73e   : > { %v1756_v62 = vpop.xlane.xlu0 %1755 }
 0x73f   : > { %2993 = vpow2.f32 %v1773_v14  ;;  %v1775_v46 = vmul.f32 1.442695, %v1766_v50  ;;  %v1768_v41 = vsub.f32 %v1730_v25, %v1756_v62 }
 0x740   : > { %v1758_v48 = vpop.xlane.xlu1 %1757 }
 0x741   : > { %2995 = vpow2.f32 %v1775_v46  ;;  %v1779_v3 = vmul.f32 1.442695, %v1768_v41  ;;  %v1769_v47 = vsub.f32 %v1735_v45, %v1758_v48 }
 0x742   : > { %v1762_v17 = vpop.xlane.xlu0 %1761 }
 0x743   : > { %2997 = vpow2.f32 %v1779_v3  ;;  %v1781_v54 = vmul.f32 1.442695, %v1769_v47  ;;  %v1771_v13 = vsub.f32 %v1743_v19, %v1762_v17 }
 0x744   : > { %v1764_v21 = vpop.xlane.xlu1 %1763 }
 0x745   : > { %v1785_v12 = vmul.f32 1.442695, %v1771_v13  ;;  %v1772_v5 = vsub.f32 %v1746_v30, %v1764_v21  ;;  %2999 = vpow2.f32 %v1781_v54 }
 0x746   : > { %v1760_v10 = vpop.xlane.xlu0 %1759 }
 0x747   : > { %v1787_v8 = vmul.f32 1.442695, %v1772_v5  ;;  %v1770_v11 = vsub.f32 %v1738_v24, %v1760_v10  ;;  %3001 = vpow2.f32 %v1785_v12 }
 0x748   : > { %v2992_v4 = vpop.eup %2991  ;;  %v1810_v32 = vpop.permute.xlu1 %1809 }
 0x749   : > { %v1783_v15 = vmul.f32 1.442695, %v1770_v11  ;;  %1793 = vadd.xlane.f32.xlu0 %v2992_v4  ;;  %3003 = vpow2.f32 %v1787_v8 }
 0x74a   : > { %v1812_v25 = vpop.permute.xlu0 %1811 }
 0x74b   : > { %3005 = vpow2.f32 %v1783_v15  ;;  %2738 = vmatprep.subr.bf16.mxu1 %v1812_v25 }
 0x74c   : > { %v2994_v45 = vpop.eup %2993  ;;  %2739 = vmatpush3.bf16.msra.mxu1 %v1812_v25 }
 0x74d   : > { %1789 = vadd.xlane.f32.xlu0 %v2994_v45  ;;  %2740 = vmatprep.subr.bf16.mxu1 %v1810_v32 }
 0x74e   : > { %v2996_v19 = vpop.eup %2995 }
 0x74f   : > { %v1805_v9 = vpack.c.bf16 %v2996_v19, %v2994_v45 }
 0x750   : > { %v2998_v30 = vpop.eup %2997  ;;  %2741 = vmatpush3.bf16.msra.mxu1 %v1810_v32 }
 0x751   : > { %1511 = vadd.xlane.f32.xlu0 %v3789_v63  ;;  %2742 = vmatprep.mubr.bf16.mxu1 %v1805_v9  ;;  %v1806_v24 = vpack.c.bf16 %v2998_v30, %v2992_v4 }
 0x752   : > { %1795 = vadd.xlane.f32.xlu1 %v2998_v30  ;;  %v3000_v26 = vpop.eup %2999 }
 0x753   : > { %2743 = vmatmul.mubr.bf16.vlgmr.msra.gmra.mxu1 %v1806_v24 }
 0x754   : > { %v3002_v31 = vpop.eup %3001 }
 0x755   : > { %1797 = vadd.xlane.f32.xlu0 %v3000_v26 }
 0x756   : > { %1791 = vadd.xlane.f32.xlu1 %v2996_v19  ;;  %v3004_v2 = vpop.eup %3003 }
 0x757   : > { %v1808_v14 = vpack.c.bf16 %v3004_v2, %v3002_v31 }
 0x758   : > { %v3006_v0 = vpop.eup %3005 }
 0x759   : > { %1801 = vadd.xlane.f32.xlu0 %v3002_v31  ;;  %v1807_v44 = vpack.c.bf16 %v3006_v0, %v3000_v26  ;;  %v2924_v26 = vld [vmem:[%s3962_s4 + $0x10] sm:$0xff]  }
 0x75a   : > { %1513 = vadd.xlane.f32.xlu1 %v3783_v61 }
 0x75b   : > { %2746 = vmatprep.mubr.bf16.mxu1 %v1807_v44 }
 0x75c   : > { %2747 = vmatmul.mubr.bf16.gmra.mxu1 %v1808_v14 }
 0x75d   : > { %923 = vadd.xlane.f32.xlu0 %v3519_v49 }
 0x75e   : > { %1799 = vadd.xlane.f32.xlu1 %v3006_v0 }
 0x761   : > { %927 = vadd.xlane.f32.xlu0 %v3523_v52 }
 0x762   : > { %1803 = vadd.xlane.f32.xlu1 %v3004_v2 }
 0x765   : > { %931 = vadd.xlane.f32.xlu0 %v3544_v56 }
 0x766   : > { %925 = vadd.xlane.f32.xlu1 %v3521_v40 }
 0x769   : > { %935 = vadd.xlane.f32.xlu0 %v3538_v57 }
 0x76a   : > { %929 = vadd.xlane.f32.xlu1 %v3527_v18 }
 0x76e   : > { %933 = vadd.xlane.f32.xlu1 %v3541_v37 }
 0x772   : > { %937 = vadd.xlane.f32.xlu1 %v3536_v53 }
 0x779   : > { %v1204_v61 = vpop.xlane.xlu1 %1203 }
 0x77a   : > { %3007 = vrcp.f32 %v1204_v61 }
 0x77b   : > { %v1202_v63 = vpop.xlane.xlu0 %1201 }
 0x77c   : > { %3009 = vrcp.f32 %v1202_v63 }
 0x77d   : > { %v1502_v49 = vpop.xlane.xlu1 %1501 }
 0x77f   : > { %v1206_v50 = vpop.xlane.xlu0 %1205 }
 0x780   : > { %3011 = vrcp.f32 %v1206_v50 }
 0x781   : > { %v1506_v52 = vpop.xlane.xlu1 %1505 }
 0x783   : > { %v1208_v62 = vpop.xlane.xlu0 %1207 }
 0x784   : > { %3013 = vrcp.f32 %v1208_v62  ;;  %v2925_v62 = vld [vmem:[%s3962_s4 + $0x8] sm:$0xff]  }
 0x785   : > { %3015 = vrcp.f32 %v1502_v49  ;;  %v1212_v18 = vpop.xlane.xlu1 %1211 }
 0x787   : > { %v3008_v40 = vpop.eup %3007  ;;  %v1500_v56 = vpop.xlane.xlu0 %1499 }
 0x788   : > { %3017 = vrcp.f32 %v1500_v56  ;;  %v1327_v53 = vmul.f32 %v3008_v40, %v3692_v43 }
 0x789   : > { %v3010_v57 = vpop.eup %3009  ;;  %3019 = vrcp.f32 %v1506_v52  ;;  %v1216_v3 = vpop.xlane.xlu1 %1215 }
 0x78a   : > { %v1326_v37 = vmul.f32 %v3010_v57, %v3688_v27  ;;  %v2926_v57 = vld [vmem:[%s3962_s4] sm:$0xff]  }
 0x78b   : > { %v1504_v46 = vpop.xlane.xlu0 %1503 }
 0x78c   : > { %3021 = vrcp.f32 %v1504_v46  ;;  %v2819_v41 = vpack.i.bf16 %v1327_v53, %v1326_v37 }
 0x78d   : > { %3023 = vrcp.f32 %v1212_v18  ;;  %v3012_v48 = vpop.eup %3011  ;;  %v1510_v2 = vpop.xlane.xlu1 %1509 }
 0x78e   : > { %2820 = vrot.lane.b32.xlu0 %v2819_v41, %s3083_s9  ;;  %v1328_v54 = vmul.f32 %v3012_v48, %v3686_v6 }
 0x78f   : > { %v1210_v47 = vpop.xlane.xlu0 %1209 }
 0x790   : > { %3025 = vrcp.f32 %v1210_v47 }
 0x791   : > { %v3014_v17 = vpop.eup %3013  ;;  %3027 = vrcp.f32 %v1216_v3 }
 0x792   : > { %v1329_v13 = vmul.f32 %v3014_v17, %v3690_v29  ;;  %v3016_v21 = vpop.eup %3015 }
 0x793   : > { %v1214_v27 = vpop.xlane.xlu0 %1213  ;;  %v1617_v10 = vmul.f32 %v3016_v21, %v3808_v42 }
 0x794   : > { %3029 = vrcp.f32 %v1214_v27  ;;  %v2824_v43 = vpack.i.bf16 %v1329_v13, %v1328_v54 }
 0x795   : > { %v3018_v12 = vpop.eup %3017 }
 0x796   : > { %2825 = vrot.lane.b32.xlu1 %v2824_v43, %s3083_s9  ;;  %v1616_v5 = vmul.f32 %v3018_v12, %v3804_v1  ;;  %v3020_v8 = vpop.eup %3019 }
 0x797   : > { %v1619_v29 = vmul.f32 %v3020_v8, %v3806_v59  ;;  %v2919_v59 = vld [vmem:[%s3962_s4 + $0x38] sm:$0xff]   ;;  %v1508_v31 = vpop.xlane.xlu0 %1507 }
 0x798   : > { %v2829_v11 = vpack.i.bf16 %v1617_v10, %v1616_v5  ;;  %2750 = vmatprep.subr.bf16.mxu1 %v2919_v59  ;;  %3031 = vrcp.f32 %v1508_v31 }
 0x799   : > { %v3022_v4 = vpop.eup %3021  ;;  %2751 = vmatpush3.bf16.msra.mxu1 %v2919_v59 }
 0x79a   : > { %2830 = vrot.lane.b32.xlu1 %v2829_v11, %s3081_s8  ;;  %v1618_v6 = vmul.f32 %v3022_v4, %v3802_v33  ;;  %v3024_v15 = vpop.eup %3023 }
 0x79b   : > { %v1331_v1 = vmul.f32 %v3024_v15, %v3700_v34  ;;  %v2923_v34 = vld [vmem:[%s3962_s4 + $0x18] sm:$0xff]  }
 0x79c   : > { %v2834_v25 = vpack.i.bf16 %v1619_v29, %v1618_v6 }
 0x79d   : > { %v3026_v45 = vpop.eup %3025 }
 0x79e   : > { %2835 = vrot.lane.b32.xlu1 %v2834_v25, %s3081_s8  ;;  %v1330_v32 = vmul.f32 %v3026_v45, %v3696_v23  ;;  %v3028_v19 = vpop.eup %3027  ;;  %v2920_v23 = vld [vmem:[%s3962_s4 + $0x30] sm:$0xff]  }
 0x79f   : > { %v1333_v33 = vmul.f32 %v3028_v19, %v3698_v35  ;;  %2752 = vmatprep.subr.bf16.mxu1 %v2920_v23  ;;  %v2922_v35 = vld [vmem:[%s3962_s4 + $0x20] sm:$0xff]  }
 0x7a0   : > { %v2839_v42 = vpack.i.bf16 %v1331_v1, %v1330_v32  ;;  %2753 = vmatpush3.bf16.msra.mxu1 %v2920_v23 }
 0x7a1   : > { %v3030_v9 = vpop.eup %3029 }
 0x7a2   : > { %2840 = vrot.lane.b32.xlu0 %v2839_v42, %s3083_s9  ;;  %v1332_v30 = vmul.f32 %v3030_v9, %v3694_v22  ;;  %v2921_v22 = vld [vmem:[%s3962_s4 + $0x28] sm:$0xff]  }
 0x7a3   : > { %2754 = vmatprep.subr.bf16.mxu1 %v2921_v22 }
 0x7a4   : > { %v2844_v24 = vpack.i.bf16 %v1333_v33, %v1332_v30  ;;  %2755 = vmatpush3.bf16.msra.mxu1 %v2921_v22 }
 0x7a5   : > { %2756 = vmatprep.subr.bf16.mxu1 %v2922_v35  ;;  %v3032_v18 = vpop.eup %3031 }
 0x7a6   : > { %2845 = vrot.lane.b32.xlu1 %v2844_v24, %s3083_s9  ;;  %v1620_v29 = vmul.f32 %v3032_v18, %v3812_v20 }
 0x7a8   : > { %2757 = vmatpush3.bf16.msra.mxu1 %v2922_v35 }
 0x7a9   : > { %2758 = vmatprep.subr.bf16.mxu1 %v2923_v34 }
 0x7ac   : > { %2759 = vmatpush3.bf16.msra.mxu1 %v2923_v34 }
 0x7ad   : > { %2760 = vmatprep.subr.bf16.mxu1 %v2924_v26 }
 0x7b0   : > { %2761 = vmatpush3.bf16.msra.mxu1 %v2924_v26 }
 0x7b1   : > { %2762 = vmatprep.subr.bf16.mxu1 %v2925_v62 }
 0x7b4   : > { %2763 = vmatpush3.bf16.msra.mxu1 %v2925_v62 }
 0x7b5   : > { %2764 = vmatprep.subr.bf16.mxu1 %v2926_v57 }
 0x7b8   : > { %2765 = vmatpush3.bf16.msra.mxu1 %v2926_v57 }
 0x7d2   : > { %v1794_v0 = vpop.xlane.xlu0 %1793 }
 0x7d3   : > { %3033 = vrcp.f32 %v1794_v0 }
 0x7d6   : > { %v1790_v14 = vpop.xlane.xlu0 %1789 }
 0x7d7   : > { %3035 = vrcp.f32 %v1790_v14 }
 0x7da   : > { %v1512_v63 = vpop.xlane.xlu0 %1511 }
 0x7db   : > { %v1796_v44 = vpop.xlane.xlu1 %1795 }
 0x7dc   : > { %3037 = vrcp.f32 %v1796_v44 }
 0x7de   : > { %v1798_v50 = vpop.xlane.xlu0 %1797 }
 0x7df   : > { %v1792_v61 = vpop.xlane.xlu1 %1791 }
 0x7e0   : > { %v3034_v53 = vpop.eup %3033 }
 0x7e2   : > { %v1802_v40 = vpop.xlane.xlu0 %1801 }
 0x7e3   : > { %v1514_v49 = vpop.xlane.xlu1 %1513 }
 0x7e4   : > { %3039 = vrcp.f32 %v1514_v49  ;;  %v3036_v46 = vpop.eup %3035 }
 0x7e5   : > { %3041 = vrcp.f32 %v1512_v63 }
 0x7e6   : > { %3043 = vrcp.f32 %v1792_v61  ;;  %v924_v35 = vpop.xlane.xlu0 %923 }
 0x7e7   : > { %v1800_v52 = vpop.xlane.xlu1 %1799  ;;  %3045 = vrcp.f32 %v1510_v2 }
 0x7e8   : > { %3047 = vrcp.f32 %v1802_v40 }
 0x7e9   : > { %v3038_v48 = vpop.eup %3037 }
 0x7ea   : > { %v928_v26 = vpop.xlane.xlu0 %927 }
 0x7eb   : > { %v1804_v56 = vpop.xlane.xlu1 %1803 }
 0x7ec   : > { %3049 = vrcp.f32 %v1804_v56 }
 0x7ed   : > { %3051 = vrcp.f32 %v1798_v50 }
 0x7ee   : > { %3053 = vrcp.f32 %v1800_v52  ;;  %v932_v0 = vpop.xlane.xlu0 %931 }
 0x7ef   : > { %3055 = vrcp.f32 %v924_v35 }
 0x7f0   : > { %3057 = vrcp.f32 %v928_v26  ;;  %v3981_v26 = vld [vmem:[#allocation10_spill] sm:$0xff] }
 0x7f1   : > { %v3040_v3 = vpop.eup %3039 }
 0x7f2   : > { %v3042_v17 = vpop.eup %3041  ;;  %v1623_v10 = vmul.f32 %v3040_v3, %v3814_v60  ;;  %v936_v14 = vpop.xlane.xlu0 %935 }
 0x7f3   : > { %v3044_v21 = vpop.eup %3043  ;;  %v1622_v6 = vmul.f32 %v3042_v17, %v3810_v7 }
 0x7f4   : > { %v3046_v8 = vpop.eup %3045 }
 0x7f5   : > { %v2864_v25 = vpack.i.bf16 %v1623_v10, %v1622_v6  ;;  %v1621_v45 = vmul.f32 %v3046_v8, %v3816_v51  ;;  %v3048_v32 = vpop.eup %3047  ;;  %v926_v51 = vpop.xlane.xlu1 %925 }
 0x7f6   : > { %3059 = vrcp.f32 %v926_v51 }
 0x7f7   : > { %v2859_v60 = vpack.i.bf16 %v1621_v45, %v1620_v29 }
 0x7f9   : > { %v3050_v1 = vpop.eup %3049  ;;  %v930_v22 = vpop.xlane.xlu1 %929 }
 0x7fa   : > { %v3052_v42 = vpop.eup %3051  ;;  %3061 = vrcp.f32 %v930_v22 }
 0x7fb   : > { %v3054_v33 = vpop.eup %3053  ;;  %3063 = vrcp.f32 %v932_v0 }
 0x7fc   : > { %3065 = vrcp.f32 %v936_v14  ;;  %v3056_v63 = vpop.eup %3055 }
 0x7fd   : > { %v934_v34 = vpop.xlane.xlu1 %933  ;;  %v3058_v50 = vpop.eup %3057 }
 0x7fe   : > { %3067 = vrcp.f32 %v934_v34 }
 0x800   : > { %v2821_v49 = vpop.permute.xlu0 %2820 }
 0x801   : > { %v938_v31 = vpop.xlane.xlu1 %937  ;;  %v2823_v56 = vunpack.i.h.bf16 %v2821_v49  ;;  %v2822_v57 = vunpack.i.l.bf16 %v2821_v49 }
 0x802   : > { %3069 = vrcp.f32 %v938_v31 }
 0x803   : > { %v3060_v52 = vpop.eup %3059 }
 0x807   : > { %v3062_v40 = vpop.eup %3061 }
 0x808   : > { %v2826_v2 = vpop.permute.xlu1 %2825  ;;  %v1019_v17 = vmul.f32 %v3062_v40, %v3674_v58  ;;  %v3064_v8 = vpop.eup %3063 }
 0x809   : > { %v2828_v18 = vunpack.i.h.bf16 %v2826_v2  ;;  %v3066_v6 = vpop.eup %3065 }
 0x80a   : > { %v1022_v51 = vmul.f32 %v3066_v6, %v3678_v55 }
 0x80c   : > { %v2831_v44 = vpop.permute.xlu1 %2830 }
 0x810   : > { %v2836_v61 = vpop.permute.xlu1 %2835 }
 0x811   : > { %v2837_v3 = vunpack.i.l.bf16 %v2836_v61 }
 0x813   : > { %v2744_v37 = vpop.f32.mrf.mxu1 }
 0x814   : > { %v1908_v54 = vmul.f32 %v3034_v53, %v2744_v37  ;;  %v2827_v37 = vunpack.i.l.bf16 %v2826_v2  ;;  %v2841_v53 = vpop.permute.xlu0 %2840 }
 0x815   : > { %v1867_v41 = vpop.f32.mrf.mxu1 }
 0x816   : > { %v1906_v43 = vmul.f32 %v3036_v46, %v1867_v41  ;;  %v1016_v46 = vmul.f32 %v3056_v63, %v3672_v36  ;;  %v1018_v41 = vmul.f32 %v3058_v50, %v3670_v28  ;;  %v2013_v36 = vsel %vm781_vm0, %v1019_v17, %v2828_v18 }
 0x817   : > { %v2745_v47 = vpop.f32.mrf.mxu1 }
 0x818   : > { %v1909_v13 = vmul.f32 %v3038_v48, %v2745_v47  ;;  %v3906_v62 = vpop.permute.xlu1 %2845  ;;  %v2838_v48 = vunpack.i.h.bf16 %v2836_v61  ;;  %v1017_v47 = vmul.f32 %v3060_v52, %v3676_v38  ;;  %v2012_v28 = vsel %vm781_vm0, %v1018_v41, %v2827_v37 }
 0x819   : > { %v1870_v27 = vpop.f32.mrf.mxu1  ;;  %v2021_v58 = vsel %vm2018_vm2, %v2012_v28, %v2837_v3  ;;  %v3985_v28 = vld [vmem:[#allocation4_spill] sm:$0xff] }
 0x81a   : > { %v2849_v12 = vpack.i.bf16 %v1909_v13, %v1908_v54  ;;  %v1907_v5 = vmul.f32 %v3044_v21, %v1870_v27  ;;  %v2833_v54 = vunpack.i.h.bf16 %v2831_v44  ;;  %v2832_v13 = vunpack.i.l.bf16 %v2831_v44 }
 0x81b   : > { %v2022_v38 = vsel %vm2018_vm2, %v2013_v36, %v2838_v48 }
 0x81c   : > { %v2854_v11 = vpack.i.bf16 %v1907_v5, %v1906_v43  ;;  %v2748_v4 = vpop.f32.mrf.mxu1  ;;  %2850 = vrot.lane.b32.xlu1 %v2849_v12, %s3080_s7  ;;  %v2011_v12 = vsel %vm781_vm0, %v1017_v47, %v2823_v56  ;;  %v2010_v5 = vsel %vm781_vm0, %v1016_v46, %v2822_v57 }
 0x81d   : > { %v1912_v9 = vmul.f32 %v3048_v32, %v2748_v4  ;;  %v2019_v29 = vsel %vm2018_vm2, %v2010_v5, %v2832_v13 }
 0x81e   : > { %v1883_v15 = vpop.f32.mrf.mxu1  ;;  %2855 = vrot.lane.b32.xlu0 %v2854_v11, %s3080_s7 }
 0x81f   : > { %v1910_v7 = vmul.f32 %v3052_v42, %v1883_v15  ;;  %v2020_v15 = vsel %vm2018_vm2, %v2011_v12, %v2833_v54  ;;  %v3982_v54 = vld [vmem:[#allocation3_spill] sm:$0xff]  ;;  %v3984_v12 = vld [vmem:[#allocation2_spill] sm:$0xff] }
 0x820   : > { %v2749_v19 = vpop.f32.mrf.mxu1  ;;  %2865 = vrot.lane.b32.xlu1 %v2864_v25, %s3081_s8 }
 0x821   : > { %v1913_v30 = vmul.f32 %v3050_v1, %v2749_v19  ;;  %v3068_v1 = vpop.eup %3067 }
 0x822   : > { %v1886_v24 = vpop.f32.mrf.mxu1  ;;  %2860 = vrot.lane.b32.xlu0 %v2859_v60, %s3081_s8  ;;  %v3070_v42 = vpop.eup %3069  ;;  %v1021_v34 = vmul.f32 %v3068_v1, %v3684_v16 }
 0x823   : > { %v2874_v20 = vpack.i.bf16 %v1913_v30, %v1912_v9  ;;  %v1911_v59 = vmul.f32 %v3054_v33, %v1886_v24  ;;  %v2843_v9 = vunpack.i.h.bf16 %v2841_v53  ;;  %v2842_v24 = vunpack.i.l.bf16 %v2841_v53 }
 0x824   : > { %v1023_v31 = vmul.f32 %v3070_v42, %v3981_v26 }
 0x825   : > { %v2869_v23 = vpack.i.bf16 %v1911_v59, %v1910_v7  ;;  %2875 = vrot.lane.b32.xlu1 %v2874_v20, %s3080_s7  ;;  %v2848_v7 = vunpack.i.h.bf16 %v3906_v62  ;;  %v2847_v20 = vunpack.i.l.bf16 %v3906_v62  ;;  %v2015_v63 = vsel %vm781_vm0, %v1021_v34, %v2843_v9 }
 0x827   : > { %2870 = vrot.lane.b32.xlu0 %v2869_v23, %s3080_s7  ;;  %v1020_v23 = vmul.f32 %v3064_v8, %v3680_v39  ;;  %v2017_v39 = vsel %vm781_vm0, %v1023_v31, %v2848_v7  ;;  %v2016_v55 = vsel %vm781_vm0, %v1022_v51, %v2847_v20 }
 0x829   : > { %v2014_v49 = vsel %vm781_vm0, %v1020_v23, %v2842_v24 }
 0x88e   : > { %v2851_v21 = vpop.permute.xlu1 %2850 }
 0x88f   : > { %v2853_v27 = vunpack.i.h.bf16 %v2851_v21  ;;  %v2852_v43 = vunpack.i.l.bf16 %v2851_v21  ;;  %v3983_v21 = vld [vmem:[#allocation5_spill] sm:$0xff] }
 0x890   : > { %v2856_v10 = vpop.permute.xlu0 %2855 }
 0x891   : > { %v2858_v11 = vunpack.i.h.bf16 %v2856_v10  ;;  %v2857_v4 = vunpack.i.l.bf16 %v2856_v10  ;;  %v2031_v25 = vsel %vm2027_vm3, %v2022_v38, %v2853_v27  ;;  %v2030_v45 = vsel %vm2027_vm3, %v2021_v58, %v2852_v43 }
 0x892   : > { %v2866_v32 = vpop.permute.xlu1 %2865  ;;  %v2037_v59 = vpack.c.bf16 %v2031_v25, %v2030_v45  ;;  %v3988_v45 = vld [vmem:[#allocation6_spill] sm:$0xff] }
 0x893   : > { %v2028_v19 = vsel %vm2027_vm3, %v2019_v29, %v2857_v4  ;;  %v2029_v60 = vsel %vm2027_vm3, %v2020_v15, %v2858_v11  ;;  %v2868_v22 = vunpack.i.h.bf16 %v2866_v32  ;;  %v2867_v35 = vunpack.i.l.bf16 %v2866_v32  ;;  %v3986_v4 = vld [vmem:[#allocation8_spill] sm:$0xff]  ;;  %v3987_v29 = vld [vmem:[#allocation9_spill] sm:$0xff] }
 0x894   : > { %v2861_v30 = vpop.permute.xlu0 %2860  ;;  %v2036_v33 = vpack.c.bf16 %v2029_v60, %v2028_v19  ;;  %v3989_v19 = vld [vmem:[#allocation7_spill] sm:$0xff] }
 0x895   : > { %v2863_v2 = vunpack.i.h.bf16 %v2861_v30  ;;  %v2862_v0 = vunpack.i.l.bf16 %v2861_v30  ;;  %v2026_v52 = vsel %vm2018_vm2, %v2017_v39, %v2868_v22  ;;  %v2025_v16 = vsel %vm2018_vm2, %v2016_v55, %v2867_v35 }
 0x896   : > { %2766 = vmatprep.mubr.bf16.mxu1 %v2036_v33 }
 0x897   : > { %v2876_v44 = vpop.permute.xlu1 %2875  ;;  %2767 = vmatmul.mubr.bf16.vlgmr.msra.gmra.mxu1 %v2037_v59  ;;  %v2023_v56 = vsel %vm2018_vm2, %v2014_v49, %v2862_v0  ;;  %v2024_v57 = vsel %vm2018_vm2, %v2015_v63, %v2863_v2 }
 0x898   : > { %v2878_v14 = vunpack.i.h.bf16 %v2876_v44  ;;  %v2877_v61 = vunpack.i.l.bf16 %v2876_v44 }
 0x899   : > { %v2871_v50 = vpop.permute.xlu0 %2870 }
 0x89a   : > { %v2873_v62 = vunpack.i.h.bf16 %v2871_v50  ;;  %v2872_v40 = vunpack.i.l.bf16 %v2871_v50  ;;  %v2034_v18 = vsel %vm2027_vm3, %v2025_v16, %v2877_v61  ;;  %v2035_v37 = vsel %vm2027_vm3, %v2026_v52, %v2878_v14 }
 0x89b   : > { %v2039_v48 = vpack.c.bf16 %v2035_v37, %v2034_v18 }
 0x89c   : > { %v2032_v53 = vsel %vm2027_vm3, %v2023_v56, %v2872_v40  ;;  %v2033_v46 = vsel %vm2027_vm3, %v2024_v57, %v2873_v62 }
 0x89d   : > { %v2038_v41 = vpack.c.bf16 %v2033_v46, %v2032_v53 }
 0x89f   : > { %2770 = vmatprep.mubr.bf16.mxu1 %v2038_v41 }
 0x8a0   : > { %2771 = vmatmul.mubr.bf16.gmra.mxu1 %v2039_v48 }
 0x957   : > { %v2768_v3 = vpop.f32.mrf.mxu1 }
 0x958   : > { %v2171_v13 = vadd.f32 %v2768_v3, %v3982_v54 }
 0x959   : > { %v2138_v47 = vpop.f32.mrf.mxu1 }
 0x95a   : > { %v2169_v5 = vadd.f32 %v3984_v12, %v2138_v47 }
 0x95b   : > { %v2769_v17 = vpop.f32.mrf.mxu1 }
 0x95c   : > { %v2172_v27 = vadd.f32 %v2769_v17, %v3983_v21 }
 0x95d   : > { %v2141_v43 = vpop.f32.mrf.mxu1 }
 0x95e   : > { %v2396_v36 = vpack.c.bf16 %v2172_v27, %v2171_v13  ;;  %v2170_v10 = vadd.f32 %v3985_v28, %v2141_v43 }
 0x960   : > { %2411 = vst [vmem:[%s244_s6 + $0x8] sm:$0xff] %v2396_v36   ;;  %v2391_v8 = vpack.c.bf16 %v2170_v10, %v2169_v5  ;;  %v2772_v38 = vpop.f32.mrf.mxu1 }
 0x961   : > { %v2175_v6 = vadd.f32 %v2772_v38, %v3986_v4 }
 0x962   : > { %2392 = vst [vmem:[%s244_s6] sm:$0xff] %v2391_v8   ;;  %v2154_v58 = vpop.f32.mrf.mxu1 }
 0x963   : > { %v2173_v32 = vadd.f32 %v3988_v45, %v2154_v58 }
 0x964   : > { %v2773_v11 = vpop.f32.mrf.mxu1 }
 0x965   : > { %v2176_v15 = vadd.f32 %v2773_v11, %v3987_v29 }
 0x966   : > { %v2157_v25 = vpop.f32.mrf.mxu1 }
 0x967   : > { %v2406_v1 = vpack.c.bf16 %v2176_v15, %v2175_v6  ;;  %v2174_v60 = vadd.f32 %v3989_v19, %v2157_v25 }
 0x969   : > { %2413 = vst [vmem:[%s244_s6 + $0x18] sm:$0xff] %v2406_v1   ;;  %v2401_v42 = vpack.c.bf16 %v2174_v60, %v2173_v32 }
 0x96b   : > { %2412 = vst [vmem:[%s244_s6 + $0x10] sm:$0xff] %v2401_v42  }
 0x96c PF: > { %s15_s18 = sadd.s32 1, %s3077_s18  }
 0x96d   : > { %p12_p4 = scmp.ge.s32.totalorder %s15_s18, 4  }
 0x96f   :  { %14 = sbr.rel (!%p12_p4) target bundleno = 1 (0x1), region = 73 }

// kernel: _lambda_.21
= control target key start
LH: loop header
LB: loop body
LE: loop exit
PB: predicated region body
PF: predicated region fallthrough
CT: control target
= control target key end

     0   :  { %s2994_s21 = smov 0   ;;  %s3768_s0 = inlined_call_operand.vmem [shape: bf16[2,64,128], index: 0, kind: input, shape index: {}]   ;;  %s3769_s1 = inlined_call_operand.vmem [shape: f32[2,1,128], index: 1, kind: input, shape index: {}]   ;;  %s3770_s2 = inlined_call_operand.vmem [shape: f32[2,1,128], index: 2, kind: input, shape index: {}]   ;;  %s3771_s3 = inlined_call_operand.vmem [shape: f32[2,1,128], index: 3, kind: input, shape index: {}]   ;;  %s3772_s4 = inlined_call_operand.vmem [shape: bf16[128,384], index: 4, kind: input, shape index: {}]   ;;  %s3773_s5 = inlined_call_operand.vmem [shape: bf16[128,128], index: 5, kind: input, shape index: {}]   ;;  %s3774_s6 = inlined_call_operand.vmem [shape: bf16[2,64,128], index: 6, kind: output, shape index: {}]  }
   0x1 LB: > { %s2274_s22 = sadd.s32 4294967295, %s2953_s21   ;;  %p2278_p0 = scmp.ge.s32.totalorder %s2953_s21, 1  ;;  %s2953_s21 = sphi %s2994_s21, %s16_s21  }
   0x2   : > { %p236_p1 = scmp.lt.s32.totalorder %s2953_s21, 3 }
   0x4   : > { %p237_p2 = pnand %p2278_p0, %p236_p1 }
   0x6   : > { %240 = sbr.rel (%p237_p2) target bundleno = 2397 (0x95d), region = 44 }
   0xb   : > { %p275_p3 = scmp.lt.s32.totalorder %s2274_s22, 1  ;;  %v2763_v12 = vld [vmem:[%s3772_s4 + $0xac] ss:$12 sps:$4 sm:$0xff]   ;;  %v2765_v13 = vld [vmem:[%s3772_s4 + $0xa8] ss:$12 sps:$4 sm:$0xff]   ;;  %vm745_vm0 = vcmask 261120  }
   0xc   : > { %595 = vmatprep.subr.bf16.mxu0 %v2763_v12  ;;  %v2766_v45 = vld [vmem:[%s3772_s4 + $0x94] ss:$12 sps:$4 sm:$0xff]   ;;  %v2768_v46 = vld [vmem:[%s3772_s4 + $0xb0] ss:$12 sps:$4 sm:$0xff]   ;;  %v2772_v50 = vld [vmem:[%s3772_s4 + $0x98] ss:$12 sps:$4 sm:$0xff]  }
   0xd   : > { %s3797_s22 = smov (!%p275_p3, %s2274_s22), 1  ;;  %596 = vmatpush1.bf16.msra.mxu0 %v2765_v13  ;;  %v2769_v47 = vld [vmem:[%s3772_s4 + $0x90] ss:$12 sps:$4 sm:$0xff]   ;;  %2499 = vmatprep.subr.bf16.mxu1 %v2768_v46  ;;  %v2773_v51 = vld [vmem:[%s3772_s4 + $0x78] ss:$12 sps:$4 sm:$0xff]   ;;  %vm835_vm1 = vcmask 523264  }
   0xe   : > { %s2359_s23 = sshll.u32 %s3797_s22, 5  ;;  %597 = vmatprep.subr.bf16.mxu0 %v2766_v45  ;;  %2500 = vmatpush3.bf16.msra.mxu1 %v2768_v46  ;;  %v2770_v49 = vld [vmem:[%s3772_s4 + $0x7c] ss:$12 sps:$4 sm:$0xff]   ;;  %v2774_v52 = vld [vmem:[%s3772_s4 + $0x64] ss:$12 sps:$4 sm:$0xff]   ;;  %s285_s11 = scalar_lea.vmem %s3770_s2, %s3797_s22  ;;  %vm1987_vm2 = vcmask 785408  }
   0xf   : > { %s279_s26 = scalar_lea.vmem %s3768_s0, %s2359_s23  ;;  %2501 = vmatprep.subr.bf16.mxu1 %v2772_v50  ;;  %v2776_v53 = vld [vmem:[%s3772_s4 + $0x80] ss:$12 sps:$4 sm:$0xff]   ;;  %v2780_v56 = vld [vmem:[%s3772_s4 + $0x68] ss:$12 sps:$4 sm:$0xff]   ;;  %v2784_v59 = vld [vmem:[%s3772_s4 + $0x50] ss:$12 sps:$4 sm:$0xff]   ;;  %s282_s14 = scalar_lea.vmem %s3769_s1, %s3797_s22 }
  0x10   : > { %v2370_v0 = vld [vmem:[%s279_s26] sm:$0xff]   ;;  %v2405_v1 = vld [vmem:[%s279_s26 + $0x8] sm:$0xff]   ;;  %v2406_v4 = vld [vmem:[%s279_s26 + $0x10] sm:$0xff]   ;;  %s2956_s15 = smov 96   ;;  %s2957_s16 = smov 64  }
  0x11   : > { %v3010_v2 = vunpack.c.l.bf16 %v2370_v0  ;;  %v3012_v3 = vunpack.c.l.bf16 %v2405_v1  ;;  %v3016_v5 = vunpack.c.h.bf16 %v2370_v0  ;;  %v3018_v6 = vunpack.c.h.bf16 %v2405_v1  ;;  %v2407_v7 = vld [vmem:[%s279_s26 + $0x18] sm:$0xff]   ;;  %598 = vmatpush1.bf16.msra.mxu0 %v2769_v47  ;;  %v2777_v54 = vld [vmem:[%s3772_s4 + $0x60] ss:$12 sps:$4 sm:$0xff]   ;;  %v2781_v57 = vld [vmem:[%s3772_s4 + $0x48] ss:$12 sps:$4 sm:$0xff]   ;;  %s2958_s17 = smov 32   ;;  %s293_s18 = scalar_lea.vmem %s3774_s6, %s2359_s23 }
  0x12   : > { %v3022_v8 = vunpack.c.l.bf16 %v2406_v4  ;;  %v3024_v9 = vunpack.c.h.bf16 %v2406_v4  ;;  %v3028_v10 = vunpack.c.l.bf16 %v2407_v7  ;;  %v3030_v11 = vunpack.c.h.bf16 %v2407_v7  ;;  %599 = vmatprep.subr.bf16.mxu0 %v2770_v49  ;;  %2502 = vmatpush3.bf16.msra.mxu1 %v2772_v50  ;;  %v2778_v55 = vld [vmem:[%s3772_s4 + $0x4c] ss:$12 sps:$4 sm:$0xff]   ;;  %v2782_v58 = vld [vmem:[%s3772_s4 + $0x34] ss:$12 sps:$4 sm:$0xff]   ;;  %v2785_v60 = vld [vmem:[%s3772_s4 + $0x30] ss:$12 sps:$4 sm:$0xff]  }
  0x13   : > { %3782 = vst [vmem:[#allocation2_spill] sm:$0xff] %v3010_v2  ;;  %311 = vadd.xlane.f32.xlu0 %v3010_v2  ;;  %315 = vadd.xlane.f32.xlu1 %v3012_v3  ;;  %3783 = vst [vmem:[#allocation3_spill] sm:$0xff] %v3016_v5  ;;  %v2786_v61 = vld [vmem:[%s3772_s4 + $0x1c] ss:$12 sps:$4 sm:$0xff]   ;;  %v2788_v62 = vld [vmem:[%s3772_s4 + $0x38] ss:$12 sps:$4 sm:$0xff]  }
  0x14   : > { %3784 = vst [vmem:[#allocation4_spill] sm:$0xff] %v3018_v6  ;;  %3785 = vst [vmem:[#allocation5_spill] sm:$0xff] %v3022_v8  ;;  %2503 = vmatprep.subr.bf16.mxu1 %v2776_v53  ;;  %v2789_v63 = vld [vmem:[%s3772_s4 + $0x18] ss:$12 sps:$4 sm:$0xff]   ;;  %v2792_v1 = vld [vmem:[%s3772_s4 + $0x20] ss:$12 sps:$4 sm:$0xff]  }
  0x15   : > { %3786 = vst [vmem:[#allocation6_spill] sm:$0xff] %v3024_v9  ;;  %3787 = vst [vmem:[#allocation7_spill] sm:$0xff] %v3028_v10  ;;  %600 = vmatpush1.bf16.msra.mxu0 %v2773_v51  ;;  %v2790_v0 = vld [vmem:[%s3772_s4 + $0x4] ss:$12 sps:$4 sm:$0xff]   ;;  %v2955_v4 = vmov 0  }
  0x16   : > { %3788 = vst [vmem:[#allocation8_spill] sm:$0xff] %v3030_v11  ;;  %601 = vmatprep.subr.bf16.mxu0 %v2774_v52  ;;  %2504 = vmatpush3.bf16.msra.mxu1 %v2776_v53  ;;  %v2793_v7 = vld [vmem:[%s3772_s4] ss:$12 sps:$4 sm:$0xff]   ;;  %v2794_v12 = vld [vmem:[%s3772_s4 + $0x8] ss:$12 sps:$4 sm:$0xff]  }
  0x17   : > { %313 = vadd.xlane.f32.xlu0 %v3016_v5  ;;  %317 = vadd.xlane.f32.xlu1 %v3018_v6 }
  0x18   : > { %2505 = vmatprep.subr.bf16.mxu1 %v2780_v56  ;;  %627 = vmatprep.mubr.bf16.mxu0 %v2955_v4 }
  0x19   : > { %602 = vmatpush1.bf16.msra.mxu0 %v2777_v54 }
  0x1a   : > { %603 = vmatprep.subr.bf16.mxu0 %v2778_v55  ;;  %2506 = vmatpush3.bf16.msra.mxu1 %v2780_v56 }
  0x1b   : > { %319 = vadd.xlane.f32.xlu0 %v3022_v8  ;;  %321 = vadd.xlane.f32.xlu1 %v3024_v9 }
  0x1c   : > { %2507 = vmatprep.subr.bf16.mxu1 %v2784_v59 }
  0x1d   : > { %604 = vmatpush1.bf16.msra.mxu0 %v2781_v57  ;;  %v2283_v57 = vld [vmem:[%s282_s14] ss:$0 sm:$0xff] }
  0x1e   : > { %605 = vmatprep.subr.bf16.mxu0 %v2782_v58  ;;  %2508 = vmatpush3.bf16.msra.mxu1 %v2784_v59 }
  0x1f   : > { %323 = vadd.xlane.f32.xlu0 %v3028_v10  ;;  %325 = vadd.xlane.f32.xlu1 %v3030_v11 }
  0x20   : > { %2509 = vmatprep.subr.bf16.mxu1 %v2788_v62 }
  0x21   : > { %606 = vmatpush1.bf16.msra.mxu0 %v2785_v60 }
  0x22   : > { %607 = vmatprep.subr.bf16.mxu0 %v2786_v61  ;;  %2510 = vmatpush3.bf16.msra.mxu1 %v2788_v62 }
  0x23   : > { %2511 = vmatprep.subr.bf16.mxu1 %v2792_v1 }
  0x25   : > { %608 = vmatpush1.bf16.msra.mxu0 %v2789_v63 }
  0x26   : > { %609 = vmatprep.subr.bf16.mxu0 %v2790_v0  ;;  %2512 = vmatpush3.bf16.msra.mxu1 %v2792_v1 }
  0x27   : > { %2513 = vmatprep.subr.bf16.mxu1 %v2794_v12 }
  0x29   : > { %610 = vmatpush1.bf16.msra.mxu0 %v2793_v7 }
  0x2a   : > { %2514 = vmatpush3.bf16.msra.mxu1 %v2794_v12 }
  0x9c   : > { %v312_v14 = vpop.xlane.xlu0 %311  ;;  %v316_v15 = vpop.xlane.xlu1 %315 }
  0x9d   : > { %v328_v16 = vmul.f32 0.0078125, %v312_v14  ;;  %v330_v17 = vmul.f32 0.0078125, %v316_v15 }
  0x9f   : > { %v3041_v18 = vsub.f32 %v3010_v2, %v328_v16  ;;  %v3044_v19 = vsub.f32 %v3012_v3, %v330_v17 }
  0xa0   : > { %v314_v20 = vpop.xlane.xlu0 %313  ;;  %v318_v21 = vpop.xlane.xlu1 %317 }
  0xa1   : > { %v329_v22 = vmul.f32 0.0078125, %v314_v20  ;;  %v344_v23 = vmul.f32 %v3041_v18, %v3041_v18  ;;  %v331_v24 = vmul.f32 0.0078125, %v318_v21  ;;  %v346_v25 = vmul.f32 %v3044_v19, %v3044_v19 }
  0xa3   : > { %352 = vadd.xlane.f32.xlu0 %v344_v23  ;;  %v3051_v26 = vsub.f32 %v3016_v5, %v329_v22  ;;  %v3054_v27 = vsub.f32 %v3018_v6, %v331_v24  ;;  %v403_v22 = vlaneseq }
  0xa4   : > { %v320_v28 = vpop.xlane.xlu0 %319  ;;  %v322_v29 = vpop.xlane.xlu1 %321 }
  0xa5   : > { %v332_v30 = vmul.f32 0.0078125, %v320_v28  ;;  %v345_v31 = vmul.f32 %v3051_v26, %v3051_v26  ;;  %v333_v32 = vmul.f32 0.0078125, %v322_v29  ;;  %v347_v33 = vmul.f32 %v3054_v27, %v3054_v27 }
  0xa7   : > { %356 = vadd.xlane.f32.xlu0 %v346_v25  ;;  %354 = vadd.xlane.f32.xlu1 %v345_v31  ;;  %v3061_v34 = vsub.f32 %v3022_v8, %v332_v30  ;;  %v3064_v35 = vsub.f32 %v3024_v9, %v333_v32  ;;  %v404_v31 = vshrl.u32 %v403_v22, 7 }
  0xa8   : > { %v324_v36 = vpop.xlane.xlu0 %323  ;;  %v326_v37 = vpop.xlane.xlu1 %325 }
  0xa9   : > { %v334_v38 = vmul.f32 0.0078125, %v324_v36  ;;  %v348_v39 = vmul.f32 %v3061_v34, %v3061_v34  ;;  %v335_v40 = vmul.f32 0.0078125, %v326_v37  ;;  %v349_v41 = vmul.f32 %v3064_v35, %v3064_v35  ;;  %v400_v36 = vld [vmem:[%s285_s11] sm:$0x1] }
  0xab   : > { %358 = vadd.xlane.f32.xlu1 %v347_v33  ;;  %360 = vadd.xlane.f32.xlu0 %v348_v39  ;;  %v3071_v42 = vsub.f32 %v3028_v10, %v334_v38  ;;  %v3074_v43 = vsub.f32 %v3030_v11, %v335_v40 }
  0xad   : > { %v350_v44 = vmul.f32 %v3071_v42, %v3071_v42  ;;  %v351_v48 = vmul.f32 %v3074_v43, %v3074_v43 }
  0xaf   : > { %362 = vadd.xlane.f32.xlu1 %v349_v41  ;;  %364 = vadd.xlane.f32.xlu0 %v350_v44  ;;  %v401_v41 = vadd.f32 1.0, %v400_v36  ;;  %v405_v44 = vsub.s32 0, %v404_v31 }
  0xb1   : > { %v406_v50 = vrot.slane %v401_v41, %v405_v44 }
  0xb3   : > { %366 = vadd.xlane.f32.xlu1 %v351_v48 }
 0x12c   : > { %v353_v13 = vpop.xlane.xlu0 %352 }
 0x12d   : > { %v368_v14 = vmul.f32 0.0078125, %v353_v13 }
 0x12f   : > { %v376_v15 = vadd.f32 1e-06, %v368_v14 }
 0x130   : > { %v355_v16 = vpop.xlane.xlu1 %354  ;;  %v357_v17 = vpop.xlane.xlu0 %356 }
 0x131   : > { %2803 = vrsqrt.f32 %v376_v15  ;;  %v369_v20 = vmul.f32 0.0078125, %v355_v16  ;;  %v370_v21 = vmul.f32 0.0078125, %v357_v17 }
 0x133   : > { %v377_v23 = vadd.f32 1e-06, %v369_v20  ;;  %v378_v24 = vadd.f32 1e-06, %v370_v21 }
 0x134   : > { %v359_v25 = vpop.xlane.xlu1 %358  ;;  %v361_v28 = vpop.xlane.xlu0 %360 }
 0x135   : > { %2805 = vrsqrt.f32 %v377_v23  ;;  %v371_v29 = vmul.f32 0.0078125, %v359_v25  ;;  %v372_v30 = vmul.f32 0.0078125, %v361_v28 }
 0x136   : > { %2807 = vrsqrt.f32 %v378_v24 }
 0x137   : > { %v379_v32 = vadd.f32 1e-06, %v371_v29  ;;  %v380_v33 = vadd.f32 1e-06, %v372_v30 }
 0x138   : > { %v363_v37 = vpop.xlane.xlu1 %362  ;;  %v365_v38 = vpop.xlane.xlu0 %364 }
 0x139   : > { %2809 = vrsqrt.f32 %v379_v32  ;;  %v373_v39 = vmul.f32 0.0078125, %v363_v37  ;;  %v374_v40 = vmul.f32 0.0078125, %v365_v38 }
 0x13a   : > { %2811 = vrsqrt.f32 %v380_v33 }
 0x13b   : > { %v381_v45 = vadd.f32 1e-06, %v373_v39  ;;  %v382_v46 = vadd.f32 1e-06, %v374_v40 }
 0x13c   : > { %v367_v47 = vpop.xlane.xlu1 %366 }
 0x13d   : > { %2813 = vrsqrt.f32 %v381_v45  ;;  %v375_v48 = vmul.f32 0.0078125, %v367_v47 }
 0x13e   : > { %v2804_v49 = vpop.eup %2803  ;;  %2815 = vrsqrt.f32 %v382_v46 }
 0x13f   : > { %v383_v51 = vadd.f32 1e-06, %v375_v48  ;;  %v392_v52 = vmul.f32 %v2804_v49, %v3041_v18 }
 0x141   : > { %2817 = vrsqrt.f32 %v383_v51  ;;  %v408_v56 = vmul.f32 %v406_v50, %v392_v52 }
 0x142   : > { %v2806_v53 = vpop.eup %2805 }
 0x143   : > { %v2808_v54 = vpop.eup %2807  ;;  %v393_v55 = vmul.f32 %v2806_v53, %v3051_v26  ;;  %v423_v63 = vadd.f32 %v2283_v57, %v408_v56 }
 0x144   : > { %v394_v58 = vmul.f32 %v2808_v54, %v3044_v19 }
 0x145   : > { %v409_v59 = vmul.f32 %v406_v50, %v393_v55 }
 0x146   : > { %v2810_v60 = vpop.eup %2809  ;;  %v410_v61 = vmul.f32 %v406_v50, %v394_v58 }
 0x147   : > { %v2812_v62 = vpop.eup %2811  ;;  %v424_v0 = vadd.f32 %v2283_v57, %v409_v59  ;;  %v395_v18 = vmul.f32 %v2810_v60, %v3054_v27 }
 0x148   : > { %v396_v1 = vmul.f32 %v2812_v62, %v3061_v34  ;;  %v425_v14 = vadd.f32 %v2283_v57, %v410_v61 }
 0x149   : > { %v431_v7 = vpack.c.bf16 %v424_v0, %v423_v63  ;;  %v411_v12 = vmul.f32 %v406_v50, %v395_v18 }
 0x14a   : > { %v2814_v13 = vpop.eup %2813  ;;  %v412_v16 = vmul.f32 %v406_v50, %v396_v1 }
 0x14b   : > { %v2816_v15 = vpop.eup %2815  ;;  %628 = vmatmul.mubr.bf16.vlgmr.msra.gmra.mxu0 %v431_v7  ;;  %2515 = vmatprep.mubr.bf16.mxu1 %v431_v7  ;;  %v426_v26 = vadd.f32 %v2283_v57, %v411_v12  ;;  %v397_v19 = vmul.f32 %v2814_v13, %v3064_v35 }
 0x14c   : > { %637 = vmatprep.mubr.bf16.mxu0 %v2955_v4  ;;  %v398_v17 = vmul.f32 %v2816_v15, %v3071_v42  ;;  %v427_v34 = vadd.f32 %v2283_v57, %v412_v16 }
 0x14d   : > { %v432_v20 = vpack.c.bf16 %v426_v26, %v425_v14  ;;  %v413_v21 = vmul.f32 %v406_v50, %v397_v19 }
 0x14e   : > { %v2818_v27 = vpop.eup %2817  ;;  %v414_v24 = vmul.f32 %v406_v50, %v398_v17 }
 0x14f   : > { %2516 = vmatmul.mubr.bf16.vlgmr.msra.gmra.mxu1 %v432_v20  ;;  %v428_v22 = vadd.f32 %v2283_v57, %v413_v21  ;;  %v399_v23 = vmul.f32 %v2818_v27, %v3074_v43 }
 0x150   : > { %v429_v29 = vadd.f32 %v2283_v57, %v414_v24 }
 0x151   : > { %v433_v25 = vpack.c.bf16 %v428_v22, %v427_v34  ;;  %v415_v28 = vmul.f32 %v406_v50, %v399_v23 }
 0x153   : > { %638 = vmatmul.mubr.bf16.gmra.mxu0 %v432_v20  ;;  %2519 = vmatprep.mubr.bf16.mxu1 %v433_v25  ;;  %v430_v35 = vadd.f32 %v2283_v57, %v415_v28 }
 0x154   : > { %647 = vmatprep.mubr.bf16.mxu0 %v2955_v4 }
 0x155   : > { %v434_v30 = vpack.c.bf16 %v430_v35, %v429_v29 }
 0x157   : > { %2520 = vmatmul.mubr.bf16.gmra.mxu1 %v434_v30 }
 0x15b   : > { %648 = vmatmul.mubr.bf16.gmra.mxu0 %v433_v25 }
 0x15c   : > { %657 = vmatprep.mubr.bf16.mxu0 %v2955_v4 }
 0x163   : > { %658 = vmatmul.mubr.bf16.gmra.mxu0 %v434_v30 }
 0x20b   : > { %v629_v42 = vpop.f32.mrf.mxu0 }
 0x20d   : > { %v631_v31 = vpop.f32.mrf.mxu0 }
 0x20f   : > { %v633_v32 = vpop.f32.mrf.mxu0  ;;  %v2517_v33 = vpop.f32.mrf.mxu1 }
 0x210   : > { %v3166_v43 = vpack.c.bf16 %v633_v32, %v629_v42 }
 0x211   : > { %v635_v36 = vpop.f32.mrf.mxu0  ;;  %v702_v37 = vpop.f32.mrf.mxu1 }
 0x212   : > { %2531 = vmatprep.mubr.msk.bf16.mxu0 %vm745_vm0, %v3166_v43  ;;  %v3202_v1 = vpack.c.bf16 %v635_v36, %v631_v31 }
 0x213   : > { %v639_v38 = vpop.f32.mrf.mxu0  ;;  %v2518_v39 = vpop.f32.mrf.mxu1 }
 0x214   : > { %v3177_v55 = vpack.c.bf16 %v2518_v39, %v2517_v33  ;;  %v759_v12 = vsel %vm745_vm0, %v3202_v1, 0 }
 0x215   : > { %v641_v40 = vpop.f32.mrf.mxu0  ;;  %v705_v41 = vpop.f32.mrf.mxu1 }
 0x216   : > { %v3181_v58 = vpack.c.bf16 %v705_v41, %v702_v37 }
 0x217   : > { %v643_v44 = vpop.f32.mrf.mxu0  ;;  %v2521_v45 = vpop.f32.mrf.mxu1 }
 0x218   : > { %v3210_v13 = vpack.c.bf16 %v643_v44, %v639_v38 }
 0x219   : > { %v645_v4 = vpop.f32.mrf.mxu0  ;;  %v718_v46 = vpop.f32.mrf.mxu1 }
 0x21a   : > { %v3196_v0 = vpack.c.bf16 %v645_v4, %v641_v40 }
 0x21b   : > { %v649_v47 = vpop.f32.mrf.mxu0  ;;  %v2522_v48 = vpop.f32.mrf.mxu1 }
 0x21c   : > { %v3170_v49 = vpack.c.bf16 %v2522_v48, %v2521_v45  ;;  %v762_v7 = vsel %vm745_vm0, %v3196_v0, 0 }
 0x21d   : > { %v651_v50 = vpop.f32.mrf.mxu0  ;;  %v721_v51 = vpop.f32.mrf.mxu1 }
 0x21e   : > { %v3172_v52 = vpack.c.bf16 %v721_v51, %v718_v46  ;;  %2539 = vmatprep.subr.bf16.mxu1 %v3170_v49 }
 0x21f   : > { %v653_v53 = vpop.f32.mrf.mxu0  ;;  %2540 = vmatpush3.bf16.msra.mxu1 %v3170_v49 }
 0x220   : > { %2541 = vmatprep.subr.bf16.mxu1 %v3172_v52  ;;  %v3212_v14 = vpack.c.bf16 %v653_v53, %v649_v47 }
 0x221   : > { %v655_v54 = vpop.f32.mrf.mxu0 }
 0x222   : > { %v3188_v62 = vpack.c.bf16 %v655_v54, %v651_v50 }
 0x223   : > { %v659_v56 = vpop.f32.mrf.mxu0  ;;  %2542 = vmatpush3.bf16.msra.mxu1 %v3172_v52 }
 0x224   : > { %2543 = vmatprep.subr.bf16.mxu1 %v3177_v55  ;;  %v765_v18 = vsel %vm745_vm0, %v3188_v62, 0 }
 0x225   : > { %v661_v57 = vpop.f32.mrf.mxu0 }
 0x227   : > { %v663_v59 = vpop.f32.mrf.mxu0  ;;  %2544 = vmatpush3.bf16.msra.mxu1 %v3177_v55 }
 0x228   : > { %2545 = vmatprep.subr.bf16.mxu1 %v3181_v58  ;;  %v3218_v15 = vpack.c.bf16 %v663_v59, %v659_v56 }
 0x229   : > { %v665_v60 = vpop.f32.mrf.mxu0 }
 0x22a   : > { %v3185_v61 = vpack.c.bf16 %v665_v60, %v661_v57 }
 0x22b   : > { %2546 = vmatpush3.bf16.msra.mxu1 %v3181_v58 }
 0x22c   : > { %2675 = vmatprep.subr.msk.bf16.mxu0 %vm745_vm0, %v3185_v61  ;;  %v768_v63 = vsel %vm745_vm0, %v3185_v61, 0 }
 0x22d   : > { %2524 = vmatpush3.bf16.xpose.msra.mxu0 %v768_v63 }
 0x22e   : > { %2676 = vmatprep.subr.msk.bf16.mxu0 %vm745_vm0, %v3188_v62 }
 0x235   : > { %2526 = vmatpush3.bf16.xpose.msra.mxu0 %v765_v18 }
 0x236   : > { %2677 = vmatprep.subr.msk.bf16.mxu0 %vm745_vm0, %v3196_v0 }
 0x23d   : > { %2528 = vmatpush3.bf16.xpose.msra.mxu0 %v762_v7 }
 0x23e   : > { %2678 = vmatprep.subr.msk.bf16.mxu0 %vm745_vm0, %v3202_v1 }
 0x245   : > { %2530 = vmatpush3.bf16.xpose.msra.mxu0 %v759_v12 }
 0x24c   : > { %2532 = vmatmul.mubr.msk.bf16.vlgmr.msra.gmra.mxu0 %vm745_vm0, %v3210_v13 }
 0x24d   : > { %2535 = vmatprep.mubr.msk.bf16.mxu0 %vm745_vm0, %v3212_v14 }
 0x254   : > { %2536 = vmatmul.mubr.msk.bf16.gmra.mxu0 %vm745_vm0, %v3218_v15 }
 0x30c   : > { %v2533_v26 = vpop.f32.mrf.mxu0 }
 0x30d   : > { %v842_v19 = vsel %vm835_vm1, %v2533_v26, -inf }
 0x30e   : > { %843 = vmax.xlane.f32.xlu0 %v842_v19  ;;  %v804_v16 = vpop.f32.mrf.mxu0 }
 0x30f   : > { %v836_v20 = vsel %vm835_vm1, %v804_v16, -inf }
 0x310   : > { %v2534_v17 = vpop.f32.mrf.mxu0 }
 0x311   : > { %v845_v21 = vsel %vm835_vm1, %v2534_v17, -inf }
 0x312   : > { %837 = vmax.xlane.f32.xlu0 %v836_v20  ;;  %846 = vmax.xlane.f32.xlu1 %v845_v21  ;;  %v807_v27 = vpop.f32.mrf.mxu0 }
 0x313   : > { %v839_v22 = vsel %vm835_vm1, %v807_v27, -inf }
 0x314   : > { %v3225_v34 = vpop.f32.mrf.mxu0 }
 0x315   : > { %v854_v23 = vsel %vm835_vm1, %v3225_v34, -inf }
 0x316   : > { %840 = vmax.xlane.f32.xlu1 %v839_v22  ;;  %855 = vmax.xlane.f32.xlu0 %v854_v23  ;;  %v3230_v24 = vpop.f32.mrf.mxu0 }
 0x317   : > { %v848_v25 = vsel %vm835_vm1, %v3230_v24, -inf }
 0x318   : > { %v3256_v28 = vpop.f32.mrf.mxu0 }
 0x319   : > { %v857_v29 = vsel %vm835_vm1, %v3256_v28, -inf }
 0x31a   : > { %849 = vmax.xlane.f32.xlu0 %v848_v25  ;;  %v3262_v35 = vpop.f32.mrf.mxu0 }
 0x31b   : > { %v851_v30 = vsel %vm835_vm1, %v3262_v35, -inf }
 0x327   : > { %1025 = vrot.lane.b32.xlu1 %v3188_v62, %s2956_s15 }
 0x32b   : > { %1023 = vrot.lane.b32.xlu1 %v3196_v0, %s2956_s15 }
 0x32f   : > { %1317 = vrot.lane.b32.xlu1 %v3185_v61, %s2957_s16 }
 0x330   : > { %1027 = vrot.lane.b32.xlu0 %v3185_v61, %s2956_s15 }
 0x334   : > { %1021 = vrot.lane.b32.xlu0 %v3202_v1, %s2956_s15 }
 0x338   : > { %1009 = vrot.lane.b32.xlu0 %v3166_v43, %s2956_s15 }
 0x33c   : > { %1313 = vrot.lane.b32.xlu0 %v3196_v0, %s2957_s16 }
 0x340   : > { %1015 = vrot.lane.b32.xlu0 %v3218_v15, %s2956_s15 }
 0x344   : > { %1303 = vrot.lane.b32.xlu0 %v3166_v43, %s2957_s16 }
 0x348   : > { %1307 = vrot.lane.b32.xlu0 %v3212_v14, %s2957_s16 }
 0x34c   : > { %1204 = vrot.lane.b32.xlu0 %v3170_v49, %s2956_s15 }
 0x350   : > { %1200 = vrot.lane.b32.xlu0 %v3177_v55, %s2956_s15 }
 0x353   : > { %858 = vmax.xlane.f32.xlu1 %v857_v29 }
 0x354   : > { %1198 = vrot.lane.b32.xlu0 %v3181_v58, %s2956_s15 }
 0x357   : > { %852 = vmax.xlane.f32.xlu1 %v851_v30 }
 0x358   : > { %1490 = vrot.lane.b32.xlu0 %v3170_v49, %s2957_s16 }
 0x368   : > { %1315 = vrot.lane.b32.xlu1 %v3188_v62, %s2957_s16 }
 0x36c   : > { %1011 = vrot.lane.b32.xlu1 %v3210_v13, %s2956_s15 }
 0x370   : > { %1013 = vrot.lane.b32.xlu1 %v3212_v14, %s2956_s15 }
 0x374   : > { %1311 = vrot.lane.b32.xlu1 %v3202_v1, %s2957_s16 }
 0x378   : > { %1305 = vrot.lane.b32.xlu1 %v3210_v13, %s2957_s16 }
 0x37c   : > { %1309 = vrot.lane.b32.xlu1 %v3218_v15, %s2957_s16 }
 0x380   : > { %1202 = vrot.lane.b32.xlu1 %v3172_v52, %s2956_s15 }
 0x384   : > { %1488 = vrot.lane.b32.xlu1 %v3172_v52, %s2957_s16 }
 0x397   : > { %v844_v42 = vpop.xlane.xlu0 %843 }
 0x398   : > { %v862_v37 = vsub.f32 %v2533_v26, %v844_v42 }
 0x39a   : > { %v872_v45 = vmul.f32 1.442695, %v862_v37 }
 0x39b   : > { %v838_v31 = vpop.xlane.xlu0 %837  ;;  %v847_v32 = vpop.xlane.xlu1 %846 }
 0x39c   : > { %v860_v33 = vsub.f32 %v804_v16, %v838_v31  ;;  %v863_v36 = vsub.f32 %v2534_v17, %v847_v32 }
 0x39e   : > { %v868_v38 = vmul.f32 1.442695, %v860_v33  ;;  %v874_v39 = vmul.f32 1.442695, %v863_v36 }
 0x39f   : > { %v841_v40 = vpop.xlane.xlu1 %840  ;;  %v856_v41 = vpop.xlane.xlu0 %855 }
 0x3a0   : > { %v861_v44 = vsub.f32 %v807_v27, %v841_v40  ;;  %2819 = vpow2.f32 %v868_v38  ;;  %v866_v30 = vsub.f32 %v3225_v34, %v856_v41 }
 0x3a1   : > { %2821 = vpow2.f32 %v874_v39 }
 0x3a2   : > { %v870_v4 = vmul.f32 1.442695, %v861_v44  ;;  %v880_v36 = vmul.f32 1.442695, %v866_v30 }
 0x3a3   : > { %v1026_v46 = vpop.permute.xlu1 %1025  ;;  %v850_v47 = vpop.xlane.xlu0 %849 }
 0x3a4   : > { %2823 = vpow2.f32 %v870_v4  ;;  %v1048_v17 = vsel %vm745_vm0, %v1026_v46, 0  ;;  %v864_v23 = vsub.f32 %v3230_v24, %v850_v47 }
 0x3a5   : > { %2825 = vpow2.f32 %v872_v45 }
 0x3a6   : > { %v876_v42 = vmul.f32 1.442695, %v864_v23 }
 0x3a7   : > { %v1024_v48 = vpop.permute.xlu1 %1023  ;;  %v1028_v50 = vpop.permute.xlu0 %1027 }
 0x3a8   : > { %2679 = vmatprep.subr.msk.bf16.mxu1 %vm745_vm0, %v1028_v50  ;;  %v1051_v26 = vsel %vm745_vm0, %v1028_v50, 0  ;;  %v1045_v20 = vsel %vm745_vm0, %v1024_v48, 0  ;;  %2827 = vpow2.f32 %v876_v42 }
 0x3ab   : > { %v1318_v51 = vpop.permute.xlu1 %1317  ;;  %v1022_v53 = vpop.permute.xlu0 %1021 }
 0x3ac   : > { %2683 = vmatprep.subr.msk.bf16.mxu0 %vm745_vm0, %v1318_v51  ;;  %v1341_v54 = vsel %vm745_vm0, %v1318_v51, 0  ;;  %v1042_v27 = vsel %vm745_vm0, %v1022_v53, 0 }
 0x3ad   : > { %2588 = vmatpush3.bf16.xpose.msra.mxu0 %v1341_v54  ;;  %v3289_v56 = vpop.eup %2819 }
 0x3ae   : > { %v3291_v59 = vpop.eup %2821 }
 0x3af   : > { %v1010_v57 = vpop.permute.xlu0 %1009 }
 0x3b1   : > { %v3293_v60 = vpop.eup %2823 }
 0x3b2   : > { %v3295_v63 = vpop.eup %2825  ;;  %v908_v18 = vpack.c.bf16 %v3293_v60, %v3289_v56 }
 0x3b3   : > { %v909_v7 = vpack.c.bf16 %v3291_v59, %v3295_v63  ;;  %v1314_v12 = vpop.permute.xlu0 %1313 }
 0x3b4   : > { %2547 = vmatprep.mubr.msk.bf16.mxu1 %vm835_vm1, %v908_v18  ;;  %v1335_v39 = vsel %vm745_vm0, %v1314_v12, 0 }
 0x3b5   : > { %2548 = vmatmul.mubr.msk.bf16.vlgmr.msra.gmra.mxu1 %vm835_vm1, %v909_v7 }
 0x3b6   : > { %2556 = vmatpush3.bf16.xpose.msra.mxu1 %v1051_v26 }
 0x3b7   : > { %2680 = vmatprep.subr.msk.bf16.mxu1 %vm745_vm0, %v1026_v46  ;;  %v3305_v19 = vpop.permute.xlu0 %1015 }
 0x3bb   : > { %v1304_v16 = vpop.permute.xlu0 %1303 }
 0x3bc   : > { %2595 = vmatprep.mubr.msk.bf16.mxu0 %vm745_vm0, %v1304_v16 }
 0x3be   : > { %2558 = vmatpush3.bf16.xpose.msra.mxu1 %v1048_v17 }
 0x3bf   : > { %2681 = vmatprep.subr.msk.bf16.mxu1 %vm745_vm0, %v1024_v48  ;;  %v1308_v21 = vpop.permute.xlu0 %1307 }
 0x3c3   : > { %v1205_v22 = vpop.permute.xlu0 %1204 }
 0x3c6   : > { %2560 = vmatpush3.bf16.xpose.msra.mxu1 %v1045_v20 }
 0x3c7   : > { %2682 = vmatprep.subr.msk.bf16.mxu1 %vm745_vm0, %v1022_v53  ;;  %v1201_v51 = vpop.permute.xlu0 %1200 }
 0x3cb   : > { %v1199_v54 = vpop.permute.xlu0 %1198 }
 0x3ce   : > { %2562 = vmatpush3.bf16.xpose.msra.mxu1 %v1042_v27 }
 0x3cf   : > { %2571 = vmatprep.subr.bf16.mxu1 %v1205_v22 }
 0x3dc   : > { %v859_v25 = vpop.xlane.xlu1 %858 }
 0x3dd   : > { %v867_v29 = vsub.f32 %v3256_v28, %v859_v25 }
 0x3df   : > { %v882_v31 = vmul.f32 1.442695, %v867_v29 }
 0x3e0   : > { %v853_v32 = vpop.xlane.xlu1 %852 }
 0x3e1   : > { %v865_v33 = vsub.f32 %v3262_v35, %v853_v32  ;;  %2829 = vpow2.f32 %v882_v31  ;;  %v3321_v35 = vpop.eup %2827 }
 0x3e3   : > { %v878_v37 = vmul.f32 1.442695, %v865_v33 }
 0x3e4   : > { %v1316_v38 = vpop.permute.xlu1 %1315 }
 0x3e5   : > { %2831 = vpow2.f32 %v878_v37  ;;  %2684 = vmatprep.subr.msk.bf16.mxu0 %vm745_vm0, %v1316_v38  ;;  %v1338_v24 = vsel %vm745_vm0, %v1316_v38, 0 }
 0x3e6   : > { %2833 = vpow2.f32 %v880_v36  ;;  %2590 = vmatpush3.bf16.xpose.msra.mxu0 %v1338_v24 }
 0x3e7   : > { %2685 = vmatprep.subr.msk.bf16.mxu0 %vm745_vm0, %v1314_v12 }
 0x3e8   : > { %v1012_v34 = vpop.permute.xlu1 %1011 }
 0x3ec   : > { %v1014_v28 = vpop.permute.xlu1 %1013 }
 0x3ee   : > { %2592 = vmatpush3.bf16.xpose.msra.mxu0 %v1335_v39  ;;  %v3323_v41 = vpop.eup %2829 }
 0x3f0   : > { %v1312_v40 = vpop.permute.xlu1 %1311 }
 0x3f1   : > { %2686 = vmatprep.subr.msk.bf16.mxu0 %vm745_vm0, %v1312_v40  ;;  %v1332_v48 = vsel %vm745_vm0, %v1312_v40, 0 }
 0x3f2   : > { %v3326_v44 = vpop.eup %2831 }
 0x3f3   : > { %v3328_v45 = vpop.eup %2833  ;;  %v910_v4 = vpack.c.bf16 %v3326_v44, %v3321_v35 }
 0x3f4   : > { %v1306_v46 = vpop.permute.xlu1 %1305  ;;  %v911_v47 = vpack.c.bf16 %v3323_v41, %v3328_v45 }
 0x3f5   : > { %2551 = vmatprep.mubr.msk.bf16.mxu1 %vm835_vm1, %v910_v4 }
 0x3f6   : > { %2552 = vmatmul.mubr.msk.bf16.gmra.mxu1 %vm835_vm1, %v911_v47  ;;  %2594 = vmatpush3.bf16.xpose.msra.mxu0 %v1332_v48 }
 0x3f7   : > { %2563 = vmatprep.mubr.msk.bf16.mxu1 %vm745_vm0, %v1010_v57  ;;  %v3345_v57 = vpop.permute.xlu0 %1490 }
 0x3f8   : > { %v1310_v50 = vpop.permute.xlu1 %1309 }
 0x3fc   : > { %v1203_v53 = vpop.permute.xlu1 %1202 }
 0x3fd   : > { %2596 = vmatmul.mubr.msk.bf16.vlgmr.msra.gmra.mxu0 %vm745_vm0, %v1306_v46 }
 0x3fe   : > { %2564 = vmatmul.mubr.msk.bf16.vlgmr.msra.gmra.mxu1 %vm745_vm0, %v1012_v34  ;;  %2599 = vmatprep.mubr.msk.bf16.mxu0 %vm745_vm0, %v1308_v21 }
 0x3ff   : > { %2572 = vmatpush3.bf16.msra.mxu1 %v1205_v22  ;;  %2567 = vmatprep.mubr.msk.bf16.mxu1 %vm745_vm0, %v1014_v28 }
 0x400   : > { %2573 = vmatprep.subr.bf16.mxu1 %v1203_v53 }
 0x403   : > { %2574 = vmatpush3.bf16.msra.mxu1 %v1203_v53 }
 0x404   : > { %2575 = vmatprep.subr.bf16.mxu1 %v1201_v51 }
 0x405   : > { %2600 = vmatmul.mubr.msk.bf16.gmra.mxu0 %vm745_vm0, %v1310_v50 }
 0x406   : > { %2568 = vmatmul.mubr.msk.bf16.gmra.mxu1 %vm745_vm0, %v3305_v19 }
 0x407   : > { %2576 = vmatpush3.bf16.msra.mxu1 %v1201_v51 }
 0x408   : > { %2577 = vmatprep.subr.bf16.mxu1 %v1199_v54 }
 0x40b   : > { %2578 = vmatpush3.bf16.msra.mxu1 %v1199_v54 }
 0x40c   : > { %2603 = vmatprep.subr.bf16.mxu1 %v3345_v57 }
 0x475   : > { %v3348_v18 = vpop.f32.mrf.mxu1 }
 0x477   : > { %v3350_v7 = vpop.f32.mrf.mxu1 }
 0x479   : > { %v3352_v12 = vpop.f32.mrf.mxu1 }
 0x47b   : > { %v3354_v26 = vpop.f32.mrf.mxu1 }
 0x4b6   : > { %v3356_v16 = vpop.f32.mrf.mxu1 }
 0x4b8   : > { %v3358_v17 = vpop.f32.mrf.mxu1 }
 0x4ba   : > { %v3360_v19 = vpop.f32.mrf.mxu1 }
 0x4bc   : > { %v3362_v20 = vpop.f32.mrf.mxu1 }
 0x4bd   : > { %v3364_v21 = vpop.f32.mrf.mxu0 }
 0x4be   : > { %v3366_v27 = vpop.f32.mrf.mxu1  ;;  %v1414_v22 = vsel %vm835_vm1, %v3364_v21, -inf }
 0x4bf   : > { %1415 = vmax.xlane.f32.xlu1 %v1414_v22  ;;  %v3370_v23 = vpop.f32.mrf.mxu0  ;;  %v1124_v4 = vsel %vm835_vm1, %v3366_v27, -inf }
 0x4c0   : > { %v3372_v25 = vpop.f32.mrf.mxu1  ;;  %v1408_v30 = vsel %vm835_vm1, %v3370_v23, -inf }
 0x4c1   : > { %v3374_v29 = vpop.f32.mrf.mxu0  ;;  %v1118_v48 = vsel %vm835_vm1, %v3372_v25, -inf }
 0x4c2   : > { %v3378_v42 = vpop.f32.mrf.mxu1  ;;  %v1417_v33 = vsel %vm835_vm1, %v3374_v29, -inf }
 0x4c3   : > { %1409 = vmax.xlane.f32.xlu1 %v1408_v30  ;;  %v3380_v31 = vpop.f32.mrf.mxu0  ;;  %v1127_v53 = vsel %vm835_vm1, %v3378_v42, -inf }
 0x4c4   : > { %v1090_v37 = vpop.f32.mrf.mxu1  ;;  %v1411_v34 = vsel %vm835_vm1, %v3380_v31, -inf }
 0x4c5   : > { %v3382_v32 = vpop.f32.mrf.mxu0  ;;  %v1121_v50 = vsel %vm835_vm1, %v1090_v37, -inf }
 0x4c6   : > { %v1426_v36 = vsel %vm835_vm1, %v3382_v32, -inf  ;;  %v3396_v39 = vpop.f32.mrf.mxu1 }
 0x4c7   : > { %1418 = vmax.xlane.f32.xlu1 %v1417_v33  ;;  %1427 = vmax.xlane.f32.xlu0 %v1426_v36  ;;  %v3388_v38 = vpop.f32.mrf.mxu0  ;;  %v1136_v30 = vsel %vm835_vm1, %v3396_v39, -inf }
 0x4c8   : > { %v1420_v28 = vsel %vm835_vm1, %v3388_v38, -inf  ;;  %v3404_v47 = vpop.f32.mrf.mxu1 }
 0x4c9   : > { %v3390_v24 = vpop.f32.mrf.mxu0  ;;  %v1130_v36 = vsel %vm835_vm1, %v3404_v47, -inf }
 0x4ca   : > { %v3409_v51 = vpop.f32.mrf.mxu1 }
 0x4cb   : > { %1412 = vmax.xlane.f32.xlu1 %v1411_v34  ;;  %1421 = vmax.xlane.f32.xlu0 %v1420_v28  ;;  %v3398_v40 = vpop.f32.mrf.mxu0  ;;  %v1139_v54 = vsel %vm835_vm1, %v3409_v51, -inf  ;;  %v1429_v34 = vsel %vm835_vm1, %v3390_v24, -inf }
 0x4cc   : > { %v1423_v46 = vsel %vm835_vm1, %v3398_v40, -inf  ;;  %v1106_v22 = vpop.f32.mrf.mxu1 }
 0x4cd   : > { %v1133_v33 = vsel %vm835_vm1, %v1106_v22, -inf }
 0x4cf   : > { %1125 = vmax.xlane.f32.xlu0 %v1124_v4  ;;  %1424 = vmax.xlane.f32.xlu1 %v1423_v46 }
 0x4d3   : > { %1119 = vmax.xlane.f32.xlu0 %v1118_v48  ;;  %1122 = vmax.xlane.f32.xlu1 %v1121_v50 }
 0x4d7   : > { %1128 = vmax.xlane.f32.xlu0 %v1127_v53  ;;  %1140 = vmax.xlane.f32.xlu1 %v1139_v54 }
 0x4db   : > { %1137 = vmax.xlane.f32.xlu0 %v1136_v30  ;;  %1134 = vmax.xlane.f32.xlu1 %v1133_v33 }
 0x4df   : > { %1131 = vmax.xlane.f32.xlu0 %v1130_v36 }
 0x4e3   : > { %1430 = vmax.xlane.f32.xlu0 %v1429_v34 }
 0x4ec   : > { %1484 = vrot.lane.b32.xlu1 %v3181_v58, %s2957_s16 }
 0x4f0   : > { %1603 = vrot.lane.b32.xlu1 %v3185_v61, %s2958_s17  ;;  %v3442_v61 = vpop.permute.xlu1 %1488 }
 0x4f4   : > { %1601 = vrot.lane.b32.xlu1 %v3188_v62, %s2958_s17 }
 0x4f8   : > { %1597 = vrot.lane.b32.xlu1 %v3202_v1, %s2958_s17 }
 0x4f9   : > { %1486 = vrot.lane.b32.xlu0 %v3177_v55, %s2957_s16 }
 0x4fc   : > { %1591 = vrot.lane.b32.xlu1 %v3210_v13, %s2958_s17 }
 0x4fd   : > { %1599 = vrot.lane.b32.xlu0 %v3196_v0, %s2958_s17 }
 0x500   : > { %1595 = vrot.lane.b32.xlu1 %v3218_v15, %s2958_s17 }
 0x501   : > { %1589 = vrot.lane.b32.xlu0 %v3166_v43, %s2958_s17 }
 0x505   : > { %1593 = vrot.lane.b32.xlu0 %v3212_v14, %s2958_s17 }
 0x548   : > { %v1416_v62 = vpop.xlane.xlu1 %1415 }
 0x54c   : > { %v1410_v1 = vpop.xlane.xlu1 %1409 }
 0x550   : > { %v3444_v28 = vpop.xlane.xlu0 %1427  ;;  %v1419_v4 = vpop.xlane.xlu1 %1418 }
 0x554   : > { %v1422_v13 = vpop.xlane.xlu0 %1421  ;;  %v1413_v46 = vpop.xlane.xlu1 %1412 }
 0x558   : > { %v1126_v48 = vpop.xlane.xlu0 %1125  ;;  %v1425_v0 = vpop.xlane.xlu1 %1424 }
 0x559   : > { %v1144_v50 = vsub.f32 %v3366_v27, %v1126_v48 }
 0x55b   : > { %v1154_v33 = vmul.f32 1.442695, %v1144_v50  ;;  %v1432_v50 = vsub.f32 %v3370_v23, %v1410_v1  ;;  %v1434_v23 = vsub.f32 %v3364_v21, %v1416_v62 }
 0x55c   : > { %v1120_v15 = vpop.xlane.xlu0 %1119  ;;  %v1123_v53 = vpop.xlane.xlu1 %1122 }
 0x55d   : > { %v1142_v43 = vsub.f32 %v3372_v25, %v1120_v15  ;;  %v1143_v54 = vsub.f32 %v1090_v37, %v1123_v53  ;;  %v1433_v25 = vsub.f32 %v3380_v31, %v1413_v46 }
 0x55f   : > { %v1150_v30 = vmul.f32 1.442695, %v1142_v43  ;;  %v1152_v14 = vmul.f32 1.442695, %v1143_v54  ;;  %v1442_v54 = vmul.f32 1.442695, %v1433_v25 }
 0x560   : > { %v1129_v36 = vpop.xlane.xlu0 %1128  ;;  %v1141_v34 = vpop.xlane.xlu1 %1140 }
 0x561   : > { %2835 = vpow2.f32 %v1150_v30  ;;  %v1145_v9 = vsub.f32 %v3378_v42, %v1129_v36  ;;  %v1149_v37 = vsub.f32 %v3409_v51, %v1141_v34 }
 0x562   : > { %2837 = vpow2.f32 %v1152_v14  ;;  %v1440_v14 = vmul.f32 1.442695, %v1432_v50 }
 0x563   : > { %v1156_v8 = vmul.f32 1.442695, %v1145_v9  ;;  %2839 = vpow2.f32 %v1154_v33  ;;  %v1164_v9 = vmul.f32 1.442695, %v1149_v37 }
 0x564   : > { %v1138_v11 = vpop.xlane.xlu0 %1137  ;;  %v1135_v10 = vpop.xlane.xlu1 %1134 }
 0x565   : > { %2841 = vpow2.f32 %v1156_v8  ;;  %v1148_v27 = vsub.f32 %v3396_v39, %v1138_v11  ;;  %v1147_v48 = vsub.f32 %v1106_v22, %v1135_v10  ;;  %v1435_v8 = vsub.f32 %v3374_v29, %v1419_v4 }
 0x566   : > { %v1437_v11 = vsub.f32 %v3398_v40, %v1425_v0  ;;  %v1436_v39 = vsub.f32 %v3388_v38, %v1422_v13  ;;  %v1444_v40 = vmul.f32 1.442695, %v1434_v23  ;;  %v1438_v13 = vsub.f32 %v3382_v32, %v3444_v28 }
 0x567   : > { %v1162_v15 = vmul.f32 1.442695, %v1148_v27  ;;  %v1160_v53 = vmul.f32 1.442695, %v1147_v48  ;;  %v1446_v29 = vmul.f32 1.442695, %v1435_v8 }
 0x568   : > { %v1132_v43 = vpop.xlane.xlu0 %1131  ;;  %v1450_v1 = vmul.f32 1.442695, %v1437_v11  ;;  %v1448_v62 = vmul.f32 1.442695, %v1436_v39  ;;  %v1485_v27 = vpop.permute.xlu1 %1484 }
 0x569   : > { %v1146_v42 = vsub.f32 %v3404_v47, %v1132_v43  ;;  %2843 = vpow2.f32 %v1162_v15 }
 0x56a   : > { %2845 = vpow2.f32 %v1160_v53 }
 0x56b   : > { %v1158_v30 = vmul.f32 1.442695, %v1146_v42 }
 0x56c   : > { %v1431_v4 = vpop.xlane.xlu0 %1430  ;;  %v1604_v15 = vpop.permute.xlu1 %1603 }
 0x56d   : > { %2847 = vpow2.f32 %v1158_v30  ;;  %v1439_v38 = vsub.f32 %v3390_v24, %v1431_v4 }
 0x56e   : > { %v3455_v10 = vpop.eup %2835  ;;  %2849 = vpow2.f32 %v1442_v54 }
 0x56f   : > { %v3458_v31 = vpop.eup %2837  ;;  %2851 = vpow2.f32 %v1164_v9  ;;  %v1454_v33 = vmul.f32 1.442695, %v1439_v38  ;;  %v1627_v9 = vsel %vm745_vm0, %v1604_v15, 0 }
 0x570   : > { %2853 = vpow2.f32 %v1440_v14  ;;  %v1190_v47 = vpack.c.bf16 %v3458_v31, %v3455_v10  ;;  %v3464_v51 = vpop.eup %2839  ;;  %v1487_v24 = vpop.permute.xlu0 %1486 }
 0x571   : > { %2855 = vpow2.f32 %v1446_v29  ;;  %v1602_v30 = vpop.permute.xlu1 %1601 }
 0x572   : > { %v3466_v22 = vpop.eup %2841  ;;  %2579 = vmatprep.mubr.msk.bf16.mxu1 %vm835_vm1, %v1190_v47  ;;  %2857 = vpow2.f32 %v1450_v1  ;;  %v1624_v39 = vsel %vm745_vm0, %v1602_v30, 0 }
 0x573   : > { %v1191_v21 = vpack.c.bf16 %v3466_v22, %v3464_v51  ;;  %2859 = vpow2.f32 %v1444_v40 }
 0x574   : > { %2861 = vpow2.f32 %v1448_v62  ;;  %v1600_v14 = vpop.permute.xlu0 %1599 }
 0x575   : > { %2580 = vmatmul.mubr.msk.bf16.vlgmr.msra.gmra.mxu1 %vm835_vm1, %v1191_v21  ;;  %2863 = vpow2.f32 %v1454_v33  ;;  %v1621_v29 = vsel %vm745_vm0, %v1600_v14, 0  ;;  %v1598_v1 = vpop.permute.xlu1 %1597 }
 0x576   : > { %2604 = vmatpush3.bf16.msra.mxu1 %v3345_v57  ;;  %v3477_v46 = vpop.eup %2843  ;;  %v1452_v57 = vmul.f32 1.442695, %v1438_v13  ;;  %v1618_v4 = vsel %vm745_vm0, %v1598_v1, 0 }
 0x577   : > { %2605 = vmatprep.subr.bf16.mxu1 %v3442_v61  ;;  %v3479_v0 = vpop.eup %2845 }
 0x578   : > { %2865 = vpow2.f32 %v1452_v57  ;;  %v1590_v47 = vpop.permute.xlu0 %1589 }
 0x579   : > { %v1592_v40 = vpop.permute.xlu1 %1591 }
 0x57a   : > { %v3481_v36 = vpop.eup %2847  ;;  %2606 = vmatpush3.bf16.msra.mxu1 %v3442_v61 }
 0x57b   : > { %v3484_v34 = vpop.eup %2849  ;;  %2607 = vmatprep.subr.bf16.mxu1 %v1487_v24  ;;  %v1192_v32 = vpack.c.bf16 %v3479_v0, %v3481_v36 }
 0x57c   : > { %v3488_v28 = vpop.eup %2851  ;;  %v1594_v21 = vpop.permute.xlu0 %1593 }
 0x57d   : > { %v3490_v48 = vpop.eup %2853  ;;  %2583 = vmatprep.mubr.msk.bf16.mxu1 %vm835_vm1, %v1192_v32  ;;  %v1193_v25 = vpack.c.bf16 %v3488_v28, %v3477_v46  ;;  %v1596_v62 = vpop.permute.xlu1 %1595 }
 0x57e   : > { %2608 = vmatpush3.bf16.msra.mxu1 %v1487_v24  ;;  %v1480_v61 = vpack.c.bf16 %v3484_v34, %v3490_v48  ;;  %v3499_v37 = vpop.eup %2855 }
 0x57f   : > { %2584 = vmatmul.mubr.msk.bf16.gmra.mxu1 %vm835_vm1, %v1193_v25  ;;  %2609 = vmatprep.subr.bf16.mxu1 %v1485_v27  ;;  %v3501_v50 = vpop.eup %2857 }
 0x580   : > { %2611 = vmatprep.mubr.msk.bf16.mxu1 %vm835_vm1, %v1480_v61  ;;  %v3504_v53 = vpop.eup %2859 }
 0x581   : > { %v3506_v43 = vpop.eup %2861  ;;  %v1481_v42 = vpack.c.bf16 %v3499_v37, %v3504_v53 }
 0x582   : > { %2610 = vmatpush3.bf16.msra.mxu1 %v1485_v27  ;;  %v1482_v54 = vpack.c.bf16 %v3501_v50, %v3506_v43  ;;  %v3516_v8 = vpop.eup %2863 }
 0x583   : > { %2687 = vmatprep.subr.msk.bf16.mxu1 %vm745_vm0, %v1604_v15 }
 0x585   : > { %v3518_v11 = vpop.eup %2865 }
 0x586   : > { %v1483_v23 = vpack.c.bf16 %v3516_v8, %v3518_v11 }
 0x587   : > { %2612 = vmatmul.mubr.msk.bf16.vlgmr.msra.gmra.mxu1 %vm835_vm1, %v1481_v42 }
 0x588   : > { %2620 = vmatpush3.bf16.xpose.msra.mxu1 %v1627_v9  ;;  %2615 = vmatprep.mubr.msk.bf16.mxu1 %vm835_vm1, %v1482_v54 }
 0x589   : > { %2688 = vmatprep.subr.msk.bf16.mxu1 %vm745_vm0, %v1602_v30 }
 0x58f   : > { %2616 = vmatmul.mubr.msk.bf16.gmra.mxu1 %vm835_vm1, %v1483_v23 }
 0x590   : > { %2622 = vmatpush3.bf16.xpose.msra.mxu1 %v1624_v39  ;;  %2627 = vmatprep.mubr.msk.bf16.mxu1 %vm745_vm0, %v1590_v47 }
 0x591   : > { %2689 = vmatprep.subr.msk.bf16.mxu1 %vm745_vm0, %v1600_v14 }
 0x598   : > { %2624 = vmatpush3.bf16.xpose.msra.mxu1 %v1621_v29 }
 0x599   : > { %2690 = vmatprep.subr.msk.bf16.mxu1 %vm745_vm0, %v1598_v1 }
 0x5a0   : > { %2626 = vmatpush3.bf16.xpose.msra.mxu1 %v1618_v4 }
 0x5a7   : > { %2628 = vmatmul.mubr.msk.bf16.vlgmr.msra.gmra.mxu1 %vm745_vm0, %v1592_v40 }
 0x5a8   : > { %2631 = vmatprep.mubr.msk.bf16.mxu1 %vm745_vm0, %v1594_v21 }
 0x5af   : > { %2632 = vmatmul.mubr.msk.bf16.gmra.mxu1 %vm745_vm0, %v1596_v62 }
 0x635   : > { %v3532_v38 = vpop.f32.mrf.mxu1 }
 0x637   : > { %v3534_v13 = vpop.f32.mrf.mxu1 }
 0x639   : > { %v3536_v33 = vpop.f32.mrf.mxu1 }
 0x63b   : > { %v3538_v24 = vpop.f32.mrf.mxu1 }
 0x63f   : > { %v3540_v57 = vpop.f32.mrf.mxu1 }
 0x641   : > { %v3542_v32 = vpop.f32.mrf.mxu1 }
 0x643   : > { %v3544_v27 = vpop.f32.mrf.mxu1 }
 0x645   : > { %v3546_v25 = vpop.f32.mrf.mxu1 }
 0x647   : > { %v3548_v61 = vpop.f32.mrf.mxu1 }
 0x649   : > { %v3550_v15 = vpop.f32.mrf.mxu1 }
 0x64b   : > { %v3552_v42 = vpop.f32.mrf.mxu1 }
 0x64d   : > { %v3554_v54 = vpop.f32.mrf.mxu1 }
 0x64f   : > { %v3556_v9 = vpop.f32.mrf.mxu1 }
 0x651   : > { %v3558_v30 = vpop.f32.mrf.mxu1 }
 0x653   : > { %v3560_v14 = vpop.f32.mrf.mxu1 }
 0x655   : > { %v3562_v23 = vpop.f32.mrf.mxu1 }
 0x667   : > { %v2629_v39 = vpop.f32.mrf.mxu1 }
 0x668   : > { %v1700_v47 = vsel %vm835_vm1, %v2629_v39, -inf }
 0x669   : > { %1701 = vmax.xlane.f32.xlu0 %v1700_v47  ;;  %v1663_v29 = vpop.f32.mrf.mxu1 }
 0x66a   : > { %v1694_v4 = vsel %vm835_vm1, %v1663_v29, -inf }
 0x66b   : > { %v3565_v1 = vpop.f32.mrf.mxu1 }
 0x66c   : > { %v1703_v62 = vsel %vm835_vm1, %v3565_v1, -inf }
 0x66d   : > { %1695 = vmax.xlane.f32.xlu0 %v1694_v4  ;;  %v1666_v40 = vpop.f32.mrf.mxu1 }
 0x66e   : > { %v1697_v21 = vsel %vm835_vm1, %v1666_v40, -inf }
 0x66f   : > { %1698 = vmax.xlane.f32.xlu1 %v1697_v21  ;;  %v3571_v5 = vpop.f32.mrf.mxu1 }
 0x670   : > { %v1712_v2 = vsel %vm835_vm1, %v3571_v5, -inf }
 0x671   : > { %1704 = vmax.xlane.f32.xlu0 %v1703_v62  ;;  %v3575_v47 = vpop.f32.mrf.mxu1 }
 0x672   : > { %v1706_v6 = vsel %vm835_vm1, %v3575_v47, -inf }
 0x673   : > { %v3585_v4 = vpop.f32.mrf.mxu1 }
 0x674   : > { %v1715_v21 = vsel %vm835_vm1, %v3585_v4, -inf }
 0x675   : > { %1713 = vmax.xlane.f32.xlu0 %v1712_v2  ;;  %v3589_v62 = vpop.f32.mrf.mxu1 }
 0x676   : > { %v1709_v2 = vsel %vm835_vm1, %v3589_v62, -inf }
 0x679   : > { %1707 = vmax.xlane.f32.xlu0 %v1706_v6  ;;  %v1166_v6 = vsel %vm835_vm1, %v3455_v10, 0.0  ;;  %v1178_v10 = vsel %vm835_vm1, %v3481_v36, 0.0  ;;  %v1465_v36 = vsel %vm835_vm1, %v3499_v37, 0.0 }
 0x680   : > { %1774 = vrot.lane.b32.xlu1 %v3172_v52, %s2958_s17  ;;  %v1172_v52 = vsel %vm835_vm1, %v3464_v51, 0.0  ;;  %v1184_v51 = vsel %vm835_vm1, %v3477_v46, 0.0  ;;  %v1181_v46 = vsel %vm835_vm1, %v3479_v0, 0.0 }
 0x684   : > { %1772 = vrot.lane.b32.xlu1 %v3177_v55, %s2958_s17  ;;  %v1456_v55 = vsel %vm835_vm1, %v3490_v48, 0.0  ;;  %v1169_v48 = vsel %vm835_vm1, %v3458_v31, 0.0  ;;  %v1471_v31 = vsel %vm835_vm1, %v3501_v50, 0.0 }
 0x68f   : > { %1776 = vrot.lane.b32.xlu0 %v3170_v49, %s2958_s17  ;;  %v1175_v49 = vsel %vm835_vm1, %v3466_v22, 0.0  ;;  %v1468_v22 = vsel %vm835_vm1, %v3506_v43, 0.0 }
 0x6a8   : > { %1716 = vmax.xlane.f32.xlu1 %v1715_v21  ;;  %v1462_v21 = vsel %vm835_vm1, %v3504_v53, 0.0  ;;  %v1187_v53 = vsel %vm835_vm1, %v3488_v28, 0.0 }
 0x6ac   : > { %1710 = vmax.xlane.f32.xlu1 %v1709_v2 }
 0x6ae   : > { %1167 = vadd.xlane.f32.xlu0 %v1166_v6 }
 0x6b2   : > { %1173 = vadd.xlane.f32.xlu0 %v1172_v52 }
 0x6b6   : > { %1176 = vadd.xlane.f32.xlu0 %v1175_v49 }
 0x6ba   : > { %1457 = vadd.xlane.f32.xlu0 %v1456_v55 }
 0x6bd   : > { %1770 = vrot.lane.b32.xlu1 %v3181_v58, %s2958_s17  ;;  %v1459_v58 = vsel %vm835_vm1, %v3484_v34, 0.0 }
 0x6be   : > { %1463 = vadd.xlane.f32.xlu0 %v1462_v21 }
 0x6c2   : > { %1179 = vadd.xlane.f32.xlu0 %v1178_v10 }
 0x6c6   : > { %1185 = vadd.xlane.f32.xlu0 %v1184_v51 }
 0x6ca   : > { %1469 = vadd.xlane.f32.xlu0 %v1468_v22 }
 0x6e1   : > { %1170 = vadd.xlane.f32.xlu1 %v1169_v48 }
 0x6e5   : > { %1460 = vadd.xlane.f32.xlu1 %v1459_v58 }
 0x6e9   : > { %1466 = vadd.xlane.f32.xlu1 %v1465_v36 }
 0x6ed   : > { %1182 = vadd.xlane.f32.xlu1 %v1181_v46 }
 0x6f1   : > { %1188 = vadd.xlane.f32.xlu1 %v1187_v53 }
 0x6f2   : > { %v1702_v43 = vpop.xlane.xlu0 %1701 }
 0x6f3   : > { %v1720_v2 = vsub.f32 %v2629_v39, %v1702_v43 }
 0x6f5   : > { %v1730_v6 = vmul.f32 1.442695, %v1720_v2  ;;  %1472 = vadd.xlane.f32.xlu1 %v1471_v31  ;;  %v1474_v31 = vsel %vm835_vm1, %v3518_v11, 0.0  ;;  %v884_v11 = vsel %vm835_vm1, %v3289_v56, 0.0 }
 0x6f6   : > { %v1696_v34 = vpop.xlane.xlu0 %1695 }
 0x6f7   : > { %2867 = vpow2.f32 %v1730_v6  ;;  %v1718_v52 = vsub.f32 %v1663_v29, %v1696_v34 }
 0x6f8   : > { %v1699_v37 = vpop.xlane.xlu1 %1698 }
 0x6f9   : > { %v1726_v49 = vmul.f32 1.442695, %v1718_v52  ;;  %v1719_v55 = vsub.f32 %v1666_v40, %v1699_v37 }
 0x6fa   : > { %v1705_v21 = vpop.xlane.xlu0 %1704 }
 0x6fb   : > { %2869 = vpow2.f32 %v1726_v49  ;;  %v1728_v0 = vmul.f32 1.442695, %v1719_v55  ;;  %v1721_v10 = vsub.f32 %v3565_v1, %v1705_v21  ;;  %v1477_v49 = vsel %vm835_vm1, %v3516_v8, 0.0 }
 0x6fc   : > { %v1775_v40 = vpop.permute.xlu1 %1774  ;;  %v902_v8 = vsel %vm835_vm1, %v3328_v45, 0.0 }
 0x6fd   : > { %2871 = vpow2.f32 %v1728_v0  ;;  %v1732_v28 = vmul.f32 1.442695, %v1721_v10  ;;  %v890_v0 = vsel %vm835_vm1, %v3295_v63, 0.0  ;;  %v896_v10 = vsel %vm835_vm1, %v3321_v35, 0.0 }
 0x6fe   : > { %v1714_v51 = vpop.xlane.xlu0 %1713 }
 0x6ff   : > { %2873 = vpow2.f32 %v1732_v28  ;;  %v1724_v39 = vsub.f32 %v3571_v5, %v1714_v51 }
 0x700   : > { %v1773_v2 = vpop.permute.xlu1 %1772 }
 0x701   : > { %v1738_v58 = vmul.f32 1.442695, %v1724_v39 }
 0x702   : > { %v1708_v50 = vpop.xlane.xlu0 %1707 }
 0x703   : > { %v1722_v22 = vsub.f32 %v3575_v47, %v1708_v50 }
 0x704   : > { %v2868_v48 = vpop.eup %2867 }
 0x705   : > { %v1734_v29 = vmul.f32 1.442695, %v1722_v22  ;;  %v1748_v36 = vsel %vm835_vm1, %v2868_v48, 0.0 }
 0x706   : > { %1749 = vadd.xlane.f32.xlu0 %v1748_v36  ;;  %v1777_v46 = vpop.permute.xlu0 %1776 }
 0x707   : > { %2875 = vpow2.f32 %v1734_v29  ;;  %2635 = vmatprep.subr.bf16.mxu0 %v1777_v46 }
 0x708   : > { %v2870_v1 = vpop.eup %2869  ;;  %2636 = vmatpush3.bf16.msra.mxu0 %v1777_v46  ;;  %2877 = vpow2.f32 %v1738_v58 }
 0x709   : > { %2637 = vmatprep.subr.bf16.mxu0 %v1775_v40  ;;  %v1742_v53 = vsel %vm835_vm1, %v2870_v1, 0.0 }
 0x70a   : > { %v2872_v5 = vpop.eup %2871  ;;  %1743 = vadd.xlane.f32.xlu0 %v1742_v53 }
 0x70b   : > { %v1766_v43 = vpack.c.bf16 %v2872_v5, %v2870_v1  ;;  %v1745_v34 = vsel %vm835_vm1, %v2872_v5, 0.0  ;;  %v893_v1 = vsel %vm835_vm1, %v3291_v59, 0.0  ;;  %v899_v5 = vsel %vm835_vm1, %v3326_v44, 0.0 }
 0x70c   : > { %v2874_v47 = vpop.eup %2873  ;;  %2638 = vmatpush3.bf16.msra.mxu0 %v1775_v40 }
 0x70d   : > { %2639 = vmatprep.subr.bf16.mxu0 %v1773_v2  ;;  %2643 = vmatprep.mubr.msk.bf16.mxu0 %vm835_vm1, %v1766_v43  ;;  %v1751_v6 = vsel %vm835_vm1, %v2874_v47, 0.0  ;;  %v1767_v63 = vpack.c.bf16 %v2874_v47, %v2868_v48  ;;  %v887_v48 = vsel %vm835_vm1, %v3293_v60, 0.0  ;;  %v905_v43 = vsel %vm835_vm1, %v3323_v41, 0.0 }
 0x70e   : > { %1475 = vadd.xlane.f32.xlu0 %v1474_v31  ;;  %1752 = vadd.xlane.f32.xlu1 %v1751_v6 }
 0x710   : > { %2640 = vmatpush3.bf16.msra.mxu0 %v1773_v2 }
 0x712   : > { %1746 = vadd.xlane.f32.xlu1 %v1745_v34 }
 0x714   : > { %v2876_v52 = vpop.eup %2875 }
 0x715   : > { %v1754_v37 = vsel %vm835_vm1, %v2876_v52, 0.0  ;;  %v2878_v55 = vpop.eup %2877 }
 0x716   : > { %1755 = vadd.xlane.f32.xlu0 %v1754_v37  ;;  %1478 = vadd.xlane.f32.xlu1 %v1477_v49  ;;  %v1760_v21 = vsel %vm835_vm1, %v2878_v55, 0.0 }
 0x71a   : > { %1761 = vadd.xlane.f32.xlu0 %v1760_v21 }
 0x71e   : > { %885 = vadd.xlane.f32.xlu0 %v884_v11 }
 0x722   : > { %891 = vadd.xlane.f32.xlu0 %v890_v0 }
 0x726   : > { %897 = vadd.xlane.f32.xlu0 %v896_v10 }
 0x72a   : > { %903 = vadd.xlane.f32.xlu0 %v902_v8 }
 0x731   : > { %v1717_v28 = vpop.xlane.xlu1 %1716 }
 0x732   : > { %v1725_v51 = vsub.f32 %v3585_v4, %v1717_v28 }
 0x734   : > { %v1740_v39 = vmul.f32 1.442695, %v1725_v51 }
 0x735   : > { %v1711_v50 = vpop.xlane.xlu1 %1710 }
 0x736   : > { %v1723_v56 = vsub.f32 %v3589_v62, %v1711_v50  ;;  %2879 = vpow2.f32 %v1740_v39 }
 0x737   : > { %v1168_v40 = vpop.xlane.xlu0 %1167 }
 0x738   : > { %v1736_v22 = vmul.f32 1.442695, %v1723_v56 }
 0x739   : > { %v1771_v58 = vpop.permute.xlu1 %1770 }
 0x73a   : > { %2881 = vpow2.f32 %v1736_v22  ;;  %2641 = vmatprep.subr.bf16.mxu0 %v1771_v58 }
 0x73b   : > { %2642 = vmatpush3.bf16.msra.mxu0 %v1771_v58  ;;  %v1174_v46 = vpop.xlane.xlu0 %1173 }
 0x73e   : > { %2644 = vmatmul.mubr.msk.bf16.vlgmr.msra.gmra.mxu0 %vm835_vm1, %v1767_v63 }
 0x73f   : > { %v1177_v53 = vpop.xlane.xlu0 %1176 }
 0x740   : > { %2883 = vrcp.f32 %v1177_v53 }
 0x741   : > { %2885 = vrcp.f32 %v1174_v46 }
 0x742   : > { %2887 = vrcp.f32 %v1168_v40 }
 0x743   : > { %v2880_v35 = vpop.eup %2879  ;;  %v1458_v47 = vpop.xlane.xlu0 %1457 }
 0x744   : > { %v1769_v4 = vpack.c.bf16 %v2880_v35, %v2878_v55  ;;  %v1763_v62 = vsel %vm835_vm1, %v2880_v35, 0.0 }
 0x747   : > { %v2882_v29 = vpop.eup %2881  ;;  %v1464_v6 = vpop.xlane.xlu0 %1463 }
 0x748   : > { %v1757_v45 = vsel %vm835_vm1, %v2882_v29, 0.0  ;;  %v1768_v36 = vpack.c.bf16 %v2882_v29, %v2876_v52 }
 0x749   : > { %1758 = vadd.xlane.f32.xlu1 %v1757_v45 }
 0x74a   : > { %2647 = vmatprep.mubr.msk.bf16.mxu0 %vm835_vm1, %v1768_v36 }
 0x74b   : > { %2648 = vmatmul.mubr.msk.bf16.gmra.mxu0 %vm835_vm1, %v1769_v4  ;;  %v1180_v37 = vpop.xlane.xlu0 %1179 }
 0x74d   : > { %1764 = vadd.xlane.f32.xlu1 %v1763_v62  ;;  %v2884_v2 = vpop.eup %2883  ;;  %v2800_v62 = vld [vmem:[%s3773_s5 + $0x10] sm:$0xff]  }
 0x74e   : > { %v2886_v31 = vpop.eup %2885  ;;  %v1298_v60 = vmul.f32 %v2884_v2, %v3536_v33 }
 0x74f   : > { %v1297_v34 = vmul.f32 %v2886_v31, %v3532_v38  ;;  %v2888_v49 = vpop.eup %2887  ;;  %v1186_v55 = vpop.xlane.xlu0 %1185 }
 0x750   : > { %v1295_v38 = vmul.f32 %v2888_v49, %v3534_v13 }
 0x751   : > { %888 = vadd.xlane.f32.xlu1 %v887_v48  ;;  %v2708_v52 = vpack.i.bf16 %v1298_v60, %v1297_v34 }
 0x753   : > { %v1470_v48 = vpop.xlane.xlu0 %1469 }
 0x755   : > { %894 = vadd.xlane.f32.xlu1 %v893_v1 }
 0x759   : > { %900 = vadd.xlane.f32.xlu1 %v899_v5 }
 0x75d   : > { %906 = vadd.xlane.f32.xlu1 %v905_v43 }
 0x76a   : > { %v1171_v59 = vpop.xlane.xlu1 %1170 }
 0x76b   : > { %2889 = vrcp.f32 %v1171_v59  ;;  %v2802_v59 = vld [vmem:[%s3773_s5] sm:$0xff]  }
 0x76c   : > { %2891 = vrcp.f32 %v1458_v47 }
 0x76e   : > { %2709 = vrot.lane.b32.xlu1 %v2708_v52, %s2958_s17  ;;  %v1461_v44 = vpop.xlane.xlu1 %1460 }
 0x76f   : > { %2893 = vrcp.f32 %v1461_v44 }
 0x770   : > { %2895 = vrcp.f32 %v1464_v6  ;;  %v2801_v6 = vld [vmem:[%s3773_s5 + $0x8] sm:$0xff]  }
 0x772   : > { %v1467_v41 = vpop.xlane.xlu1 %1466 }
 0x773   : > { %2897 = vrcp.f32 %v1467_v41 }
 0x774   : > { %2899 = vrcp.f32 %v1180_v37 }
 0x776   : > { %v1183_v33 = vpop.xlane.xlu1 %1182 }
 0x777   : > { %2901 = vrcp.f32 %v1183_v33 }
 0x778   : > { %v2890_v21 = vpop.eup %2889  ;;  %2903 = vrcp.f32 %v1186_v55 }
 0x779   : > { %v1296_v11 = vmul.f32 %v2890_v21, %v3538_v24  ;;  %v2892_v0 = vpop.eup %2891 }
 0x77a   : > { %v1189_v10 = vpop.xlane.xlu1 %1188  ;;  %v1581_v51 = vmul.f32 %v2892_v0, %v3550_v15 }
 0x77b   : > { %2905 = vrcp.f32 %v1189_v10  ;;  %v2703_v8 = vpack.i.bf16 %v1296_v11, %v1295_v38 }
 0x77c   : > { %v2894_v28 = vpop.eup %2893 }
 0x77d   : > { %2704 = vrot.lane.b32.xlu0 %v2703_v8, %s2958_s17  ;;  %v1582_v39 = vmul.f32 %v2894_v28, %v3554_v54  ;;  %v2896_v50 = vpop.eup %2895 }
 0x77e   : > { %v1583_v13 = vmul.f32 %v2896_v50, %v3548_v61  ;;  %v1473_v46 = vpop.xlane.xlu1 %1472 }
 0x77f   : > { %v2713_v56 = vpack.i.bf16 %v1582_v39, %v1581_v51  ;;  %2907 = vrcp.f32 %v1473_v46 }
 0x780   : > { %v2898_v22 = vpop.eup %2897 }
 0x781   : > { %2714 = vrot.lane.b32.xlu1 %v2713_v56, %s2957_s16  ;;  %v1584_v24 = vmul.f32 %v2898_v22, %v3552_v42  ;;  %v2900_v58 = vpop.eup %2899  ;;  %v2795_v42 = vld [vmem:[%s3773_s5 + $0x38] sm:$0xff]  }
 0x782   : > { %v1299_v29 = vmul.f32 %v2900_v58, %v3542_v32  ;;  %v2796_v32 = vld [vmem:[%s3773_s5 + $0x30] sm:$0xff]   ;;  %2651 = vmatprep.subr.bf16.mxu0 %v2795_v42 }
 0x783   : > { %v2718_v63 = vpack.i.bf16 %v1584_v24, %v1583_v13  ;;  %2652 = vmatpush3.bf16.msra.mxu0 %v2795_v42 }
 0x784   : > { %v2902_v35 = vpop.eup %2901  ;;  %2653 = vmatprep.subr.bf16.mxu0 %v2796_v32 }
 0x785   : > { %2719 = vrot.lane.b32.xlu1 %v2718_v63, %s2957_s16  ;;  %v1300_v15 = vmul.f32 %v2902_v35, %v3546_v25  ;;  %v2904_v45 = vpop.eup %2903  ;;  %v2799_v25 = vld [vmem:[%s3773_s5 + $0x18] sm:$0xff]  }
 0x786   : > { %v1301_v40 = vmul.f32 %v2904_v45, %v3540_v57  ;;  %v2797_v57 = vld [vmem:[%s3773_s5 + $0x28] sm:$0xff]  }
 0x787   : > { %v2723_v54 = vpack.i.bf16 %v1300_v15, %v1299_v29  ;;  %2654 = vmatpush3.bf16.msra.mxu0 %v2796_v32 }
 0x788   : > { %v2906_v36 = vpop.eup %2905  ;;  %2655 = vmatprep.subr.bf16.mxu0 %v2797_v57 }
 0x789   : > { %2724 = vrot.lane.b32.xlu0 %v2723_v54, %s2958_s17  ;;  %v1302_v61 = vmul.f32 %v2906_v36, %v3544_v27  ;;  %v2798_v27 = vld [vmem:[%s3773_s5 + $0x20] sm:$0xff]  }
 0x78b   : > { %v2728_v4 = vpack.i.bf16 %v1302_v61, %v1301_v40  ;;  %2656 = vmatpush3.bf16.msra.mxu0 %v2797_v57 }
 0x78c   : > { %2657 = vmatprep.subr.bf16.mxu0 %v2798_v27  ;;  %v2908_v34 = vpop.eup %2907 }
 0x78d   : > { %2729 = vrot.lane.b32.xlu1 %v2728_v4, %s2958_s17  ;;  %v1586_v58 = vmul.f32 %v2908_v34, %v3562_v23 }
 0x78f   : > { %2658 = vmatpush3.bf16.msra.mxu0 %v2798_v27  ;;  %v1750_v53 = vpop.xlane.xlu0 %1749 }
 0x790   : > { %2659 = vmatprep.subr.bf16.mxu0 %v2799_v25  ;;  %2909 = vrcp.f32 %v1750_v53 }
 0x793   : > { %2660 = vmatpush3.bf16.msra.mxu0 %v2799_v25  ;;  %v1744_v43 = vpop.xlane.xlu0 %1743 }
 0x794   : > { %2661 = vmatprep.subr.bf16.mxu0 %v2800_v62  ;;  %2911 = vrcp.f32 %v1744_v43 }
 0x797   : > { %2662 = vmatpush3.bf16.msra.mxu0 %v2800_v62  ;;  %v1753_v1 = vpop.xlane.xlu1 %1752  ;;  %v1476_v2 = vpop.xlane.xlu0 %1475 }
 0x798   : > { %2913 = vrcp.f32 %v1753_v1  ;;  %2663 = vmatprep.subr.bf16.mxu0 %v2801_v6 }
 0x79b   : > { %v1747_v5 = vpop.xlane.xlu1 %1746  ;;  %2664 = vmatpush3.bf16.msra.mxu0 %v2801_v6 }
 0x79c   : > { %2665 = vmatprep.subr.bf16.mxu0 %v2802_v59 }
 0x79d   : > { %v2910_v37 = vpop.eup %2909 }
 0x79f   : > { %v1479_v47 = vpop.xlane.xlu1 %1478  ;;  %v1756_v31 = vpop.xlane.xlu0 %1755  ;;  %2666 = vmatpush3.bf16.msra.mxu0 %v2802_v59 }
 0x7a0   : > { %2915 = vrcp.f32 %v1479_v47 }
 0x7a1   : > { %2917 = vrcp.f32 %v1476_v2  ;;  %v2912_v49 = vpop.eup %2911 }
 0x7a2   : > { %2919 = vrcp.f32 %v1747_v5 }
 0x7a3   : > { %2921 = vrcp.f32 %v1470_v48  ;;  %v1762_v52 = vpop.xlane.xlu0 %1761 }
 0x7a4   : > { %2923 = vrcp.f32 %v1762_v52 }
 0x7a5   : > { %v2914_v33 = vpop.eup %2913 }
 0x7a7   : > { %v886_v46 = vpop.xlane.xlu0 %885 }
 0x7ab   : > { %v892_v1 = vpop.xlane.xlu0 %891 }
 0x7ad   : > { %v2916_v21 = vpop.eup %2915 }
 0x7ae   : > { %v2918_v11 = vpop.eup %2917  ;;  %v1588_v56 = vmul.f32 %v2916_v21, %v3560_v14 }
 0x7af   : > { %v2920_v8 = vpop.eup %2919  ;;  %v1587_v24 = vmul.f32 %v2918_v11, %v3556_v9  ;;  %v898_v5 = vpop.xlane.xlu0 %897 }
 0x7b0   : > { %v2922_v22 = vpop.eup %2921 }
 0x7b1   : > { %v2748_v63 = vpack.i.bf16 %v1588_v56, %v1587_v24  ;;  %v1585_v35 = vmul.f32 %v2922_v22, %v3558_v30  ;;  %v2924_v14 = vpop.eup %2923 }
 0x7b3   : > { %v2743_v15 = vpack.i.bf16 %v1586_v58, %v1585_v35  ;;  %v904_v47 = vpop.xlane.xlu0 %903 }
 0x7d2   : > { %v1759_v60 = vpop.xlane.xlu1 %1758 }
 0x7d6   : > { %v1765_v41 = vpop.xlane.xlu1 %1764 }
 0x7d7   : > { %2925 = vrcp.f32 %v1765_v41 }
 0x7d8   : > { %2927 = vrcp.f32 %v1756_v31 }
 0x7d9   : > { %2929 = vrcp.f32 %v1759_v60 }
 0x7da   : > { %v889_v30 = vpop.xlane.xlu1 %888  ;;  %2931 = vrcp.f32 %v886_v46 }
 0x7de   : > { %v895_v25 = vpop.xlane.xlu1 %894 }
 0x7df   : > { %2933 = vrcp.f32 %v895_v25 }
 0x7e0   : > { %2935 = vrcp.f32 %v892_v1 }
 0x7e1   : > { %2937 = vrcp.f32 %v889_v30 }
 0x7e2   : > { %v901_v62 = vpop.xlane.xlu1 %900  ;;  %2939 = vrcp.f32 %v898_v5 }
 0x7e3   : > { %2941 = vrcp.f32 %v904_v47 }
 0x7e4   : > { %v2926_v54 = vpop.eup %2925  ;;  %2943 = vrcp.f32 %v901_v62 }
 0x7e5   : > { %v2928_v40 = vpop.eup %2927 }
 0x7e6   : > { %v2930_v4 = vpop.eup %2929  ;;  %v907_v48 = vpop.xlane.xlu1 %906 }
 0x7e7   : > { %v2932_v31 = vpop.eup %2931  ;;  %2945 = vrcp.f32 %v907_v48 }
 0x7e8   : > { %v997_v21 = vmul.f32 %v2932_v31, %v3350_v7 }
 0x7ea   : > { %v2710_v53 = vpop.permute.xlu1 %2709 }
 0x7ec   : > { %v2934_v6 = vpop.eup %2933 }
 0x7ed   : > { %v2936_v59 = vpop.eup %2935 }
 0x7ee   : > { %v2938_v52 = vpop.eup %2937 }
 0x7ef   : > { %v2705_v60 = vpop.permute.xlu0 %2704 }
 0x7f0   : > { %v2707_v41 = vunpack.i.h.bf16 %v2705_v60 }
 0x7f3   : > { %v2715_v43 = vpop.permute.xlu1 %2714 }
 0x7f7   : > { %v2720_v2 = vpop.permute.xlu1 %2719 }
 0x7f8   : > { %v2721_v11 = vunpack.i.l.bf16 %v2720_v2 }
 0x7fe   : > { %v2645_v44 = vpop.f32.mrf.mxu0 }
 0x7ff   : > { %v1869_v0 = vmul.f32 %v2910_v37, %v2645_v44  ;;  %v3712_v34 = vpop.permute.xlu1 %2729  ;;  %v1000_v44 = vmul.f32 %v2934_v6, %v3352_v12  ;;  %v2711_v37 = vunpack.i.l.bf16 %v2710_v53 }
 0x800   : > { %v1828_v55 = vpop.f32.mrf.mxu0  ;;  %v2731_v30 = vunpack.i.l.bf16 %v3712_v34 }
 0x801   : > { %v1867_v51 = vmul.f32 %v2912_v49, %v1828_v55  ;;  %v2706_v49 = vunpack.i.l.bf16 %v2705_v60  ;;  %v2725_v55 = vpop.permute.xlu0 %2724 }
 0x802   : > { %v2646_v38 = vpop.f32.mrf.mxu0 }
 0x803   : > { %v1870_v10 = vmul.f32 %v2914_v33, %v2646_v38  ;;  %v999_v33 = vmul.f32 %v2936_v59, %v3348_v18  ;;  %v2722_v38 = vunpack.i.h.bf16 %v2720_v2  ;;  %v1971_v22 = vsel %vm745_vm0, %v997_v21, %v2706_v49 }
 0x804   : > { %v1831_v28 = vpop.f32.mrf.mxu0 }
 0x805   : > { %v2733_v39 = vpack.i.bf16 %v1870_v10, %v1869_v0  ;;  %v1868_v50 = vmul.f32 %v2920_v8, %v1831_v28  ;;  %v2712_v0 = vunpack.i.h.bf16 %v2710_v53  ;;  %v998_v10 = vmul.f32 %v2938_v52, %v3354_v26 }
 0x806   : > { %v2717_v8 = vunpack.i.h.bf16 %v2715_v43  ;;  %v2716_v28 = vunpack.i.l.bf16 %v2715_v43  ;;  %v1973_v56 = vsel %vm745_vm0, %v999_v33, %v2711_v37 }
 0x807   : > { %v2738_v13 = vpack.i.bf16 %v1868_v50, %v1867_v51  ;;  %2734 = vrot.lane.b32.xlu1 %v2733_v39, %s2956_s15  ;;  %v1974_v12 = vsel %vm745_vm0, %v1000_v44, %v2712_v0  ;;  %v1972_v18 = vsel %vm745_vm0, %v998_v10, %v2707_v41 }
 0x808   : > { %v1982_v24 = vsel %vm835_vm1, %v1974_v12, %v2722_v38  ;;  %v1979_v35 = vsel %vm835_vm1, %v1971_v22, %v2716_v28 }
 0x809   : > { %2739 = vrot.lane.b32.xlu0 %v2738_v13, %s2956_s15  ;;  %v1981_v13 = vsel %vm835_vm1, %v1973_v56, %v2721_v11  ;;  %v3789_v56 = vld [vmem:[#allocation4_spill] sm:$0xff] }
 0x80b   : > { %v2649_v29 = vpop.f32.mrf.mxu0  ;;  %2749 = vrot.lane.b32.xlu1 %v2748_v63, %s2957_s16  ;;  %v1980_v63 = vsel %vm835_vm1, %v1972_v18, %v2717_v8 }
 0x80c   : > { %v1873_v61 = vmul.f32 %v2924_v14, %v2649_v29 }
 0x80d   : > { %v1844_v45 = vpop.f32.mrf.mxu0  ;;  %2744 = vrot.lane.b32.xlu0 %v2743_v15, %s2957_s16 }
 0x80e   : > { %v1871_v42 = vmul.f32 %v2928_v40, %v1844_v45 }
 0x80f   : > { %v2650_v36 = vpop.f32.mrf.mxu0 }
 0x810   : > { %v1874_v9 = vmul.f32 %v2926_v54, %v2650_v36  ;;  %v2940_v36 = vpop.eup %2939 }
 0x811   : > { %v1847_v23 = vpop.f32.mrf.mxu0  ;;  %v1001_v25 = vmul.f32 %v2940_v36, %v3358_v17  ;;  %v3792_v36 = vld [vmem:[#allocation7_spill] sm:$0xff] }
 0x812   : > { %v2758_v32 = vpack.i.bf16 %v1874_v9, %v1873_v61  ;;  %v1872_v57 = vmul.f32 %v2930_v4, %v1847_v23  ;;  %v2942_v61 = vpop.eup %2941 }
 0x813   : > { %v2944_v9 = vpop.eup %2943  ;;  %v1003_v62 = vmul.f32 %v2942_v61, %v3356_v16  ;;  %v3793_v61 = vld [vmem:[#allocation8_spill] sm:$0xff] }
 0x814   : > { %v2753_v27 = vpack.i.bf16 %v1872_v57, %v1871_v42  ;;  %2759 = vrot.lane.b32.xlu1 %v2758_v32, %s2956_s15  ;;  %v2946_v23 = vpop.eup %2945  ;;  %v2727_v32 = vunpack.i.h.bf16 %v2725_v55  ;;  %v2726_v57 = vunpack.i.l.bf16 %v2725_v55  ;;  %v1002_v1 = vmul.f32 %v2944_v9, %v3362_v20 }
 0x815   : > { %v1004_v53 = vmul.f32 %v2946_v23, %v3360_v19  ;;  %v1977_v17 = vsel %vm745_vm0, %v1003_v62, %v2731_v30  ;;  %v3794_v23 = vld [vmem:[#allocation5_spill] sm:$0xff] }
 0x816   : > { %2754 = vrot.lane.b32.xlu0 %v2753_v27, %s2956_s15  ;;  %v2732_v27 = vunpack.i.h.bf16 %v3712_v34  ;;  %v1975_v60 = vsel %vm745_vm0, %v1001_v25, %v2726_v57  ;;  %v1976_v6 = vsel %vm745_vm0, %v1002_v1, %v2727_v32  ;;  %s288_s15 = scalar_lea.vmem %s3771_s3, %s3797_s22  ;;  %v3795_v57 = vld [vmem:[#allocation6_spill] sm:$0xff] }
 0x817   : > { %v2348_v0 = vld [vmem:[%s288_s15] ss:$0 sm:$0xff] }
 0x818   : > { %v1978_v59 = vsel %vm745_vm0, %v1004_v53, %v2732_v27 }
 0x879   : > { %v2735_v51 = vpop.permute.xlu1 %2734 }
 0x87a   : > { %v2737_v39 = vunpack.i.h.bf16 %v2735_v51  ;;  %v2736_v50 = vunpack.i.l.bf16 %v2735_v51 }
 0x87b   : > { %v2740_v7 = vpop.permute.xlu0 %2739 }
 0x87c   : > { %v2742_v26 = vunpack.i.h.bf16 %v2740_v7  ;;  %v2741_v58 = vunpack.i.l.bf16 %v2740_v7  ;;  %v1990_v29 = vsel %vm1987_vm2, %v1981_v13, %v2736_v50  ;;  %v1991_v15 = vsel %vm1987_vm2, %v1982_v24, %v2737_v39  ;;  %v3790_v7 = vld [vmem:[#allocation2_spill] sm:$0xff] }
 0x87d   : > { %v1997_v40 = vpack.c.bf16 %v1991_v15, %v1990_v29  ;;  %v2750_v4 = vpop.permute.xlu1 %2749 }
 0x87e   : > { %v1988_v45 = vsel %vm1987_vm2, %v1979_v35, %v2741_v58  ;;  %v1989_v14 = vsel %vm1987_vm2, %v1980_v63, %v2742_v26  ;;  %v2752_v46 = vunpack.i.h.bf16 %v2750_v4  ;;  %v2751_v48 = vunpack.i.l.bf16 %v2750_v4  ;;  %v3791_v26 = vld [vmem:[#allocation3_spill] sm:$0xff] }
 0x87f   : > { %v1996_v54 = vpack.c.bf16 %v1989_v14, %v1988_v45  ;;  %v2745_v42 = vpop.permute.xlu0 %2744 }
 0x880   : > { %v2747_v5 = vunpack.i.h.bf16 %v2745_v42  ;;  %v2746_v43 = vunpack.i.l.bf16 %v2745_v42  ;;  %v1985_v34 = vsel %vm835_vm1, %v1977_v17, %v2751_v48  ;;  %v1986_v20 = vsel %vm835_vm1, %v1978_v59, %v2752_v46 }
 0x881   : > { %2667 = vmatprep.mubr.bf16.mxu0 %v1996_v54 }
 0x882   : > { %2668 = vmatmul.mubr.bf16.vlgmr.msra.gmra.mxu0 %v1997_v40  ;;  %v1983_v44 = vsel %vm835_vm1, %v1975_v60, %v2746_v43  ;;  %v1984_v37 = vsel %vm835_vm1, %v1976_v6, %v2747_v5 }
 0x886   : > { %v2760_v47 = vpop.permute.xlu1 %2759 }
 0x887   : > { %v2762_v2 = vunpack.i.h.bf16 %v2760_v47  ;;  %v2761_v31 = vunpack.i.l.bf16 %v2760_v47 }
 0x888   : > { %v2755_v16 = vpop.permute.xlu0 %2754 }
 0x889   : > { %v2757_v19 = vunpack.i.h.bf16 %v2755_v16  ;;  %v2756_v52 = vunpack.i.l.bf16 %v2755_v16  ;;  %v1994_v41 = vsel %vm1987_vm2, %v1985_v34, %v2761_v31  ;;  %v1995_v49 = vsel %vm1987_vm2, %v1986_v20, %v2762_v2 }
 0x88a   : > { %v1999_v38 = vpack.c.bf16 %v1995_v49, %v1994_v41 }
 0x88b   : > { %v1992_v55 = vsel %vm1987_vm2, %v1983_v44, %v2756_v52  ;;  %v1993_v33 = vsel %vm1987_vm2, %v1984_v37, %v2757_v19 }
 0x88c   : > { %v1998_v21 = vpack.c.bf16 %v1993_v33, %v1992_v55 }
 0x88e   : > { %2671 = vmatprep.mubr.bf16.mxu0 %v1998_v21 }
 0x88f   : > { %2672 = vmatmul.mubr.bf16.gmra.mxu0 %v1999_v38 }
 0x942   : > { %v2669_v11 = vpop.f32.mrf.mxu0 }
 0x943   : > { %v2138_v8 = vmul.f32 %v2669_v11, %v2348_v0 }
 0x944   : > { %v2098_v10 = vpop.f32.mrf.mxu0 }
 0x945   : > { %v2136_v51 = vmul.f32 %v2348_v0, %v2098_v10  ;;  %v2146_v12 = vadd.f32 %v3012_v3, %v2138_v8 }
 0x946   : > { %v2670_v28 = vpop.f32.mrf.mxu0 }
 0x947   : > { %v2139_v39 = vmul.f32 %v2670_v28, %v2348_v0  ;;  %v2144_v13 = vadd.f32 %v3790_v7, %v2136_v51 }
 0x948   : > { %v2101_v50 = vpop.f32.mrf.mxu0 }
 0x949   : > { %v2147_v22 = vadd.f32 %v3789_v56, %v2139_v39  ;;  %v2137_v18 = vmul.f32 %v2348_v0, %v2101_v50 }
 0x94b   : > { %v2393_v24 = vpack.c.bf16 %v2147_v22, %v2146_v12  ;;  %v2145_v58 = vadd.f32 %v3791_v26, %v2137_v18 }
 0x94d   : > { %2408 = vst [vmem:[%s293_s18 + $0x8] sm:$0xff] %v2393_v24   ;;  %v2388_v63 = vpack.c.bf16 %v2145_v58, %v2144_v13 }
 0x94f   : > { %2389 = vst [vmem:[%s293_s18] sm:$0xff] %v2388_v63   ;;  %v2673_v35 = vpop.f32.mrf.mxu0 }
 0x950   : > { %v2142_v15 = vmul.f32 %v2673_v35, %v2348_v0 }
 0x951   : > { %v2114_v29 = vpop.f32.mrf.mxu0 }
 0x952   : > { %v2140_v45 = vmul.f32 %v2348_v0, %v2114_v29  ;;  %v2150_v40 = vadd.f32 %v3792_v36, %v2142_v15 }
 0x953   : > { %v2674_v3 = vpop.f32.mrf.mxu0 }
 0x954   : > { %v2143_v14 = vmul.f32 %v2674_v3, %v2348_v0  ;;  %v2148_v42 = vadd.f32 %v3794_v23, %v2140_v45 }
 0x955   : > { %v2117_v54 = vpop.f32.mrf.mxu0 }
 0x956   : > { %v2151_v9 = vadd.f32 %v3793_v61, %v2143_v14  ;;  %v2141_v4 = vmul.f32 %v2348_v0, %v2117_v54 }
 0x958   : > { %v2403_v32 = vpack.c.bf16 %v2151_v9, %v2150_v40  ;;  %v2149_v27 = vadd.f32 %v3795_v57, %v2141_v4 }
 0x95a   : > { %2410 = vst [vmem:[%s293_s18 + $0x18] sm:$0xff] %v2403_v32   ;;  %v2398_v30 = vpack.c.bf16 %v2149_v27, %v2148_v42 }
 0x95c   : > { %2409 = vst [vmem:[%s293_s18 + $0x10] sm:$0xff] %v2398_v30  }
 0x95d PF: > { %s16_s21 = sadd.s32 1, %s2953_s21  }
 0x95e   : > { %p13_p4 = scmp.ge.s32.totalorder %s16_s21, 4  }
 0x960   :  { %15 = sbr.rel (!%p13_p4) target bundleno = 1 (0x1), region = 83 }

// kernel: _lambda_.29
= control target key start
LH: loop header
LB: loop body
LE: loop exit
PB: predicated region body
PF: predicated region fallthrough
CT: control target
= control target key end

     0   :  { %v221_v1 = vmov 0   ;;  %s291_s1 = inlined_call_operand.vmem [shape: bf16[128,256], index: 1, kind: input, shape index: {}]   ;;  %s292_s0 = inlined_call_operand.vmem [shape: f32[2,128], index: 0, kind: input, shape index: {}]   ;;  %s293_s2 = inlined_call_operand.vmem [shape: f32[2,256], index: 2, kind: output, shape index: {}]  }
   0x1   :  { %v193_v0 = vld [vmem:[%s291_s1 + $0x74] ss:$8 sps:$4 sm:$0xff]   ;;  %149 = vmatprep.mubr.bf16.mxu0 %v221_v1  ;;  %v195_v2 = vld [vmem:[%s291_s1 + $0x70] ss:$8 sps:$4 sm:$0xff]   ;;  %v196_v3 = vld [vmem:[%s291_s1 + $0x64] ss:$8 sps:$4 sm:$0xff]  }
   0x2   :  { %117 = vmatprep.subr.bf16.mxu0 %v193_v0  ;;  %v198_v4 = vld [vmem:[%s291_s1 + $0x60] ss:$8 sps:$4 sm:$0xff]   ;;  %v199_v5 = vld [vmem:[%s291_s1 + $0x54] ss:$8 sps:$4 sm:$0xff]   ;;  %v201_v6 = vld [vmem:[%s291_s1 + $0x50] ss:$8 sps:$4 sm:$0xff]  }
   0x3   :  { %118 = vmatpush1.bf16.msra.mxu0 %v195_v2  ;;  %v202_v7 = vld [vmem:[%s291_s1 + $0x44] ss:$8 sps:$4 sm:$0xff]   ;;  %v12_v8 = vld [vmem:[%s292_s0] sm:$0x3]  ;;  %v205_v11 = vld [vmem:[%s291_s1 + $0x34] ss:$8 sps:$4 sm:$0xff]  }
   0x4   :  { %119 = vmatprep.subr.bf16.mxu0 %v196_v3  ;;  %v204_v9 = vld [vmem:[%s291_s1 + $0x40] ss:$8 sps:$4 sm:$0xff]   ;;  %v174_v10 = vmul.f32 -1.442695, %v12_v8  ;;  %v207_v12 = vld [vmem:[%s291_s1 + $0x30] ss:$8 sps:$4 sm:$0xff]  }
   0x5   :  { %v208_v13 = vld [vmem:[%s291_s1 + $0x24] ss:$8 sps:$4 sm:$0xff]   ;;  %v210_v14 = vld [vmem:[%s291_s1 + $0x20] ss:$8 sps:$4 sm:$0xff]   ;;  %v211_v15 = vld [vmem:[%s291_s1 + $0x14] ss:$8 sps:$4 sm:$0xff]  }
   0x6   :  { %217 = vpow2.f32 %v174_v10  ;;  %v213_v16 = vld [vmem:[%s291_s1 + $0x10] ss:$8 sps:$4 sm:$0xff]   ;;  %v214_v17 = vld [vmem:[%s291_s1 + $0x4] ss:$8 sps:$4 sm:$0xff]   ;;  %v216_v19 = vld [vmem:[%s291_s1] ss:$8 sps:$4 sm:$0xff]  }
   0x7   :  { %120 = vmatpush1.bf16.msra.mxu0 %v198_v4 }
   0x8   :  { %121 = vmatprep.subr.bf16.mxu0 %v199_v5 }
   0xb   :  { %122 = vmatpush1.bf16.msra.mxu0 %v201_v6 }
   0xc   :  { %123 = vmatprep.subr.bf16.mxu0 %v202_v7 }
   0xf   :  { %124 = vmatpush1.bf16.msra.mxu0 %v204_v9 }
  0x10   :  { %125 = vmatprep.subr.bf16.mxu0 %v205_v11 }
  0x13   :  { %126 = vmatpush1.bf16.msra.mxu0 %v207_v12  ;;  %v218_v18 = vpop.eup %217 }
  0x14   :  { %127 = vmatprep.subr.bf16.mxu0 %v208_v13  ;;  %v16_v20 = vadd.f32 1.0, %v218_v18 }
  0x16   :  { %219 = vrcp.f32 %v16_v20 }
  0x17   :  { %128 = vmatpush1.bf16.msra.mxu0 %v210_v14 }
  0x18   :  { %129 = vmatprep.subr.bf16.mxu0 %v211_v15 }
  0x1b   :  { %130 = vmatpush1.bf16.msra.mxu0 %v213_v16 }
  0x1c   :  { %131 = vmatprep.subr.bf16.mxu0 %v214_v17 }
  0x1f   :  { %132 = vmatpush1.bf16.msra.mxu0 %v216_v19 }
  0x23   :  { %v220_v21 = vpop.eup %219 }
  0x24   :  { %v19_v22 = vmul.f32 %v220_v21, %v12_v8 }
  0x26   :  { %v20_v23 = vpack.c.bf16 %v19_v22, %v19_v22 }
  0x28   :  { %150 = vmatmul.mubr.bf16.vlgmr.msra.gmra.mxu0 %v20_v23 }
  0xe8   :  { %v151_v24 = vpop.f32.mrf.mxu0 }
  0xea   :  { %v153_v25 = vpop.f32.mrf.mxu0 }
  0xeb   :  { %v160_v26 = vcombine.low %v151_v24, %v153_v25 }
  0xec   :  { %v155_v27 = vpop.f32.mrf.mxu0 }
  0xed   :  { %191 = vst.sshfl [vmem:[%s293_s2] sm:$0x33 pattern:$0x76325410] %v160_v26 }
  0xee   :  { %v156_v28 = vpop.f32.mrf.mxu0 }

// kernel: _lambda_.31
= control target key start
LH: loop header
LB: loop body
LE: loop exit
PB: predicated region body
PF: predicated region fallthrough
CT: control target
= control target key end

     0   :  { %v16_v0 = vlaneseq  ;;  %v140_v5 = vmov 1983009808   ;;  %s176_s0 = inlined_call_operand.vmem [shape: f32[2,256], index: 0, kind: input, shape index: {}]   ;;  %s177_s1 = inlined_call_operand.vmem [shape: f32[2,256], index: 1, kind: input, shape index: {}]   ;;  %s178_s2 = inlined_call_operand.hbm [shape: f32[1,1], index: 2, kind: output, shape index: {}]  }
   0x1   :  { %v21_v1 = vld [vmem:[%s176_s0] sm:$0xf]  ;;  %v28_v6 = vunpack.c.l.s4 %v140_v5 }
   0x2   :  { %v22_v2 = vld [vmem:[%s177_s1] sm:$0xf]  ;;  %vm165_vm0 = vcmp.lt.s32.totalorder %v16_v0, 256  ;;  %v31_v7 = vshrl.u32 %v16_v0, 7 }
   0x3   :  { %v23_v3 = vsub.f32 %v21_v1, %v22_v2 }
   0x4   :  { %7 = vsyncpa [#allocation4], 0  ;;  %v141_v8 = vmov 0.0   ;;  %v29_v10 = vunpack.c.0.s8 %v28_v6  ;;  %vm37_vm1 = vcmask 1041408   ;;  %v142_v21 = vmov 1966171168  }
   0x5   :  { %20 = vst.msk [vmem:[#allocation2] sm:$0x3] %vm165_vm0, %v141_v8  ;;  %v25_v9 = vmul.f32 %v23_v3, %v23_v3  ;;  %v56_v22 = vunpack.c.l.s4 %v142_v21  ;;  %v83_v37 = vsub.s32 0, %v31_v7  ;;  %v87_v38 = vsub.s32 1, %v31_v7  ;;  %s143_s0 = smov [#allocation3]  }
   0x6   :  { %v32_v11 = vsub.s32 %v29_v10, %v31_v7  ;;  %vm91_vm2 = vcmask 1040384   ;;  %s106_s1 = sshll.u32 %s143_s0, 4  ;;  %vm98_vm3 = vcmask 0   ;;  %s107_s1 = int_to_ptr.vmem [resolvable:$true] %s106_s1 }
   0x7   :  { %v57_v27 = vunpack.c.0.s8 %v56_v22  ;;  %s118_s13 = scalar_lea.vmem %s107_s1, 16  ;;  %s122_s14 = scalar_lea.vmem %s107_s1, 32 }
   0x8   :  { %v33_v12 = vrot.slane %v25_v9, %v32_v11  ;;  %p119_p0 = scmp.ne.s32.totalorder %s107_s1, %s118_s13  ;;  %p123_p1 = scmp.lt.s32.totalorder %s107_s1, %s107_s1 }
   0x9   :  { %v60_v31 = vsub.s32 %v57_v27, %v31_v7  ;;  %p124_p2 = scmp.lt.s32.totalorder %s122_s14, %s118_s13 }
   0xa   :  { %v34_v13 = vcombine.high %v33_v12, %v33_v12  ;;  %v38_v14 = vsel %vm37_vm1, %v33_v12, 0.0 }
   0xb   :  { %v39_v15 = vrot.slane %v38_v14, 4  ;;  %p125_p3 = por %p124_p2, %p123_p1 }
   0xc   :  { %v45_v16 = vsel %vm37_vm1, %v34_v13, 0.0  ;;  %v24_v34 = vld [vmem:[#allocation2] sm:$0x3] }
   0xd   :  { %v40_v17 = vadd.f32 %v39_v15, %v38_v14  ;;  %v46_v18 = vrot.slane %v45_v16, 4  ;;  %p126_p4 = pnand %p125_p3, %p119_p0 }
   0xf   :  { %v41_v19 = vrot.slane %v40_v17, 2  ;;  %v47_v20 = vadd.f32 %v46_v18, %v45_v16 }
  0x11   :  { %v42_v23 = vadd.f32 %v41_v19, %v40_v17  ;;  %v48_v24 = vrot.slane %v47_v20, 2 }
  0x13   :  { %v43_v25 = vrot.slane %v42_v23, 1  ;;  %v49_v26 = vadd.f32 %v48_v24, %v47_v20 }
  0x15   :  { %v44_v28 = vadd.f32 %v43_v25, %v42_v23  ;;  %v50_v29 = vrot.slane %v49_v26, 1 }
  0x17   :  { %v51_v30 = vadd.f32 %v50_v29, %v49_v26 }
  0x19   :  { %v54_v32 = vcombine.low %v44_v28, %v51_v30 }
  0x1b   :  { %v61_v33 = vrot.slane %v54_v32, %v60_v31 }
  0x1d   :  { %v68_v35 = vrot.slane %v61_v33, %v60_v31 }
  0x1f   :  { %v70_v36 = vadd.f32 %v68_v35, %v24_v34 }
  0x21   :  { %75 = vst.msk [vmem:[#allocation2] sm:$0x3] %vm165_vm0, %v70_v36 }
  0x28   :  { %v79_v39 = vld [vmem:[#allocation2] sm:$0x3] }
  0x29   :  { %v84_v40 = vrot.slane %v79_v39, %v83_v37  ;;  %v88_v41 = vrot.slane %v79_v39, %v87_v38 }
  0x2b   :  { %v92_v42 = vsel %vm91_vm2, %v84_v40, 0.0  ;;  %v93_v43 = vsel %vm91_vm2, %v88_v41, 0.0 }
  0x2c   :  { %v94_v44 = vadd.f32 %v93_v43, %v92_v42 }
  0x2e   :  { %95 = vadd.xlane.f32.xlu0 %v94_v44 }
  0xb7   :  { %v96_v45 = vpop.xlane.xlu0 %95 }
  0xb8   :  { %v97_v46 = vmul.f32 0.001953125, %v96_v45 }
  0xba   :  { %99 = vst.msk [vmem:[#allocation3] sm:$0x1] %vm98_vm3, %v97_v46 }
  0xbb   :  { %129 = shalt.err (!%p126_p4)
}
  0xbc   :  { %109 = dma.vmem_to_hbm [thread:$0]  %s107_s1, 16, %s178_s2, [#allocation4]  }
  0xbd   :  { %138 = dma.done.wait [#allocation4], 16  }
  0xbe   :  { %139 = vsyncadd [#allocation4], 4294967280 }
  0xbf   :  { %113 = vsyncpa [#allocation4], 1 }

// kernel: _lambda_.30
= control target key start
LH: loop header
LB: loop body
LE: loop exit
PB: predicated region body
PF: predicated region fallthrough
CT: control target
= control target key end

     0   :  { %s839_s15 = smov 0   ;;  %s841_s16 = smov 0   ;;  %s956_s0 = inlined_call_operand.vmem [shape: bf16[2,64,128], index: 0, kind: input, shape index: {}]   ;;  %s957_s1 = inlined_call_operand.vmem [shape: f32[2,1,128], index: 1, kind: input, shape index: {}]   ;;  %s958_s2 = inlined_call_operand.vmem [shape: f32[2,1,128], index: 2, kind: input, shape index: {}]   ;;  %s959_s3 = inlined_call_operand.vmem [shape: bf16[128,4], index: 3, kind: input, shape index: {}]   ;;  %s960_s4 = inlined_call_operand.vmem [shape: f32[2,64,4], index: 4, kind: output, shape index: {}]  }
   0x1   :  { %s843_s17 = smov 0  }
   0x2 LB: > { %s26_s18 = sadd.s32 1, %s808_s16  ;;  %p653_p0 = scmp.ge.s32.totalorder %s812_s17, 1  ;;  %s812_s17 = sphi %s843_s17, %s14_s17   ;;  %s808_s16 = sphi %s841_s16, %s962_s16   ;;  %s804_s15 = sphi %s839_s15, %s961_s15  }
   0x3   : > { %p28_p1 = scmp.ge.s32.totalorder %s26_s18, 2  ;;  %p199_p2 = scmp.lt.s32.totalorder %s812_s17, 3 }
   0x5   : > { %s964_s18 = smov (%p28_p1, %s26_s18), 0  ;;  %p200_p3 = pnand %p653_p0, %p199_p2 }
   0x6   : > { %p240_p4 = scmp.lt.s32.totalorder (!%p200_p3), %s804_s15, 1 }
   0x7   : > { %203 = sbr.rel (%p200_p3) target bundleno = 542 (0x21e), region = 36 }
   0xc   : > { %s966_s15 = smov (!%p240_p4, %s804_s15), 1  ;;  %v766_v44 = vld [vmem:[%s959_s3 + $0x38] sm:$0xff]   ;;  %v767_v45 = vld [vmem:[%s959_s3 + $0x30] sm:$0xff]   ;;  %v768_v46 = vld [vmem:[%s959_s3 + $0x28] sm:$0xff]   ;;  %v374_v59 = vlaneseq  ;;  %vm535_vm0 = vcmask 31744  }
   0xd   : > { %s669_s19 = sshll.u32 %s966_s15, 5  ;;  %702 = vmatprep.subr.bf16.mxu0 %v766_v44  ;;  %726 = vmatprep.subr.bf16.mxu1 %v766_v44  ;;  %v769_v47 = vld [vmem:[%s959_s3 + $0x20] sm:$0xff]   ;;  %v770_v48 = vld [vmem:[%s959_s3 + $0x18] sm:$0xff]   ;;  %v771_v49 = vld [vmem:[%s959_s3 + $0x10] sm:$0xff]   ;;  %s670_s23 = sshll.u32 %s966_s15, 6 }
   0xe   : > { %s247_s22 = scalar_lea.vmem %s956_s0, %s669_s19  ;;  %703 = vmatpush3.bf16.msra.mxu0 %v766_v44  ;;  %734 = vmatpush3.bf16.msra.mxu1 %v766_v44  ;;  %v772_v50 = vld [vmem:[%s959_s3 + $0x8] sm:$0xff]   ;;  %v773_v51 = vld [vmem:[%s959_s3] sm:$0xff]   ;;  %s254_s19 = scalar_lea.vmem %s958_s2, %s966_s15 }
   0xf   : > { %v672_v0 = vld [vmem:[%s247_s22] sm:$0xff]   ;;  %v688_v1 = vld [vmem:[%s247_s22 + $0x10] sm:$0xff]   ;;  %v687_v6 = vld [vmem:[%s247_s22 + $0x8] sm:$0xff]   ;;  %704 = vmatprep.subr.bf16.mxu0 %v767_v45  ;;  %727 = vmatprep.subr.bf16.mxu1 %v767_v45  ;;  %s263_s26 = scalar_lea.vmem %s960_s4, %s670_s23 }
  0x10   : > { %v673_v2 = vunpack.c.l.bf16 %v672_v0  ;;  %v681_v3 = vunpack.c.l.bf16 %v688_v1  ;;  %v674_v4 = vunpack.c.h.bf16 %v672_v0  ;;  %v682_v5 = vunpack.c.h.bf16 %v688_v1  ;;  %v689_v9 = vld [vmem:[%s247_s22 + $0x18] sm:$0xff]   ;;  %s251_s22 = scalar_lea.vmem %s957_s1, %s966_s15 }
  0x11   : > { %v677_v7 = vunpack.c.l.bf16 %v687_v6  ;;  %v678_v8 = vunpack.c.h.bf16 %v687_v6  ;;  %v685_v10 = vunpack.c.l.bf16 %v689_v9  ;;  %v686_v11 = vunpack.c.h.bf16 %v689_v9 }
  0x12   : > { %282 = vadd.xlane.f32.xlu0 %v673_v2  ;;  %290 = vadd.xlane.f32.xlu1 %v681_v3 }
  0x13   : > { %705 = vmatpush3.bf16.msra.mxu0 %v767_v45  ;;  %735 = vmatpush3.bf16.msra.mxu1 %v767_v45 }
  0x14   : > { %706 = vmatprep.subr.bf16.mxu0 %v768_v46  ;;  %728 = vmatprep.subr.bf16.mxu1 %v768_v46 }
  0x16   : > { %284 = vadd.xlane.f32.xlu0 %v674_v4  ;;  %292 = vadd.xlane.f32.xlu1 %v682_v5 }
  0x17   : > { %707 = vmatpush3.bf16.msra.mxu0 %v768_v46  ;;  %736 = vmatpush3.bf16.msra.mxu1 %v768_v46 }
  0x18   : > { %708 = vmatprep.subr.bf16.mxu0 %v769_v47  ;;  %729 = vmatprep.subr.bf16.mxu1 %v769_v47 }
  0x1a   : > { %286 = vadd.xlane.f32.xlu0 %v677_v7  ;;  %288 = vadd.xlane.f32.xlu1 %v678_v8 }
  0x1b   : > { %709 = vmatpush3.bf16.msra.mxu0 %v769_v47  ;;  %737 = vmatpush3.bf16.msra.mxu1 %v769_v47 }
  0x1c   : > { %710 = vmatprep.subr.bf16.mxu0 %v770_v48  ;;  %730 = vmatprep.subr.bf16.mxu1 %v770_v48 }
  0x1e   : > { %294 = vadd.xlane.f32.xlu0 %v685_v10  ;;  %296 = vadd.xlane.f32.xlu1 %v686_v11 }
  0x1f   : > { %711 = vmatpush3.bf16.msra.mxu0 %v770_v48  ;;  %738 = vmatpush3.bf16.msra.mxu1 %v770_v48 }
  0x20   : > { %712 = vmatprep.subr.bf16.mxu0 %v771_v49  ;;  %731 = vmatprep.subr.bf16.mxu1 %v771_v49 }
  0x23   : > { %713 = vmatpush3.bf16.msra.mxu0 %v771_v49  ;;  %739 = vmatpush3.bf16.msra.mxu1 %v771_v49 }
  0x24   : > { %714 = vmatprep.subr.bf16.mxu0 %v772_v50  ;;  %732 = vmatprep.subr.bf16.mxu1 %v772_v50 }
  0x27   : > { %715 = vmatpush3.bf16.msra.mxu0 %v772_v50  ;;  %740 = vmatpush3.bf16.msra.mxu1 %v772_v50 }
  0x28   : > { %716 = vmatprep.subr.bf16.mxu0 %v773_v51  ;;  %733 = vmatprep.subr.bf16.mxu1 %v773_v51 }
  0x2b   : > { %717 = vmatpush3.bf16.msra.mxu0 %v773_v51  ;;  %741 = vmatpush3.bf16.msra.mxu1 %v773_v51 }
  0x9b   : > { %v283_v12 = vpop.xlane.xlu0 %282  ;;  %v291_v13 = vpop.xlane.xlu1 %290 }
  0x9c   : > { %v299_v14 = vmul.f32 0.0078125, %v283_v12  ;;  %v303_v15 = vmul.f32 0.0078125, %v291_v13 }
  0x9e   : > { %v863_v16 = vsub.f32 %v673_v2, %v299_v14  ;;  %v865_v17 = vsub.f32 %v681_v3, %v303_v15  ;;  %v375_v2 = vshrl.u32 %v374_v59, 7 }
  0x9f   : > { %v285_v18 = vpop.xlane.xlu0 %284  ;;  %v293_v19 = vpop.xlane.xlu1 %292 }
  0xa0   : > { %v300_v20 = vmul.f32 0.0078125, %v285_v18  ;;  %v315_v21 = vmul.f32 %v863_v16, %v863_v16  ;;  %v304_v22 = vmul.f32 0.0078125, %v293_v19  ;;  %v319_v25 = vmul.f32 %v865_v17, %v865_v17 }
  0xa2   : > { %v869_v23 = vsub.f32 %v674_v4, %v300_v20  ;;  %323 = vadd.xlane.f32.xlu0 %v315_v21  ;;  %v871_v24 = vsub.f32 %v682_v5, %v304_v22  ;;  %v371_v5 = vld [vmem:[%s254_s19] sm:$0x1] }
  0xa3   : > { %v287_v26 = vpop.xlane.xlu0 %286  ;;  %v289_v27 = vpop.xlane.xlu1 %288 }
  0xa4   : > { %v301_v28 = vmul.f32 0.0078125, %v287_v26  ;;  %v316_v29 = vmul.f32 %v869_v23, %v869_v23  ;;  %v302_v30 = vmul.f32 0.0078125, %v289_v27  ;;  %v320_v33 = vmul.f32 %v871_v24, %v871_v24 }
  0xa6   : > { %v877_v31 = vsub.f32 %v677_v7, %v301_v28  ;;  %331 = vadd.xlane.f32.xlu0 %v319_v25  ;;  %325 = vadd.xlane.f32.xlu1 %v316_v29  ;;  %v879_v32 = vsub.f32 %v678_v8, %v302_v30  ;;  %v658_v28 = vld [vmem:[%s251_s22] ss:$0 sm:$0xff] }
  0xa7   : > { %v295_v34 = vpop.xlane.xlu0 %294  ;;  %v297_v35 = vpop.xlane.xlu1 %296 }
  0xa8   : > { %v305_v36 = vmul.f32 0.0078125, %v295_v34  ;;  %v317_v37 = vmul.f32 %v877_v31, %v877_v31  ;;  %v306_v38 = vmul.f32 0.0078125, %v297_v35  ;;  %v318_v41 = vmul.f32 %v879_v32, %v879_v32 }
  0xaa   : > { %v885_v39 = vsub.f32 %v685_v10, %v305_v36  ;;  %333 = vadd.xlane.f32.xlu1 %v320_v33  ;;  %327 = vadd.xlane.f32.xlu0 %v317_v37  ;;  %v887_v40 = vsub.f32 %v686_v11, %v306_v38  ;;  %v372_v10 = vadd.f32 1.0, %v371_v5  ;;  %v376_v11 = vsub.s32 0, %v375_v2 }
  0xac   : > { %v321_v42 = vmul.f32 %v885_v39, %v885_v39  ;;  %v322_v43 = vmul.f32 %v887_v40, %v887_v40  ;;  %v377_v19 = vrot.slane %v372_v10, %v376_v11 }
  0xae   : > { %329 = vadd.xlane.f32.xlu1 %v318_v41  ;;  %335 = vadd.xlane.f32.xlu0 %v321_v42 }
  0xb2   : > { %337 = vadd.xlane.f32.xlu1 %v322_v43 }
 0x12b   : > { %v324_v52 = vpop.xlane.xlu0 %323 }
 0x12c   : > { %v339_v53 = vmul.f32 0.0078125, %v324_v52 }
 0x12e   : > { %v347_v54 = vadd.f32 1e-06, %v339_v53 }
 0x12f   : > { %v326_v55 = vpop.xlane.xlu1 %325  ;;  %v332_v56 = vpop.xlane.xlu0 %331 }
 0x130   : > { %774 = vrsqrt.f32 %v347_v54  ;;  %v340_v57 = vmul.f32 0.0078125, %v326_v55  ;;  %v343_v58 = vmul.f32 0.0078125, %v332_v56 }
 0x132   : > { %v348_v60 = vadd.f32 1e-06, %v340_v57  ;;  %v351_v61 = vadd.f32 1e-06, %v343_v58 }
 0x133   : > { %v334_v62 = vpop.xlane.xlu1 %333  ;;  %v328_v63 = vpop.xlane.xlu0 %327 }
 0x134   : > { %776 = vrsqrt.f32 %v348_v60  ;;  %v344_v0 = vmul.f32 0.0078125, %v334_v62  ;;  %v341_v1 = vmul.f32 0.0078125, %v328_v63 }
 0x135   : > { %778 = vrsqrt.f32 %v351_v61 }
 0x136   : > { %v352_v3 = vadd.f32 1e-06, %v344_v0  ;;  %v349_v4 = vadd.f32 1e-06, %v341_v1 }
 0x137   : > { %v330_v6 = vpop.xlane.xlu1 %329  ;;  %v336_v7 = vpop.xlane.xlu0 %335 }
 0x138   : > { %780 = vrsqrt.f32 %v352_v3  ;;  %v342_v8 = vmul.f32 0.0078125, %v330_v6  ;;  %v345_v9 = vmul.f32 0.0078125, %v336_v7 }
 0x139   : > { %782 = vrsqrt.f32 %v349_v4 }
 0x13a   : > { %v350_v12 = vadd.f32 1e-06, %v342_v8  ;;  %v353_v13 = vadd.f32 1e-06, %v345_v9 }
 0x13b   : > { %v338_v14 = vpop.xlane.xlu1 %337 }
 0x13c   : > { %784 = vrsqrt.f32 %v350_v12  ;;  %v346_v15 = vmul.f32 0.0078125, %v338_v14 }
 0x13d   : > { %v775_v18 = vpop.eup %774  ;;  %786 = vrsqrt.f32 %v353_v13 }
 0x13e   : > { %v354_v20 = vadd.f32 1e-06, %v346_v15  ;;  %v363_v21 = vmul.f32 %v775_v18, %v863_v16 }
 0x140   : > { %788 = vrsqrt.f32 %v354_v20  ;;  %v379_v27 = vmul.f32 %v377_v19, %v363_v21 }
 0x141   : > { %v777_v22 = vpop.eup %776 }
 0x142   : > { %v779_v25 = vpop.eup %778  ;;  %v364_v26 = vmul.f32 %v777_v22, %v869_v23  ;;  %v394_v35 = vadd.f32 %v658_v28, %v379_v27 }
 0x143   : > { %v367_v29 = vmul.f32 %v779_v25, %v865_v17 }
 0x144   : > { %v380_v30 = vmul.f32 %v377_v19, %v364_v26 }
 0x145   : > { %v781_v33 = vpop.eup %780  ;;  %v383_v37 = vmul.f32 %v377_v19, %v367_v29 }
 0x146   : > { %v783_v34 = vpop.eup %782  ;;  %v395_v36 = vadd.f32 %v658_v28, %v380_v30  ;;  %v368_v16 = vmul.f32 %v781_v33, %v871_v24 }
 0x147   : > { %v365_v38 = vmul.f32 %v783_v34, %v877_v31  ;;  %v398_v23 = vadd.f32 %v658_v28, %v383_v37 }
 0x148   : > { %v402_v41 = vpack.c.bf16 %v395_v36, %v394_v35  ;;  %v384_v42 = vmul.f32 %v377_v19, %v368_v16 }
 0x149   : > { %v785_v43 = vpop.eup %784  ;;  %v381_v17 = vmul.f32 %v377_v19, %v365_v38 }
 0x14a   : > { %v787_v44 = vpop.eup %786  ;;  %718 = vmatprep.mubr.bf16.mxu0 %v402_v41  ;;  %v399_v45 = vadd.f32 %v658_v28, %v384_v42  ;;  %v366_v46 = vmul.f32 %v785_v43, %v879_v32 }
 0x14b   : > { %v369_v47 = vmul.f32 %v787_v44, %v885_v39  ;;  %v396_v24 = vadd.f32 %v658_v28, %v381_v17 }
 0x14c   : > { %v404_v48 = vpack.c.bf16 %v399_v45, %v398_v23  ;;  %v382_v49 = vmul.f32 %v377_v19, %v366_v46 }
 0x14d   : > { %v789_v50 = vpop.eup %788  ;;  %v385_v52 = vmul.f32 %v377_v19, %v369_v47 }
 0x14e   : > { %722 = vmatprep.mubr.bf16.mxu1 %v404_v48  ;;  %v397_v51 = vadd.f32 %v658_v28, %v382_v49  ;;  %v370_v31 = vmul.f32 %v789_v50, %v887_v40 }
 0x14f   : > { %v400_v55 = vadd.f32 %v658_v28, %v385_v52 }
 0x150   : > { %v403_v53 = vpack.c.bf16 %v397_v51, %v396_v24  ;;  %v386_v54 = vmul.f32 %v377_v19, %v370_v31 }
 0x152   : > { %719 = vmatmul.mubr.bf16.vlgmr.msra.gmra.mxu0 %v403_v53  ;;  %v401_v56 = vadd.f32 %v658_v28, %v386_v54 }
 0x154   : > { %v405_v57 = vpack.c.bf16 %v401_v56, %v400_v55 }
 0x156   : > { %723 = vmatmul.mubr.bf16.vlgmr.msra.gmra.mxu1 %v405_v57 }
 0x212   : > { %v720_v32 = vpop.f32.mrf.mxu0 }
 0x213   : > { %538 = vst.msk [vmem:[%s263_s26 + $0x10] sm:$0xff] %vm535_vm0, %v720_v32 }
 0x214   : > { %v504_v39 = vpop.f32.mrf.mxu0 }
 0x215   : > { %536 = vst.msk [vmem:[%s263_s26] sm:$0xff] %vm535_vm0, %v504_v39 }
 0x216   : > { %v721_v40 = vpop.f32.mrf.mxu0  ;;  %v724_v58 = vpop.f32.mrf.mxu1 }
 0x217   : > { %539 = vst.msk [vmem:[%s263_s26 + $0x18] sm:$0xff] %vm535_vm0, %v721_v40  ;;  %542 = vst.msk [vmem:[%s263_s26 + $0x30] sm:$0xff] %vm535_vm0, %v724_v58 }
 0x218   : > { %v507_v59 = vpop.f32.mrf.mxu0  ;;  %v520_v60 = vpop.f32.mrf.mxu1 }
 0x219   : > { %537 = vst.msk [vmem:[%s263_s26 + $0x8] sm:$0xff] %vm535_vm0, %v507_v59  ;;  %540 = vst.msk [vmem:[%s263_s26 + $0x20] sm:$0xff] %vm535_vm0, %v520_v60 }
 0x21a   : > { %v725_v61 = vpop.f32.mrf.mxu1 }
 0x21b   : > { %543 = vst.msk [vmem:[%s263_s26 + $0x38] sm:$0xff] %vm535_vm0, %v725_v61 }
 0x21c   : > { %v523_v62 = vpop.f32.mrf.mxu1 }
 0x21d   : > { %541 = vst.msk [vmem:[%s263_s26 + $0x28] sm:$0xff] %vm535_vm0, %v523_v62 }
 0x21e PF: > { %s14_s17 = sadd.s32 1, %s812_s17   ;;  %s961_s15 = smov %s808_s16 }
 0x21f   : > { %p11_p5 = scmp.ge.s32.totalorder %s14_s17, 4   ;;  %s962_s16 = smov %s964_s18 }
 0x221   :  { %13 = sbr.rel (!%p11_p5) target bundleno = 2 (0x2), region = 72 }

</bundles_post_ra>
